<compile_context>
chip_gen: v5e
topology: v5e:2x2
jax: 0.10.0
libtpu: 0.0.40
codegen_flags: <defaults>
</compile_context>

<pallas_src>
import functools

import jax
import jax.numpy as jnp
import numpy as np
from jax import lax
from jax.experimental import pallas as pl
from jax.experimental.pallas import tpu as pltpu

VMEM_SPEC = pl.BlockSpec(memory_space=pltpu.MemorySpace.VMEM)


def _round_up(x, m):
    return ((x + m - 1) // m) * m


# ----------------------------------------------------------------------------
# In-kernel helpers
# ----------------------------------------------------------------------------
def _lstm_recurrence(xp, whh, B, H, T):
    """Batched recurrent tail of a 1-layer LSTM.

    xp  : (T*B, 4H) pre-projected inputs, time-major (rows t*B..t*B+B-1 = step t),
          gate order [i, f, o, g] (permuted at weight-prep time).
    whh : (H, 4H) transposed recurrent weight (same gate order).
    Returns the final hidden state hn[-1], shape (B, H).
    """
    f32 = jnp.float32
    H3 = 3 * H
    h = jnp.zeros((B, H), f32)
    c = jnp.zeros((B, H), f32)
    for t in range(T):  # tiny trip count; full unroll
        g = xp[t * B:(t + 1) * B, :] + jnp.dot(h, whh, preferred_element_type=f32)
        sg = jax.nn.sigmoid(g[:, :H3])        # i | f | o  (contiguous)
        gg = jnp.tanh(g[:, H3:])              # g
        i_g = sg[:, :H]
        f_g = sg[:, H:2 * H]
        o_g = sg[:, 2 * H:H3]
        c = f_g * c + i_g * gg
        h = o_g * jnp.tanh(c)
    return h


# ----------------------------------------------------------------------------
# Fused kernel: whole Critic forward
# ----------------------------------------------------------------------------
def critic_fused_kernel(
    # data ----------------------------------------------------------------
    s1_ref, x2_ref, act_ref,
    # LSTM-1 ----------------------------------------------------------------
    wih1_ref, whh1_ref, b1_ref,
    # conv blocks: flattened weights, BN gamma/beta, valid-position masks ---
    wf1_ref, g1_ref, be1_ref, m1_ref,
    wf2_ref, g2_ref, be2_ref, m2_ref,
    wf3_ref, g3_ref, be3_ref, m3_ref,
    # LSTM-2 ----------------------------------------------------------------
    wih2_ref, whh2_ref, b2_ref,
    # head -------------------------------------------------------------------
    w1a_ref, w1b_ref, w1c_ref, bh1_ref,
    w2h_ref, bh2_ref, w3h_ref, bh3_ref, w4h_ref, bh4_ref,
    # output ------------------------------------------------------------------
    out_ref,
    # VMEM scratch ----------------------------------------------------------
    fma_ref, fmb_ref, xstk_ref, m2b_ref,
    *, B, T1, H1, T2, H2, K, R, SEG, TAIL, L3, Hos, eps, slope):
    f32 = jnp.float32
    NSEG = B * SEG
    Cn = T2  # conv channels == sequence_length

    # Zero the scratch tails once so every tap read past the computed region
    # is defined and finite (garbage positions are masked / zero-weighted).
    fma_ref[:, NSEG:] = jnp.zeros((Cn, TAIL), f32)
    fmb_ref[:, NSEG:] = jnp.zeros((Cn, TAIL), f32)

    # -------------------- Branch 1: LSTM over state1 (batched) -------------
    xp1 = jnp.dot(s1_ref[...], wih1_ref[...], preferred_element_type=f32) + b1_ref[...]
    h1 = _lstm_recurrence(xp1, whh1_ref[...], B, H1, T1)

    # -------------------- Branch 2: conv stack (flat, uniform SEG) ---------
    # Feature maps stay flat with row stride R inside each SEG-wide batch
    # segment; a tap at (ki,kj) is a single shifted slice across the whole
    # (Cin, B*SEG) slab, so each layer is ONE matmul with contraction Cin*K*K.
    def conv_bn_lrelu(src_ref, dst_ref, wf_ref, g_ref, be_ref, m_ref, Ho):
        for ki in range(K):
            for kj in range(K):
                tap = ki * K + kj
                s = ki * R + kj
                xstk_ref[tap * Cn:(tap + 1) * Cn, :] = src_ref[:, s:s + NSEG]
        acc = jnp.dot(wf_ref[...], xstk_ref[...],
                      preferred_element_type=f32)              # (Cout, B*SEG)
        # NOTE: Conv2d bias omitted on purpose -- a per-channel constant shift
        # cancels exactly under the following (training-mode) BatchNorm.
        mask = m_ref[...] > 0.5                                # (1, B*SEG)
        inv_cnt = 1.0 / float(B * Ho * Ho)
        mean = jnp.sum(jnp.where(mask, acc, 0.0), axis=1, keepdims=True) * inv_cnt
        d = acc - mean
        var = jnp.sum(jnp.where(mask, d * d, 0.0), axis=1, keepdims=True) * inv_cnt
        scale = g_ref[...] * lax.rsqrt(var + eps)              # (Cout, 1)
        shift = be_ref[...] - scale * mean
        z = acc * scale + shift
        dst_ref[:, :NSEG] = jnp.where(z > 0.0, z, slope * z)   # LeakyReLU(0.2)

    conv_bn_lrelu(x2_ref, fma_ref, wf1_ref, g1_ref, be1_ref, m1_ref, Hos[0])
    conv_bn_lrelu(fma_ref, fmb_ref, wf2_ref, g2_ref, be2_ref, m2_ref, Hos[1])
    conv_bn_lrelu(fmb_ref, fma_ref, wf3_ref, g3_ref, be3_ref, m3_ref, Hos[2])

    # -------------------- LSTM-2 over flattened conv maps -------------------
    # Gather the L3-wide window per (timestep=channel, batch) into a VMEM
    # scratch; wih2 was zero-scattered onto this flat row-stride-R canvas at
    # prep time, so no reshape is needed and one matmul projects all steps.
    for t in range(T2):
        for b in range(B):
            m2b_ref[t * B + b:t * B + b + 1, :] = fma_ref[t:t + 1, b * SEG:b * SEG + L3]
    m3win = m3_ref[0:1, 0:L3] > 0.5
    x2seq = jnp.where(m3win, m2b_ref[...], 0.0)                # NaN-proof garbage zeroing
    xp2 = jnp.dot(x2seq, wih2_ref[...], preferred_element_type=f32) + b2_ref[...]
    h2 = _lstm_recurrence(xp2, whh2_ref[...], B, H2, T2)

    # -------------------- Head: MLP + fc_last (batched) ---------------------
    # concat([x_1, output_r, action]) folded into a split first Linear.
    z = (jnp.dot(h1, w1a_ref[...], preferred_element_type=f32)
         + jnp.dot(h2, w1b_ref[...], preferred_element_type=f32)
         + jnp.dot(act_ref[...], w1c_ref[...], preferred_element_type=f32)
         + bh1_ref[...])
    z = jnp.maximum(z, 0.0)
    z = jnp.maximum(jnp.dot(z, w2h_ref[...], preferred_element_type=f32) + bh2_ref[...], 0.0)
    z = jnp.dot(z, w3h_ref[...], preferred_element_type=f32) + bh3_ref[...]
    out_ref[...] = jnp.dot(z, w4h_ref[...], preferred_element_type=f32) + bh4_ref[...]


# ----------------------------------------------------------------------------
# One-time parameter prep (hoisted out of the per-call path)
# ----------------------------------------------------------------------------
def _perm_gates(w_ih, w_hh, b_ih, b_hh):
    """PyTorch gate order [i,f,g,o] -> [i,f,o,g]; fold biases; transpose."""
    H = w_hh.shape[1]
    perm = np.concatenate([np.arange(0, 2 * H), np.arange(3 * H, 4 * H),
                           np.arange(2 * H, 3 * H)])
    perm = jnp.asarray(perm)
    wih_t = w_ih[perm, :].T                        # (in, 4H)
    whh_t = w_hh[perm, :].T                        # (H, 4H)
    b = (b_ih + b_hh)[perm].reshape(1, -1)         # (1, 4H)
    return wih_t, whh_t, b


def prepare_params(params, spatial):
    w_ih1, w_hh1, b_ih1, b_hh1 = params["lstm1"]
    w_ih2, w_hh2, b_ih2, b_hh2 = params["lstm2"]
    H1 = w_hh1.shape[1]
    H2 = w_hh2.shape[1]
    K = params["conv_blocks"][0]["w"].shape[2]
    R = spatial
    Ho3 = spatial - 3 * (K - 1)
    L3 = _round_up((Ho3 - 1) * R + Ho3, 128)       # lane-padded LSTM-2 window

    wih1, whh1, b1 = _perm_gates(w_ih1, w_hh1, b_ih1, b_hh1)
    wih2_t, whh2, b2 = _perm_gates(w_ih2, w_hh2, b_ih2, b_hh2)
    # Scatter LSTM-2 input projection onto the flat row-stride-R canvas so the
    # conv output feeds the LSTM reshape-free (invalid positions get 0 rows).
    rows = (np.arange(Ho3)[:, None] * R + np.arange(Ho3)[None, :]).reshape(-1)
    wih2_pad = jnp.zeros((L3, 4 * H2), jnp.float32).at[jnp.asarray(rows)].set(wih2_t)

    out = dict(wih1=wih1, whh1=whh1, b1=b1, wih2=wih2_pad, whh2=whh2, b2=b2)
    for idx, blk in enumerate(params["conv_blocks"], start=1):
        w = blk["w"]                               # (Cout, Cin, K, K)
        out[f"wf{idx}"] = jnp.transpose(w, (0, 2, 3, 1)).reshape(
            w.shape[0], K * K * w.shape[1])        # (Cout, K*K*Cin)
        out[f"g{idx}"] = blk["gamma"].reshape(-1, 1)
        out[f"be{idx}"] = blk["beta"].reshape(-1, 1)

    W1 = params["mlp_w1"]                          # (hid3, H1+H2+A)
    out.update(
        w1a=W1[:, :H1].T, w1b=W1[:, H1:H1 + H2].T, w1c=W1[:, H1 + H2:].T,
        bh1=params["mlp_b1"].reshape(1, -1),
        w2=params["mlp_w2"].T, bh2=params["mlp_b2"].reshape(1, -1),
        w3=params["mlp_w3"].T, bh3=params["mlp_b3"].reshape(1, -1),
        w4=params["fc_last_w"].T, bh4=params["fc_last_b"].reshape(1, -1))
    return out


def _full_mask(B, SEG, Ho, Wo, R):
    """{0,1} mask over the (1, B*SEG) flat canvas marking valid conv outputs."""
    p = np.arange(SEG)
    m = (((p % R) < Wo) & ((p // R) < Ho)).astype(np.float32)
    return jnp.asarray(np.tile(m, B)).reshape(1, B * SEG)


# ----------------------------------------------------------------------------
# Per-call wrapper: input layout + single pallas_call
# ----------------------------------------------------------------------------
@jax.jit
def critic_forward(prepped, state1, state2, action):
    B, T1, D1 = state1.shape
    _, C, Hin, Win = state2.shape
    assert Hin == Win, "square state_2 assumed (matches the module's geometry)"
    H1 = prepped["whh1"].shape[0]
    H2 = prepped["whh2"].shape[0]
    K = int(round((prepped["wf1"].shape[1] // C) ** 0.5))
    R = Win
    L3 = prepped["wih2"].shape[0]
    Ho1, Ho2, Ho3 = Hin - (K - 1), Hin - 2 * (K - 1), Hin - 3 * (K - 1)
    assert Ho3 > 0
    HW = Hin * Win
    SEG = _round_up(max(HW, L3), 128)              # per-batch segment width
    TAIL = _round_up((K - 1) * (R + 1), 128)       # read slack for the taps
    NSEG = B * SEG

    # Per-call input layout (the only per-call prep left).
    s1 = jnp.transpose(state1, (1, 0, 2)).reshape(T1 * B, D1)        # time-major
    x2 = jnp.transpose(state2.reshape(B, C, HW), (1, 0, 2))           # (C, B, HW)
    x2 = jnp.pad(x2, ((0, 0), (0, 0), (0, SEG - HW))).reshape(C, NSEG)
    x2 = jnp.pad(x2, ((0, 0), (0, TAIL)))

    masks = [_full_mask(B, SEG, Ho, Ho, R) for Ho in (Ho1, Ho2, Ho3)]  # constants

    args = [s1, x2, action,
            prepped["wih1"], prepped["whh1"], prepped["b1"],
            prepped["wf1"], prepped["g1"], prepped["be1"], masks[0],
            prepped["wf2"], prepped["g2"], prepped["be2"], masks[1],
            prepped["wf3"], prepped["g3"], prepped["be3"], masks[2],
            prepped["wih2"], prepped["whh2"], prepped["b2"],
            prepped["w1a"], prepped["w1b"], prepped["w1c"], prepped["bh1"],
            prepped["w2"], prepped["bh2"], prepped["w3"], prepped["bh3"],
            prepped["w4"], prepped["bh4"]]

    kern = functools.partial(
        critic_fused_kernel,
        B=B, T1=T1, H1=H1, T2=C, H2=H2, K=K, R=R,
        SEG=SEG, TAIL=TAIL, L3=L3, Hos=(Ho1, Ho2, Ho3),
        eps=1e-5, slope=0.2)

    return pl.pallas_call(
        kern,
        out_shape=jax.ShapeDtypeStruct((B, 1), jnp.float32),
        in_specs=[VMEM_SPEC] * len(args),
        out_specs=VMEM_SPEC,
        scratch_shapes=[
            pltpu.VMEM((C, NSEG + TAIL), jnp.float32),   # feature-map ping
            pltpu.VMEM((C, NSEG + TAIL), jnp.float32),   # feature-map pong
            pltpu.VMEM((K * K * C, NSEG), jnp.float32),  # im2col stack
            pltpu.VMEM((C * B, L3), jnp.float32),        # LSTM-2 input gather
        ],
    )(*args)


# ----------------------------------------------------------------------------
# Pure-JAX reference (for correctness check only)
# ----------------------------------------------------------------------------
def _lstm_ref(x, w_ih, w_hh, b_ih, b_hh):
    B, T, _ = x.shape
    H = w_hh.shape[1]
    h = jnp.zeros((B, H), jnp.float32)
    c = jnp.zeros((B, H), jnp.float32)
    for t in range(T):
        g = x[:, t] @ w_ih.T + h @ w_hh.T + b_ih + b_hh
        i = jax.nn.sigmoid(g[:, :H])
        f = jax.nn.sigmoid(g[:, H:2 * H])
        gg = jnp.tanh(g[:, 2 * H:3 * H])
        o = jax.nn.sigmoid(g[:, 3 * H:])
        c = f * c + i * gg
        h = o * jnp.tanh(c)
    return h


def _conv_block_ref(x, w, b, gamma, beta, eps=1e-5, slope=0.2):
    y = lax.conv_general_dilated(x, w, window_strides=(1, 1), padding="VALID",
                                 dimension_numbers=("NCHW", "OIHW", "NCHW"))
    y = y + b[None, :, None, None]
    mean = y.mean(axis=(0, 2, 3), keepdims=True)
    var = ((y - mean) ** 2).mean(axis=(0, 2, 3), keepdims=True)
    yn = (y - mean) * lax.rsqrt(var + eps)
    z = gamma[None, :, None, None] * yn + beta[None, :, None, None]
    return jnp.where(z > 0, z, slope * z)


def critic_forward_ref(params, state1, state2, action):
    B = state1.shape[0]
    seq_len = state2.shape[1]
    x_1 = _lstm_ref(state1, *params["lstm1"])
    x2 = state2
    for blk in params["conv_blocks"]:
        x2 = _conv_block_ref(x2, blk["w"], blk["b"], blk["gamma"], blk["beta"])
    x_2 = x2.reshape(B, seq_len, -1)
    output_r = _lstm_ref(x_2, *params["lstm2"])
    h = jnp.concatenate([x_1, output_r, action], axis=1)
    h = jnp.maximum(h @ params["mlp_w1"].T + params["mlp_b1"], 0.0)
    h = jnp.maximum(h @ params["mlp_w2"].T + params["mlp_b2"], 0.0)
    h = h @ params["mlp_w3"].T + params["mlp_b3"]
    return h @ params["fc_last_w"].T + params["fc_last_b"]


# ----------------------------------------------------------------------------
# Deterministic parameter init (PyTorch layouts)
# ----------------------------------------------------------------------------
def _uniform(key, shape, scale=0.1):
    return jax.random.uniform(key, shape, jnp.float32, -scale, scale)


def init_params(key, *, D1, H1, seq_len, K, H2, conv_in_flat, in_last,
                hid3, hid3_out):
    keys = iter(jax.random.split(key, 32))
    params = {}
    params["lstm1"] = (_uniform(next(keys), (4 * H1, D1)),
                       _uniform(next(keys), (4 * H1, H1)),
                       _uniform(next(keys), (4 * H1,)),
                       _uniform(next(keys), (4 * H1,)))
    params["conv_blocks"] = []
    for _ in range(3):
        params["conv_blocks"].append(dict(
            w=_uniform(next(keys), (seq_len, seq_len, K, K), scale=0.2),
            b=_uniform(next(keys), (seq_len,)),
            gamma=jnp.ones((seq_len,), jnp.float32),   # BatchNorm2d default init
            beta=jnp.zeros((seq_len,), jnp.float32),
        ))
    params["lstm2"] = (_uniform(next(keys), (4 * H2, conv_in_flat)),
                       _uniform(next(keys), (4 * H2, H2)),
                       _uniform(next(keys), (4 * H2,)),
                       _uniform(next(keys), (4 * H2,)))
    params["mlp_w1"] = _uniform(next(keys), (hid3, in_last))
    params["mlp_b1"] = _uniform(next(keys), (hid3,))
    params["mlp_w2"] = _uniform(next(keys), (hid3, hid3))
    params["mlp_b2"] = _uniform(next(keys), (hid3,))
    params["mlp_w3"] = _uniform(next(keys), (hid3_out, hid3))
    params["mlp_b3"] = _uniform(next(keys), (hid3_out,))
    params["fc_last_w"] = _uniform(next(keys), (1, hid3_out))
    params["fc_last_b"] = _uniform(next(keys), (1,))
    return params


# ----------------------------------------------------------------------------
if __name__ == "__main__":
    # Config consistent with the module:
    #   kernel_size=3, stride=1, state_2=30 -> 30->28->26->24, 24*24=576 == LSTM2 input
    B = 2
    D1 = 8            # state_size['state_1']
    H1 = 32           # hidden_1_size, num_layers_1 = 1
    seq_len = 4       # sequence_length == conv channels
    W2 = 30           # state_size['state_2']
    K = 3             # kernel_size
    H2 = 32           # hidden_2_size, num_layers_2 = 1
    A = 4             # action_size
    hid3, hid3_out = 64, 32   # hidden_3_size / hidden_3_out
    in_last = H1 + H2 + A     # input_dims_last critic = 68

    key = jax.random.PRNGKey(0)
    k_p, k_s1, k_s2, k_a = jax.random.split(key, 4)

    # TODO(synk): the MLP class is not defined in the provided source file;
    # implemented here as the Linear+ReLU stack implied by
    # MLP(input_dims, hidden_size, output_size, num_layers).
    params = init_params(k_p, D1=D1, H1=H1, seq_len=seq_len, K=K, H2=H2,
                         conv_in_flat=576, in_last=in_last,
                         hid3=hid3, hid3_out=hid3_out)
    prepped = prepare_params(params, spatial=W2)   # one-time weight layout prep

    state1 = jax.random.normal(k_s1, (B, seq_len, D1), jnp.float32)
    state2 = jax.random.normal(k_s2, (B, seq_len, W2, W2), jnp.float32)
    action = jax.random.normal(k_a, (B, A), jnp.float32)

    q = jax.block_until_ready(critic_forward(prepped, state1, state2, action))
    assert q.shape == (B, 1), q.shape

    q_ref = jax.block_until_ready(critic_forward_ref(params, state1, state2, action))
    np.testing.assert_allclose(np.asarray(q), np.asarray(q_ref), rtol=1e-2, atol=1e-2)

    print("KERNEL_OK")
</pallas_src>

<mosaic_0001>
module attributes {stable_mosaic.version = 11 : i64} {
  func.func @critic_fused_kernel(%arg0: memref<8x8xf32, #tpu.memory_space<vmem>>, %arg1: memref<4x2176xf32, #tpu.memory_space<vmem>>, %arg2: memref<2x4xf32, #tpu.memory_space<vmem>>, %arg3: memref<8x128xf32, #tpu.memory_space<vmem>>, %arg4: memref<32x128xf32, #tpu.memory_space<vmem>>, %arg5: memref<1x128xf32, #tpu.memory_space<vmem>>, %arg6: memref<4x36xf32, #tpu.memory_space<vmem>>, %arg7: memref<4x1xf32, #tpu.memory_space<vmem>>, %arg8: memref<4x1xf32, #tpu.memory_space<vmem>>, %arg9: memref<1x2048xf32, #tpu.memory_space<vmem>>, %arg10: memref<4x36xf32, #tpu.memory_space<vmem>>, %arg11: memref<4x1xf32, #tpu.memory_space<vmem>>, %arg12: memref<4x1xf32, #tpu.memory_space<vmem>>, %arg13: memref<1x2048xf32, #tpu.memory_space<vmem>>, %arg14: memref<4x36xf32, #tpu.memory_space<vmem>>, %arg15: memref<4x1xf32, #tpu.memory_space<vmem>>, %arg16: memref<4x1xf32, #tpu.memory_space<vmem>>, %arg17: memref<1x2048xf32, #tpu.memory_space<vmem>>, %arg18: memref<768x128xf32, #tpu.memory_space<vmem>>, %arg19: memref<32x128xf32, #tpu.memory_space<vmem>>, %arg20: memref<1x128xf32, #tpu.memory_space<vmem>>, %arg21: memref<32x64xf32, #tpu.memory_space<vmem>>, %arg22: memref<32x64xf32, #tpu.memory_space<vmem>>, %arg23: memref<4x64xf32, #tpu.memory_space<vmem>>, %arg24: memref<1x64xf32, #tpu.memory_space<vmem>>, %arg25: memref<64x64xf32, #tpu.memory_space<vmem>>, %arg26: memref<1x64xf32, #tpu.memory_space<vmem>>, %arg27: memref<64x32xf32, #tpu.memory_space<vmem>>, %arg28: memref<1x32xf32, #tpu.memory_space<vmem>>, %arg29: memref<32x1xf32, #tpu.memory_space<vmem>>, %arg30: memref<1x1xf32, #tpu.memory_space<vmem>>, %arg31: memref<2x1xf32, #tpu.memory_space<vmem>>, %arg32: memref<4x2176xf32, #tpu.memory_space<vmem>>, %arg33: memref<4x2176xf32, #tpu.memory_space<vmem>>, %arg34: memref<36x2048xf32, #tpu.memory_space<vmem>>, %arg35: memref<8x768xf32, #tpu.memory_space<vmem>>) attributes {dimension_semantics = [], scalar_prefetch = 0 : i64, scratch_operands = 4 : i64, tpu.core_type = #tpu.core_type<tc>} {
    %cst = arith.constant 0.000000e+00 : f32
    %0 = vector.broadcast %cst : f32 to vector<4x128xf32>
    %c0 = arith.constant 0 : index
    %c2048 = arith.constant 2048 : index
    %1 = vector.load %arg32[%c0, %c2048] : memref<4x2176xf32, #tpu.memory_space<vmem>>, vector<4x128xf32>
    tpu.vector_store %arg32[%c0, %c2048], %0 {strides = array<i32>} : memref<4x2176xf32, #tpu.memory_space<vmem>>, vector<4x128xf32>,
    %cst_0 = arith.constant 0.000000e+00 : f32
    %2 = vector.broadcast %cst_0 : f32 to vector<4x128xf32>
    %c0_1 = arith.constant 0 : index
    %c2048_2 = arith.constant 2048 : index
    %3 = vector.load %arg33[%c0_1, %c2048_2] : memref<4x2176xf32, #tpu.memory_space<vmem>>, vector<4x128xf32>
    tpu.vector_store %arg33[%c0_1, %c2048_2], %2 {strides = array<i32>} : memref<4x2176xf32, #tpu.memory_space<vmem>>, vector<4x128xf32>,
    %c0_3 = arith.constant 0 : index
    %c0_4 = arith.constant 0 : index
    %4 = vector.load %arg0[%c0_3, %c0_4] : memref<8x8xf32, #tpu.memory_space<vmem>>, vector<8x8xf32>
    %c0_5 = arith.constant 0 : index
    %c0_6 = arith.constant 0 : index
    %5 = vector.load %arg3[%c0_5, %c0_6] : memref<8x128xf32, #tpu.memory_space<vmem>>, vector<8x128xf32>
    %cst_7 = arith.constant dense<0.000000e+00> : vector<8x128xf32>
    %6 = tpu.matmul %4, %5, %cst_7 {dimension_numbers = #tpu.dot_dimension_numbers<[1], [0], [0], [1], [0, 0, 1, 1], [], []>} : vector<8x8xf32>, vector<8x128xf32>, vector<8x128xf32> -> vector<8x128xf32>
    %c0_8 = arith.constant 0 : index
    %c0_9 = arith.constant 0 : index
    %7 = vector.load %arg5[%c0_8, %c0_9] : memref<1x128xf32, #tpu.memory_space<vmem>>, vector<1x128xf32>
    %8 = vector.broadcast %7 : vector<1x128xf32> to vector<8x128xf32>
    %9 = arith.addf %6, %8 : vector<8x128xf32>
    %c0_10 = arith.constant 0 : index
    %c0_11 = arith.constant 0 : index
    %10 = vector.load %arg4[%c0_10, %c0_11] : memref<32x128xf32, #tpu.memory_space<vmem>>, vector<32x128xf32>
    %cst_12 = arith.constant 0.000000e+00 : f32
    %11 = vector.broadcast %cst_12 : f32 to vector<2x32xf32>
    %cst_13 = arith.constant 0.000000e+00 : f32
    %12 = vector.broadcast %cst_13 : f32 to vector<2x32xf32>
    %13 = vector.extract_strided_slice %9 {offsets = [0, 0], sizes = [2, 128], strides = [1, 1]} : vector<8x128xf32> to vector<2x128xf32>
    %cst_14 = arith.constant dense<0.000000e+00> : vector<2x128xf32>
    %14 = tpu.matmul %11, %10, %cst_14 {dimension_numbers = #tpu.dot_dimension_numbers<[1], [0], [0], [1], [0, 0, 1, 1], [], []>} : vector<2x32xf32>, vector<32x128xf32>, vector<2x128xf32> -> vector<2x128xf32>
    %15 = arith.addf %13, %14 : vector<2x128xf32>
    %16 = vector.extract_strided_slice %15 {offsets = [0, 0], sizes = [2, 96], strides = [1, 1]} : vector<2x128xf32> to vector<2x96xf32>
    %17 = arith.negf %16 : vector<2x96xf32>
    %18 = math.exp %17 : vector<2x96xf32>
    %cst_15 = arith.constant 1.000000e+00 : f32
    %19 = vector.broadcast %cst_15 : f32 to vector<2x96xf32>
    %20 = arith.addf %19, %18 : vector<2x96xf32>
    %21 = arith.divf %19, %20 : vector<2x96xf32>
    %22 = vector.extract_strided_slice %15 {offsets = [0, 96], sizes = [2, 32], strides = [1, 1]} : vector<2x128xf32> to vector<2x32xf32>
    %23 = math.tanh %22 : vector<2x32xf32>
    %24 = vector.extract_strided_slice %21 {offsets = [0, 0], sizes = [2, 32], strides = [1, 1]} : vector<2x96xf32> to vector<2x32xf32>
    %25 = vector.extract_strided_slice %21 {offsets = [0, 32], sizes = [2, 32], strides = [1, 1]} : vector<2x96xf32> to vector<2x32xf32>
    %26 = vector.extract_strided_slice %21 {offsets = [0, 64], sizes = [2, 32], strides = [1, 1]} : vector<2x96xf32> to vector<2x32xf32>
    %27 = arith.mulf %25, %12 : vector<2x32xf32>
    %28 = arith.mulf %24, %23 : vector<2x32xf32>
    %29 = arith.addf %27, %28 : vector<2x32xf32>
    %30 = math.tanh %29 : vector<2x32xf32>
    %31 = arith.mulf %26, %30 : vector<2x32xf32>
    %32 = vector.extract_strided_slice %9 {offsets = [2, 0], sizes = [2, 128], strides = [1, 1]} : vector<8x128xf32> to vector<2x128xf32>
    %cst_16 = arith.constant dense<0.000000e+00> : vector<2x128xf32>
    %33 = tpu.matmul %31, %10, %cst_16 {dimension_numbers = #tpu.dot_dimension_numbers<[1], [0], [0], [1], [0, 0, 1, 1], [], []>} : vector<2x32xf32>, vector<32x128xf32>, vector<2x128xf32> -> vector<2x128xf32>
    %34 = arith.addf %32, %33 : vector<2x128xf32>
    %35 = vector.extract_strided_slice %34 {offsets = [0, 0], sizes = [2, 96], strides = [1, 1]} : vector<2x128xf32> to vector<2x96xf32>
    %36 = arith.negf %35 : vector<2x96xf32>
    %37 = math.exp %36 : vector<2x96xf32>
    %cst_17 = arith.constant 1.000000e+00 : f32
    %38 = vector.broadcast %cst_17 : f32 to vector<2x96xf32>
    %39 = arith.addf %38, %37 : vector<2x96xf32>
    %40 = arith.divf %38, %39 : vector<2x96xf32>
    %41 = vector.extract_strided_slice %34 {offsets = [0, 96], sizes = [2, 32], strides = [1, 1]} : vector<2x128xf32> to vector<2x32xf32>
    %42 = math.tanh %41 : vector<2x32xf32>
    %43 = vector.extract_strided_slice %40 {offsets = [0, 0], sizes = [2, 32], strides = [1, 1]} : vector<2x96xf32> to vector<2x32xf32>
    %44 = vector.extract_strided_slice %40 {offsets = [0, 32], sizes = [2, 32], strides = [1, 1]} : vector<2x96xf32> to vector<2x32xf32>
    %45 = vector.extract_strided_slice %40 {offsets = [0, 64], sizes = [2, 32], strides = [1, 1]} : vector<2x96xf32> to vector<2x32xf32>
    %46 = arith.mulf %44, %29 : vector<2x32xf32>
    %47 = arith.mulf %43, %42 : vector<2x32xf32>
    %48 = arith.addf %46, %47 : vector<2x32xf32>
    %49 = math.tanh %48 : vector<2x32xf32>
    %50 = arith.mulf %45, %49 : vector<2x32xf32>
    %51 = vector.extract_strided_slice %9 {offsets = [4, 0], sizes = [2, 128], strides = [1, 1]} : vector<8x128xf32> to vector<2x128xf32>
    %cst_18 = arith.constant dense<0.000000e+00> : vector<2x128xf32>
    %52 = tpu.matmul %50, %10, %cst_18 {dimension_numbers = #tpu.dot_dimension_numbers<[1], [0], [0], [1], [0, 0, 1, 1], [], []>} : vector<2x32xf32>, vector<32x128xf32>, vector<2x128xf32> -> vector<2x128xf32>
    %53 = arith.addf %51, %52 : vector<2x128xf32>
    %54 = vector.extract_strided_slice %53 {offsets = [0, 0], sizes = [2, 96], strides = [1, 1]} : vector<2x128xf32> to vector<2x96xf32>
    %55 = arith.negf %54 : vector<2x96xf32>
    %56 = math.exp %55 : vector<2x96xf32>
    %cst_19 = arith.constant 1.000000e+00 : f32
    %57 = vector.broadcast %cst_19 : f32 to vector<2x96xf32>
    %58 = arith.addf %57, %56 : vector<2x96xf32>
    %59 = arith.divf %57, %58 : vector<2x96xf32>
    %60 = vector.extract_strided_slice %53 {offsets = [0, 96], sizes = [2, 32], strides = [1, 1]} : vector<2x128xf32> to vector<2x32xf32>
    %61 = math.tanh %60 : vector<2x32xf32>
    %62 = vector.extract_strided_slice %59 {offsets = [0, 0], sizes = [2, 32], strides = [1, 1]} : vector<2x96xf32> to vector<2x32xf32>
    %63 = vector.extract_strided_slice %59 {offsets = [0, 32], sizes = [2, 32], strides = [1, 1]} : vector<2x96xf32> to vector<2x32xf32>
    %64 = vector.extract_strided_slice %59 {offsets = [0, 64], sizes = [2, 32], strides = [1, 1]} : vector<2x96xf32> to vector<2x32xf32>
    %65 = arith.mulf %63, %48 : vector<2x32xf32>
    %66 = arith.mulf %62, %61 : vector<2x32xf32>
    %67 = arith.addf %65, %66 : vector<2x32xf32>
    %68 = math.tanh %67 : vector<2x32xf32>
    %69 = arith.mulf %64, %68 : vector<2x32xf32>
    %70 = vector.extract_strided_slice %9 {offsets = [6, 0], sizes = [2, 128], strides = [1, 1]} : vector<8x128xf32> to vector<2x128xf32>
    %cst_20 = arith.constant dense<0.000000e+00> : vector<2x128xf32>
    %71 = tpu.matmul %69, %10, %cst_20 {dimension_numbers = #tpu.dot_dimension_numbers<[1], [0], [0], [1], [0, 0, 1, 1], [], []>} : vector<2x32xf32>, vector<32x128xf32>, vector<2x128xf32> -> vector<2x128xf32>
    %72 = arith.addf %70, %71 : vector<2x128xf32>
    %73 = vector.extract_strided_slice %72 {offsets = [0, 0], sizes = [2, 96], strides = [1, 1]} : vector<2x128xf32> to vector<2x96xf32>
    %74 = arith.negf %73 : vector<2x96xf32>
    %75 = math.exp %74 : vector<2x96xf32>
    %cst_21 = arith.constant 1.000000e+00 : f32
    %76 = vector.broadcast %cst_21 : f32 to vector<2x96xf32>
    %77 = arith.addf %76, %75 : vector<2x96xf32>
    %78 = arith.divf %76, %77 : vector<2x96xf32>
    %79 = vector.extract_strided_slice %72 {offsets = [0, 96], sizes = [2, 32], strides = [1, 1]} : vector<2x128xf32> to vector<2x32xf32>
    %80 = math.tanh %79 : vector<2x32xf32>
    %81 = vector.extract_strided_slice %78 {offsets = [0, 0], sizes = [2, 32], strides = [1, 1]} : vector<2x96xf32> to vector<2x32xf32>
    %82 = vector.extract_strided_slice %78 {offsets = [0, 32], sizes = [2, 32], strides = [1, 1]} : vector<2x96xf32> to vector<2x32xf32>
    %83 = vector.extract_strided_slice %78 {offsets = [0, 64], sizes = [2, 32], strides = [1, 1]} : vector<2x96xf32> to vector<2x32xf32>
    %84 = arith.mulf %82, %67 : vector<2x32xf32>
    %85 = arith.mulf %81, %80 : vector<2x32xf32>
    %86 = arith.addf %84, %85 : vector<2x32xf32>
    %87 = math.tanh %86 : vector<2x32xf32>
    %88 = arith.mulf %83, %87 : vector<2x32xf32>
    %c0_22 = arith.constant 0 : index
    %c0_23 = arith.constant 0 : index
    %89 = vector.load %arg1[%c0_22, %c0_23] : memref<4x2176xf32, #tpu.memory_space<vmem>>, vector<4x2048xf32>
    %c0_24 = arith.constant 0 : index
    %c0_25 = arith.constant 0 : index
    %90 = vector.load %arg34[%c0_24, %c0_25] : memref<36x2048xf32, #tpu.memory_space<vmem>>, vector<4x2048xf32>
    tpu.vector_store %arg34[%c0_24, %c0_25], %89 {strides = array<i32>} : memref<36x2048xf32, #tpu.memory_space<vmem>>, vector<4x2048xf32>,
    %c0_26 = arith.constant 0 : index
    %c1 = arith.constant 1 : index
    %91 = vector.load %arg1[%c0_26, %c1] : memref<4x2176xf32, #tpu.memory_space<vmem>>, vector<4x2048xf32>
    %c4 = arith.constant 4 : index
    %c0_27 = arith.constant 0 : index
    %92 = vector.load %arg34[%c4, %c0_27] : memref<36x2048xf32, #tpu.memory_space<vmem>>, vector<4x2048xf32>
    tpu.vector_store %arg34[%c4, %c0_27], %91 {strides = array<i32>} : memref<36x2048xf32, #tpu.memory_space<vmem>>, vector<4x2048xf32>,
    %c0_28 = arith.constant 0 : index
    %c2 = arith.constant 2 : index
    %93 = vector.load %arg1[%c0_28, %c2] : memref<4x2176xf32, #tpu.memory_space<vmem>>, vector<4x2048xf32>
    %c8 = arith.constant 8 : index
    %c0_29 = arith.constant 0 : index
    %94 = vector.load %arg34[%c8, %c0_29] : memref<36x2048xf32, #tpu.memory_space<vmem>>, vector<4x2048xf32>
    tpu.vector_store %arg34[%c8, %c0_29], %93 {strides = array<i32>} : memref<36x2048xf32, #tpu.memory_space<vmem>>, vector<4x2048xf32>,
    %c0_30 = arith.constant 0 : index
    %c30 = arith.constant 30 : index
    %95 = vector.load %arg1[%c0_30, %c30] : memref<4x2176xf32, #tpu.memory_space<vmem>>, vector<4x2048xf32>
    %c12 = arith.constant 12 : index
    %c0_31 = arith.constant 0 : index
    %96 = vector.load %arg34[%c12, %c0_31] : memref<36x2048xf32, #tpu.memory_space<vmem>>, vector<4x2048xf32>
    tpu.vector_store %arg34[%c12, %c0_31], %95 {strides = array<i32>} : memref<36x2048xf32, #tpu.memory_space<vmem>>, vector<4x2048xf32>,
    %c0_32 = arith.constant 0 : index
    %c31 = arith.constant 31 : index
    %97 = vector.load %arg1[%c0_32, %c31] : memref<4x2176xf32, #tpu.memory_space<vmem>>, vector<4x2048xf32>
    %c16 = arith.constant 16 : index
    %c0_33 = arith.constant 0 : index
    %98 = vector.load %arg34[%c16, %c0_33] : memref<36x2048xf32, #tpu.memory_space<vmem>>, vector<4x2048xf32>
    tpu.vector_store %arg34[%c16, %c0_33], %97 {strides = array<i32>} : memref<36x2048xf32, #tpu.memory_space<vmem>>, vector<4x2048xf32>,
    %c0_34 = arith.constant 0 : index
    %c32 = arith.constant 32 : index
    %99 = vector.load %arg1[%c0_34, %c32] : memref<4x2176xf32, #tpu.memory_space<vmem>>, vector<4x2048xf32>
    %c20 = arith.constant 20 : index
    %c0_35 = arith.constant 0 : index
    %100 = vector.load %arg34[%c20, %c0_35] : memref<36x2048xf32, #tpu.memory_space<vmem>>, vector<4x2048xf32>
    tpu.vector_store %arg34[%c20, %c0_35], %99 {strides = array<i32>} : memref<36x2048xf32, #tpu.memory_space<vmem>>, vector<4x2048xf32>,
    %c0_36 = arith.constant 0 : index
    %c60 = arith.constant 60 : index
    %101 = vector.load %arg1[%c0_36, %c60] : memref<4x2176xf32, #tpu.memory_space<vmem>>, vector<4x2048xf32>
    %c24 = arith.constant 24 : index
    %c0_37 = arith.constant 0 : index
    %102 = vector.load %arg34[%c24, %c0_37] : memref<36x2048xf32, #tpu.memory_space<vmem>>, vector<4x2048xf32>
    tpu.vector_store %arg34[%c24, %c0_37], %101 {strides = array<i32>} : memref<36x2048xf32, #tpu.memory_space<vmem>>, vector<4x2048xf32>,
    %c0_38 = arith.constant 0 : index
    %c61 = arith.constant 61 : index
    %103 = vector.load %arg1[%c0_38, %c61] : memref<4x2176xf32, #tpu.memory_space<vmem>>, vector<4x2048xf32>
    %c28 = arith.constant 28 : index
    %c0_39 = arith.constant 0 : index
    %104 = vector.load %arg34[%c28, %c0_39] : memref<36x2048xf32, #tpu.memory_space<vmem>>, vector<4x2048xf32>
    tpu.vector_store %arg34[%c28, %c0_39], %103 {strides = array<i32>} : memref<36x2048xf32, #tpu.memory_space<vmem>>, vector<4x2048xf32>,
    %c0_40 = arith.constant 0 : index
    %c62 = arith.constant 62 : index
    %105 = vector.load %arg1[%c0_40, %c62] : memref<4x2176xf32, #tpu.memory_space<vmem>>, vector<4x2048xf32>
    %c32_41 = arith.constant 32 : index
    %c0_42 = arith.constant 0 : index
    %106 = vector.load %arg34[%c32_41, %c0_42] : memref<36x2048xf32, #tpu.memory_space<vmem>>, vector<4x2048xf32>
    tpu.vector_store %arg34[%c32_41, %c0_42], %105 {strides = array<i32>} : memref<36x2048xf32, #tpu.memory_space<vmem>>, vector<4x2048xf32>,
    %c0_43 = arith.constant 0 : index
    %c0_44 = arith.constant 0 : index
    %107 = vector.load %arg6[%c0_43, %c0_44] : memref<4x36xf32, #tpu.memory_space<vmem>>, vector<4x36xf32>
    %c0_45 = arith.constant 0 : index
    %c0_46 = arith.constant 0 : index
    %108 = vector.load %arg34[%c0_45, %c0_46] : memref<36x2048xf32, #tpu.memory_space<vmem>>, vector<36x2048xf32>
    %cst_47 = arith.constant dense<0.000000e+00> : vector<4x2048xf32>
    %109 = tpu.matmul %107, %108, %cst_47 {dimension_numbers = #tpu.dot_dimension_numbers<[1], [0], [0], [1], [0, 0, 1, 1], [], []>} : vector<4x36xf32>, vector<36x2048xf32>, vector<4x2048xf32> -> vector<4x2048xf32>
    %c0_48 = arith.constant 0 : index
    %c0_49 = arith.constant 0 : index
    %110 = vector.load %arg9[%c0_48, %c0_49] : memref<1x2048xf32, #tpu.memory_space<vmem>>, vector<1x2048xf32>
    %cst_50 = arith.constant 5.000000e-01 : f32
    %111 = vector.broadcast %cst_50 : f32 to vector<1x2048xf32>
    %112 = arith.cmpf ogt, %110, %111 : vector<1x2048xf32>
    %cst_51 = arith.constant 0.000000e+00 : f32
    %113 = vector.shape_cast %112 : vector<1x2048xi1> to vector<1x2048xi1>
    %114 = vector.broadcast %113 : vector<1x2048xi1> to vector<4x2048xi1>
    %115 = vector.broadcast %cst_51 : f32 to vector<4x2048xf32>
    %116 = arith.select %114, %109, %115 : vector<4x2048xi1>, vector<4x2048xf32>
    %cst_52 = arith.constant dense<0.000000e+00> : vector<4xf32>
    %117 = vector.multi_reduction <add>, %116, %cst_52 [1] : vector<4x2048xf32> to vector<4xf32>
    %118 = vector.shape_cast %117 : vector<4xf32> to vector<4x1xf32>
    %cst_53 = arith.constant 6.37755089E-4 : f32
    %119 = vector.broadcast %cst_53 : f32 to vector<4x1xf32>
    %120 = arith.mulf %118, %119 : vector<4x1xf32>
    %121 = vector.broadcast %120 : vector<4x1xf32> to vector<4x2048xf32>
    %122 = arith.subf %109, %121 : vector<4x2048xf32>
    %123 = arith.mulf %122, %122 : vector<4x2048xf32>
    %cst_54 = arith.constant 0.000000e+00 : f32
    %124 = vector.shape_cast %112 : vector<1x2048xi1> to vector<1x2048xi1>
    %125 = vector.broadcast %124 : vector<1x2048xi1> to vector<4x2048xi1>
    %126 = vector.broadcast %cst_54 : f32 to vector<4x2048xf32>
    %127 = arith.select %125, %123, %126 : vector<4x2048xi1>, vector<4x2048xf32>
    %cst_55 = arith.constant dense<0.000000e+00> : vector<4xf32>
    %128 = vector.multi_reduction <add>, %127, %cst_55 [1] : vector<4x2048xf32> to vector<4xf32>
    %129 = vector.shape_cast %128 : vector<4xf32> to vector<4x1xf32>
    %cst_56 = arith.constant 6.37755089E-4 : f32
    %130 = vector.broadcast %cst_56 : f32 to vector<4x1xf32>
    %131 = arith.mulf %129, %130 : vector<4x1xf32>
    %c0_57 = arith.constant 0 : index
    %c0_58 = arith.constant 0 : index
    %132 = vector.load %arg7[%c0_57, %c0_58] : memref<4x1xf32, #tpu.memory_space<vmem>>, vector<4x1xf32>
    %cst_59 = arith.constant 9.99999974E-6 : f32
    %133 = vector.broadcast %cst_59 : f32 to vector<4x1xf32>
    %134 = arith.addf %131, %133 : vector<4x1xf32>
    %135 = math.rsqrt %134 : vector<4x1xf32>
    %136 = arith.mulf %132, %135 : vector<4x1xf32>
    %c0_60 = arith.constant 0 : index
    %c0_61 = arith.constant 0 : index
    %137 = vector.load %arg8[%c0_60, %c0_61] : memref<4x1xf32, #tpu.memory_space<vmem>>, vector<4x1xf32>
    %138 = arith.mulf %136, %120 : vector<4x1xf32>
    %139 = arith.subf %137, %138 : vector<4x1xf32>
    %140 = vector.broadcast %136 : vector<4x1xf32> to vector<4x2048xf32>
    %141 = arith.mulf %109, %140 : vector<4x2048xf32>
    %142 = vector.broadcast %139 : vector<4x1xf32> to vector<4x2048xf32>
    %143 = arith.addf %141, %142 : vector<4x2048xf32>
    %cst_62 = arith.constant 0.000000e+00 : f32
    %144 = vector.broadcast %cst_62 : f32 to vector<4x2048xf32>
    %145 = arith.cmpf ogt, %143, %144 : vector<4x2048xf32>
    %cst_63 = arith.constant 2.000000e-01 : f32
    %146 = vector.broadcast %cst_63 : f32 to vector<4x2048xf32>
    %147 = arith.mulf %146, %143 : vector<4x2048xf32>
    %148 = arith.select %145, %143, %147 : vector<4x2048xi1>, vector<4x2048xf32>
    %c0_64 = arith.constant 0 : index
    %c0_65 = arith.constant 0 : index
    %149 = vector.load %arg32[%c0_64, %c0_65] : memref<4x2176xf32, #tpu.memory_space<vmem>>, vector<4x2048xf32>
    tpu.vector_store %arg32[%c0_64, %c0_65], %148 {strides = array<i32>} : memref<4x2176xf32, #tpu.memory_space<vmem>>, vector<4x2048xf32>,
    %c0_66 = arith.constant 0 : index
    %c0_67 = arith.constant 0 : index
    %150 = vector.load %arg32[%c0_66, %c0_67] : memref<4x2176xf32, #tpu.memory_space<vmem>>, vector<4x2048xf32>
    %c0_68 = arith.constant 0 : index
    %c0_69 = arith.constant 0 : index
    %151 = vector.load %arg34[%c0_68, %c0_69] : memref<36x2048xf32, #tpu.memory_space<vmem>>, vector<4x2048xf32>
    tpu.vector_store %arg34[%c0_68, %c0_69], %150 {strides = array<i32>} : memref<36x2048xf32, #tpu.memory_space<vmem>>, vector<4x2048xf32>,
    %c0_70 = arith.constant 0 : index
    %c1_71 = arith.constant 1 : index
    %152 = vector.load %arg32[%c0_70, %c1_71] : memref<4x2176xf32, #tpu.memory_space<vmem>>, vector<4x2048xf32>
    %c4_72 = arith.constant 4 : index
    %c0_73 = arith.constant 0 : index
    %153 = vector.load %arg34[%c4_72, %c0_73] : memref<36x2048xf32, #tpu.memory_space<vmem>>, vector<4x2048xf32>
    tpu.vector_store %arg34[%c4_72, %c0_73], %152 {strides = array<i32>} : memref<36x2048xf32, #tpu.memory_space<vmem>>, vector<4x2048xf32>,
    %c0_74 = arith.constant 0 : index
    %c2_75 = arith.constant 2 : index
    %154 = vector.load %arg32[%c0_74, %c2_75] : memref<4x2176xf32, #tpu.memory_space<vmem>>, vector<4x2048xf32>
    %c8_76 = arith.constant 8 : index
    %c0_77 = arith.constant 0 : index
    %155 = vector.load %arg34[%c8_76, %c0_77] : memref<36x2048xf32, #tpu.memory_space<vmem>>, vector<4x2048xf32>
    tpu.vector_store %arg34[%c8_76, %c0_77], %154 {strides = array<i32>} : memref<36x2048xf32, #tpu.memory_space<vmem>>, vector<4x2048xf32>,
    %c0_78 = arith.constant 0 : index
    %c30_79 = arith.constant 30 : index
    %156 = vector.load %arg32[%c0_78, %c30_79] : memref<4x2176xf32, #tpu.memory_space<vmem>>, vector<4x2048xf32>
    %c12_80 = arith.constant 12 : index
    %c0_81 = arith.constant 0 : index
    %157 = vector.load %arg34[%c12_80, %c0_81] : memref<36x2048xf32, #tpu.memory_space<vmem>>, vector<4x2048xf32>
    tpu.vector_store %arg34[%c12_80, %c0_81], %156 {strides = array<i32>} : memref<36x2048xf32, #tpu.memory_space<vmem>>, vector<4x2048xf32>,
    %c0_82 = arith.constant 0 : index
    %c31_83 = arith.constant 31 : index
    %158 = vector.load %arg32[%c0_82, %c31_83] : memref<4x2176xf32, #tpu.memory_space<vmem>>, vector<4x2048xf32>
    %c16_84 = arith.constant 16 : index
    %c0_85 = arith.constant 0 : index
    %159 = vector.load %arg34[%c16_84, %c0_85] : memref<36x2048xf32, #tpu.memory_space<vmem>>, vector<4x2048xf32>
    tpu.vector_store %arg34[%c16_84, %c0_85], %158 {strides = array<i32>} : memref<36x2048xf32, #tpu.memory_space<vmem>>, vector<4x2048xf32>,
    %c0_86 = arith.constant 0 : index
    %c32_87 = arith.constant 32 : index
    %160 = vector.load %arg32[%c0_86, %c32_87] : memref<4x2176xf32, #tpu.memory_space<vmem>>, vector<4x2048xf32>
    %c20_88 = arith.constant 20 : index
    %c0_89 = arith.constant 0 : index
    %161 = vector.load %arg34[%c20_88, %c0_89] : memref<36x2048xf32, #tpu.memory_space<vmem>>, vector<4x2048xf32>
    tpu.vector_store %arg34[%c20_88, %c0_89], %160 {strides = array<i32>} : memref<36x2048xf32, #tpu.memory_space<vmem>>, vector<4x2048xf32>,
    %c0_90 = arith.constant 0 : index
    %c60_91 = arith.constant 60 : index
    %162 = vector.load %arg32[%c0_90, %c60_91] : memref<4x2176xf32, #tpu.memory_space<vmem>>, vector<4x2048xf32>
    %c24_92 = arith.constant 24 : index
    %c0_93 = arith.constant 0 : index
    %163 = vector.load %arg34[%c24_92, %c0_93] : memref<36x2048xf32, #tpu.memory_space<vmem>>, vector<4x2048xf32>
    tpu.vector_store %arg34[%c24_92, %c0_93], %162 {strides = array<i32>} : memref<36x2048xf32, #tpu.memory_space<vmem>>, vector<4x2048xf32>,
    %c0_94 = arith.constant 0 : index
    %c61_95 = arith.constant 61 : index
    %164 = vector.load %arg32[%c0_94, %c61_95] : memref<4x2176xf32, #tpu.memory_space<vmem>>, vector<4x2048xf32>
    %c28_96 = arith.constant 28 : index
    %c0_97 = arith.constant 0 : index
    %165 = vector.load %arg34[%c28_96, %c0_97] : memref<36x2048xf32, #tpu.memory_space<vmem>>, vector<4x2048xf32>
    tpu.vector_store %arg34[%c28_96, %c0_97], %164 {strides = array<i32>} : memref<36x2048xf32, #tpu.memory_space<vmem>>, vector<4x2048xf32>,
    %c0_98 = arith.constant 0 : index
    %c62_99 = arith.constant 62 : index
    %166 = vector.load %arg32[%c0_98, %c62_99] : memref<4x2176xf32, #tpu.memory_space<vmem>>, vector<4x2048xf32>
    %c32_100 = arith.constant 32 : index
    %c0_101 = arith.constant 0 : index
    %167 = vector.load %arg34[%c32_100, %c0_101] : memref<36x2048xf32, #tpu.memory_space<vmem>>, vector<4x2048xf32>
    tpu.vector_store %arg34[%c32_100, %c0_101], %166 {strides = array<i32>} : memref<36x2048xf32, #tpu.memory_space<vmem>>, vector<4x2048xf32>,
    %c0_102 = arith.constant 0 : index
    %c0_103 = arith.constant 0 : index
    %168 = vector.load %arg10[%c0_102, %c0_103] : memref<4x36xf32, #tpu.memory_space<vmem>>, vector<4x36xf32>
    %c0_104 = arith.constant 0 : index
    %c0_105 = arith.constant 0 : index
    %169 = vector.load %arg34[%c0_104, %c0_105] : memref<36x2048xf32, #tpu.memory_space<vmem>>, vector<36x2048xf32>
    %cst_106 = arith.constant dense<0.000000e+00> : vector<4x2048xf32>
    %170 = tpu.matmul %168, %169, %cst_106 {dimension_numbers = #tpu.dot_dimension_numbers<[1], [0], [0], [1], [0, 0, 1, 1], [], []>} : vector<4x36xf32>, vector<36x2048xf32>, vector<4x2048xf32> -> vector<4x2048xf32>
    %c0_107 = arith.constant 0 : index
    %c0_108 = arith.constant 0 : index
    %171 = vector.load %arg13[%c0_107, %c0_108] : memref<1x2048xf32, #tpu.memory_space<vmem>>, vector<1x2048xf32>
    %cst_109 = arith.constant 5.000000e-01 : f32
    %172 = vector.broadcast %cst_109 : f32 to vector<1x2048xf32>
    %173 = arith.cmpf ogt, %171, %172 : vector<1x2048xf32>
    %cst_110 = arith.constant 0.000000e+00 : f32
    %174 = vector.shape_cast %173 : vector<1x2048xi1> to vector<1x2048xi1>
    %175 = vector.broadcast %174 : vector<1x2048xi1> to vector<4x2048xi1>
    %176 = vector.broadcast %cst_110 : f32 to vector<4x2048xf32>
    %177 = arith.select %175, %170, %176 : vector<4x2048xi1>, vector<4x2048xf32>
    %cst_111 = arith.constant dense<0.000000e+00> : vector<4xf32>
    %178 = vector.multi_reduction <add>, %177, %cst_111 [1] : vector<4x2048xf32> to vector<4xf32>
    %179 = vector.shape_cast %178 : vector<4xf32> to vector<4x1xf32>
    %cst_112 = arith.constant 7.396450e-04 : f32
    %180 = vector.broadcast %cst_112 : f32 to vector<4x1xf32>
    %181 = arith.mulf %179, %180 : vector<4x1xf32>
    %182 = vector.broadcast %181 : vector<4x1xf32> to vector<4x2048xf32>
    %183 = arith.subf %170, %182 : vector<4x2048xf32>
    %184 = arith.mulf %183, %183 : vector<4x2048xf32>
    %cst_113 = arith.constant 0.000000e+00 : f32
    %185 = vector.shape_cast %173 : vector<1x2048xi1> to vector<1x2048xi1>
    %186 = vector.broadcast %185 : vector<1x2048xi1> to vector<4x2048xi1>
    %187 = vector.broadcast %cst_113 : f32 to vector<4x2048xf32>
    %188 = arith.select %186, %184, %187 : vector<4x2048xi1>, vector<4x2048xf32>
    %cst_114 = arith.constant dense<0.000000e+00> : vector<4xf32>
    %189 = vector.multi_reduction <add>, %188, %cst_114 [1] : vector<4x2048xf32> to vector<4xf32>
    %190 = vector.shape_cast %189 : vector<4xf32> to vector<4x1xf32>
    %cst_115 = arith.constant 7.396450e-04 : f32
    %191 = vector.broadcast %cst_115 : f32 to vector<4x1xf32>
    %192 = arith.mulf %190, %191 : vector<4x1xf32>
    %c0_116 = arith.constant 0 : index
    %c0_117 = arith.constant 0 : index
    %193 = vector.load %arg11[%c0_116, %c0_117] : memref<4x1xf32, #tpu.memory_space<vmem>>, vector<4x1xf32>
    %cst_118 = arith.constant 9.99999974E-6 : f32
    %194 = vector.broadcast %cst_118 : f32 to vector<4x1xf32>
    %195 = arith.addf %192, %194 : vector<4x1xf32>
    %196 = math.rsqrt %195 : vector<4x1xf32>
    %197 = arith.mulf %193, %196 : vector<4x1xf32>
    %c0_119 = arith.constant 0 : index
    %c0_120 = arith.constant 0 : index
    %198 = vector.load %arg12[%c0_119, %c0_120] : memref<4x1xf32, #tpu.memory_space<vmem>>, vector<4x1xf32>
    %199 = arith.mulf %197, %181 : vector<4x1xf32>
    %200 = arith.subf %198, %199 : vector<4x1xf32>
    %201 = vector.broadcast %197 : vector<4x1xf32> to vector<4x2048xf32>
    %202 = arith.mulf %170, %201 : vector<4x2048xf32>
    %203 = vector.broadcast %200 : vector<4x1xf32> to vector<4x2048xf32>
    %204 = arith.addf %202, %203 : vector<4x2048xf32>
    %cst_121 = arith.constant 0.000000e+00 : f32
    %205 = vector.broadcast %cst_121 : f32 to vector<4x2048xf32>
    %206 = arith.cmpf ogt, %204, %205 : vector<4x2048xf32>
    %cst_122 = arith.constant 2.000000e-01 : f32
    %207 = vector.broadcast %cst_122 : f32 to vector<4x2048xf32>
    %208 = arith.mulf %207, %204 : vector<4x2048xf32>
    %209 = arith.select %206, %204, %208 : vector<4x2048xi1>, vector<4x2048xf32>
    %c0_123 = arith.constant 0 : index
    %c0_124 = arith.constant 0 : index
    %210 = vector.load %arg33[%c0_123, %c0_124] : memref<4x2176xf32, #tpu.memory_space<vmem>>, vector<4x2048xf32>
    tpu.vector_store %arg33[%c0_123, %c0_124], %209 {strides = array<i32>} : memref<4x2176xf32, #tpu.memory_space<vmem>>, vector<4x2048xf32>,
    %c0_125 = arith.constant 0 : index
    %c0_126 = arith.constant 0 : index
    %211 = vector.load %arg33[%c0_125, %c0_126] : memref<4x2176xf32, #tpu.memory_space<vmem>>, vector<4x2048xf32>
    %c0_127 = arith.constant 0 : index
    %c0_128 = arith.constant 0 : index
    %212 = vector.load %arg34[%c0_127, %c0_128] : memref<36x2048xf32, #tpu.memory_space<vmem>>, vector<4x2048xf32>
    tpu.vector_store %arg34[%c0_127, %c0_128], %211 {strides = array<i32>} : memref<36x2048xf32, #tpu.memory_space<vmem>>, vector<4x2048xf32>,
    %c0_129 = arith.constant 0 : index
    %c1_130 = arith.constant 1 : index
    %213 = vector.load %arg33[%c0_129, %c1_130] : memref<4x2176xf32, #tpu.memory_space<vmem>>, vector<4x2048xf32>
    %c4_131 = arith.constant 4 : index
    %c0_132 = arith.constant 0 : index
    %214 = vector.load %arg34[%c4_131, %c0_132] : memref<36x2048xf32, #tpu.memory_space<vmem>>, vector<4x2048xf32>
    tpu.vector_store %arg34[%c4_131, %c0_132], %213 {strides = array<i32>} : memref<36x2048xf32, #tpu.memory_space<vmem>>, vector<4x2048xf32>,
    %c0_133 = arith.constant 0 : index
    %c2_134 = arith.constant 2 : index
    %215 = vector.load %arg33[%c0_133, %c2_134] : memref<4x2176xf32, #tpu.memory_space<vmem>>, vector<4x2048xf32>
    %c8_135 = arith.constant 8 : index
    %c0_136 = arith.constant 0 : index
    %216 = vector.load %arg34[%c8_135, %c0_136] : memref<36x2048xf32, #tpu.memory_space<vmem>>, vector<4x2048xf32>
    tpu.vector_store %arg34[%c8_135, %c0_136], %215 {strides = array<i32>} : memref<36x2048xf32, #tpu.memory_space<vmem>>, vector<4x2048xf32>,
    %c0_137 = arith.constant 0 : index
    %c30_138 = arith.constant 30 : index
    %217 = vector.load %arg33[%c0_137, %c30_138] : memref<4x2176xf32, #tpu.memory_space<vmem>>, vector<4x2048xf32>
    %c12_139 = arith.constant 12 : index
    %c0_140 = arith.constant 0 : index
    %218 = vector.load %arg34[%c12_139, %c0_140] : memref<36x2048xf32, #tpu.memory_space<vmem>>, vector<4x2048xf32>
    tpu.vector_store %arg34[%c12_139, %c0_140], %217 {strides = array<i32>} : memref<36x2048xf32, #tpu.memory_space<vmem>>, vector<4x2048xf32>,
    %c0_141 = arith.constant 0 : index
    %c31_142 = arith.constant 31 : index
    %219 = vector.load %arg33[%c0_141, %c31_142] : memref<4x2176xf32, #tpu.memory_space<vmem>>, vector<4x2048xf32>
    %c16_143 = arith.constant 16 : index
    %c0_144 = arith.constant 0 : index
    %220 = vector.load %arg34[%c16_143, %c0_144] : memref<36x2048xf32, #tpu.memory_space<vmem>>, vector<4x2048xf32>
    tpu.vector_store %arg34[%c16_143, %c0_144], %219 {strides = array<i32>} : memref<36x2048xf32, #tpu.memory_space<vmem>>, vector<4x2048xf32>,
    %c0_145 = arith.constant 0 : index
    %c32_146 = arith.constant 32 : index
    %221 = vector.load %arg33[%c0_145, %c32_146] : memref<4x2176xf32, #tpu.memory_space<vmem>>, vector<4x2048xf32>
    %c20_147 = arith.constant 20 : index
    %c0_148 = arith.constant 0 : index
    %222 = vector.load %arg34[%c20_147, %c0_148] : memref<36x2048xf32, #tpu.memory_space<vmem>>, vector<4x2048xf32>
    tpu.vector_store %arg34[%c20_147, %c0_148], %221 {strides = array<i32>} : memref<36x2048xf32, #tpu.memory_space<vmem>>, vector<4x2048xf32>,
    %c0_149 = arith.constant 0 : index
    %c60_150 = arith.constant 60 : index
    %223 = vector.load %arg33[%c0_149, %c60_150] : memref<4x2176xf32, #tpu.memory_space<vmem>>, vector<4x2048xf32>
    %c24_151 = arith.constant 24 : index
    %c0_152 = arith.constant 0 : index
    %224 = vector.load %arg34[%c24_151, %c0_152] : memref<36x2048xf32, #tpu.memory_space<vmem>>, vector<4x2048xf32>
    tpu.vector_store %arg34[%c24_151, %c0_152], %223 {strides = array<i32>} : memref<36x2048xf32, #tpu.memory_space<vmem>>, vector<4x2048xf32>,
    %c0_153 = arith.constant 0 : index
    %c61_154 = arith.constant 61 : index
    %225 = vector.load %arg33[%c0_153, %c61_154] : memref<4x2176xf32, #tpu.memory_space<vmem>>, vector<4x2048xf32>
    %c28_155 = arith.constant 28 : index
    %c0_156 = arith.constant 0 : index
    %226 = vector.load %arg34[%c28_155, %c0_156] : memref<36x2048xf32, #tpu.memory_space<vmem>>, vector<4x2048xf32>
    tpu.vector_store %arg34[%c28_155, %c0_156], %225 {strides = array<i32>} : memref<36x2048xf32, #tpu.memory_space<vmem>>, vector<4x2048xf32>,
    %c0_157 = arith.constant 0 : index
    %c62_158 = arith.constant 62 : index
    %227 = vector.load %arg33[%c0_157, %c62_158] : memref<4x2176xf32, #tpu.memory_space<vmem>>, vector<4x2048xf32>
    %c32_159 = arith.constant 32 : index
    %c0_160 = arith.constant 0 : index
    %228 = vector.load %arg34[%c32_159, %c0_160] : memref<36x2048xf32, #tpu.memory_space<vmem>>, vector<4x2048xf32>
    tpu.vector_store %arg34[%c32_159, %c0_160], %227 {strides = array<i32>} : memref<36x2048xf32, #tpu.memory_space<vmem>>, vector<4x2048xf32>,
    %c0_161 = arith.constant 0 : index
    %c0_162 = arith.constant 0 : index
    %229 = vector.load %arg14[%c0_161, %c0_162] : memref<4x36xf32, #tpu.memory_space<vmem>>, vector<4x36xf32>
    %c0_163 = arith.constant 0 : index
    %c0_164 = arith.constant 0 : index
    %230 = vector.load %arg34[%c0_163, %c0_164] : memref<36x2048xf32, #tpu.memory_space<vmem>>, vector<36x2048xf32>
    %cst_165 = arith.constant dense<0.000000e+00> : vector<4x2048xf32>
    %231 = tpu.matmul %229, %230, %cst_165 {dimension_numbers = #tpu.dot_dimension_numbers<[1], [0], [0], [1], [0, 0, 1, 1], [], []>} : vector<4x36xf32>, vector<36x2048xf32>, vector<4x2048xf32> -> vector<4x2048xf32>
    %c0_166 = arith.constant 0 : index
    %c0_167 = arith.constant 0 : index
    %232 = vector.load %arg17[%c0_166, %c0_167] : memref<1x2048xf32, #tpu.memory_space<vmem>>, vector<1x2048xf32>
    %cst_168 = arith.constant 5.000000e-01 : f32
    %233 = vector.broadcast %cst_168 : f32 to vector<1x2048xf32>
    %234 = arith.cmpf ogt, %232, %233 : vector<1x2048xf32>
    %cst_169 = arith.constant 0.000000e+00 : f32
    %235 = vector.shape_cast %234 : vector<1x2048xi1> to vector<1x2048xi1>
    %236 = vector.broadcast %235 : vector<1x2048xi1> to vector<4x2048xi1>
    %237 = vector.broadcast %cst_169 : f32 to vector<4x2048xf32>
    %238 = arith.select %236, %231, %237 : vector<4x2048xi1>, vector<4x2048xf32>
    %cst_170 = arith.constant dense<0.000000e+00> : vector<4xf32>
    %239 = vector.multi_reduction <add>, %238, %cst_170 [1] : vector<4x2048xf32> to vector<4xf32>
    %240 = vector.shape_cast %239 : vector<4xf32> to vector<4x1xf32>
    %cst_171 = arith.constant 8.68055562E-4 : f32
    %241 = vector.broadcast %cst_171 : f32 to vector<4x1xf32>
    %242 = arith.mulf %240, %241 : vector<4x1xf32>
    %243 = vector.broadcast %242 : vector<4x1xf32> to vector<4x2048xf32>
    %244 = arith.subf %231, %243 : vector<4x2048xf32>
    %245 = arith.mulf %244, %244 : vector<4x2048xf32>
    %cst_172 = arith.constant 0.000000e+00 : f32
    %246 = vector.shape_cast %234 : vector<1x2048xi1> to vector<1x2048xi1>
    %247 = vector.broadcast %246 : vector<1x2048xi1> to vector<4x2048xi1>
    %248 = vector.broadcast %cst_172 : f32 to vector<4x2048xf32>
    %249 = arith.select %247, %245, %248 : vector<4x2048xi1>, vector<4x2048xf32>
    %cst_173 = arith.constant dense<0.000000e+00> : vector<4xf32>
    %250 = vector.multi_reduction <add>, %249, %cst_173 [1] : vector<4x2048xf32> to vector<4xf32>
    %251 = vector.shape_cast %250 : vector<4xf32> to vector<4x1xf32>
    %cst_174 = arith.constant 8.68055562E-4 : f32
    %252 = vector.broadcast %cst_174 : f32 to vector<4x1xf32>
    %253 = arith.mulf %251, %252 : vector<4x1xf32>
    %c0_175 = arith.constant 0 : index
    %c0_176 = arith.constant 0 : index
    %254 = vector.load %arg15[%c0_175, %c0_176] : memref<4x1xf32, #tpu.memory_space<vmem>>, vector<4x1xf32>
    %cst_177 = arith.constant 9.99999974E-6 : f32
    %255 = vector.broadcast %cst_177 : f32 to vector<4x1xf32>
    %256 = arith.addf %253, %255 : vector<4x1xf32>
    %257 = math.rsqrt %256 : vector<4x1xf32>
    %258 = arith.mulf %254, %257 : vector<4x1xf32>
    %c0_178 = arith.constant 0 : index
    %c0_179 = arith.constant 0 : index
    %259 = vector.load %arg16[%c0_178, %c0_179] : memref<4x1xf32, #tpu.memory_space<vmem>>, vector<4x1xf32>
    %260 = arith.mulf %258, %242 : vector<4x1xf32>
    %261 = arith.subf %259, %260 : vector<4x1xf32>
    %262 = vector.broadcast %258 : vector<4x1xf32> to vector<4x2048xf32>
    %263 = arith.mulf %231, %262 : vector<4x2048xf32>
    %264 = vector.broadcast %261 : vector<4x1xf32> to vector<4x2048xf32>
    %265 = arith.addf %263, %264 : vector<4x2048xf32>
    %cst_180 = arith.constant 0.000000e+00 : f32
    %266 = vector.broadcast %cst_180 : f32 to vector<4x2048xf32>
    %267 = arith.cmpf ogt, %265, %266 : vector<4x2048xf32>
    %cst_181 = arith.constant 2.000000e-01 : f32
    %268 = vector.broadcast %cst_181 : f32 to vector<4x2048xf32>
    %269 = arith.mulf %268, %265 : vector<4x2048xf32>
    %270 = arith.select %267, %265, %269 : vector<4x2048xi1>, vector<4x2048xf32>
    %c0_182 = arith.constant 0 : index
    %c0_183 = arith.constant 0 : index
    %271 = vector.load %arg32[%c0_182, %c0_183] : memref<4x2176xf32, #tpu.memory_space<vmem>>, vector<4x2048xf32>
    tpu.vector_store %arg32[%c0_182, %c0_183], %270 {strides = array<i32>} : memref<4x2176xf32, #tpu.memory_space<vmem>>, vector<4x2048xf32>,
    %c0_184 = arith.constant 0 : index
    %c0_185 = arith.constant 0 : index
    %272 = vector.load %arg32[%c0_184, %c0_185] : memref<4x2176xf32, #tpu.memory_space<vmem>>, vector<1x768xf32>
    %c0_186 = arith.constant 0 : index
    %c0_187 = arith.constant 0 : index
    %273 = vector.load %arg35[%c0_186, %c0_187] : memref<8x768xf32, #tpu.memory_space<vmem>>, vector<1x768xf32>
    tpu.vector_store %arg35[%c0_186, %c0_187], %272 {strides = array<i32>} : memref<8x768xf32, #tpu.memory_space<vmem>>, vector<1x768xf32>,
    %c0_188 = arith.constant 0 : index
    %c1024 = arith.constant 1024 : index
    %274 = vector.load %arg32[%c0_188, %c1024] : memref<4x2176xf32, #tpu.memory_space<vmem>>, vector<1x768xf32>
    %c1_189 = arith.constant 1 : index
    %c0_190 = arith.constant 0 : index
    %275 = vector.load %arg35[%c1_189, %c0_190] : memref<8x768xf32, #tpu.memory_space<vmem>>, vector<1x768xf32>
    tpu.vector_store %arg35[%c1_189, %c0_190], %274 {strides = array<i32>} : memref<8x768xf32, #tpu.memory_space<vmem>>, vector<1x768xf32>,
    %c1_191 = arith.constant 1 : index
    %c0_192 = arith.constant 0 : index
    %276 = vector.load %arg32[%c1_191, %c0_192] : memref<4x2176xf32, #tpu.memory_space<vmem>>, vector<1x768xf32>
    %c2_193 = arith.constant 2 : index
    %c0_194 = arith.constant 0 : index
    %277 = vector.load %arg35[%c2_193, %c0_194] : memref<8x768xf32, #tpu.memory_space<vmem>>, vector<1x768xf32>
    tpu.vector_store %arg35[%c2_193, %c0_194], %276 {strides = array<i32>} : memref<8x768xf32, #tpu.memory_space<vmem>>, vector<1x768xf32>,
    %c1_195 = arith.constant 1 : index
    %c1024_196 = arith.constant 1024 : index
    %278 = vector.load %arg32[%c1_195, %c1024_196] : memref<4x2176xf32, #tpu.memory_space<vmem>>, vector<1x768xf32>
    %c3 = arith.constant 3 : index
    %c0_197 = arith.constant 0 : index
    %279 = vector.load %arg35[%c3, %c0_197] : memref<8x768xf32, #tpu.memory_space<vmem>>, vector<1x768xf32>
    tpu.vector_store %arg35[%c3, %c0_197], %278 {strides = array<i32>} : memref<8x768xf32, #tpu.memory_space<vmem>>, vector<1x768xf32>,
    %c2_198 = arith.constant 2 : index
    %c0_199 = arith.constant 0 : index
    %280 = vector.load %arg32[%c2_198, %c0_199] : memref<4x2176xf32, #tpu.memory_space<vmem>>, vector<1x768xf32>
    %c4_200 = arith.constant 4 : index
    %c0_201 = arith.constant 0 : index
    %281 = vector.load %arg35[%c4_200, %c0_201] : memref<8x768xf32, #tpu.memory_space<vmem>>, vector<1x768xf32>
    tpu.vector_store %arg35[%c4_200, %c0_201], %280 {strides = array<i32>} : memref<8x768xf32, #tpu.memory_space<vmem>>, vector<1x768xf32>,
    %c2_202 = arith.constant 2 : index
    %c1024_203 = arith.constant 1024 : index
    %282 = vector.load %arg32[%c2_202, %c1024_203] : memref<4x2176xf32, #tpu.memory_space<vmem>>, vector<1x768xf32>
    %c5 = arith.constant 5 : index
    %c0_204 = arith.constant 0 : index
    %283 = vector.load %arg35[%c5, %c0_204] : memref<8x768xf32, #tpu.memory_space<vmem>>, vector<1x768xf32>
    tpu.vector_store %arg35[%c5, %c0_204], %282 {strides = array<i32>} : memref<8x768xf32, #tpu.memory_space<vmem>>, vector<1x768xf32>,
    %c3_205 = arith.constant 3 : index
    %c0_206 = arith.constant 0 : index
    %284 = vector.load %arg32[%c3_205, %c0_206] : memref<4x2176xf32, #tpu.memory_space<vmem>>, vector<1x768xf32>
    %c6 = arith.constant 6 : index
    %c0_207 = arith.constant 0 : index
    %285 = vector.load %arg35[%c6, %c0_207] : memref<8x768xf32, #tpu.memory_space<vmem>>, vector<1x768xf32>
    tpu.vector_store %arg35[%c6, %c0_207], %284 {strides = array<i32>} : memref<8x768xf32, #tpu.memory_space<vmem>>, vector<1x768xf32>,
    %c3_208 = arith.constant 3 : index
    %c1024_209 = arith.constant 1024 : index
    %286 = vector.load %arg32[%c3_208, %c1024_209] : memref<4x2176xf32, #tpu.memory_space<vmem>>, vector<1x768xf32>
    %c7 = arith.constant 7 : index
    %c0_210 = arith.constant 0 : index
    %287 = vector.load %arg35[%c7, %c0_210] : memref<8x768xf32, #tpu.memory_space<vmem>>, vector<1x768xf32>
    tpu.vector_store %arg35[%c7, %c0_210], %286 {strides = array<i32>} : memref<8x768xf32, #tpu.memory_space<vmem>>, vector<1x768xf32>,
    %c0_211 = arith.constant 0 : index
    %c0_212 = arith.constant 0 : index
    %288 = vector.load %arg17[%c0_211, %c0_212] : memref<1x2048xf32, #tpu.memory_space<vmem>>, vector<1x768xf32>
    %cst_213 = arith.constant 5.000000e-01 : f32
    %289 = vector.broadcast %cst_213 : f32 to vector<1x768xf32>
    %290 = arith.cmpf ogt, %288, %289 : vector<1x768xf32>
    %c0_214 = arith.constant 0 : index
    %c0_215 = arith.constant 0 : index
    %291 = vector.load %arg35[%c0_214, %c0_215] : memref<8x768xf32, #tpu.memory_space<vmem>>, vector<8x768xf32>
    %cst_216 = arith.constant 0.000000e+00 : f32
    %292 = vector.shape_cast %290 : vector<1x768xi1> to vector<1x768xi1>
    %293 = vector.broadcast %292 : vector<1x768xi1> to vector<8x768xi1>
    %294 = vector.broadcast %cst_216 : f32 to vector<8x768xf32>
    %295 = arith.select %293, %291, %294 : vector<8x768xi1>, vector<8x768xf32>
    %c0_217 = arith.constant 0 : index
    %c0_218 = arith.constant 0 : index
    %296 = vector.load %arg18[%c0_217, %c0_218] : memref<768x128xf32, #tpu.memory_space<vmem>>, vector<768x128xf32>
    %cst_219 = arith.constant dense<0.000000e+00> : vector<8x128xf32>
    %297 = tpu.matmul %295, %296, %cst_219 {dimension_numbers = #tpu.dot_dimension_numbers<[1], [0], [0], [1], [0, 0, 1, 1], [], []>} : vector<8x768xf32>, vector<768x128xf32>, vector<8x128xf32> -> vector<8x128xf32>
    %c0_220 = arith.constant 0 : index
    %c0_221 = arith.constant 0 : index
    %298 = vector.load %arg20[%c0_220, %c0_221] : memref<1x128xf32, #tpu.memory_space<vmem>>, vector<1x128xf32>
    %299 = vector.broadcast %298 : vector<1x128xf32> to vector<8x128xf32>
    %300 = arith.addf %297, %299 : vector<8x128xf32>
    %c0_222 = arith.constant 0 : index
    %c0_223 = arith.constant 0 : index
    %301 = vector.load %arg19[%c0_222, %c0_223] : memref<32x128xf32, #tpu.memory_space<vmem>>, vector<32x128xf32>
    %cst_224 = arith.constant 0.000000e+00 : f32
    %302 = vector.broadcast %cst_224 : f32 to vector<2x32xf32>
    %cst_225 = arith.constant 0.000000e+00 : f32
    %303 = vector.broadcast %cst_225 : f32 to vector<2x32xf32>
    %304 = vector.extract_strided_slice %300 {offsets = [0, 0], sizes = [2, 128], strides = [1, 1]} : vector<8x128xf32> to vector<2x128xf32>
    %cst_226 = arith.constant dense<0.000000e+00> : vector<2x128xf32>
    %305 = tpu.matmul %302, %301, %cst_226 {dimension_numbers = #tpu.dot_dimension_numbers<[1], [0], [0], [1], [0, 0, 1, 1], [], []>} : vector<2x32xf32>, vector<32x128xf32>, vector<2x128xf32> -> vector<2x128xf32>
    %306 = arith.addf %304, %305 : vector<2x128xf32>
    %307 = vector.extract_strided_slice %306 {offsets = [0, 0], sizes = [2, 96], strides = [1, 1]} : vector<2x128xf32> to vector<2x96xf32>
    %308 = arith.negf %307 : vector<2x96xf32>
    %309 = math.exp %308 : vector<2x96xf32>
    %cst_227 = arith.constant 1.000000e+00 : f32
    %310 = vector.broadcast %cst_227 : f32 to vector<2x96xf32>
    %311 = arith.addf %310, %309 : vector<2x96xf32>
    %312 = arith.divf %310, %311 : vector<2x96xf32>
    %313 = vector.extract_strided_slice %306 {offsets = [0, 96], sizes = [2, 32], strides = [1, 1]} : vector<2x128xf32> to vector<2x32xf32>
    %314 = math.tanh %313 : vector<2x32xf32>
    %315 = vector.extract_strided_slice %312 {offsets = [0, 0], sizes = [2, 32], strides = [1, 1]} : vector<2x96xf32> to vector<2x32xf32>
    %316 = vector.extract_strided_slice %312 {offsets = [0, 32], sizes = [2, 32], strides = [1, 1]} : vector<2x96xf32> to vector<2x32xf32>
    %317 = vector.extract_strided_slice %312 {offsets = [0, 64], sizes = [2, 32], strides = [1, 1]} : vector<2x96xf32> to vector<2x32xf32>
    %318 = arith.mulf %316, %303 : vector<2x32xf32>
    %319 = arith.mulf %315, %314 : vector<2x32xf32>
    %320 = arith.addf %318, %319 : vector<2x32xf32>
    %321 = math.tanh %320 : vector<2x32xf32>
    %322 = arith.mulf %317, %321 : vector<2x32xf32>
    %323 = vector.extract_strided_slice %300 {offsets = [2, 0], sizes = [2, 128], strides = [1, 1]} : vector<8x128xf32> to vector<2x128xf32>
    %cst_228 = arith.constant dense<0.000000e+00> : vector<2x128xf32>
    %324 = tpu.matmul %322, %301, %cst_228 {dimension_numbers = #tpu.dot_dimension_numbers<[1], [0], [0], [1], [0, 0, 1, 1], [], []>} : vector<2x32xf32>, vector<32x128xf32>, vector<2x128xf32> -> vector<2x128xf32>
    %325 = arith.addf %323, %324 : vector<2x128xf32>
    %326 = vector.extract_strided_slice %325 {offsets = [0, 0], sizes = [2, 96], strides = [1, 1]} : vector<2x128xf32> to vector<2x96xf32>
    %327 = arith.negf %326 : vector<2x96xf32>
    %328 = math.exp %327 : vector<2x96xf32>
    %cst_229 = arith.constant 1.000000e+00 : f32
    %329 = vector.broadcast %cst_229 : f32 to vector<2x96xf32>
    %330 = arith.addf %329, %328 : vector<2x96xf32>
    %331 = arith.divf %329, %330 : vector<2x96xf32>
    %332 = vector.extract_strided_slice %325 {offsets = [0, 96], sizes = [2, 32], strides = [1, 1]} : vector<2x128xf32> to vector<2x32xf32>
    %333 = math.tanh %332 : vector<2x32xf32>
    %334 = vector.extract_strided_slice %331 {offsets = [0, 0], sizes = [2, 32], strides = [1, 1]} : vector<2x96xf32> to vector<2x32xf32>
    %335 = vector.extract_strided_slice %331 {offsets = [0, 32], sizes = [2, 32], strides = [1, 1]} : vector<2x96xf32> to vector<2x32xf32>
    %336 = vector.extract_strided_slice %331 {offsets = [0, 64], sizes = [2, 32], strides = [1, 1]} : vector<2x96xf32> to vector<2x32xf32>
    %337 = arith.mulf %335, %320 : vector<2x32xf32>
    %338 = arith.mulf %334, %333 : vector<2x32xf32>
    %339 = arith.addf %337, %338 : vector<2x32xf32>
    %340 = math.tanh %339 : vector<2x32xf32>
    %341 = arith.mulf %336, %340 : vector<2x32xf32>
    %342 = vector.extract_strided_slice %300 {offsets = [4, 0], sizes = [2, 128], strides = [1, 1]} : vector<8x128xf32> to vector<2x128xf32>
    %cst_230 = arith.constant dense<0.000000e+00> : vector<2x128xf32>
    %343 = tpu.matmul %341, %301, %cst_230 {dimension_numbers = #tpu.dot_dimension_numbers<[1], [0], [0], [1], [0, 0, 1, 1], [], []>} : vector<2x32xf32>, vector<32x128xf32>, vector<2x128xf32> -> vector<2x128xf32>
    %344 = arith.addf %342, %343 : vector<2x128xf32>
    %345 = vector.extract_strided_slice %344 {offsets = [0, 0], sizes = [2, 96], strides = [1, 1]} : vector<2x128xf32> to vector<2x96xf32>
    %346 = arith.negf %345 : vector<2x96xf32>
    %347 = math.exp %346 : vector<2x96xf32>
    %cst_231 = arith.constant 1.000000e+00 : f32
    %348 = vector.broadcast %cst_231 : f32 to vector<2x96xf32>
    %349 = arith.addf %348, %347 : vector<2x96xf32>
    %350 = arith.divf %348, %349 : vector<2x96xf32>
    %351 = vector.extract_strided_slice %344 {offsets = [0, 96], sizes = [2, 32], strides = [1, 1]} : vector<2x128xf32> to vector<2x32xf32>
    %352 = math.tanh %351 : vector<2x32xf32>
    %353 = vector.extract_strided_slice %350 {offsets = [0, 0], sizes = [2, 32], strides = [1, 1]} : vector<2x96xf32> to vector<2x32xf32>
    %354 = vector.extract_strided_slice %350 {offsets = [0, 32], sizes = [2, 32], strides = [1, 1]} : vector<2x96xf32> to vector<2x32xf32>
    %355 = vector.extract_strided_slice %350 {offsets = [0, 64], sizes = [2, 32], strides = [1, 1]} : vector<2x96xf32> to vector<2x32xf32>
    %356 = arith.mulf %354, %339 : vector<2x32xf32>
    %357 = arith.mulf %353, %352 : vector<2x32xf32>
    %358 = arith.addf %356, %357 : vector<2x32xf32>
    %359 = math.tanh %358 : vector<2x32xf32>
    %360 = arith.mulf %355, %359 : vector<2x32xf32>
    %361 = vector.extract_strided_slice %300 {offsets = [6, 0], sizes = [2, 128], strides = [1, 1]} : vector<8x128xf32> to vector<2x128xf32>
    %cst_232 = arith.constant dense<0.000000e+00> : vector<2x128xf32>
    %362 = tpu.matmul %360, %301, %cst_232 {dimension_numbers = #tpu.dot_dimension_numbers<[1], [0], [0], [1], [0, 0, 1, 1], [], []>} : vector<2x32xf32>, vector<32x128xf32>, vector<2x128xf32> -> vector<2x128xf32>
    %363 = arith.addf %361, %362 : vector<2x128xf32>
    %364 = vector.extract_strided_slice %363 {offsets = [0, 0], sizes = [2, 96], strides = [1, 1]} : vector<2x128xf32> to vector<2x96xf32>
    %365 = arith.negf %364 : vector<2x96xf32>
    %366 = math.exp %365 : vector<2x96xf32>
    %cst_233 = arith.constant 1.000000e+00 : f32
    %367 = vector.broadcast %cst_233 : f32 to vector<2x96xf32>
    %368 = arith.addf %367, %366 : vector<2x96xf32>
    %369 = arith.divf %367, %368 : vector<2x96xf32>
    %370 = vector.extract_strided_slice %363 {offsets = [0, 96], sizes = [2, 32], strides = [1, 1]} : vector<2x128xf32> to vector<2x32xf32>
    %371 = math.tanh %370 : vector<2x32xf32>
    %372 = vector.extract_strided_slice %369 {offsets = [0, 0], sizes = [2, 32], strides = [1, 1]} : vector<2x96xf32> to vector<2x32xf32>
    %373 = vector.extract_strided_slice %369 {offsets = [0, 32], sizes = [2, 32], strides = [1, 1]} : vector<2x96xf32> to vector<2x32xf32>
    %374 = vector.extract_strided_slice %369 {offsets = [0, 64], sizes = [2, 32], strides = [1, 1]} : vector<2x96xf32> to vector<2x32xf32>
    %375 = arith.mulf %373, %358 : vector<2x32xf32>
    %376 = arith.mulf %372, %371 : vector<2x32xf32>
    %377 = arith.addf %375, %376 : vector<2x32xf32>
    %378 = math.tanh %377 : vector<2x32xf32>
    %379 = arith.mulf %374, %378 : vector<2x32xf32>
    %c0_234 = arith.constant 0 : index
    %c0_235 = arith.constant 0 : index
    %380 = vector.load %arg21[%c0_234, %c0_235] : memref<32x64xf32, #tpu.memory_space<vmem>>, vector<32x64xf32>
    %cst_236 = arith.constant dense<0.000000e+00> : vector<2x64xf32>
    %381 = tpu.matmul %88, %380, %cst_236 {dimension_numbers = #tpu.dot_dimension_numbers<[1], [0], [0], [1], [0, 0, 1, 1], [], []>} : vector<2x32xf32>, vector<32x64xf32>, vector<2x64xf32> -> vector<2x64xf32>
    %c0_237 = arith.constant 0 : index
    %c0_238 = arith.constant 0 : index
    %382 = vector.load %arg22[%c0_237, %c0_238] : memref<32x64xf32, #tpu.memory_space<vmem>>, vector<32x64xf32>
    %cst_239 = arith.constant dense<0.000000e+00> : vector<2x64xf32>
    %383 = tpu.matmul %379, %382, %cst_239 {dimension_numbers = #tpu.dot_dimension_numbers<[1], [0], [0], [1], [0, 0, 1, 1], [], []>} : vector<2x32xf32>, vector<32x64xf32>, vector<2x64xf32> -> vector<2x64xf32>
    %384 = arith.addf %381, %383 : vector<2x64xf32>
    %c0_240 = arith.constant 0 : index
    %c0_241 = arith.constant 0 : index
    %385 = vector.load %arg2[%c0_240, %c0_241] : memref<2x4xf32, #tpu.memory_space<vmem>>, vector<2x4xf32>
    %c0_242 = arith.constant 0 : index
    %c0_243 = arith.constant 0 : index
    %386 = vector.load %arg23[%c0_242, %c0_243] : memref<4x64xf32, #tpu.memory_space<vmem>>, vector<4x64xf32>
    %cst_244 = arith.constant dense<0.000000e+00> : vector<2x64xf32>
    %387 = tpu.matmul %385, %386, %cst_244 {dimension_numbers = #tpu.dot_dimension_numbers<[1], [0], [0], [1], [0, 0, 1, 1], [], []>} : vector<2x4xf32>, vector<4x64xf32>, vector<2x64xf32> -> vector<2x64xf32>
    %388 = arith.addf %384, %387 : vector<2x64xf32>
    %c0_245 = arith.constant 0 : index
    %c0_246 = arith.constant 0 : index
    %389 = vector.load %arg24[%c0_245, %c0_246] : memref<1x64xf32, #tpu.memory_space<vmem>>, vector<1x64xf32>
    %390 = vector.broadcast %389 : vector<1x64xf32> to vector<2x64xf32>
    %391 = arith.addf %388, %390 : vector<2x64xf32>
    %cst_247 = arith.constant 0.000000e+00 : f32
    %392 = vector.broadcast %cst_247 : f32 to vector<2x64xf32>
    %393 = arith.maximumf %391, %392 : vector<2x64xf32>
    %c0_248 = arith.constant 0 : index
    %c0_249 = arith.constant 0 : index
    %394 = vector.load %arg25[%c0_248, %c0_249] : memref<64x64xf32, #tpu.memory_space<vmem>>, vector<64x64xf32>
    %cst_250 = arith.constant dense<0.000000e+00> : vector<2x64xf32>
    %395 = tpu.matmul %393, %394, %cst_250 {dimension_numbers = #tpu.dot_dimension_numbers<[1], [0], [0], [1], [0, 0, 1, 1], [], []>} : vector<2x64xf32>, vector<64x64xf32>, vector<2x64xf32> -> vector<2x64xf32>
    %c0_251 = arith.constant 0 : index
    %c0_252 = arith.constant 0 : index
    %396 = vector.load %arg26[%c0_251, %c0_252] : memref<1x64xf32, #tpu.memory_space<vmem>>, vector<1x64xf32>
    %397 = vector.broadcast %396 : vector<1x64xf32> to vector<2x64xf32>
    %398 = arith.addf %395, %397 : vector<2x64xf32>
    %cst_253 = arith.constant 0.000000e+00 : f32
    %399 = vector.broadcast %cst_253 : f32 to vector<2x64xf32>
    %400 = arith.maximumf %398, %399 : vector<2x64xf32>
    %c0_254 = arith.constant 0 : index
    %c0_255 = arith.constant 0 : index
    %401 = vector.load %arg27[%c0_254, %c0_255] : memref<64x32xf32, #tpu.memory_space<vmem>>, vector<64x32xf32>
    %cst_256 = arith.constant dense<0.000000e+00> : vector<2x32xf32>
    %402 = tpu.matmul %400, %401, %cst_256 {dimension_numbers = #tpu.dot_dimension_numbers<[1], [0], [0], [1], [0, 0, 1, 1], [], []>} : vector<2x64xf32>, vector<64x32xf32>, vector<2x32xf32> -> vector<2x32xf32>
    %c0_257 = arith.constant 0 : index
    %c0_258 = arith.constant 0 : index
    %403 = vector.load %arg28[%c0_257, %c0_258] : memref<1x32xf32, #tpu.memory_space<vmem>>, vector<1x32xf32>
    %404 = vector.broadcast %403 : vector<1x32xf32> to vector<2x32xf32>
    %405 = arith.addf %402, %404 : vector<2x32xf32>
    %c0_259 = arith.constant 0 : index
    %c0_260 = arith.constant 0 : index
    %406 = vector.load %arg29[%c0_259, %c0_260] : memref<32x1xf32, #tpu.memory_space<vmem>>, vector<32x1xf32>
    %cst_261 = arith.constant dense<0.000000e+00> : vector<2x1xf32>
    %407 = tpu.matmul %405, %406, %cst_261 {dimension_numbers = #tpu.dot_dimension_numbers<[1], [0], [0], [1], [0, 0, 1, 1], [], []>} : vector<2x32xf32>, vector<32x1xf32>, vector<2x1xf32> -> vector<2x1xf32>
    %c0_262 = arith.constant 0 : index
    %c0_263 = arith.constant 0 : index
    %408 = vector.load %arg30[%c0_262, %c0_263] : memref<1x1xf32, #tpu.memory_space<vmem>>, vector<1x1xf32>
    %409 = vector.broadcast %408 : vector<1x1xf32> to vector<2x1xf32>
    %410 = arith.addf %407, %409 : vector<2x1xf32>
    %c0_264 = arith.constant 0 : index
    %c0_265 = arith.constant 0 : index
    %411 = vector.load %arg31[%c0_264, %c0_265] : memref<2x1xf32, #tpu.memory_space<vmem>>, vector<2x1xf32>
    tpu.vector_store %arg31[%c0_264, %c0_265], %410 {strides = array<i32>} : memref<2x1xf32, #tpu.memory_space<vmem>>, vector<2x1xf32>,
    return
  }
}

</mosaic_0001>

<bundles_post_ra>
// kernel: critic_forward.1
= control target key start
LH: loop header
LB: loop body
LE: loop exit
PB: predicated region body
PF: predicated region fallthrough
CT: control target
= control target key end

     0   :  { %s7151_s3 = smov 4   ;;  %v11287_v0 = vmov 0.0   ;;  %s7153_s7 = smov 3   ;;  %vm140_vm0 = vcmask 64512   ;;  %vm11291_vm5 = vcmask 261120   ;;  %vm11293_vm10 = vcmask 539648   ;;  %s11286_s0 = inlined_call_operand.smem [shape: u32[32], index: -1, kind: input, shape index: {}] }
   0x1   :  { %s6878_s6 = sld [smem:[%s11286_s0 + %s7151_s3]]   ;;  %132 = vst [vmem:[#allocation2 + $0x40] sm:$0xf] %v11287_v0  ;;  %s7154_s14 = smov 5   ;;  %vm11295_vm11 = vcmask 556032   ;;  %vm11296_vm12 = vcmask 785408   ;;  %vm11294_vm13 = vcmask 547840  }
   0x2   :  { %133 = vst [vmem:[#allocation3 + $0x40] sm:$0xf] %v11287_v0  ;;  %s6877_s10 = sld [smem:[%s11286_s0 + %s7153_s7]]   ;;  %s7155_s18 = smov 32   ;;  %vm11297_vm14 = vcmask 793600   ;;  %vm11306_vm15 = vcmask 1043456  }
   0x3   :  { %s1_s13 = sld [smem:[%s11286_s0]]   ;;  %s7156_s19 = smov 64  }
   0x4   :  { %s6879_s17 = sld [smem:[%s11286_s0 + %s7154_s14]]   ;;  %s7157_s20 = smov 1  }
   0x5   :  { %s7230_s23 = sld [smem:[%s11286_s0 + %s7157_s20]]   ;;  %s7158_s24 = smov 68  }
   0x6   :  { %s7159_s25 = smov 67   ;;  %s7160_s26 = smov 97  }
   0x7   :  { %v167_v1 = vld [vmem:[%s6878_s6 + $0x18] sm:$0xff]  ;;  %v166_v2 = vld [vmem:[%s6878_s6 + $0x10] sm:$0xff]  ;;  %v165_v3 = vld [vmem:[%s6878_s6 + $0x8] sm:$0xff]  ;;  %s7161_s27 = smov 66   ;;  %s7162_s28 = smov 96  }
   0x8   :  { %184 = vmatpush.msra.mxu3 %v167_v1  ;;  %247 = vmatpush.msra.mxu2 %v167_v1  ;;  %v164_v4 = vld [vmem:[%s6878_s6] sm:$0xff]  ;;  %s7163_s29 = smov 98   ;;  %s7164_s30 = smov 127  }
   0x9   :  { %v135_v5 = vld [vmem:[%s6877_s10] sm:$0xff]  ;;  %s7165_s1 = smov 126   ;;  %s7166_s2 = smov 6  }
   0xa   :  { %185 = vmatpush.msra.mxu3 %v166_v2  ;;  %248 = vmatpush.msra.mxu2 %v166_v2  ;;  %v134_v6 = vld [vmem:[%s1_s13] sm:$0xff]  ;;  %s6880_s5 = sld [smem:[%s11286_s0 + %s7166_s2]]   ;;  %s7168_s6 = smov 9  }
   0xb   :  { %159 = vmatpush.msra.mxu0 %v135_v5  ;;  %v7075_v7 = vld [vmem:[%s6879_s17] ss:$0 sm:$0xff]  ;;  %v7252_v55 = vld [vmem:[%s7230_s23 + $0x8] sm:$0xff]  ;;  %s6883_s9 = sld [smem:[%s11286_s0 + %s7168_s6]]   ;;  %s7169_s10 = smov 7  }
   0xc   :  { %186 = vmatpush.msra.mxu3 %v165_v3  ;;  %249 = vmatpush.msra.mxu2 %v165_v3  ;;  %v7233_v39 = vld [vmem:[%s7230_s23] sm:$0xff]  ;;  %457 = vst [vmem:[#allocation1 + $0x10] ss:$2 sm:$0xff] %v7252_v55  ;;  %v7259_v59 = vld [vmem:[%s7230_s23 + $0x28] sm:$0xff]  ;;  %s6881_s13 = sld [smem:[%s11286_s0 + %s7169_s10]]   ;;  %s7170_s14 = smov 8  }
   0xd   :  { %6906 = vmatmul.msk.f32.vlgmr.msra.gmra.mxu0 %vm140_vm0, %v134_v6  ;;  %455 = vst [vmem:[#allocation1] ss:$2 sm:$0xff] %v7233_v39  ;;  %v7237_v40 = vld [vmem:[%s7230_s23 + $0x20] sm:$0xff]  ;;  %vm11299_vm0 = vcmask 1031168   ;;  %s6882_s17 = sld [smem:[%s11286_s0 + %s7170_s14]]   ;;  %s7171_s20 = smov 10  }
   0xe   :  { %187 = vmatpush.msra.mxu3 %v164_v4  ;;  %250 = vmatpush.msra.mxu2 %v164_v4  ;;  %v522_v50 = vld [vmem:[%s7230_s23 + $0x40] sm:$0xf]  ;;  %s7172_s2 = smov 13   ;;  %s7173_s6 = smov 11  }
   0xf   :  { %188 = vmatmul.f32.vlgmr.msra.gmra.mxu3 %v11287_v0  ;;  %387 = vmatpush.msrb.mxu0 %v167_v1  ;;  %s7174_s10 = smov 12   ;;  %s7177_s14 = smov 18  }
  0x10   :  { %317 = vmatpush.msrb.mxu3 %v167_v1  ;;  %s7187_s4 = smov 26   ;;  %s7188_s8 = smov 25  }
  0x11   :  { %388 = vmatpush.msrb.mxu0 %v166_v2  ;;  %s11251_s7 = sld [smem:[%s11286_s0 + %s7187_s4]]   ;;  %s7189_s12 = smov 27  }
  0x12   :  { %318 = vmatpush.msrb.mxu3 %v166_v2  ;;  %s6899_s11 = sld [smem:[%s11286_s0 + %s7188_s8]]   ;;  %s7192_s15 = smov 30  }
  0x13   :  { %389 = vmatpush.msrb.mxu0 %v165_v3  ;;  %v464_v60 = vld.sshfl [vmem:[#allocation1 + $0x10] sm:$0xff pattern:$0x75316420]  ;;  %v465_v61 = vld.sshfl [vmem:[#allocation1 + $0x18] sm:$0xff pattern:$0x75316420] }
  0x14   :  { %319 = vmatpush.msrb.mxu3 %v165_v3  ;;  %v462_v41 = vld.sshfl [vmem:[#allocation1] sm:$0xff pattern:$0x75316420]  ;;  %v463_v42 = vld.sshfl [vmem:[#allocation1 + $0x8] sm:$0xff pattern:$0x75316420] }
  0x15   :  { %390 = vmatpush.msrb.mxu0 %v164_v4  ;;  %498 = vst [vmem:[#allocation4 + $0xc8] sm:$0xf] %v462_v41  ;;  %s7193_s21 = smov 31  }
  0x16   :  { %320 = vmatpush.msrb.mxu3 %v164_v4  ;;  %470 = vst [vmem:[#allocation1] ss:$2 sm:$0xff] %v7237_v40 }
  0x17   :  { %499 = vst [vmem:[#allocation4 + $0x8] sm:$0xf] %v463_v42  ;;  %v7334_v42 = vld [vmem:[%s7230_s23 + $0x10] sm:$0xff] }
  0x18   :  { %500 = vst [vmem:[#allocation4 + $0x40] sm:$0xf] %v464_v60 }
  0x19   :  { %471 = vst [vmem:[#allocation1 + $0x10] ss:$2 sm:$0xff] %v7259_v59 }
  0x1a   :  { %501 = vst [vmem:[#allocation4 + $0x28] sm:$0xf] %v465_v61 }
  0x1b   :  { %459 = vst [vmem:[#allocation1 + $0x20] ss:$2 sm:$0xff] %v7334_v42 }
  0x1d   :  { %v474_v44 = vld.sshfl [vmem:[#allocation1] sm:$0xff pattern:$0x75316420]  ;;  %v475_v45 = vld.sshfl [vmem:[#allocation1 + $0x8] sm:$0xff pattern:$0x75316420] }
  0x1e   :  { %533 = vst [vmem:[#allocation1 + $0x1] ss:$2 sm:$0xff] %v7233_v39 }
  0x1f   :  { %506 = vst [vmem:[#allocation4 + $0xd8] sm:$0xf] %v474_v44 }
  0x20   :  { %507 = vst [vmem:[#allocation4 + $0x148] sm:$0xf] %v475_v45 }
  0x25   :  { %v7241_v48 = vld.sshfl [vmem:[#allocation1] sm:$0xff pattern:$0x75316420]  ;;  %v7243_v49 = vld.sshfl [vmem:[#allocation1 + $0x8] sm:$0xff pattern:$0x75316420] }
  0x26   :  { %548 = vst [vmem:[#allocation1 + $0x1] ss:$2 sm:$0xff] %v7237_v40 }
  0x2d   :  { %v7247_v51 = vld.sshfl [vmem:[#allocation1] sm:$0xff pattern:$0x75316420]  ;;  %v7249_v52 = vld.sshfl [vmem:[#allocation1 + $0x8] sm:$0xff pattern:$0x75316420] }
  0x2e   :  { %11313 = vst [vmem:[#allocation8_spill] sm:$0xff] %v7247_v51 }
  0x2f   :  { %11314 = vst [vmem:[#allocation9_spill] sm:$0xff] %v7249_v52 }
  0x30   :  { %560 = vst [vmem:[#allocation1 + $0x1] ss:$2 sm:$0xff] %v522_v50  ;;  %v466_v50 = vld.sshfl [vmem:[#allocation1 + $0x20] sm:$0xff pattern:$0x75316420] }
  0x31   :  { %502 = vst [vmem:[#allocation4 + $0xe8] sm:$0xf] %v466_v50 }
  0x37   :  { %v7255_v56 = vld.sshfl [vmem:[#allocation1] sm:$0xff pattern:$0x75316420] }
  0x38   :  { %11315 = vst [vmem:[#allocation10_spill] sm:$0xff] %v7255_v56 }
  0x39   :  { %663 = vst [vmem:[#allocation1] ss:$2 sm:$0xff] %v7233_v39 }
  0x40   :  { %v7262_v63 = vld.sshfl [vmem:[#allocation1] sm:$0xff pattern:$0x75316420]  ;;  %v7264_v2 = vld.sshfl [vmem:[#allocation1 + $0x8] sm:$0xff pattern:$0x75316420] }
  0x41   :  { %678 = vst [vmem:[#allocation1] ss:$2 sm:$0xff] %v7237_v40 }
  0x8a   :  { %v161_v8 = vpop.f32.mrf.mxu0 }
  0x8b   :  { %v7214_v9 = vadd.f32 %v7075_v7, %v161_v8  ;;  %v476_v8 = vld.sshfl [vmem:[#allocation1 + $0x10] sm:$0xff pattern:$0x75316420] }
  0x8c   :  { %508 = vst [vmem:[#allocation4 + $0x158] sm:$0xf] %v476_v8 }
  0x8d   :  { %11312 = vst [vmem:[#allocation7_spill] sm:$0xff] %v7214_v9 }
  0x92   :  { %v189_v10 = vpop.f32.mrf.mxu3 }
  0x93   :  { %v192_v11 = vadd.f32 %v189_v10, %v7214_v9  ;;  %v477_v10 = vld.sshfl [vmem:[#allocation1 + $0x18] sm:$0xff pattern:$0x75316420] }
  0x94   :  { %535 = vst [vmem:[#allocation1 + $0x11] ss:$2 sm:$0xff] %v7252_v55 }
  0x95   :  { %7081 = vtanh.f32 %v192_v11  ;;  %v6907_v13 = vmul.f32 -1.442695, %v192_v11  ;;  %509 = vst [vmem:[#allocation4 + $0x108] sm:$0xf] %v477_v10 }
  0x97   :  { %7083 = vpow2.f32 %v6907_v13  ;;  %v7272_v13 = vld.sshfl [vmem:[#allocation1] sm:$0xff pattern:$0x75316420] }
  0x9b   :  { %v7082_v12 = vpop.eup %7081 }
  0x9c   :  { %215 = vrot.lane.b32.xlu0 %v7082_v12, %s7155_s18  ;;  %v653_v12 = vld [vmem:[%s7230_s23 + $0x40] sm:$0xf] }
  0x9d   :  { %v7084_v14 = vpop.eup %7083 }
  0x9e   :  { %v196_v15 = vadd.f32 1.0, %v7084_v14  ;;  %v7275_v14 = vld.sshfl [vmem:[#allocation1 + $0x8] sm:$0xff pattern:$0x75316420] }
  0x9f   :  { %11316 = vst [vmem:[#allocation11_spill] sm:$0xff] %v7275_v14 }
  0xa0   :  { %7085 = vrcp.f32 %v196_v15  ;;  %v208_v21 = vand.u32 2147483648, %v196_v15  ;;  %vm202_vm2 = vweird.f32 %v196_v15  ;;  %v206_v22 = vand.u32 2147483647, %v196_v15  ;;  %690 = vst [vmem:[#allocation1] ss:$2 sm:$0xff] %v653_v12 }
  0xa2   :  { %v209_v24 = vor.u32 1.1754944e-38, %v208_v21  ;;  %vm207_vm4 = vcmp.eq.f32.partialorder %v206_v22, 8.507059e+37 }
  0xa6   :  { %v7086_v16 = vpop.eup %7085 }
  0xa7   :  { %v198_v17 = vmul.f32 %v7086_v16, %v196_v15  ;;  %vm203_vm1 = vweird.f32 %v7086_v16  ;;  %v7277_v15 = vld.sshfl [vmem:[#allocation1 + $0x10] sm:$0xff pattern:$0x75316420] }
  0xa8   :  { %vm204_vm3 = vmor %vm202_vm2, %vm203_vm1  ;;  %vm11300_vm1 = vcmask 1039360   ;;  %vm11298_vm2 = vcmask 801792  }
  0xa9   :  { %v199_v18 = vsub.f32 1.0, %v198_v17  ;;  %v7282_v17 = vld.sshfl [vmem:[#allocation1] sm:$0xff pattern:$0x75316420] }
  0xaa   :  { %11317 = vst [vmem:[#allocation12_spill] sm:$0xff] %v7282_v17  ;;  %v1175_v17 = vld [vmem:[%s7230_s23 + $0x40] sm:$0xf] }
  0xab   :  { %v200_v19 = vmul.f32 %v7086_v16, %v199_v18  ;;  %794 = vst [vmem:[#allocation1 + $0x1] ss:$2 sm:$0xff] %v7233_v39 }
  0xad   :  { %v201_v20 = vadd.f32 %v7086_v16, %v200_v19 }
  0xaf   :  { %v205_v23 = vsel %vm204_vm3, %v7086_v16, %v201_v20  ;;  %v7279_v16 = vld.sshfl [vmem:[#allocation1 + $0x18] sm:$0xff pattern:$0x75316420]  ;;  %vm11292_vm3 = vcmask 293888  }
  0xb0   :  { %v210_v26 = vsel %vm207_vm4, %v209_v24, %v205_v23  ;;  %549 = vst [vmem:[#allocation1 + $0x11] ss:$2 sm:$0xff] %v7259_v59  ;;  %v783_v24 = vld [vmem:[%s7230_s23 + $0x40] sm:$0xf] }
  0xb1   :  { %v213_v28 = vmul.f32 0.0, %v210_v26 }
  0xb2   :  { %v7290_v20 = vld.sshfl [vmem:[#allocation1] sm:$0xff pattern:$0x75316420]  ;;  %v7292_v21 = vld.sshfl [vmem:[#allocation1 + $0x8] sm:$0xff pattern:$0x75316420] }
  0xb3   :  { %809 = vst [vmem:[#allocation1 + $0x1] ss:$2 sm:$0xff] %v7237_v40 }
  0xb7   :  { %v7285_v18 = vld.sshfl [vmem:[#allocation1 + $0x10] sm:$0xff pattern:$0x75316420]  ;;  %v7287_v19 = vld.sshfl [vmem:[#allocation1 + $0x18] sm:$0xff pattern:$0x75316420] }
  0xb8   :  { %11318 = vst [vmem:[#allocation13_spill] sm:$0xff] %v7285_v18 }
  0xb9   :  { %11319 = vst [vmem:[#allocation14_spill] sm:$0xff] %v7287_v19 }
  0xba   :  { %665 = vst [vmem:[#allocation1 + $0x10] ss:$2 sm:$0xff] %v7252_v55 }
  0xc1   :  { %v7295_v22 = vld.sshfl [vmem:[#allocation1 + $0x10] sm:$0xff pattern:$0x75316420]  ;;  %v7297_v23 = vld.sshfl [vmem:[#allocation1 + $0x18] sm:$0xff pattern:$0x75316420] }
  0xc2   :  { %679 = vst [vmem:[#allocation1 + $0x10] ss:$2 sm:$0xff] %v7259_v59 }
 0x10e   :  { %v216_v25 = vpop.permute.xlu0 %215 }
 0x10f   :  { %v218_v27 = vmul.f32 %v216_v25, %v210_v26  ;;  %v7301_v25 = vld.sshfl [vmem:[#allocation1] sm:$0xff pattern:$0x75316420] }
 0x110   :  { %11320 = vst [vmem:[#allocation15_spill] sm:$0xff] %v7301_v25 }
 0x111   :  { %220 = vrot.lane.b32.xlu0 %v218_v27, %s7155_s18  ;;  %v7305_v27 = vld.sshfl [vmem:[#allocation1 + $0x10] sm:$0xff pattern:$0x75316420] }
 0x183   :  { %v221_v29 = vpop.permute.xlu0 %220 }
 0x184   :  { %v7219_v30 = vadd.f32 %v221_v29, %v213_v28  ;;  %v7307_v28 = vld.sshfl [vmem:[#allocation1 + $0x18] sm:$0xff pattern:$0x75316420] }
 0x185   :  { %11321 = vst [vmem:[#allocation16_spill] sm:$0xff] %v7307_v28 }
 0x186   :  { %7087 = vtanh.f32 %v7219_v30  ;;  %796 = vst [vmem:[#allocation1 + $0x11] ss:$2 sm:$0xff] %v7252_v55  ;;  %v280_v50 = vrot.slane %v7219_v30, 6 }
 0x18c   :  { %v7088_v31 = vpop.eup %7087 }
 0x18d   :  { %226 = vrot.lane.b32.xlu1 %v7088_v31, %s7155_s18  ;;  %v7313_v31 = vld.sshfl [vmem:[#allocation1 + $0x10] sm:$0xff pattern:$0x75316420] }
 0x1ff   :  { %v227_v32 = vpop.permute.xlu1 %226 }
 0x200   :  { %v229_v33 = vmul.f32 %v227_v32, %v210_v26  ;;  %v7303_v26 = vld.sshfl [vmem:[#allocation1 + $0x8] sm:$0xff pattern:$0x75316420]  ;;  %v7315_v32 = vld.sshfl [vmem:[#allocation1 + $0x18] sm:$0xff pattern:$0x75316420] }
 0x201   :  { %821 = vst [vmem:[#allocation1 + $0x1] ss:$2 sm:$0xff] %v783_v24 }
 0x202   :  { %231 = vrot.lane.b32.xlu1 %v229_v33, %s7156_s19  ;;  %810 = vst [vmem:[#allocation1 + $0x11] ss:$2 sm:$0xff] %v7259_v59 }
 0x208   :  { %v7310_v29 = vld.sshfl [vmem:[#allocation1] sm:$0xff pattern:$0x75316420] }
 0x209   :  { %11322 = vst [vmem:[#allocation17_spill] sm:$0xff] %v7310_v29 }
 0x20a   :  { %924 = vst [vmem:[#allocation1] ss:$2 sm:$0xff] %v7233_v39 }
 0x211   :  { %v7318_v33 = vld.sshfl [vmem:[#allocation1] sm:$0xff pattern:$0x75316420] }
 0x274   :  { %v232_v34 = vpop.permute.xlu1 %231 }
 0x275   :  { %6908 = vmatmul.msk.f32.vlgmr.msra.gmra.mxu2 %vm11291_vm5, %v232_v34  ;;  %v7320_v34 = vld.sshfl [vmem:[#allocation1 + $0x8] sm:$0xff pattern:$0x75316420] }
 0x276   :  { %939 = vst [vmem:[#allocation1] ss:$2 sm:$0xff] %v7237_v40 }
 0x27d   :  { %v7331_v41 = vld.sshfl [vmem:[#allocation1 + $0x8] sm:$0xff pattern:$0x75316420] }
 0x2f8   :  { %v252_v35 = vpop.f32.mrf.mxu2 }
 0x2f9   :  { %v256_v36 = vrot.slane %v252_v35, 6  ;;  %v7323_v35 = vld.sshfl [vmem:[#allocation1 + $0x10] sm:$0xff pattern:$0x75316420] }
 0x2fa   :  { %11323 = vst [vmem:[#allocation18_spill] sm:$0xff] %v7323_v35  ;;  %v1305_v35 = vld [vmem:[%s7230_s23 + $0x40] sm:$0xf] }
 0x2fb   :  { %v258_v37 = vadd.f32 %v256_v36, %v7214_v9  ;;  %v7325_v36 = vld.sshfl [vmem:[#allocation1 + $0x18] sm:$0xff pattern:$0x75316420] }
 0x2fc   :  { %11324 = vst [vmem:[#allocation19_spill] sm:$0xff] %v7325_v36 }
 0x2fd   :  { %7089 = vtanh.f32 %v258_v37  ;;  %v6909_v43 = vmul.f32 -1.442695, %v258_v37  ;;  %926 = vst [vmem:[#allocation1 + $0x10] ss:$2 sm:$0xff] %v7252_v55  ;;  %v914_v37 = vld [vmem:[%s7230_s23 + $0x40] sm:$0xf] }
 0x2ff   :  { %7091 = vpow2.f32 %v6909_v43 }
 0x303   :  { %v7090_v38 = vpop.eup %7089 }
 0x304   :  { %284 = vrot.lane.b32.xlu2 %v7090_v38, %s7155_s18  ;;  %v7329_v38 = vld.sshfl [vmem:[#allocation1] sm:$0xff pattern:$0x75316420]  ;;  %v7336_v43 = vld.sshfl [vmem:[#allocation1 + $0x10] sm:$0xff pattern:$0x75316420] }
 0x305   :  { %v7092_v46 = vpop.eup %7091  ;;  %951 = vst [vmem:[#allocation1] ss:$2 sm:$0xff] %v914_v37  ;;  %v7338_v44 = vld.sshfl [vmem:[#allocation1 + $0x18] sm:$0xff pattern:$0x75316420] }
 0x306   :  { %v262_v47 = vadd.f32 1.0, %v7092_v46  ;;  %940 = vst [vmem:[#allocation1 + $0x10] ss:$2 sm:$0xff] %v7259_v59 }
 0x308   :  { %7093 = vrcp.f32 %v262_v47  ;;  %v274_v1 = vand.u32 2147483648, %v262_v47  ;;  %vm268_vm7 = vweird.f32 %v262_v47  ;;  %v272_v3 = vand.u32 2147483647, %v262_v47 }
 0x30a   :  { %v275_v5 = vor.u32 1.1754944e-38, %v274_v1  ;;  %vm273_vm9 = vcmp.eq.f32.partialorder %v272_v3, 8.507059e+37 }
 0x30c   :  { %v7342_v45 = vld.sshfl [vmem:[#allocation1] sm:$0xff pattern:$0x75316420] }
 0x30d   :  { %11325 = vst [vmem:[#allocation20_spill] sm:$0xff] %v7342_v45  ;;  %v7345_v46 = vld.sshfl [vmem:[#allocation1 + $0x10] sm:$0xff pattern:$0x75316420] }
 0x30e   :  { %v7094_v53 = vpop.eup %7093  ;;  %1055 = vst [vmem:[#allocation1 + $0x1] ss:$2 sm:$0xff] %v7233_v39 }
 0x30f   :  { %v264_v54 = vmul.f32 %v7094_v53, %v262_v47  ;;  %vm269_vm6 = vweird.f32 %v7094_v53  ;;  %v7347_v47 = vld.sshfl [vmem:[#allocation1 + $0x18] sm:$0xff pattern:$0x75316420] }
 0x310   :  { %vm270_vm8 = vmor %vm268_vm7, %vm269_vm6  ;;  %11326 = vst [vmem:[#allocation21_spill] sm:$0xff] %v7347_v47 }
 0x311   :  { %v265_v57 = vsub.f32 1.0, %v264_v54  ;;  %1057 = vst [vmem:[#allocation1 + $0x11] ss:$2 sm:$0xff] %v7252_v55  ;;  %v467_v54 = vld.sshfl [vmem:[#allocation1 + $0x28] sm:$0xff pattern:$0x75316420] }
 0x312   :  { %503 = vst [vmem:[#allocation4 + $0xf0] sm:$0xf] %v467_v54 }
 0x313   :  { %v266_v58 = vmul.f32 %v7094_v53, %v265_v57 }
 0x315   :  { %v267_v62 = vadd.f32 %v7094_v53, %v266_v58  ;;  %v7353_v57 = vld.sshfl [vmem:[#allocation1] sm:$0xff pattern:$0x75316420]  ;;  %v7355_v58 = vld.sshfl [vmem:[#allocation1 + $0x8] sm:$0xff pattern:$0x75316420] }
 0x316   :  { %1070 = vst [vmem:[#allocation1 + $0x1] ss:$2 sm:$0xff] %v7237_v40 }
 0x317   :  { %v271_v4 = vsel %vm270_vm8, %v7094_v53, %v267_v62  ;;  %v7351_v53 = vld [vmem:[%s7230_s23 + $0x30] sm:$0xff]  ;;  %v1044_v62 = vld [vmem:[%s7230_s23 + $0x40] sm:$0xf] }
 0x318   :  { %v7267_v7 = vsel %vm273_vm9, %v275_v5, %v271_v4  ;;  %472 = vst [vmem:[#allocation1 + $0x20] ss:$2 sm:$0xff] %v7351_v53  ;;  %v7359_v60 = vld.sshfl [vmem:[#allocation1 + $0x10] sm:$0xff pattern:$0x75316420] }
 0x319   :  { %v7361_v61 = vld.sshfl [vmem:[#allocation1 + $0x18] sm:$0xff pattern:$0x75316420] }
 0x31a   :  { %1071 = vst [vmem:[#allocation1 + $0x11] ss:$2 sm:$0xff] %v7259_v59 }
 0x31d   :  { %v7365_v1 = vld.sshfl [vmem:[#allocation1] sm:$0xff pattern:$0x75316420]  ;;  %v7367_v3 = vld.sshfl [vmem:[#allocation1 + $0x8] sm:$0xff pattern:$0x75316420] }
 0x31e   :  { %11327 = vst [vmem:[#allocation22_spill] sm:$0xff] %v7365_v1 }
 0x31f   :  { %1082 = vst [vmem:[#allocation1 + $0x1] ss:$2 sm:$0xff] %v1044_v62  ;;  %v478_v4 = vld.sshfl [vmem:[#allocation1 + $0x20] sm:$0xff pattern:$0x75316420] }
 0x320   :  { %v479_v5 = vld.sshfl [vmem:[#allocation1 + $0x28] sm:$0xff pattern:$0x75316420]  ;;  %510 = vst [vmem:[#allocation4 + $0x220] sm:$0xf] %v478_v4  ;;  %v282_v4 = vmul.f32 %v280_v50, %v7267_v7 }
 0x321   :  { %537 = vst [vmem:[#allocation1 + $0x21] ss:$2 sm:$0xff] %v7334_v42  ;;  %v7372_v8 = vld.sshfl [vmem:[#allocation1 + $0x18] sm:$0xff pattern:$0x75316420] }
 0x322   :  { %511 = vst [vmem:[#allocation4 + $0xc0] sm:$0xf] %v479_v5 }
 0x326   :  { %v7375_v10 = vld.sshfl [vmem:[#allocation1] sm:$0xff pattern:$0x75316420] }
 0x327   :  { %11328 = vst [vmem:[#allocation23_spill] sm:$0xff] %v7375_v10 }
 0x328   :  { %1185 = vst [vmem:[#allocation1] ss:$2 sm:$0xff] %v7233_v39  ;;  %v7380_v12 = vld.sshfl [vmem:[#allocation1 + $0x28] sm:$0xff pattern:$0x75316420] }
 0x32f   :  { %v7387_v54 = vld.sshfl [vmem:[#allocation1] sm:$0xff pattern:$0x75316420]  ;;  %v1193_v62 = vld.sshfl [vmem:[#allocation1 + $0x8] sm:$0xff pattern:$0x75316420] }
 0x330   :  { %1200 = vst [vmem:[#allocation1] ss:$2 sm:$0xff] %v7237_v40  ;;  %1216 = vrot.lane.b32.xlu1 %v1193_v62, %s7158_s24 }
 0x337   :  { %v7406_v62 = vld.sshfl [vmem:[#allocation1] sm:$0xff pattern:$0x75316420]  ;;  %v7408_v56 = vld.sshfl [vmem:[#allocation1 + $0x8] sm:$0xff pattern:$0x75316420] }
 0x338   :  { %1212 = vst [vmem:[#allocation1] ss:$2 sm:$0xff] %v1175_v17 }
 0x33f   :  { %v7424_v17 = vld.sshfl [vmem:[#allocation1] sm:$0xff pattern:$0x75316420] }
 0x340   :  { %11332 = vst [vmem:[#allocation27_spill] sm:$0xff] %v7424_v17 }
 0x341   :  { %1316 = vst [vmem:[#allocation1 + $0x1] ss:$2 sm:$0xff] %v7233_v39 }
 0x348   :  { %v1324_v17 = vld.sshfl [vmem:[#allocation1 + $0x8] sm:$0xff pattern:$0x75316420] }
 0x35e   :  { %v285_v6 = vpop.permute.xlu2 %284 }
 0x35f   :  { %v287_v11 = vmul.f32 %v285_v6, %v7267_v7  ;;  %v7370_v6 = vld.sshfl [vmem:[#allocation1 + $0x10] sm:$0xff pattern:$0x75316420] }
 0x360   :  { %1187 = vst [vmem:[#allocation1 + $0x10] ss:$2 sm:$0xff] %v7252_v55 }
 0x361   :  { %289 = vrot.lane.b32.xlu2 %v287_v11, %s7155_s18  ;;  %v7378_v11 = vld.sshfl [vmem:[#allocation1 + $0x20] sm:$0xff pattern:$0x75316420] }
 0x362   :  { %550 = vst [vmem:[#allocation1 + $0x21] ss:$2 sm:$0xff] %v7351_v53 }
 0x367   :  { %v7383_v24 = vld.sshfl [vmem:[#allocation1 + $0x10] sm:$0xff pattern:$0x75316420]  ;;  %v1195_v37 = vld.sshfl [vmem:[#allocation1 + $0x18] sm:$0xff pattern:$0x75316420] }
 0x368   :  { %1201 = vst [vmem:[#allocation1 + $0x10] ss:$2 sm:$0xff] %v7259_v59 }
 0x369   :  { %v7392_v0 = vld.sshfl [vmem:[#allocation1 + $0x20] sm:$0xff pattern:$0x75316420]  ;;  %v7394_v29 = vld.sshfl [vmem:[#allocation1 + $0x28] sm:$0xff pattern:$0x75316420] }
 0x36a   :  { %11329 = vst [vmem:[#allocation24_spill] sm:$0xff] %v7392_v0 }
 0x36b   :  { %11330 = vst [vmem:[#allocation25_spill] sm:$0xff] %v7394_v29 }
 0x36c   :  { %667 = vst [vmem:[#allocation1 + $0x20] ss:$2 sm:$0xff] %v7334_v42 }
 0x36f   :  { %v7400_v30 = vld.sshfl [vmem:[#allocation1 + $0x10] sm:$0xff pattern:$0x75316420]  ;;  %v7402_v50 = vld.sshfl [vmem:[#allocation1 + $0x18] sm:$0xff pattern:$0x75316420] }
 0x370   :  { %1318 = vst [vmem:[#allocation1 + $0x11] ss:$2 sm:$0xff] %v7252_v55 }
 0x373   :  { %v7410_v10 = vld.sshfl [vmem:[#allocation1 + $0x20] sm:$0xff pattern:$0x75316420] }
 0x377   :  { %v1325_v0 = vld.sshfl [vmem:[#allocation1 + $0x10] sm:$0xff pattern:$0x75316420]  ;;  %v7420_v29 = vld.sshfl [vmem:[#allocation1 + $0x18] sm:$0xff pattern:$0x75316420] }
 0x378   :  { %1332 = vst [vmem:[#allocation1 + $0x11] ss:$2 sm:$0xff] %v7259_v59  ;;  %1349 = vrot.lane.b32.xlu1 %v1325_v0, %s7159_s25 }
 0x37f   :  { %v7436_v59 = vld.sshfl [vmem:[#allocation1 + $0x10] sm:$0xff pattern:$0x75316420]  ;;  %v7438_v0 = vld.sshfl [vmem:[#allocation1 + $0x18] sm:$0xff pattern:$0x75316420] }
 0x380   :  { %1448 = vst [vmem:[#allocation1 + $0x10] ss:$2 sm:$0xff] %v7252_v55  ;;  %957 = vrot.lane.b32.xlu1 %v7336_v43, %s7160_s26 }
 0x387   :  { %v1455_v55 = vld.sshfl [vmem:[#allocation1 + $0x10] sm:$0xff pattern:$0x75316420] }
 0x388   :  { %1220 = vrot.lane.b32.xlu1 %v1195_v37, %s7158_s24 }
 0x3bb   :  { %v290_v5 = vpop.permute.xlu2 %289 }
 0x3bc   :  { %v7396_v45 = vadd.f32 %v290_v5, %v282_v4  ;;  %v7412_v4 = vld.sshfl [vmem:[#allocation1 + $0x28] sm:$0xff pattern:$0x75316420] }
 0x3bd   :  { %680 = vst [vmem:[#allocation1 + $0x20] ss:$2 sm:$0xff] %v7351_v53 }
 0x3be   :  { %11331 = vst [vmem:[#allocation26_spill] sm:$0xff] %v7396_v45  ;;  %7095 = vtanh.f32 %v7396_v45  ;;  %v7416_v45 = vld [vmem:[%s7230_s23 + $0x18] sm:$0xff] }
 0x3bf   :  { %461 = vst [vmem:[#allocation1 + $0x30] ss:$2 sm:$0xff] %v7416_v45 }
 0x3c4   :  { %v7096_v5 = vpop.eup %7095  ;;  %v7427_v19 = vld.sshfl [vmem:[#allocation1 + $0x20] sm:$0xff pattern:$0x75316420]  ;;  %v7429_v51 = vld.sshfl [vmem:[#allocation1 + $0x28] sm:$0xff pattern:$0x75316420] }
 0x3c5   :  { %295 = vrot.lane.b32.xlu0 %v7096_v5, %s7155_s18  ;;  %11333 = vst [vmem:[#allocation28_spill] sm:$0xff] %v7427_v19  ;;  %v7433_v5 = vld [vmem:[%s7230_s23 + $0x38] sm:$0xff] }
 0x3c6   :  { %11334 = vst [vmem:[#allocation29_spill] sm:$0xff] %v7429_v51  ;;  %v468_v36 = vld.sshfl [vmem:[#allocation1 + $0x30] sm:$0xff pattern:$0x75316420] }
 0x3c7   :  { %798 = vst [vmem:[#allocation1 + $0x21] ss:$2 sm:$0xff] %v7334_v42  ;;  %v469_v25 = vld.sshfl [vmem:[#allocation1 + $0x38] sm:$0xff pattern:$0x75316420] }
 0x3c8   :  { %504 = vst [vmem:[#allocation4 + $0x70] sm:$0xf] %v468_v36  ;;  %v7443_v51 = vld.sshfl [vmem:[#allocation1] sm:$0xff pattern:$0x75316420] }
 0x3c9   :  { %473 = vst [vmem:[#allocation1 + $0x30] ss:$2 sm:$0xff] %v7433_v5 }
 0x3ca   :  { %1331 = vst [vmem:[#allocation1 + $0x1] ss:$2 sm:$0xff] %v7237_v40 }
 0x3cb   :  { %505 = vst [vmem:[#allocation4 + $0x120] sm:$0xf] %v469_v25 }
 0x3cd   :  { %1479 = vrot.lane.b32.xlu0 %v1455_v55, %s7161_s27 }
 0x3ce   :  { %v7446_v19 = vld.sshfl [vmem:[#allocation1 + $0x20] sm:$0xff pattern:$0x75316420]  ;;  %v7448_v36 = vld.sshfl [vmem:[#allocation1 + $0x28] sm:$0xff pattern:$0x75316420] }
 0x3cf   :  { %811 = vst [vmem:[#allocation1 + $0x21] ss:$2 sm:$0xff] %v7351_v53 }
 0x3d0   :  { %v480_v18 = vld.sshfl [vmem:[#allocation1 + $0x30] sm:$0xff pattern:$0x75316420]  ;;  %v481_v1 = vld.sshfl [vmem:[#allocation1 + $0x38] sm:$0xff pattern:$0x75316420] }
 0x3d1   :  { %539 = vst [vmem:[#allocation1 + $0x31] ss:$2 sm:$0xff] %v7416_v45  ;;  %v7455_v43 = vld.sshfl [vmem:[#allocation1] sm:$0xff pattern:$0x75316420] }
 0x3d2   :  { %v7457_v9 = vld.sshfl [vmem:[#allocation1 + $0x8] sm:$0xff pattern:$0x75316420]  ;;  %512 = vst [vmem:[#allocation4 + $0x140] sm:$0xf] %v480_v18 }
 0x3d3   :  { %1343 = vst [vmem:[#allocation1 + $0x1] ss:$2 sm:$0xff] %v1305_v35 }
 0x3d4   :  { %513 = vst [vmem:[#allocation4 + $0x200] sm:$0xf] %v481_v1 }
 0x3d5   :  { %1347 = vrot.lane.b32.xlu0 %v1324_v17, %s7159_s25 }
 0x3d6   :  { %v7459_v28 = vld.sshfl [vmem:[#allocation1 + $0x20] sm:$0xff pattern:$0x75316420]  ;;  %v7461_v52 = vld.sshfl [vmem:[#allocation1 + $0x28] sm:$0xff pattern:$0x75316420] }
 0x3d7   :  { %11335 = vst [vmem:[#allocation30_spill] sm:$0xff] %v7459_v28 }
 0x3d8   :  { %11336 = vst [vmem:[#allocation31_spill] sm:$0xff] %v7461_v52  ;;  %v7464_v47 = vld.sshfl [vmem:[#allocation1 + $0x30] sm:$0xff pattern:$0x75316420] }
 0x3d9   :  { %928 = vst [vmem:[#allocation1 + $0x20] ss:$2 sm:$0xff] %v7334_v42  ;;  %v7466_v14 = vld.sshfl [vmem:[#allocation1 + $0x38] sm:$0xff pattern:$0x75316420] }
 0x3da   :  { %551 = vst [vmem:[#allocation1 + $0x31] ss:$2 sm:$0xff] %v7433_v5  ;;  %v7470_v25 = vld.sshfl [vmem:[#allocation1] sm:$0xff pattern:$0x75316420] }
 0x3db   :  { %11337 = vst [vmem:[#allocation32_spill] sm:$0xff] %v7470_v25  ;;  %v1456_v52 = vld.sshfl [vmem:[#allocation1 + $0x18] sm:$0xff pattern:$0x75316420] }
 0x3dc   :  { %1446 = vst [vmem:[#allocation1] ss:$2 sm:$0xff] %v7233_v39 }
 0x3dd   :  { %955 = vrot.lane.b32.xlu0 %v7320_v34, %s7160_s26 }
 0x3e0   :  { %v7473_v35 = vld.sshfl [vmem:[#allocation1 + $0x20] sm:$0xff pattern:$0x75316420]  ;;  %v7475_v37 = vld.sshfl [vmem:[#allocation1 + $0x28] sm:$0xff pattern:$0x75316420] }
 0x3e1   :  { %941 = vst [vmem:[#allocation1 + $0x20] ss:$2 sm:$0xff] %v7351_v53  ;;  %v7478_v55 = vld.sshfl [vmem:[#allocation1 + $0x30] sm:$0xff pattern:$0x75316420] }
 0x3e2   :  { %11338 = vst [vmem:[#allocation33_spill] sm:$0xff] %v7478_v55  ;;  %v7480_v28 = vld.sshfl [vmem:[#allocation1 + $0x38] sm:$0xff pattern:$0x75316420] }
 0x3e3   :  { %11339 = vst [vmem:[#allocation34_spill] sm:$0xff] %v7480_v28  ;;  %v1454_v18 = vld.sshfl [vmem:[#allocation1 + $0x8] sm:$0xff pattern:$0x75316420] }
 0x3e4   :  { %669 = vst [vmem:[#allocation1 + $0x30] ss:$2 sm:$0xff] %v7416_v45  ;;  %v1453_v1 = vld.sshfl [vmem:[#allocation1] sm:$0xff pattern:$0x75316420]  ;;  %1477 = vrot.lane.b32.xlu2 %v1454_v18, %s7161_s27 }
 0x3e5   :  { %1461 = vst [vmem:[#allocation1] ss:$2 sm:$0xff] %v7237_v40  ;;  %1088 = vrot.lane.b32.xlu0 %v7359_v60, %s7162_s28 }
 0x3e8   :  { %v7487_v39 = vld.sshfl [vmem:[#allocation1 + $0x20] sm:$0xff pattern:$0x75316420]  ;;  %v7489_v17 = vld.sshfl [vmem:[#allocation1 + $0x28] sm:$0xff pattern:$0x75316420] }
 0x3e9   :  { %11340 = vst [vmem:[#allocation35_spill] sm:$0xff] %v7487_v39 }
 0x3ea   :  { %11341 = vst [vmem:[#allocation36_spill] sm:$0xff] %v7489_v17 }
 0x3eb   :  { %1059 = vst [vmem:[#allocation1 + $0x21] ss:$2 sm:$0xff] %v7334_v42  ;;  %v7492_v25 = vld.sshfl [vmem:[#allocation1 + $0x30] sm:$0xff pattern:$0x75316420] }
 0x3ec   :  { %v7494_v28 = vld.sshfl [vmem:[#allocation1 + $0x38] sm:$0xff pattern:$0x75316420]  ;;  %1218 = vrot.lane.b32.xlu2 %v7383_v24, %s7158_s24 }
 0x3ed   :  { %681 = vst [vmem:[#allocation1 + $0x30] ss:$2 sm:$0xff] %v7433_v5  ;;  %1475 = vrot.lane.b32.xlu0 %v1453_v1, %s7161_s27 }
 0x3f2   :  { %v7501_v40 = vld.sshfl [vmem:[#allocation1 + $0x20] sm:$0xff pattern:$0x75316420]  ;;  %v7503_v34 = vld.sshfl [vmem:[#allocation1 + $0x28] sm:$0xff pattern:$0x75316420] }
 0x3f3   :  { %1072 = vst [vmem:[#allocation1 + $0x21] ss:$2 sm:$0xff] %v7351_v53 }
 0x3f4   :  { %v7506_v18 = vld.sshfl [vmem:[#allocation1 + $0x30] sm:$0xff pattern:$0x75316420]  ;;  %v7508_v55 = vld.sshfl [vmem:[#allocation1 + $0x38] sm:$0xff pattern:$0x75316420]  ;;  %1481 = vrot.lane.b32.xlu2 %v1456_v52, %s7161_s27 }
 0x3f5   :  { %11342 = vst [vmem:[#allocation37_spill] sm:$0xff] %v7506_v18  ;;  %825 = vrot.lane.b32.xlu0 %v7292_v21, %s7163_s29 }
 0x3f6   :  { %11343 = vst [vmem:[#allocation38_spill] sm:$0xff] %v7508_v55 }
 0x3f7   :  { %800 = vst [vmem:[#allocation1 + $0x31] ss:$2 sm:$0xff] %v7416_v45 }
 0x3fa   :  { %v7513_v60 = vld.sshfl [vmem:[#allocation1 + $0x20] sm:$0xff pattern:$0x75316420]  ;;  %v7515_v24 = vld.sshfl [vmem:[#allocation1 + $0x28] sm:$0xff pattern:$0x75316420] }
 0x3fb   :  { %11344 = vst [vmem:[#allocation39_spill] sm:$0xff] %v7513_v60 }
 0x3fc   :  { %11345 = vst [vmem:[#allocation40_spill] sm:$0xff] %v7515_v24  ;;  %1086 = vrot.lane.b32.xlu2 %v7355_v58, %s7162_s28 }
 0x3fd   :  { %1189 = vst [vmem:[#allocation1 + $0x20] ss:$2 sm:$0xff] %v7334_v42  ;;  %1090 = vrot.lane.b32.xlu0 %v7361_v61, %s7162_s28 }
 0x3fe   :  { %v7518_v39 = vld.sshfl [vmem:[#allocation1 + $0x30] sm:$0xff pattern:$0x75316420]  ;;  %v7520_v17 = vld.sshfl [vmem:[#allocation1 + $0x38] sm:$0xff pattern:$0x75316420] }
 0x3ff   :  { %812 = vst [vmem:[#allocation1 + $0x31] ss:$2 sm:$0xff] %v7433_v5 }
 0x404   :  { %v7527_v52 = vld.sshfl [vmem:[#allocation1 + $0x20] sm:$0xff pattern:$0x75316420]  ;;  %v1197_v1 = vld.sshfl [vmem:[#allocation1 + $0x28] sm:$0xff pattern:$0x75316420]  ;;  %1351 = vrot.lane.b32.xlu2 %v7420_v29, %s7159_s25 }
 0x405   :  { %1202 = vst [vmem:[#allocation1 + $0x20] ss:$2 sm:$0xff] %v7351_v53  ;;  %564 = vrot.lane.b32.xlu0 %v7243_v49, %s7164_s30 }
 0x406   :  { %v7530_v60 = vld.sshfl [vmem:[#allocation1 + $0x30] sm:$0xff pattern:$0x75316420]  ;;  %v7532_v55 = vld.sshfl [vmem:[#allocation1 + $0x38] sm:$0xff pattern:$0x75316420] }
 0x407   :  { %11346 = vst [vmem:[#allocation41_spill] sm:$0xff] %v7530_v60 }
 0x408   :  { %11347 = vst [vmem:[#allocation42_spill] sm:$0xff] %v7532_v55 }
 0x409   :  { %930 = vst [vmem:[#allocation1 + $0x30] ss:$2 sm:$0xff] %v7416_v45 }
 0x40c   :  { %v7539_v21 = vld.sshfl [vmem:[#allocation1 + $0x20] sm:$0xff pattern:$0x75316420]  ;;  %v7541_v58 = vld.sshfl [vmem:[#allocation1 + $0x28] sm:$0xff pattern:$0x75316420]  ;;  %696 = vrot.lane.b32.xlu2 %v7295_v22, %s7165_s1 }
 0x40d   :  { %11348 = vst [vmem:[#allocation43_spill] sm:$0xff] %v7539_v21  ;;  %829 = vrot.lane.b32.xlu0 %v7315_v32, %s7163_s29 }
 0x40e   :  { %1320 = vst [vmem:[#allocation1 + $0x21] ss:$2 sm:$0xff] %v7334_v42 }
 0x410   :  { %v7544_v24 = vld.sshfl [vmem:[#allocation1 + $0x30] sm:$0xff pattern:$0x75316420]  ;;  %v7546_v18 = vld.sshfl [vmem:[#allocation1 + $0x38] sm:$0xff pattern:$0x75316420] }
 0x411   :  { %942 = vst [vmem:[#allocation1 + $0x30] ss:$2 sm:$0xff] %v7433_v5 }
 0x414   :  { %959 = vrot.lane.b32.xlu2 %v7338_v44, %s7160_s26 }
 0x415   :  { %v1327_v29 = vld.sshfl [vmem:[#allocation1 + $0x20] sm:$0xff pattern:$0x75316420]  ;;  %v7553_v61 = vld.sshfl [vmem:[#allocation1 + $0x28] sm:$0xff pattern:$0x75316420] }
 0x416   :  { %1333 = vst [vmem:[#allocation1 + $0x21] ss:$2 sm:$0xff] %v7351_v53 }
 0x418   :  { %v7556_v60 = vld.sshfl [vmem:[#allocation1 + $0x30] sm:$0xff pattern:$0x75316420]  ;;  %v7558_v55 = vld.sshfl [vmem:[#allocation1 + $0x38] sm:$0xff pattern:$0x75316420] }
 0x419   :  { %11349 = vst [vmem:[#allocation44_spill] sm:$0xff] %v7556_v60 }
 0x41a   :  { %11350 = vst [vmem:[#allocation45_spill] sm:$0xff] %v7558_v55 }
 0x41b   :  { %1061 = vst [vmem:[#allocation1 + $0x31] ss:$2 sm:$0xff] %v7416_v45 }
 0x41c   :  { %1345 = vrot.lane.b32.xlu2 %v7443_v51, %s7159_s25 }
 0x41d   :  { %v7565_v49 = vld.sshfl [vmem:[#allocation1 + $0x20] sm:$0xff pattern:$0x75316420]  ;;  %v7567_v22 = vld.sshfl [vmem:[#allocation1 + $0x28] sm:$0xff pattern:$0x75316420] }
 0x41e   :  { %11351 = vst [vmem:[#allocation46_spill] sm:$0xff] %v7567_v22 }
 0x41f   :  { %1450 = vst [vmem:[#allocation1 + $0x20] ss:$2 sm:$0xff] %v7334_v42 }
 0x422   :  { %v1068_v21 = vld.sshfl [vmem:[#allocation1 + $0x30] sm:$0xff pattern:$0x75316420]  ;;  %v7570_v53 = vld.sshfl [vmem:[#allocation1 + $0x38] sm:$0xff pattern:$0x75316420] }
 0x423   :  { %1073 = vst [vmem:[#allocation1 + $0x31] ss:$2 sm:$0xff] %v7433_v5 }
 0x424   :  { %698 = vrot.lane.b32.xlu2 %v7297_v23, %s7165_s1 }
 0x426   :  { %v1458_v55 = vld.sshfl [vmem:[#allocation1 + $0x28] sm:$0xff pattern:$0x75316420]  ;;  %v1457_v60 = vld.sshfl [vmem:[#allocation1 + $0x20] sm:$0xff pattern:$0x75316420] }
 0x427   :  { %1485 = vrot.lane.b32.xlu0 %v1458_v55, %s7161_s27 }
 0x42a   :  { %v7576_v32 = vld.sshfl [vmem:[#allocation1 + $0x30] sm:$0xff pattern:$0x75316420]  ;;  %v7578_v44 = vld.sshfl [vmem:[#allocation1 + $0x38] sm:$0xff pattern:$0x75316420] }
 0x42b   :  { %11352 = vst [vmem:[#allocation47_spill] sm:$0xff] %v7578_v44 }
 0x42c   :  { %1191 = vst [vmem:[#allocation1 + $0x30] ss:$2 sm:$0xff] %v7416_v45  ;;  %1084 = vrot.lane.b32.xlu2 %v7353_v57, %s7162_s28 }
 0x42f   :  { %692 = vrot.lane.b32.xlu0 %v7262_v63, %s7165_s1 }
 0x433   :  { %v1198_v42 = vld.sshfl [vmem:[#allocation1 + $0x30] sm:$0xff pattern:$0x75316420]  ;;  %v1199_v22 = vld.sshfl [vmem:[#allocation1 + $0x38] sm:$0xff pattern:$0x75316420] }
 0x434   :  { %1203 = vst [vmem:[#allocation1 + $0x30] ss:$2 sm:$0xff] %v7433_v5  ;;  %568 = vrot.lane.b32.xlu2 %v7279_v16, %s7164_s30 }
 0x437   :  { %1226 = vrot.lane.b32.xlu0 %v1198_v42, %s7158_s24  ;;  %v296_v44 = vpop.permute.xlu0 %295 }
 0x438   :  { %v298_v23 = vmul.f32 %v296_v44, %v7267_v7 }
 0x43a   :  { %v300_v63 = vrot.slane %v298_v23, 2 }
 0x43b   :  { %v7589_v51 = vld.sshfl [vmem:[#allocation1 + $0x30] sm:$0xff pattern:$0x75316420]  ;;  %v7591_v55 = vld.sshfl [vmem:[#allocation1 + $0x38] sm:$0xff pattern:$0x75316420] }
 0x43c   :  { %1322 = vst [vmem:[#allocation1 + $0x31] ss:$2 sm:$0xff] %v7416_v45  ;;  %301 = vrot.lane.b32.xlu1 %v300_v63, %s7156_s19  ;;  %1224 = vrot.lane.b32.xlu2 %v1197_v1, %s7158_s24 }
 0x43e   :  { %v1478_v7 = vpop.permute.xlu2 %1477 }
 0x43f   :  { %1483 = vrot.lane.b32.xlu0 %v1457_v60, %s7161_s27  ;;  %v1480_v60 = vpop.permute.xlu0 %1479 }
 0x443   :  { %v1329_v57 = vld.sshfl [vmem:[#allocation1 + $0x30] sm:$0xff pattern:$0x75316420]  ;;  %v7599_v42 = vld.sshfl [vmem:[#allocation1 + $0x38] sm:$0xff pattern:$0x75316420] }
 0x444   :  { %1334 = vst [vmem:[#allocation1 + $0x31] ss:$2 sm:$0xff] %v7433_v5  ;;  %694 = vrot.lane.b32.xlu1 %v7264_v2, %s7165_s1  ;;  %1357 = vrot.lane.b32.xlu2 %v1329_v57, %s7159_s25  ;;  %v1511_v5 = vsel %vm11293_vm10, %v1478_v7, %v1480_v60 }
 0x445   :  { %1543 = vst [vmem:[#allocation4 + $0x60] sm:$0xf] %v1511_v5 }
 0x446   :  { %v1219_v2 = vpop.permute.xlu2 %1218 }
 0x447   :  { %963 = vrot.lane.b32.xlu0 %v7475_v37, %s7160_s26  ;;  %v7619_v37 = vpop.permute.xlu0 %1347 }
 0x44b   :  { %v7607_v44 = vld.sshfl [vmem:[#allocation1 + $0x30] sm:$0xff pattern:$0x75316420]  ;;  %v7609_v16 = vld.sshfl [vmem:[#allocation1 + $0x38] sm:$0xff pattern:$0x75316420] }
 0x44c   :  { %1452 = vst [vmem:[#allocation1 + $0x30] ss:$2 sm:$0xff] %v7416_v45  ;;  %827 = vrot.lane.b32.xlu1 %v7313_v31, %s7163_s29  ;;  %562 = vrot.lane.b32.xlu2 %v7241_v48, %s7164_s30 }
 0x44e   :  { %v7624_v45 = vpop.permute.xlu2 %1481 }
 0x44f   :  { %1096 = vrot.lane.b32.xlu0 %v1068_v21, %s7162_s28  ;;  %v1512_v1 = vsel %vm11293_vm10, %v1480_v60, %v7624_v45  ;;  %v7630_v31 = vpop.permute.xlu0 %955 }
 0x450   :  { %1544 = vst [vmem:[#allocation4 + $0x138] sm:$0xf] %v1512_v1 }
 0x453   :  { %v1459_v63 = vld.sshfl [vmem:[#allocation1 + $0x30] sm:$0xff pattern:$0x75316420] }
 0x454   :  { %1214 = vrot.lane.b32.xlu1 %v7387_v54, %s7158_s24  ;;  %1094 = vrot.lane.b32.xlu2 %v7503_v34, %s7162_s28  ;;  %v7638_v54 = vpop.permute.xlu1 %1216 }
 0x455   :  { %v1250_v21 = vsel %vm11295_vm11, %v7638_v54, %v1219_v2 }
 0x456   :  { %v7636_v48 = vpop.permute.xlu2 %1086  ;;  %1282 = vst [vmem:[#allocation4 + $0x1f0] sm:$0xf] %v1250_v21 }
 0x457   :  { %1353 = vrot.lane.b32.xlu0 %v1327_v29, %s7159_s25  ;;  %v1089_v34 = vpop.permute.xlu0 %1088 }
 0x458   :  { %v1120_v29 = vsel %vm11296_vm12, %v7636_v48, %v1089_v34 }
 0x459   :  { %1152 = vst [vmem:[#allocation4 + $0x98] sm:$0xf0] %v1120_v29 }
 0x45c   :  { %566 = vrot.lane.b32.xlu1 %v7277_v15, %s7164_s30  ;;  %1228 = vrot.lane.b32.xlu2 %v1199_v22, %s7158_s24 }
 0x45e   :  { %v7649_v15 = vpop.permute.xlu2 %1351 }
 0x45f   :  { %704 = vrot.lane.b32.xlu0 %v7492_v25, %s7165_s1  ;;  %v1350_v25 = vpop.permute.xlu1 %1349 }
 0x460   :  { %v1381_v23 = vsel %vm11294_vm13, %v7619_v37, %v1350_v25  ;;  %v1382_v22 = vsel %vm11294_vm13, %v1350_v25, %v7649_v15 }
 0x461   :  { %1413 = vst [vmem:[#allocation4 + $0x1f0] sm:$0xf0] %v1381_v23 }
 0x462   :  { %1414 = vst [vmem:[#allocation4 + $0xa0] sm:$0xf0] %v1382_v22  ;;  %v1460_v22 = vld.sshfl [vmem:[#allocation1 + $0x38] sm:$0xff pattern:$0x75316420] }
 0x464   :  { %953 = vrot.lane.b32.xlu1 %v7318_v33, %s7160_s26  ;;  %702 = vrot.lane.b32.xlu2 %v7412_v4, %s7165_s1  ;;  %v1476_v33 = vpop.permute.xlu0 %1475 }
 0x466   :  { %v7661_v57 = vpop.permute.xlu2 %696 }
 0x467   :  { %961 = vrot.lane.b32.xlu0 %v7473_v35, %s7160_s26  ;;  %v1510_v35 = vsel %vm11293_vm10, %v1476_v33, %v1478_v7  ;;  %v958_v60 = vpop.permute.xlu1 %957  ;;  %v1624_v7 = vld [vmem:[#allocation4 + $0x60] sm:$0xf] }
 0x468   :  { %1542 = vst [vmem:[#allocation4 + $0xa8] sm:$0xf] %v1510_v35  ;;  %v989_v5 = vsel %vm11297_vm14, %v7630_v31, %v958_v60  ;;  %v1608_v21 = vld [vmem:[#allocation4 + $0x1f0] sm:$0xff]  ;;  %6916 = vmatpush.msk.msrb.mxu2 %vm11306_vm15, %v1624_v7 }
 0x469   :  { %1021 = vst [vmem:[#allocation4 + $0x98] sm:$0xf] %v989_v5 }
 0x46a   :  { %1724 = vmatpush.msrb.mxu2 %v1608_v21 }
 0x46c   :  { %1487 = vrot.lane.b32.xlu1 %v1459_v63, %s7161_s27  ;;  %835 = vrot.lane.b32.xlu2 %v7518_v39, %s7163_s29  ;;  %v7667_v4 = vpop.permute.xlu0 %825 }
 0x46f   :  { %1098 = vrot.lane.b32.xlu0 %v7570_v53, %s7162_s28  ;;  %v7673_v53 = vpop.permute.xlu2 %959  ;;  %v7675_v1 = vpop.permute.xlu1 %1220 }
 0x470   :  { %v990_v29 = vsel %vm11297_vm14, %v958_v60, %v7673_v53  ;;  %v1251_v39 = vsel %vm11295_vm11, %v1219_v2, %v7675_v1  ;;  %v1625_v2 = vld [vmem:[#allocation4 + $0x138] sm:$0xf] }
 0x471   :  { %1022 = vst [vmem:[#allocation4 + $0xe0] sm:$0xf] %v990_v29  ;;  %6918 = vmatpush.msk.msra.mxu3 %vm11306_vm15, %v1625_v2 }
 0x472   :  { %1283 = vst [vmem:[#allocation4 + $0xa0] sm:$0xf] %v1251_v39 }
 0x474   :  { %823 = vrot.lane.b32.xlu1 %v7290_v20, %s7163_s29  ;;  %1092 = vrot.lane.b32.xlu2 %v7501_v40, %s7162_s28  ;;  %v7684_v20 = vpop.permute.xlu0 %1090 }
 0x477   :  { %700 = vrot.lane.b32.xlu0 %v7410_v10, %s7165_s1  ;;  %v1121_v10 = vsel %vm11296_vm12, %v1089_v34, %v7684_v20  ;;  %v1346_v25 = vpop.permute.xlu2 %1345 }
 0x478   :  { %1153 = vst [vmem:[#allocation4 + $0xe0] sm:$0xf0] %v1121_v10  ;;  %v1380_v23 = vsel %vm11294_vm13, %v1346_v25, %v7619_v37  ;;  %v1592_v37 = vld [vmem:[#allocation4 + $0x98] sm:$0xff]  ;;  %v1465_v10 = vld.sshfl [vmem:[#allocation1] sm:$0xff pattern:$0x75316420] }
 0x479   :  { %1412 = vst [vmem:[#allocation4 + $0x78] sm:$0xf0] %v1380_v23  ;;  %v1609_v40 = vld [vmem:[#allocation4 + $0xa0] sm:$0xff]  ;;  %1725 = vmatpush.msrb.mxu2 %v1592_v37 }
 0x47a   :  { %1744 = vmatpush.msra.mxu3 %v1609_v40 }
 0x47c   :  { %1355 = vrot.lane.b32.xlu1 %v7553_v61, %s7159_s25  ;;  %574 = vrot.lane.b32.xlu2 %v7464_v47, %s7164_s30  ;;  %v7697_v61 = vpop.permute.xlu0 %564 }
 0x47f   :  { %837 = vrot.lane.b32.xlu0 %v7520_v17, %s7163_s29  ;;  %v7702_v17 = vpop.permute.xlu2 %698  ;;  %v1593_v34 = vld [vmem:[#allocation4 + $0xe0] sm:$0xff] }
 0x480   :  { %v729_v63 = vsel %vm11299_vm0, %v7661_v57, %v7702_v17  ;;  %1745 = vmatpush.msra.mxu3 %v1593_v34 }
 0x481   :  { %761 = vst [vmem:[#allocation4 + $0x10] sm:$0xf] %v729_v63 }
 0x484   :  { %1489 = vrot.lane.b32.xlu1 %v1460_v22, %s7161_s27  ;;  %831 = vrot.lane.b32.xlu2 %v7446_v19, %s7163_s29  ;;  %v7711_v33 = vpop.permute.xlu0 %829 }
 0x487   :  { %570 = vrot.lane.b32.xlu0 %v7378_v11, %s7164_s30  ;;  %v1085_v47 = vpop.permute.xlu2 %1084 }
 0x488   :  { %v1119_v11 = vsel %vm11296_vm12, %v1085_v47, %v7636_v48 }
 0x489   :  { %1151 = vst [vmem:[#allocation4 + $0xf8] sm:$0xf0] %v1119_v11 }
 0x48c   :  { %965 = vrot.lane.b32.xlu1 %v7544_v24, %s7160_s26 }
 0x48f   :  { %1234 = vrot.lane.b32.xlu0 %v7400_v30, %s7158_s24  ;;  %v7719_v35 = vpop.permute.xlu2 %568 }
 0x494   :  { %1222 = vrot.lane.b32.xlu1 %v7527_v52, %s7158_s24  ;;  %v1623_v52 = vld [vmem:[#allocation4 + $0xa8] sm:$0xf] }
 0x495   :  { %6914 = vmatpush.msk.msra.mxu1 %vm11306_vm15, %v1623_v52 }
 0x497   :  { %v7725_v19 = vpop.permute.xlu2 %1224  ;;  %1491 = vrot.lane.b32.xlu0 %v1465_v10, %s7161_s27 }
 0x499   :  { %v7721_v60 = vpop.permute.xlu0 %1485 }
 0x49c   :  { %1359 = vrot.lane.b32.xlu1 %v7599_v42, %s7159_s25 }
 0x49f   :  { %v7729_v30 = vpop.permute.xlu2 %1357  ;;  %971 = vrot.lane.b32.xlu0 %v7331_v41, %s7160_s26 }
 0x4a1   :  { %v693_v24 = vpop.permute.xlu0 %692 }
 0x4a4   :  { %833 = vrot.lane.b32.xlu1 %v7448_v36, %s7163_s29 }
 0x4a7   :  { %v563_v42 = vpop.permute.xlu2 %562  ;;  %1104 = vrot.lane.b32.xlu0 %v7370_v6, %s7162_s28 }
 0x4a8   :  { %v597_v7 = vsel %vm11300_vm1, %v563_v42, %v7697_v61 }
 0x4a9   :  { %v1227_v48 = vpop.permute.xlu0 %1226  ;;  %629 = vst [vmem:[#allocation4 + $0xc8] sm:$0xf0] %v597_v7 }
 0x4aa   :  { %v1254_v5 = vsel %vm11295_vm11, %v7725_v19, %v1227_v48 }
 0x4ab   :  { %1286 = vst [vmem:[#allocation4 + $0x258] sm:$0xf] %v1254_v5 }
 0x4ac   :  { %967 = vrot.lane.b32.xlu1 %v7546_v18, %s7160_s26  ;;  %v1433_v18 = vld [vmem:[%s7230_s23 + $0x28] sm:$0xff] }
 0x4ad   :  { %1462 = vst [vmem:[#allocation1 + $0x10] ss:$2 sm:$0xff] %v1433_v18 }
 0x4ae   :  { %v302_v36 = vpop.permute.xlu1 %301 }
 0x4af   :  { %6910 = vmatmul.msk.f32.vlgmr.msrb.gmra.mxu3 %vm11291_vm5, %v302_v36  ;;  %v1095_v25 = vpop.permute.xlu2 %1094  ;;  %1361 = vrot.lane.b32.xlu0 %v7455_v43, %s7159_s25 }
 0x4b1   :  { %v1484_v21 = vpop.permute.xlu0 %1483 }
 0x4b2   :  { %v1513_v29 = vsel %vm11293_vm10, %v7624_v45, %v1484_v21  ;;  %v1514_v39 = vsel %vm11293_vm10, %v1484_v21, %v7721_v60 }
 0x4b3   :  { %1545 = vst [vmem:[#allocation4 + $0x208] sm:$0xf] %v1513_v29 }
 0x4b4   :  { %1546 = vst [vmem:[#allocation4 + $0x240] sm:$0xf] %v1514_v39  ;;  %572 = vrot.lane.b32.xlu1 %v7380_v12, %s7164_s30 }
 0x4b6   :  { %v695_v2 = vpop.permute.xlu1 %694 }
 0x4b7   :  { %v728_v45 = vsel %vm11299_vm0, %v695_v2, %v7661_v57  ;;  %v727_v40 = vsel %vm11299_vm0, %v693_v24, %v695_v2  ;;  %v7757_v12 = vpop.permute.xlu2 %1228  ;;  %712 = vrot.lane.b32.xlu0 %v7305_v27, %s7165_s1 }
 0x4b8   :  { %760 = vst [vmem:[#allocation4 + $0x30] sm:$0xf] %v728_v45  ;;  %v1255_v37 = vsel %vm11295_vm11, %v1227_v48, %v7757_v12 }
 0x4b9   :  { %v7747_v23 = vpop.permute.xlu0 %963  ;;  %759 = vst [vmem:[#allocation4 + $0x80] sm:$0xf] %v727_v40  ;;  %v1468_v40 = vld.sshfl [vmem:[#allocation1 + $0x18] sm:$0xff pattern:$0x75316420] }
 0x4ba   :  { %v1626_v22 = vld [vmem:[#allocation4 + $0x208] sm:$0xf]  ;;  %1287 = vst [vmem:[#allocation4 + $0x260] sm:$0xf] %v1255_v37 }
 0x4bb   :  { %6920 = vmatpush.msk.msra.mxu0 %vm11306_vm15, %v1626_v22 }
 0x4bc   :  { %706 = vrot.lane.b32.xlu1 %v7494_v28, %s7165_s1  ;;  %v1466_v28 = vld.sshfl [vmem:[#allocation1 + $0x8] sm:$0xff pattern:$0x75316420] }
 0x4be   :  { %v828_v57 = vpop.permute.xlu1 %827 }
 0x4bf   :  { %v859_v63 = vsel %vm11298_vm2, %v7667_v4, %v828_v57  ;;  %v860_v47 = vsel %vm11298_vm2, %v828_v57, %v7711_v33  ;;  %v7769_v11 = vpop.permute.xlu2 %702  ;;  %969 = vrot.lane.b32.xlu0 %v7329_v38, %s7160_s26 }
 0x4c0   :  { %891 = vst [vmem:[#allocation4 + $0x30] sm:$0xf0] %v859_v63 }
 0x4c1   :  { %v1097_v34 = vpop.permute.xlu0 %1096  ;;  %892 = vst [vmem:[#allocation4 + $0x10] sm:$0xf0] %v860_v47 }
 0x4c2   :  { %v1124_v41 = vsel %vm11296_vm12, %v1095_v25, %v1097_v34 }
 0x4c3   :  { %1156 = vst [vmem:[#allocation4 + $0x1e0] sm:$0xf0] %v1124_v41 }
 0x4c4   :  { %1493 = vrot.lane.b32.xlu1 %v1466_v28, %s7161_s27 }
 0x4c6   :  { %v1215_v24 = vpop.permute.xlu1 %1214 }
 0x4c7   :  { %v1249_v5 = vsel %vm11295_vm11, %v1215_v24, %v7638_v54  ;;  %v7782_v6 = vpop.permute.xlu2 %835  ;;  %1106 = vrot.lane.b32.xlu0 %v7372_v8, %s7162_s28 }
 0x4c8   :  { %1281 = vst [vmem:[#allocation4 + $0x78] sm:$0xf] %v1249_v5  ;;  %v1577_v43 = vld [vmem:[#allocation4 + $0x10] sm:$0xff] }
 0x4c9   :  { %v7771_v48 = vpop.permute.xlu0 %1353  ;;  %1746 = vmatpush.msra.mxu3 %v1577_v43 }
 0x4ca   :  { %v1383_v52 = vsel %vm11294_vm13, %v7649_v15, %v7771_v48 }
 0x4cb   :  { %1415 = vst [vmem:[#allocation4 + $0x1f8] sm:$0xf0] %v1383_v52  ;;  %v11353_v52 = vld [vmem:[#allocation11_spill] sm:$0xff] }
 0x4cc   :  { %576 = vrot.lane.b32.xlu1 %v7466_v14, %s7164_s30  ;;  %v1576_v14 = vld [vmem:[#allocation4 + $0x30] sm:$0xff] }
 0x4cd   :  { %1726 = vmatpush.msrb.mxu2 %v1576_v14 }
 0x4ce   :  { %v567_v42 = vpop.permute.xlu1 %566 }
 0x4cf   :  { %v598_v54 = vsel %vm11300_vm1, %v7697_v61, %v567_v42  ;;  %v599_v36 = vsel %vm11300_vm1, %v567_v42, %v7719_v35  ;;  %v1607_v15 = vld [vmem:[#allocation4 + $0x78] sm:$0xff]  ;;  %v1093_v61 = vpop.permute.xlu2 %1092  ;;  %708 = vrot.lane.b32.xlu0 %v7272_v13, %s7165_s1 }
 0x4d0   :  { %630 = vst [vmem:[#allocation4 + $0x8] sm:$0xf0] %v598_v54  ;;  %1704 = vmatpush.msra.mxu1 %v1607_v15  ;;  %v1122_v29 = vsel %vm11296_vm12, %v7684_v20, %v1093_v61  ;;  %v1123_v39 = vsel %vm11296_vm12, %v1093_v61, %v1095_v25  ;;  %v11355_v15 = vld [vmem:[#allocation9_spill] sm:$0xff] }
 0x4d1   :  { %v7784_v7 = vpop.permute.xlu0 %704  ;;  %631 = vst [vmem:[#allocation4 + $0x40] sm:$0xf0] %v599_v36 }
 0x4d2   :  { %v732_v21 = vsel %vm11299_vm0, %v7769_v11, %v7784_v7  ;;  %1154 = vst [vmem:[#allocation4 + $0x198] sm:$0xf0] %v1122_v29 }
 0x4d3   :  { %764 = vst [vmem:[#allocation4 + $0x1a0] sm:$0xf] %v732_v21 }
 0x4d4   :  { %1363 = vrot.lane.b32.xlu1 %v7457_v9, %s7159_s25  ;;  %1155 = vst [vmem:[#allocation4 + $0x1d0] sm:$0xf0] %v1123_v39  ;;  %v1467_v9 = vld.sshfl [vmem:[#allocation1 + $0x10] sm:$0xff pattern:$0x75316420] }
 0x4d5   :  { %1495 = vrot.lane.b32.xlu2 %v1467_v9, %s7161_s27  ;;  %v11356_v39 = vld [vmem:[#allocation16_spill] sm:$0xff] }
 0x4d6   :  { %v954_v10 = vpop.permute.xlu1 %953 }
 0x4d7   :  { %v988_v2 = vsel %vm11297_vm14, %v954_v10, %v7630_v31  ;;  %v7810_v31 = vpop.permute.xlu2 %574  ;;  %v1560_v24 = vld [vmem:[#allocation4 + $0x8] sm:$0xff] }
 0x4d8   :  { %1020 = vst [vmem:[#allocation4 + $0xf8] sm:$0xf] %v988_v2  ;;  %v1561_v28 = vld [vmem:[#allocation4 + $0x40] sm:$0xff]  ;;  %1727 = vmatpush.msrb.mxu2 %v1560_v24 }
 0x4d9   :  { %v962_v18 = vpop.permute.xlu0 %961  ;;  %1747 = vmatpush.msra.mxu3 %v1561_v28 }
 0x4da   :  { %v991_v45 = vsel %vm11297_vm14, %v7673_v53, %v962_v18  ;;  %v992_v27 = vsel %vm11297_vm14, %v962_v18, %v7747_v23 }
 0x4db   :  { %1023 = vst [vmem:[#allocation4 + $0x198] sm:$0xf] %v991_v45 }
 0x4dc   :  { %1024 = vst [vmem:[#allocation4 + $0x1d0] sm:$0xf] %v992_v27  ;;  %1497 = vrot.lane.b32.xlu1 %v1468_v40, %s7161_s27 }
 0x4dd   :  { %1232 = vrot.lane.b32.xlu2 %v7408_v56, %s7158_s24 }
 0x4de   :  { %v1488_v20 = vpop.permute.xlu1 %1487 }
 0x4df   :  { %v1515_v53 = vsel %vm11293_vm10, %v7721_v60, %v1488_v20  ;;  %v1591_v22 = vld [vmem:[#allocation4 + $0xf8] sm:$0xff]  ;;  %v7824_v38 = vpop.permute.xlu2 %831 }
 0x4e0   :  { %1547 = vst [vmem:[#allocation4 + $0x88] sm:$0xf] %v1515_v53  ;;  %1705 = vmatpush.msra.mxu1 %v1591_v22  ;;  %v861_v60 = vsel %vm11298_vm2, %v7711_v33, %v7824_v38 }
 0x4e1   :  { %v7812_v25 = vpop.permute.xlu0 %1098  ;;  %893 = vst [vmem:[#allocation4 + $0x160] sm:$0xf0] %v861_v60 }
 0x4e2   :  { %v1125_v37 = vsel %vm11296_vm12, %v1097_v34, %v7812_v25  ;;  %v1594_v61 = vld [vmem:[#allocation4 + $0x198] sm:$0xff] }
 0x4e3   :  { %1157 = vst [vmem:[#allocation4 + $0x1a8] sm:$0xf0] %v1125_v37  ;;  %v1595_v45 = vld [vmem:[#allocation4 + $0x1d0] sm:$0xff] }
 0x4e4   :  { %973 = vrot.lane.b32.xlu1 %v7345_v46, %s7160_s26 }
 0x4e5   :  { %1365 = vrot.lane.b32.xlu2 %v7436_v59, %s7159_s25 }
 0x4e6   :  { %v824_v57 = vpop.permute.xlu1 %823 }
 0x4e7   :  { %v858_v63 = vsel %vm11298_vm2, %v824_v57, %v7667_v4  ;;  %v1628_v5 = vld [vmem:[#allocation4 + $0x88] sm:$0xf] }
 0x4e8   :  { %890 = vst [vmem:[#allocation4 + $0x80] sm:$0xf0] %v858_v63  ;;  %6924 = vmatpush.msk.msra.mxu2 %vm11306_vm15, %v1628_v5 }
 0x4e9   :  { %v701_v34 = vpop.permute.xlu0 %700 }
 0x4ea   :  { %v730_v56 = vsel %vm11299_vm0, %v7702_v17, %v701_v34  ;;  %v731_v8 = vsel %vm11299_vm0, %v701_v34, %v7769_v11 }
 0x4eb   :  { %762 = vst [vmem:[#allocation4 + $0x160] sm:$0xf] %v730_v56 }
 0x4ec   :  { %763 = vst [vmem:[#allocation4 + $0x1d8] sm:$0xf] %v731_v8  ;;  %1230 = vrot.lane.b32.xlu1 %v7406_v62, %s7158_s24 }
 0x4ed   :  { %1102 = vrot.lane.b32.xlu2 %v7367_v3, %s7162_s28 }
 0x4ee   :  { %v1356_v46 = vpop.permute.xlu1 %1355 }
 0x4ef   :  { %v1384_v17 = vsel %vm11294_vm13, %v7771_v48, %v1356_v46  ;;  %v1385_v33 = vsel %vm11294_vm13, %v1356_v46, %v7729_v30  ;;  %v1575_v11 = vld [vmem:[#allocation4 + $0x80] sm:$0xff] }
 0x4f0   :  { %1416 = vst [vmem:[#allocation4 + $0x58] sm:$0xf0] %v1384_v17  ;;  %1706 = vmatpush.msra.mxu1 %v1575_v11 }
 0x4f1   :  { %v7841_v4 = vpop.permute.xlu0 %837  ;;  %1417 = vst [vmem:[#allocation4 + $0x258] sm:$0xf0] %v1385_v33  ;;  %v11357_v33 = vld [vmem:[#allocation7_spill] sm:$0xff] }
 0x4f2   :  { %v864_v59 = vsel %vm11298_vm2, %v7782_v6, %v7841_v4 }
 0x4f3   :  { %896 = vst [vmem:[#allocation4 + $0x248] sm:$0xf0] %v864_v59 }
 0x4f4   :  { %1367 = vrot.lane.b32.xlu1 %v7438_v0, %s7159_s25  ;;  %v1559_v0 = vld [vmem:[#allocation4 + $0xc8] sm:$0xff] }
 0x4f5   :  { %1236 = vrot.lane.b32.xlu2 %v7402_v50, %s7158_s24  ;;  %1707 = vmatpush.msra.mxu1 %v1559_v0 }
 0x4f6   :  { %v7854_v13 = vpop.permute.xlu1 %1489 }
 0x4f7   :  { %v1516_v47 = vsel %vm11293_vm10, %v1488_v20, %v7854_v13 }
 0x4f8   :  { %1548 = vst [vmem:[#allocation4 + $0x118] sm:$0xf] %v1516_v47  ;;  %v1612_v50 = vld [vmem:[#allocation4 + $0x258] sm:$0xff] }
 0x4f9   :  { %v7856_v62 = vpop.permute.xlu0 %570  ;;  %1804 = vmatpush.msra.mxu2 %v1612_v50 }
 0x4fa   :  { %v600_v41 = vsel %vm11300_vm1, %v7719_v35, %v7856_v62  ;;  %v1627_v35 = vld [vmem:[#allocation4 + $0x240] sm:$0xf] }
 0x4fb   :  { %632 = vst [vmem:[#allocation4 + $0x28] sm:$0xf0] %v600_v41  ;;  %6922 = vmatpush.msk.msrb.mxu1 %vm11306_vm15, %v1627_v35 }
 0x4fc   :  { %841 = vrot.lane.b32.xlu1 %v7303_v26, %s7163_s29  ;;  %v11354_v26 = vld [vmem:[#allocation21_spill] sm:$0xff] }
 0x4fd   :  { %710 = vrot.lane.b32.xlu2 %v11353_v52, %s7165_s1  ;;  %v7933_v52 = vld [vmem:[%s6880_s5] sm:$0xf]  ;;  %s6887_s5 = sld [smem:[%s11286_s0 + %s7172_s2]]   ;;  %s7179_s2 = smov 16  }
 0x4fe   :  { %v966_v3 = vpop.permute.xlu1 %965  ;;  %6919 = vmatmul.msk.f32.vlgmr.msra.gmra.mxu3 %vm11292_vm3, %v7933_v52  ;;  %6917 = vmatmul.msk.f32.vlgmr.msrb.gmra.mxu2 %vm11292_vm3, %v7933_v52 }
 0x4ff   :  { %v993_v48 = vsel %vm11297_vm14, %v7747_v23, %v966_v3  ;;  %v1629_v36 = vld [vmem:[#allocation4 + $0x118] sm:$0xf]  ;;  %6915 = vmatmul.msk.f32.vlgmr.msra.gmra.mxu1 %vm11292_vm3, %v7933_v52 }
 0x500   :  { %1025 = vst [vmem:[#allocation4 + $0x1e0] sm:$0xf] %v993_v48  ;;  %6926 = vmatpush.msk.msrb.mxu3 %vm11306_vm15, %v1629_v36 }
 0x501   :  { %v7895_v40 = vpop.permute.xlu0 %1234 }
 0x502   :  { %v1562_v29 = vld [vmem:[#allocation4 + $0x28] sm:$0xff] }
 0x504   :  { %975 = vrot.lane.b32.xlu1 %v11354_v26, %s7160_s26 }
 0x506   :  { %v1223_v42 = vpop.permute.xlu1 %1222 }
 0x507   :  { %v1252_v23 = vsel %vm11295_vm11, %v7675_v1, %v1223_v42  ;;  %v1253_v54 = vsel %vm11295_vm11, %v1223_v42, %v7725_v19  ;;  %v1578_v19 = vld [vmem:[#allocation4 + $0x160] sm:$0xff] }
 0x508   :  { %1284 = vst [vmem:[#allocation4 + $0x1f8] sm:$0xf] %v1252_v23  ;;  %v1596_v27 = vld [vmem:[#allocation4 + $0x1e0] sm:$0xff]  ;;  %v11358_v23 = vld [vmem:[#allocation18_spill] sm:$0xff] }
 0x509   :  { %1285 = vst [vmem:[#allocation4 + $0x58] sm:$0xf] %v1253_v54  ;;  %1805 = vmatpush.msra.mxu2 %v1596_v27  ;;  %v1492_v22 = vpop.permute.xlu0 %1491 }
 0x50a   :  { %v1517_v57 = vsel %vm11293_vm10, %v7854_v13, %v1492_v22 }
 0x50b   :  { %1549 = vst [vmem:[#allocation4 + $0x128] sm:$0xf] %v1517_v57 }
 0x50c   :  { %580 = vrot.lane.b32.xlu1 %v11355_v15, %s7164_s30 }
 0x50e   :  { %v7882_v21 = vpop.permute.xlu1 %1359 }
 0x50f   :  { %v1386_v14 = vsel %vm11294_vm13, %v7729_v30, %v7882_v21  ;;  %v1610_v43 = vld [vmem:[#allocation4 + $0x1f8] sm:$0xff] }
 0x510   :  { %1418 = vst [vmem:[#allocation4 + $0x260] sm:$0xf0] %v1386_v14  ;;  %1764 = vmatpush.msra.mxu0 %v1610_v43  ;;  %v1611_v1 = vld [vmem:[#allocation4 + $0x58] sm:$0xff] }
 0x511   :  { %1784 = vmatpush.msrb.mxu1 %v1611_v1  ;;  %v7907_v63 = vpop.permute.xlu0 %971  ;;  %v11359_v1 = vld [vmem:[#allocation22_spill] sm:$0xff] }
 0x512   :  { %1765 = vmatpush.msra.mxu0 %v1594_v61 }
 0x513   :  { %1785 = vmatpush.msrb.mxu1 %v1595_v45  ;;  %v11360_v45 = vld [vmem:[#allocation13_spill] sm:$0xff] }
 0x514   :  { %1766 = vmatpush.msra.mxu0 %v1578_v19  ;;  %714 = vrot.lane.b32.xlu1 %v11356_v39, %s7165_s1 }
 0x516   :  { %v834_v10 = vpop.permute.xlu1 %833  ;;  %1767 = vmatpush.msra.mxu0 %v1562_v29 }
 0x517   :  { %v862_v18 = vsel %vm11298_vm2, %v7824_v38, %v834_v10  ;;  %v863_v30 = vsel %vm11298_vm2, %v834_v10, %v7782_v6  ;;  %v1613_v2 = vld [vmem:[#allocation4 + $0x260] sm:$0xff] }
 0x518   :  { %894 = vst [vmem:[#allocation4 + $0x1d8] sm:$0xf0] %v862_v18  ;;  %1824 = vmatpush.msrb.mxu3 %v1613_v2 }
 0x519   :  { %895 = vst [vmem:[#allocation4 + $0x1a0] sm:$0xf0] %v863_v30 }
 0x51e   :  { %v7893_v9 = vpop.permute.xlu1 %967 }
 0x51f   :  { %v994_v20 = vsel %vm11297_vm14, %v966_v3, %v7893_v9  ;;  %v1579_v37 = vld [vmem:[#allocation4 + $0x1d8] sm:$0xff] }
 0x520   :  { %1026 = vst [vmem:[#allocation4 + $0x1a8] sm:$0xf] %v994_v20  ;;  %v1580_v6 = vld [vmem:[#allocation4 + $0x1a0] sm:$0xff]  ;;  %1786 = vmatpush.msrb.mxu1 %v1579_v37 }
 0x521   :  { %1806 = vmatpush.msra.mxu2 %v1580_v6 }
 0x526   :  { %v573_v53 = vpop.permute.xlu1 %572 }
 0x527   :  { %v601_v38 = vsel %vm11300_vm1, %v7856_v62, %v573_v53  ;;  %v602_v60 = vsel %vm11300_vm1, %v573_v53, %v7810_v31  ;;  %v1597_v56 = vld [vmem:[#allocation4 + $0x1a8] sm:$0xff]  ;;  %v7915_v62 = vpop.permute.xlu0 %1104 }
 0x528   :  { %633 = vst [vmem:[#allocation4 + $0xe8] sm:$0xf0] %v601_v38  ;;  %1825 = vmatpush.msrb.mxu3 %v1597_v56  ;;  %v11361_v38 = vld [vmem:[#allocation15_spill] sm:$0xff] }
 0x529   :  { %634 = vst [vmem:[#allocation4 + $0xf0] sm:$0xf0] %v602_v60 }
 0x52e   :  { %v7905_v34 = vpop.permute.xlu1 %706 }
 0x52f   :  { %v733_v8 = vsel %vm11299_vm0, %v7784_v7, %v7905_v34  ;;  %v1496_v28 = vpop.permute.xlu2 %1495  ;;  %v1362_v0 = vpop.permute.xlu0 %1361 }
 0x530   :  { %765 = vst [vmem:[#allocation4 + $0x248] sm:$0xf] %v733_v8  ;;  %v1387_v48 = vsel %vm11294_vm13, %v7882_v21, %v1362_v0  ;;  %v1564_v50 = vld [vmem:[#allocation4 + $0xf0] sm:$0xff] }
 0x531   :  { %1419 = vst [vmem:[#allocation4 + $0x100] sm:$0xf0] %v1387_v48  ;;  %1807 = vmatpush.msra.mxu2 %v1564_v50 }
 0x532   :  { %v322_v46 = vpop.f32.mrf.mxu3  ;;  %6925 = vmatmul.msk.f32.vlgmr.msra.gmra.mxu2 %vm11292_vm3, %v7933_v52 }
 0x533   :  { %v326_v17 = vrot.slane %v322_v46, 4 }
 0x535   :  { %v7913_v59 = vadd.f32 %v326_v17, %v11357_v33 }
 0x536   :  { %v1494_v13 = vpop.permute.xlu1 %1493 }
 0x537   :  { %7097 = vtanh.f32 %v7913_v59  ;;  %v1518_v47 = vsel %vm11293_vm10, %v1492_v22, %v1494_v13  ;;  %v1581_v41 = vld [vmem:[#allocation4 + $0x248] sm:$0xff]  ;;  %v1519_v7 = vsel %vm11293_vm10, %v1494_v13, %v1496_v28  ;;  %v1233_v35 = vpop.permute.xlu2 %1232  ;;  %v7945_v36 = vpop.permute.xlu0 %712 }
 0x538   :  { %1550 = vst [vmem:[#allocation4 + $0x1c0] sm:$0xf] %v1518_v47  ;;  %1826 = vmatpush.msrb.mxu3 %v1581_v41  ;;  %v1258_v5 = vsel %vm11295_vm11, %v1233_v35, %v7895_v40 }
 0x539   :  { %1551 = vst [vmem:[#allocation4 + $0x230] sm:$0xf] %v1519_v7 }
 0x53a   :  { %1290 = vst [vmem:[#allocation4 + $0x168] sm:$0xf] %v1258_v5 }
 0x53d   :  { %v7098_v11 = vpop.eup %7097 }
 0x53e   :  { %354 = vrot.lane.b32.xlu2 %v7098_v11, %s7155_s18  ;;  %v7924_v3 = vpop.permute.xlu1 %576 }
 0x53f   :  { %v603_v24 = vsel %vm11300_vm1, %v7810_v31, %v7924_v3  ;;  %v1563_v31 = vld [vmem:[#allocation4 + $0xe8] sm:$0xff]  ;;  %v1631_v42 = vld [vmem:[#allocation4 + $0x1c0] sm:$0xf]  ;;  %v1366_v14 = vpop.permute.xlu2 %1365  ;;  %v970_v19 = vpop.permute.xlu0 %969 }
 0x540   :  { %635 = vst [vmem:[#allocation4 + $0x70] sm:$0xf0] %v603_v24  ;;  %v1632_v26 = vld [vmem:[#allocation4 + $0x230] sm:$0xf]  ;;  %1787 = vmatpush.msrb.mxu1 %v1563_v31  ;;  %v995_v39 = vsel %vm11297_vm14, %v7893_v9, %v970_v19  ;;  %v996_v18 = vsel %vm11297_vm14, %v970_v19, %v7907_v63  ;;  %v1435_v24 = vld [vmem:[%s7230_s23 + $0x38] sm:$0xff]  ;;  %v1434_v31 = vld [vmem:[%s7230_s23 + $0x30] sm:$0xff] }
 0x541   :  { %6932 = vmatpush.msk.msrb.mxu2 %vm11306_vm15, %v1632_v26  ;;  %6923 = vmatmul.msk.f32.vlgmr.msrb.gmra.mxu1 %vm11292_vm3, %v7933_v52  ;;  %1027 = vst [vmem:[#allocation4 + $0x228] sm:$0xf] %v995_v39  ;;  %v11362_v19 = vld [vmem:[#allocation19_spill] sm:$0xff] }
 0x542   :  { %6930 = vmatpush.msk.msra.mxu1 %vm11306_vm15, %v1631_v42  ;;  %1028 = vst [vmem:[#allocation4] sm:$0xf] %v996_v18 }
 0x543   :  { %1464 = vst [vmem:[#allocation1 + $0x30] ss:$2 sm:$0xff] %v1435_v24  ;;  %v11379_v24 = vld [vmem:[#allocation24_spill] sm:$0xff] }
 0x544   :  { %1463 = vst [vmem:[#allocation1 + $0x20] ss:$2 sm:$0xff] %v1434_v31 }
 0x546   :  { %843 = vrot.lane.b32.xlu2 %v11358_v23, %s7163_s29  ;;  %v1364_v54 = vpop.permute.xlu1 %1363 }
 0x547   :  { %v1388_v15 = vsel %vm11294_vm13, %v1362_v0, %v1364_v54  ;;  %v1565_v21 = vld [vmem:[#allocation4 + $0x70] sm:$0xff]  ;;  %v1389_v43 = vsel %vm11294_vm13, %v1364_v54, %v1366_v14  ;;  %v7963_v10 = vpop.permute.xlu2 %1102  ;;  %v7974_v9 = vpop.permute.xlu0 %1106 }
 0x548   :  { %1420 = vst [vmem:[#allocation4 + $0x1b8] sm:$0xf0] %v1388_v15  ;;  %1827 = vmatpush.msrb.mxu3 %v1565_v21  ;;  %v1128_v30 = vsel %vm11296_vm12, %v7963_v10, %v7915_v62  ;;  %v1129_v22 = vsel %vm11296_vm12, %v7915_v62, %v7974_v9 }
 0x549   :  { %1421 = vst [vmem:[#allocation4 + $0x168] sm:$0xf0] %v1389_v43  ;;  %6927 = vmatmul.msk.f32.vlgmr.msrb.gmra.mxu3 %vm11292_vm3, %v7933_v52 }
 0x54a   :  { %1160 = vst [vmem:[#allocation4 + $0x1b0] sm:$0xf0] %v1128_v30  ;;  %v1471_v5 = vld.sshfl [vmem:[#allocation1 + $0x30] sm:$0xff pattern:$0x75316420] }
 0x54b   :  { %1161 = vst [vmem:[#allocation4 + $0x90] sm:$0xf0] %v1129_v22  ;;  %v11365_v22 = vld [vmem:[#allocation37_spill] sm:$0xff] }
 0x54e   :  { %1100 = vrot.lane.b32.xlu2 %v11359_v1, %s7162_s28  ;;  %v7957_v61 = vpop.permute.xlu1 %1497 }
 0x54f   :  { %v1520_v29 = vsel %vm11293_vm10, %v1496_v28, %v7957_v61  ;;  %v7983_v37 = vpop.permute.xlu2 %1236  ;;  %v709_v57 = vpop.permute.xlu0 %708 }
 0x550   :  { %1552 = vst [vmem:[#allocation4 + $0x170] sm:$0xf] %v1520_v29  ;;  %v1616_v2 = vld [vmem:[#allocation4 + $0x168] sm:$0xff]  ;;  %v1259_v6 = vsel %vm11295_vm11, %v7895_v40, %v7983_v37  ;;  %v734_v17 = vsel %vm11299_vm0, %v7905_v34, %v709_v57  ;;  %v6911_v34 = vmul.f32 -1.442695, %v7913_v59 }
 0x551   :  { %1884 = vmatpush.msrb.mxu2 %v1616_v2  ;;  %1291 = vst [vmem:[#allocation4 + $0xd0] sm:$0xf] %v1259_v6 }
 0x552   :  { %766 = vst [vmem:[#allocation4 + $0x218] sm:$0xf] %v734_v17  ;;  %7099 = vpow2.f32 %v6911_v34  ;;  %v11370_v17 = vld [vmem:[#allocation47_spill] sm:$0xff]  ;;  %v11375_v34 = vld [vmem:[#allocation45_spill] sm:$0xff] }
 0x556   :  { %582 = vrot.lane.b32.xlu2 %v11360_v45, %s7164_s30  ;;  %v7972_v27 = vpop.permute.xlu1 %973 }
 0x557   :  { %v997_v20 = vsel %vm11297_vm14, %v7907_v63, %v7972_v27  ;;  %v1633_v53 = vld [vmem:[#allocation4 + $0x170] sm:$0xf]  ;;  %v711_v46 = vpop.permute.xlu2 %710 }
 0x558   :  { %1029 = vst [vmem:[#allocation4 + $0x1b0] sm:$0xf] %v997_v20  ;;  %6934 = vmatpush.msk.msra.mxu3 %vm11306_vm15, %v1633_v53  ;;  %v736_v40 = vsel %vm11299_vm0, %v711_v46, %v7945_v36  ;;  %v735_v13 = vsel %vm11299_vm0, %v709_v57, %v711_v46  ;;  %v7100_v28 = vpop.eup %7099  ;;  %v1469_v20 = vld.sshfl [vmem:[#allocation1 + $0x20] sm:$0xff pattern:$0x75316420] }
 0x559   :  { %768 = vst [vmem:[#allocation4 + $0x48] sm:$0xf] %v736_v40  ;;  %v332_v7 = vadd.f32 1.0, %v7100_v28  ;;  %v11369_v46 = vld [vmem:[#allocation14_spill] sm:$0xff]  ;;  %v11377_v28 = vld [vmem:[#allocation25_spill] sm:$0xff] }
 0x55a   :  { %767 = vst [vmem:[#allocation4 + $0x190] sm:$0xf] %v735_v13  ;;  %v11371_v40 = vld [vmem:[#allocation46_spill] sm:$0xff]  ;;  %v11372_v13 = vld [vmem:[#allocation28_spill] sm:$0xff] }
 0x55b   :  { %7101 = vrcp.f32 %v332_v7  ;;  %v344_v26 = vand.u32 2147483648, %v332_v7  ;;  %vm338_vm6 = vweird.f32 %v332_v7  ;;  %v342_v59 = vand.u32 2147483647, %v332_v7 }
 0x55d   :  { %v345_v23 = vor.u32 1.1754944e-38, %v344_v26  ;;  %vm343_vm8 = vcmp.eq.f32.partialorder %v342_v59, 8.507059e+37 }
 0x55e   :  { %839 = vrot.lane.b32.xlu2 %v11361_v38, %s7163_s29  ;;  %v1231_v60 = vpop.permute.xlu1 %1230  ;;  %v1470_v38 = vld.sshfl [vmem:[#allocation1 + $0x28] sm:$0xff pattern:$0x75316420] }
 0x55f   :  { %v1256_v63 = vsel %vm11295_vm11, %v7757_v12, %v1231_v60  ;;  %v1257_v56 = vsel %vm11295_vm11, %v1231_v60, %v1233_v35  ;;  %v1600_v8 = vld [vmem:[#allocation4 + $0x1b0] sm:$0xff]  ;;  %1501 = vrot.lane.b32.xlu1 %v1470_v38, %s7161_s27 }
 0x560   :  { %1288 = vst [vmem:[#allocation4 + $0x100] sm:$0xf] %v1256_v63  ;;  %1885 = vmatpush.msrb.mxu2 %v1600_v8  ;;  %v11368_v63 = vld [vmem:[#allocation43_spill] sm:$0xff] }
 0x561   :  { %1289 = vst [vmem:[#allocation4 + $0x1b8] sm:$0xf] %v1257_v56  ;;  %v7102_v11 = vpop.eup %7101 }
 0x562   :  { %v334_v0 = vmul.f32 %v7102_v11, %v332_v7  ;;  %vm339_vm4 = vweird.f32 %v7102_v11 }
 0x563   :  { %vm340_vm7 = vmor %vm338_vm6, %vm339_vm4 }
 0x564   :  { %v335_v48 = vsub.f32 1.0, %v334_v0 }
 0x566   :  { %v7998_v12 = vpop.permute.xlu1 %1367  ;;  %v336_v35 = vmul.f32 %v7102_v11, %v335_v48  ;;  %1503 = vrot.lane.b32.xlu2 %v1471_v5, %s7161_s27  ;;  %v11381_v5 = vld [vmem:[#allocation26_spill] sm:$0xff] }
 0x567   :  { %v1390_v62 = vsel %vm11294_vm13, %v1366_v14, %v7998_v12  ;;  %584 = vrot.lane.b32.xlu1 %v11369_v46, %s7164_s30 }
 0x568   :  { %1422 = vst [vmem:[#allocation4 + $0xd0] sm:$0xf0] %v1390_v62  ;;  %v1615_v47 = vld [vmem:[#allocation4 + $0x1b8] sm:$0xff]  ;;  %v337_v50 = vadd.f32 %v7102_v11, %v336_v35 }
 0x569   :  { %1864 = vmatpush.msra.mxu1 %v1615_v47  ;;  %v11373_v62 = vld [vmem:[#allocation31_spill] sm:$0xff]  ;;  %v11374_v47 = vld [vmem:[#allocation42_spill] sm:$0xff] }
 0x56a   :  { %v341_v42 = vsel %vm340_vm7, %v7102_v11, %v337_v50  ;;  %v11378_v11 = vld [vmem:[#allocation38_spill] sm:$0xff]  ;;  %v11380_v35 = vld [vmem:[#allocation27_spill] sm:$0xff]  ;;  %v350_v50 = vrot.slane %v11381_v5, 6 }
 0x56b   :  { %v8006_v15 = vsel %vm343_vm8, %v345_v23, %v341_v42 }
 0x56c   :  { %v352_v59 = vmul.f32 %v350_v50, %v8006_v15 }
 0x56e   :  { %1240 = vrot.lane.b32.xlu2 %v7541_v58, %s7158_s24  ;;  %v842_v14 = vpop.permute.xlu1 %841  ;;  %v11363_v58 = vld [vmem:[#allocation36_spill] sm:$0xff] }
 0x56f   :  { %v1617_v41 = vld [vmem:[#allocation4 + $0xd0] sm:$0xff]  ;;  %1371 = vrot.lane.b32.xlu1 %v11371_v40, %s7159_s25 }
 0x570   :  { %1904 = vmatpush.msra.mxu3 %v1617_v41  ;;  %v11389_v40 = vld [vmem:[#allocation30_spill] sm:$0xff] }
 0x576   :  { %1373 = vrot.lane.b32.xlu2 %v7607_v44, %s7159_s25  ;;  %v11364_v44 = vld [vmem:[#allocation8_spill] sm:$0xff] }
 0x57e   :  { %979 = vrot.lane.b32.xlu2 %v11363_v58, %s7160_s26 }
 0x586   :  { %1112 = vrot.lane.b32.xlu2 %v7576_v32, %s7162_s28  ;;  %v8040_v32 = vpop.permute.xlu1 %975 }
 0x58e   :  { %1369 = vrot.lane.b32.xlu2 %v7565_v49, %s7159_s25  ;;  %v581_v6 = vpop.permute.xlu1 %580 }
 0x596   :  { %720 = vrot.lane.b32.xlu2 %v11365_v22, %s7165_s1  ;;  %v8056_v56 = vpop.permute.xlu1 %714  ;;  %v11387_v22 = vld [vmem:[#allocation39_spill] sm:$0xff] }
 0x597   :  { %v737_v8 = vsel %vm11299_vm0, %v7945_v36, %v8056_v56  ;;  %v1472_v36 = vld.sshfl [vmem:[#allocation1 + $0x38] sm:$0xff pattern:$0x75316420] }
 0x598   :  { %v355_v54 = vpop.permute.xlu2 %354  ;;  %769 = vst [vmem:[#allocation4 + $0x68] sm:$0xf] %v737_v8  ;;  %1505 = vrot.lane.b32.xlu1 %v1472_v36, %s7161_s27 }
 0x599   :  { %v357_v21 = vmul.f32 %v355_v54, %v8006_v15 }
 0x59b   :  { %359 = vrot.lane.b32.xlu0 %v357_v21, %s7155_s18  ;;  %v11384_v21 = vld [vmem:[#allocation10_spill] sm:$0xff] }
 0x5a0   :  { %v8012_v43 = vpop.permute.xlu2 %843 }
 0x5a1   :  { %v867_v1 = vsel %vm11298_vm2, %v842_v14, %v8012_v43 }
 0x5a2   :  { %899 = vst [vmem:[#allocation4 + $0x48] sm:$0xf0] %v867_v1 }
 0x5a3   :  { %845 = vrot.lane.b32.xlu0 %v11362_v19, %s7163_s29 }
 0x5a8   :  { %v1101_v29 = vpop.permute.xlu2 %1100 }
 0x5a9   :  { %v1126_v39 = vsel %vm11296_vm12, %v7812_v25, %v1101_v29  ;;  %v1127_v18 = vsel %vm11296_vm12, %v1101_v29, %v7963_v10  ;;  %v1584_v30 = vld [vmem:[#allocation4 + $0x48] sm:$0xff] }
 0x5aa   :  { %1158 = vst [vmem:[#allocation4 + $0x228] sm:$0xf0] %v1126_v39  ;;  %1886 = vmatpush.msrb.mxu2 %v1584_v30  ;;  %v11385_v30 = vld [vmem:[#allocation29_spill] sm:$0xff] }
 0x5ab   :  { %1159 = vst [vmem:[#allocation4] sm:$0xf0] %v1127_v18  ;;  %578 = vrot.lane.b32.xlu0 %v11364_v44, %s7164_s30 }
 0x5b0   :  { %v8028_v2 = vpop.permute.xlu2 %582 }
 0x5b1   :  { %v606_v60 = vsel %vm11300_vm1, %v581_v6, %v8028_v2 }
 0x5b2   :  { %v1599_v45 = vld [vmem:[#allocation4] sm:$0xff]  ;;  %638 = vst [vmem:[#allocation4 + $0x148] sm:$0xf0] %v606_v60 }
 0x5b3   :  { %1865 = vmatpush.msra.mxu1 %v1599_v45  ;;  %1242 = vrot.lane.b32.xlu0 %v7589_v51, %s7158_s24  ;;  %v998_v51 = vsel %vm11297_vm14, %v7972_v27, %v8040_v32  ;;  %v11367_v27 = vld [vmem:[#allocation35_spill] sm:$0xff] }
 0x5b4   :  { %1030 = vst [vmem:[#allocation4 + $0x90] sm:$0xf] %v998_v51  ;;  %977 = vrot.lane.b32.xlu2 %v11367_v27, %s7160_s26 }
 0x5b8   :  { %v840_v25 = vpop.permute.xlu2 %839 }
 0x5b9   :  { %v865_v10 = vsel %vm11298_vm2, %v7841_v4, %v840_v25  ;;  %v866_v53 = vsel %vm11298_vm2, %v840_v25, %v842_v14  ;;  %v11366_v4 = vld [vmem:[#allocation44_spill] sm:$0xff] }
 0x5ba   :  { %897 = vst [vmem:[#allocation4 + $0x218] sm:$0xf0] %v865_v10 }
 0x5bb   :  { %898 = vst [vmem:[#allocation4 + $0x190] sm:$0xf0] %v866_v53  ;;  %1499 = vrot.lane.b32.xlu0 %v1469_v20, %s7161_s27  ;;  %v1601_v57 = vld [vmem:[#allocation4 + $0x90] sm:$0xff]  ;;  %v11386_v20 = vld [vmem:[#allocation41_spill] sm:$0xff] }
 0x5bc   :  { %1905 = vmatpush.msra.mxu3 %v1601_v57  ;;  %1114 = vrot.lane.b32.xlu2 %v11370_v17, %s7162_s28  ;;  %v11388_v57 = vld [vmem:[#allocation33_spill] sm:$0xff] }
 0x5c0   :  { %v8080_v41 = vpop.permute.xlu2 %1503 }
 0x5c2   :  { %v1583_v49 = vld [vmem:[#allocation4 + $0x190] sm:$0xff] }
 0x5c3   :  { %1866 = vmatpush.msra.mxu1 %v1583_v49  ;;  %981 = vrot.lane.b32.xlu0 %v11366_v4, %s7160_s26  ;;  %v1568_v4 = vld [vmem:[#allocation4 + $0x148] sm:$0xff] }
 0x5c4   :  { %716 = vrot.lane.b32.xlu2 %v11372_v13, %s7165_s1  ;;  %1887 = vmatpush.msrb.mxu2 %v1568_v4 }
 0x5c5   :  { %6933 = vmatmul.msk.f32.vlgmr.msrb.gmra.mxu2 %vm11292_vm3, %v7933_v52 }
 0x5c8   :  { %v8086_v7 = vpop.permute.xlu2 %1240 }
 0x5cb   :  { %1238 = vrot.lane.b32.xlu0 %v11368_v63, %s7158_s24 }
 0x5cc   :  { %853 = vrot.lane.b32.xlu2 %v11374_v47, %s7163_s29 }
 0x5d0   :  { %v8090_v0 = vpop.permute.xlu2 %1373 }
 0x5d1   :  { %v1502_v27 = vpop.permute.xlu1 %1501 }
 0x5d2   :  { %v1523_v8 = vsel %vm11293_vm10, %v1502_v27, %v8080_v41 }
 0x5d3   :  { %1375 = vrot.lane.b32.xlu0 %v7609_v16, %s7159_s25  ;;  %v11376_v16 = vld [vmem:[#allocation40_spill] sm:$0xff]  ;;  %1555 = vst [vmem:[#allocation4 + $0x178] sm:$0xf] %v1523_v8 }
 0x5d4   :  { %1110 = vrot.lane.b32.xlu1 %v11376_v16, %s7162_s28  ;;  %v11390_v16 = vld [vmem:[#allocation34_spill] sm:$0xff] }
 0x5d8   :  { %v980_v48 = vpop.permute.xlu2 %979 }
 0x5d9   :  { %v585_v13 = vpop.permute.xlu1 %584 }
 0x5da   :  { %v1636_v47 = vld [vmem:[#allocation4 + $0x178] sm:$0xf] }
 0x5db   :  { %849 = vrot.lane.b32.xlu0 %v11373_v62, %s7163_s29  ;;  %v607_v62 = vsel %vm11300_vm1, %v8028_v2, %v585_v13  ;;  %6940 = vmatpush.msk.msra.mxu2 %vm11306_vm15, %v1636_v47 }
 0x5dc   :  { %1244 = vrot.lane.b32.xlu1 %v7591_v55, %s7158_s24  ;;  %v11382_v55 = vld [vmem:[#allocation23_spill] sm:$0xff]  ;;  %639 = vst [vmem:[#allocation4 + $0x158] sm:$0xf0] %v607_v62 }
 0x5e0   :  { %v8097_v26 = vpop.permute.xlu2 %1112 }
 0x5e3   :  { %983 = vrot.lane.b32.xlu0 %v11375_v34, %s7160_s26 }
 0x5e8   :  { %v8105_v23 = vpop.permute.xlu2 %1369 }
 0x5e9   :  { %v1391_v54 = vsel %vm11294_vm13, %v7998_v12, %v8105_v23 }
 0x5ea   :  { %1423 = vst [vmem:[#allocation4 + $0x278] sm:$0xf0] %v1391_v54 }
 0x5eb   :  { %588 = vrot.lane.b32.xlu0 %v11377_v28, %s7164_s30  ;;  %v1372_v28 = vpop.permute.xlu1 %1371 }
 0x5ec   :  { %v1392_v2 = vsel %vm11294_vm13, %v8105_v23, %v1372_v28 }
 0x5ed   :  { %1424 = vst [vmem:[#allocation4 + $0x210] sm:$0xf0] %v1392_v2 }
 0x5f0   :  { %v8118_v29 = vpop.permute.xlu2 %720 }
 0x5f3   :  { %722 = vrot.lane.b32.xlu0 %v11378_v11, %s7165_s1  ;;  %v1569_v11 = vld [vmem:[#allocation4 + $0x158] sm:$0xff] }
 0x5fb   :  { %586 = vrot.lane.b32.xlu0 %v11379_v24, %s7164_s30 }
 0x603   :  { %1246 = vrot.lane.b32.xlu0 %v11380_v35, %s7158_s24 }
 0x60a   :  { %v8186_v35 = vpop.permute.xlu1 %1505 }
 0x60b   :  { %1116 = vrot.lane.b32.xlu0 %v11382_v55, %s7162_s28  ;;  %v1524_v50 = vsel %vm11293_vm10, %v8080_v41, %v8186_v35 }
 0x60c   :  { %1556 = vst [vmem:[#allocation4 + $0x50] sm:$0xf] %v1524_v50 }
 0x60d   :  { %v360_v31 = vpop.permute.xlu0 %359 }
 0x60e   :  { %v8102_v42 = vadd.f32 %v360_v31, %v352_v59  ;;  %v978_v44 = vpop.permute.xlu2 %977  ;;  %v11392_v31 = vld [vmem:[#allocation12_spill] sm:$0xff] }
 0x60f   :  { %v1000_v45 = vsel %vm11297_vm14, %v978_v44, %v980_v48 }
 0x610   :  { %11383 = vst [vmem:[#allocation11_spill] sm:$0xff] %v8102_v42  ;;  %7103 = vtanh.f32 %v8102_v42 }
 0x611   :  { %1032 = vst [vmem:[#allocation4 + $0x1e8] sm:$0xf] %v1000_v45 }
 0x613   :  { %594 = vrot.lane.b32.xlu0 %v11384_v21, %s7164_s30  ;;  %v1637_v21 = vld [vmem:[#allocation4 + $0x50] sm:$0xf] }
 0x615   :  { %v8112_v14 = vpop.permute.xlu0 %845 }
 0x616   :  { %v7104_v1 = vpop.eup %7103  ;;  %v868_v19 = vsel %vm11298_vm2, %v8012_v43, %v8112_v14  ;;  %v999_v43 = vsel %vm11297_vm14, %v8040_v32, %v978_v44  ;;  %v8135_v10 = vpop.permute.xlu2 %1114 }
 0x617   :  { %900 = vst [vmem:[#allocation4 + $0x68] sm:$0xf0] %v868_v19  ;;  %365 = vrot.lane.b32.xlu1 %v7104_v1, %s7155_s18  ;;  %v1133_v53 = vsel %vm11296_vm12, %v8097_v26, %v8135_v10 }
 0x618   :  { %1031 = vst [vmem:[#allocation4 + $0x270] sm:$0xf] %v999_v43  ;;  %v1436_v43 = vld [vmem:[%s7230_s23 + $0x40] sm:$0xf]  ;;  %s6884_s23 = sld [smem:[%s11286_s0 + %s7171_s20]]   ;;  %s7178_s20 = smov 15  }
 0x619   :  { %1165 = vst [vmem:[#allocation4 + $0x1c8] sm:$0xf0] %v1133_v53 }
 0x61a   :  { %1473 = vst [vmem:[#allocation1] ss:$2 sm:$0xff] %v1436_v43 }
 0x61d   :  { %v579_v58 = vpop.permute.xlu0 %578 }
 0x61e   :  { %v604_v12 = vsel %vm11300_vm1, %v7924_v3, %v579_v58  ;;  %v605_v39 = vsel %vm11300_vm1, %v579_v58, %v581_v6  ;;  %v1585_v18 = vld [vmem:[#allocation4 + $0x68] sm:$0xff]  ;;  %v8148_v6 = vpop.permute.xlu2 %716 }
 0x61f   :  { %636 = vst [vmem:[#allocation4 + $0x120] sm:$0xf0] %v604_v12  ;;  %718 = vrot.lane.b32.xlu1 %v11385_v30, %s7165_s1  ;;  %1906 = vmatpush.msra.mxu3 %v1585_v18 }
 0x620   :  { %637 = vst [vmem:[#allocation4 + $0xd8] sm:$0xf0] %v605_v39 }
 0x621   :  { %1907 = vmatpush.msra.mxu3 %v1569_v11 }
 0x622   :  { %6935 = vmatmul.msk.f32.vlgmr.msra.gmra.mxu3 %vm11292_vm3, %v7933_v52 }
 0x623   :  { %6942 = vmatpush.msk.msrb.mxu3 %vm11306_vm15, %v1637_v21 }
 0x625   :  { %v8128_v25 = vpop.permute.xlu0 %1242 }
 0x626   :  { %v1262_v3 = vsel %vm11295_vm11, %v8086_v7, %v8128_v25 }
 0x627   :  { %1294 = vst [vmem:[#allocation4 + $0x180] sm:$0xf] %v1262_v3  ;;  %851 = vrot.lane.b32.xlu1 %v11386_v20, %s7163_s29  ;;  %v1567_v49 = vld [vmem:[#allocation4 + $0xd8] sm:$0xff] }
 0x628   :  { %1867 = vmatpush.msra.mxu1 %v1567_v49  ;;  %v1474_v49 = vld.sshfl [vmem:[#allocation1] sm:$0xff pattern:$0x75316420] }
 0x629   :  { %6931 = vmatmul.msk.f32.vlgmr.msra.gmra.mxu1 %vm11292_vm3, %v7933_v52 }
 0x62d   :  { %v1500_v32 = vpop.permute.xlu0 %1499 }
 0x62e   :  { %v1521_v51 = vsel %vm11293_vm10, %v7957_v61, %v1500_v32  ;;  %v738_v61 = vsel %vm11299_vm0, %v8056_v56, %v8148_v6  ;;  %v1522_v63 = vsel %vm11293_vm10, %v1500_v32, %v1502_v27 }
 0x62f   :  { %1553 = vst [vmem:[#allocation4 + $0x150] sm:$0xf] %v1521_v51  ;;  %1108 = vrot.lane.b32.xlu1 %v11387_v22, %s7162_s28 }
 0x630   :  { %770 = vst [vmem:[#allocation4 + $0x238] sm:$0xf] %v738_v61 }
 0x631   :  { %1554 = vst [vmem:[#allocation4 + $0x20] sm:$0xf] %v1522_v63 }
 0x635   :  { %v982_v38 = vpop.permute.xlu0 %981 }
 0x636   :  { %v1001_v60 = vsel %vm11297_vm14, %v980_v48, %v982_v38  ;;  %v11391_v48 = vld [vmem:[#allocation32_spill] sm:$0xff] }
 0x637   :  { %1033 = vst [vmem:[#allocation4 + $0x38] sm:$0xf] %v1001_v60  ;;  %590 = vrot.lane.b32.xlu1 %v11388_v57, %s7164_s30 }
 0x638   :  { %v1635_v36 = vld [vmem:[#allocation4 + $0x20] sm:$0xf] }
 0x639   :  { %6938 = vmatpush.msk.msrb.mxu1 %vm11306_vm15, %v1635_v36 }
 0x63d   :  { %v1239_v46 = vpop.permute.xlu0 %1238 }
 0x63e   :  { %v1260_v56 = vsel %vm11295_vm11, %v7983_v37, %v1239_v46  ;;  %v1261_v17 = vsel %vm11295_vm11, %v1239_v46, %v8086_v7  ;;  %v1393_v7 = vsel %vm11294_vm13, %v1372_v28, %v8090_v0 }
 0x63f   :  { %1292 = vst [vmem:[#allocation4 + $0x278] sm:$0xf] %v1260_v56  ;;  %847 = vrot.lane.b32.xlu1 %v11389_v40, %s7163_s29 }
 0x640   :  { %1293 = vst [vmem:[#allocation4 + $0x210] sm:$0xf] %v1261_v17  ;;  %v11394_v17 = vld [vmem:[#allocation17_spill] sm:$0xff] }
 0x641   :  { %1425 = vst [vmem:[#allocation4 + $0x180] sm:$0xf0] %v1393_v7 }
 0x645   :  { %v8169_v37 = vpop.permute.xlu0 %1375 }
 0x646   :  { %v1394_v34 = vsel %vm11294_vm13, %v8090_v0, %v8169_v37  ;;  %v1111_v23 = vpop.permute.xlu1 %1110 }
 0x647   :  { %1426 = vst [vmem:[#allocation4 + $0x130] sm:$0xf0] %v1394_v34  ;;  %592 = vrot.lane.b32.xlu1 %v11390_v16, %s7164_s30  ;;  %v1619_v5 = vld [vmem:[#allocation4 + $0x210] sm:$0xff]  ;;  %v1132_v54 = vsel %vm11296_vm12, %v1111_v23, %v8097_v26 }
 0x648   :  { %1944 = vmatpush.msrb.mxu1 %v1619_v5  ;;  %v1620_v0 = vld [vmem:[#allocation4 + $0x180] sm:$0xff]  ;;  %1164 = vst [vmem:[#allocation4 + $0x38] sm:$0xf0] %v1132_v54 }
 0x649   :  { %1964 = vmatpush.msra.mxu2 %v1620_v0 }
 0x64d   :  { %v8182_v24 = vpop.permute.xlu0 %849 }
 0x64e   :  { %v1245_v1 = vpop.permute.xlu1 %1244 }
 0x64f   :  { %1377 = vrot.lane.b32.xlu1 %v11391_v48, %s7159_s25  ;;  %v1263_v19 = vsel %vm11295_vm11, %v8128_v25, %v1245_v1  ;;  %v1604_v58 = vld [vmem:[#allocation4 + $0x38] sm:$0xff] }
 0x650   :  { %1295 = vst [vmem:[#allocation4 + $0x130] sm:$0xf] %v1263_v19  ;;  %1965 = vmatpush.msra.mxu2 %v1604_v58  ;;  %v1618_v19 = vld [vmem:[#allocation4 + $0x278] sm:$0xff] }
 0x655   :  { %v8191_v55 = vpop.permute.xlu0 %983 }
 0x656   :  { %v1002_v59 = vsel %vm11297_vm14, %v982_v38, %v8191_v55  ;;  %v8220_v38 = vpop.permute.xlu2 %853 }
 0x657   :  { %1034 = vst [vmem:[#allocation4 + $0x1c8] sm:$0xf] %v1002_v59  ;;  %724 = vrot.lane.b32.xlu1 %v11392_v31, %s7165_s1  ;;  %v1621_v26 = vld [vmem:[#allocation4 + $0x130] sm:$0xff]  ;;  %v1630_v59 = vld [vmem:[#allocation4 + $0x128] sm:$0xf] }
 0x658   :  { %1984 = vmatpush.msrb.mxu3 %v1621_v26  ;;  %v1598_v31 = vld [vmem:[#allocation4 + $0x228] sm:$0xff] }
 0x65d   :  { %v589_v41 = vpop.permute.xlu0 %588 }
 0x665   :  { %v8202_v12 = vpop.permute.xlu0 %722 }
 0x666   :  { %v741_v39 = vsel %vm11299_vm0, %v8118_v29, %v8202_v12 }
 0x667   :  { %773 = vst [vmem:[#allocation4 + $0xb8] sm:$0xf] %v741_v39 }
 0x66d   :  { %v587_v18 = vpop.permute.xlu0 %586 }
 0x66e   :  { %v608_v30 = vsel %vm11300_vm1, %v585_v13, %v587_v18  ;;  %v609_v44 = vsel %vm11300_vm1, %v587_v18, %v589_v41 }
 0x66f   :  { %640 = vst [vmem:[#allocation4 + $0x108] sm:$0xf0] %v608_v30 }
 0x670   :  { %641 = vst [vmem:[#allocation4 + $0x220] sm:$0xf0] %v609_v44 }
 0x675   :  { %v1247_v45 = vpop.permute.xlu0 %1246 }
 0x676   :  { %v1264_v25 = vsel %vm11295_vm11, %v1245_v1, %v1247_v45  ;;  %v1634_v1 = vld [vmem:[#allocation4 + $0x150] sm:$0xf]  ;;  %v1570_v18 = vld [vmem:[#allocation4 + $0x108] sm:$0xff] }
 0x677   :  { %1296 = vst [vmem:[#allocation4 + $0x110] sm:$0xf] %v1264_v25  ;;  %v1571_v2 = vld [vmem:[#allocation4 + $0x220] sm:$0xff] }
 0x67d   :  { %v1117_v8 = vpop.permute.xlu0 %1116 }
 0x67e   :  { %v1134_v56 = vsel %vm11296_vm12, %v8135_v10, %v1117_v8  ;;  %v2013_v8 = vld [vmem:[%s6883_s9 + $0x8] sm:$0xff] }
 0x67f   :  { %1166 = vst [vmem:[#allocation4 + $0x18] sm:$0xf0] %v1134_v56  ;;  %vm2015_vm8 = vcmp.gt.f32.partialorder %v2013_v8, 0.5 }
 0x685   :  { %v595_v5 = vpop.permute.xlu0 %594 }
 0x689   :  { %v366_v3 = vpop.permute.xlu1 %365 }
 0x68a   :  { %v368_v20 = vmul.f32 %v366_v3, %v8006_v15  ;;  %v1605_v15 = vld [vmem:[#allocation4 + $0x1c8] sm:$0xff]  ;;  %v11302_v3 = vmov 0  }
 0x68b   :  { %1985 = vmatpush.msrb.mxu3 %v1605_v15  ;;  %7073 = vset.pattern.permute.xlu0 %v11302_v3 }
 0x68c   :  { %v370_v53 = vrot.slane %v368_v20, 4  ;;  %7074 = vset.pattern.permute.xlu1 %v11302_v3  ;;  %v2012_v20 = vld [vmem:[%s6883_s9] sm:$0xff]  ;;  %s6885_s9 = sld [smem:[%s11286_s0 + %s7173_s6]]   ;;  %s7180_s6 = smov 20  }
 0x68d   :  { %vm2014_vm9 = vcmp.gt.f32.partialorder %v2012_v20, 0.5 }
 0x68e   :  { %371 = vrot.lane.b32.xlu2 %v370_v53, %s7156_s19  ;;  %v2016_v53 = vsel %vm2014_vm9, 1, %v11302_v3 }
 0x68f   :  { %v2021_v56 = vperm.slane %v2016_v53, 3 }
 0x691   :  { %v719_v32 = vpop.permute.xlu1 %718 }
 0x692   :  { %v739_v51 = vsel %vm11299_vm0, %v8148_v6, %v719_v32  ;;  %v740_v22 = vsel %vm11299_vm0, %v719_v32, %v8118_v29  ;;  %v11393_v29 = vld [vmem:[#allocation20_spill] sm:$0xff]  ;;  %v2018_v32 = vperm.slane %v2016_v53, 0 }
 0x693   :  { %771 = vst [vmem:[#allocation4 + $0x188] sm:$0xf] %v739_v51  ;;  %v2019_v51 = vperm.slane %v2016_v53, 1 }
 0x694   :  { %772 = vst [vmem:[#allocation4 + $0x250] sm:$0xf] %v740_v22  ;;  %v8274_v22 = vpop.f32.mrf.mxu1  ;;  %vm8276_vm4 = vcmp.eq.s32.totalorder %v2018_v32, 1 }
 0x695   :  { %vm8282_vm6 = vcmp.eq.s32.totalorder %v2019_v51, 1  ;;  %v2050_v15 = vsel %vm8276_vm4, %v8274_v22, 0.0 }
 0x696   :  { %1507 = vrot.lane.b32.xlu2 %v1474_v49, %s7161_s27  ;;  %v8280_v49 = vpop.f32.mrf.mxu2 }
 0x699   :  { %v852_v4 = vpop.permute.xlu1 %851 }
 0x69a   :  { %v871_v61 = vsel %vm11298_vm2, %v8182_v24, %v852_v4  ;;  %v872_v6 = vsel %vm11298_vm2, %v852_v4, %v8220_v38 }
 0x69b   :  { %903 = vst [vmem:[#allocation4 + $0x250] sm:$0xf0] %v871_v61  ;;  %v2020_v61 = vperm.slane %v2016_v53, 2 }
 0x69c   :  { %904 = vst [vmem:[#allocation4 + $0xb8] sm:$0xf0] %v872_v6  ;;  %v8292_v6 = vpop.f32.mrf.mxu3 }
 0x69d   :  { %vm8294_vm7 = vcmp.eq.s32.totalorder %v2020_v61, 1 }
 0x69e   :  { %985 = vrot.lane.b32.xlu2 %v11393_v29, %s7160_s26 }
 0x6a1   :  { %v1109_v60 = vpop.permute.xlu1 %1108 }
 0x6a2   :  { %v1130_v57 = vsel %vm11296_vm12, %v7974_v9, %v1109_v60  ;;  %v1131_v27 = vsel %vm11296_vm12, %v1109_v60, %v1111_v23  ;;  %v1588_v63 = vld [vmem:[#allocation4 + $0x250] sm:$0xff]  ;;  %v1582_v23 = vld [vmem:[#allocation4 + $0x218] sm:$0xff] }
 0x6a3   :  { %1162 = vst [vmem:[#allocation4 + $0x270] sm:$0xf0] %v1130_v57  ;;  %1966 = vmatpush.msra.mxu2 %v1588_v63  ;;  %v1589_v46 = vld [vmem:[#allocation4 + $0xb8] sm:$0xff]  ;;  %v2066_v57 = vsel %vm11306_vm15, %v2050_v15, 0.0  ;;  %v2022_v63 = vperm.slane %v2016_v53, 4 }
 0x6a4   :  { %1163 = vst [vmem:[#allocation4 + $0x1e8] sm:$0xf0] %v1131_v27  ;;  %1986 = vmatpush.msrb.mxu3 %v1589_v46  ;;  %v2052_v46 = vsel %vm8294_vm7, %v8292_v6, 0.0 }
 0x6a5   :  { %vm8308_vm9 = vcmp.eq.s32.totalorder %v2022_v63, 1 }
 0x6a6   :  { %855 = vrot.lane.b32.xlu2 %v11394_v17, %s7163_s29  ;;  %v8305_v17 = vpop.f32.mrf.mxu1 }
 0x6a9   :  { %v591_v40 = vpop.permute.xlu1 %590 }
 0x6aa   :  { %v610_v13 = vsel %vm11300_vm1, %v589_v41, %v591_v40  ;;  %v1566_v41 = vld [vmem:[#allocation4 + $0x120] sm:$0xff]  ;;  %v1602_v58 = vld [vmem:[#allocation4 + $0x270] sm:$0xff] }
 0x6ab   :  { %642 = vst [vmem:[#allocation4 + $0xc0] sm:$0xf0] %v610_v13  ;;  %v1603_v9 = vld [vmem:[#allocation4 + $0x1e8] sm:$0xff] }
 0x6ac   :  { %1945 = vmatpush.msrb.mxu1 %v1603_v9  ;;  %v2069_v9 = vsel %vm11306_vm15, %v2052_v46, 0.0 }
 0x6b1   :  { %v848_v62 = vpop.permute.xlu1 %847 }
 0x6b2   :  { %v869_v36 = vsel %vm11298_vm2, %v8112_v14, %v848_v62  ;;  %v870_v47 = vsel %vm11298_vm2, %v848_v62, %v8182_v24  ;;  %v1572_v34 = vld [vmem:[#allocation4 + $0xc0] sm:$0xff] }
 0x6b3   :  { %901 = vst [vmem:[#allocation4 + $0x238] sm:$0xf0] %v869_v36  ;;  %1967 = vmatpush.msra.mxu2 %v1572_v34  ;;  %v8312_v36 = vpop.f32.mrf.mxu2 }
 0x6b4   :  { %902 = vst [vmem:[#allocation4 + $0x188] sm:$0xf0] %v870_v47  ;;  %6941 = vmatmul.msk.f32.vlgmr.msra.gmra.mxu2 %vm11292_vm3, %v7933_v52  ;;  %v2024_v47 = vperm.slane %v2016_v53, 6 }
 0x6b9   :  { %v593_v10 = vpop.permute.xlu1 %592 }
 0x6ba   :  { %v611_v16 = vsel %vm11300_vm1, %v591_v40, %v593_v10  ;;  %v612_v50 = vsel %vm11300_vm1, %v593_v10, %v595_v5  ;;  %v1586_v39 = vld [vmem:[#allocation4 + $0x238] sm:$0xff]  ;;  %v2023_v40 = vperm.slane %v2016_v53, 5 }
 0x6bb   :  { %643 = vst [vmem:[#allocation4 + $0x140] sm:$0xf0] %v611_v16  ;;  %v1587_v28 = vld [vmem:[#allocation4 + $0x188] sm:$0xff]  ;;  %v8323_v16 = vsel %vm2015_vm8, 1, %v11302_v3 }
 0x6bc   :  { %1946 = vmatpush.msrb.mxu1 %v1587_v28  ;;  %644 = vst [vmem:[#allocation4 + $0x200] sm:$0xf0] %v612_v50  ;;  %v2026_v5 = vperm.slane %v8323_v16, 0  ;;  %v2030_v20 = vperm.slane %v8323_v16, 4  ;;  %v2029_v15 = vperm.slane %v8323_v16, 3 }
 0x6be   :  { %1947 = vmatpush.msrb.mxu1 %v1571_v2  ;;  %v2054_v2 = vsel %vm8308_vm9, %v8305_v17, 0.0  ;;  %vm8352_vm8 = vcmp.eq.s32.totalorder %v2026_v5, 1 }
 0x6bf   :  { %6939 = vmatmul.msk.f32.vlgmr.msrb.gmra.mxu1 %vm11292_vm3, %v7933_v52 }
 0x6c1   :  { %v1378_v14 = vpop.permute.xlu1 %1377 }
 0x6c2   :  { %v1395_v7 = vsel %vm11294_vm13, %v8169_v37, %v1378_v14  ;;  %v1573_v48 = vld [vmem:[#allocation4 + $0x140] sm:$0xff]  ;;  %v8328_v14 = vpop.f32.mrf.mxu3 }
 0x6c3   :  { %1427 = vst [vmem:[#allocation4 + $0x110] sm:$0xf0] %v1395_v7  ;;  %1987 = vmatpush.msrb.mxu3 %v1573_v48  ;;  %v1614_v37 = vld [vmem:[#allocation4 + $0x100] sm:$0xff] }
 0x6c4   :  { %6943 = vmatmul.msk.f32.vlgmr.msrb.gmra.mxu3 %vm11292_vm3, %v7933_v52  ;;  %v1574_v25 = vld [vmem:[#allocation4 + $0x200] sm:$0xff] }
 0x6c9   :  { %v725_v11 = vpop.permute.xlu1 %724 }
 0x6ca   :  { %v742_v24 = vsel %vm11299_vm0, %v8202_v12, %v725_v11  ;;  %v1622_v30 = vld [vmem:[#allocation4 + $0x110] sm:$0xff] }
 0x6cb   :  { %774 = vst [vmem:[#allocation4 + $0x268] sm:$0xf] %v742_v24 }
 0x6e8   :  { %v372_v0 = vpop.permute.xlu2 %371 }
 0x6e9   :  { %6912 = vmatmul.msk.f32.vlgmr.msrb.gmra.mxu0 %vm11291_vm5, %v372_v0  ;;  %vm8314_vm5 = vcmp.eq.s32.totalorder %v2021_v56, 1  ;;  %v2073_v0 = vsel %vm11306_vm15, %v2054_v2, 0.0 }
 0x6ea   :  { %6928 = vmatpush.msk.msrb.mxu0 %vm11306_vm15, %v1630_v59 }
 0x6ec   :  { %1844 = vmatpush.msrb.mxu0 %v1614_v37 }
 0x6ee   :  { %1845 = vmatpush.msrb.mxu0 %v1598_v31  ;;  %v2025_v31 = vperm.slane %v2016_v53, 7 }
 0x6f0   :  { %1846 = vmatpush.msrb.mxu0 %v1582_v23  ;;  %v1508_v54 = vpop.permute.xlu2 %1507  ;;  %v2027_v23 = vperm.slane %v8323_v16, 1  ;;  %vm8360_vm13 = vcmp.eq.s32.totalorder %v2025_v31, 1 }
 0x6f1   :  { %v1525_v21 = vsel %vm11293_vm10, %v8186_v35, %v1508_v54  ;;  %6921 = vmatmul.msk.f32.vlgmr.msra.gmra.mxu0 %vm11292_vm3, %v7933_v52  ;;  %vm8332_vm10 = vcmp.eq.s32.totalorder %v2024_v47, 1  ;;  %v2032_v47 = vperm.slane %v8323_v16, 6 }
 0x6f2   :  { %1557 = vst [vmem:[#allocation4 + $0xb0] sm:$0xf] %v1525_v21  ;;  %1847 = vmatpush.msrb.mxu0 %v1566_v41  ;;  %v2056_v37 = vsel %vm8332_vm10, %v8328_v14, 0.0  ;;  %v8350_v21 = vpop.f32.mrf.mxu1  ;;  %vm8364_vm11 = vcmp.eq.s32.totalorder %v2027_v23, 1 }
 0x6f3   :  { %vm8427_vm1 = vcmp.eq.s32.totalorder %v2032_v47, 1 }
 0x6f4   :  { %6936 = vmatpush.msk.msra.mxu0 %vm11306_vm15, %v1634_v1 }
 0x6f6   :  { %1924 = vmatpush.msra.mxu0 %v1618_v19  ;;  %v2028_v19 = vperm.slane %v8323_v16, 2 }
 0x6f8   :  { %1925 = vmatpush.msra.mxu0 %v1602_v58  ;;  %v986_v12 = vpop.permute.xlu2 %985  ;;  %v2077_v58 = vsel %vm11306_vm15, %v2056_v37, 0.0  ;;  %vm8375_vm12 = vcmp.eq.s32.totalorder %v2028_v19, 1 }
 0x6f9   :  { %v1003_v26 = vsel %vm11297_vm14, %v8191_v55, %v986_v12  ;;  %v1638_v35 = vld [vmem:[#allocation4 + $0xb0] sm:$0xf]  ;;  %6929 = vmatmul.msk.f32.vlgmr.msrb.gmra.mxu0 %vm11292_vm3, %v7933_v52  ;;  %v8358_v12 = vpop.f32.mrf.mxu2  ;;  %vm8396_vm14 = vcmp.eq.s32.totalorder %v2030_v20, 1 }
 0x6fa   :  { %1926 = vmatpush.msra.mxu0 %v1586_v39  ;;  %1035 = vst [vmem:[#allocation4 + $0x18] sm:$0xf] %v1003_v26 }
 0x6fc   :  { %1927 = vmatpush.msra.mxu0 %v1570_v18  ;;  %v2058_v18 = vsel %vm8352_vm8, %v8350_v21, 0.0 }
 0x6fd   :  { %v2081_v32 = vsel %vm11306_vm15, %v2058_v18, 0.0 }
 0x6fe   :  { %6944 = vmatpush.msk.msrb.mxu0 %vm11306_vm15, %v1638_v35 }
 0x700   :  { %2004 = vmatpush.msrb.mxu0 %v1622_v30  ;;  %v856_v44 = vpop.permute.xlu2 %855 }
 0x701   :  { %v873_v43 = vsel %vm11298_vm2, %v8220_v38, %v856_v44  ;;  %v1606_v45 = vld [vmem:[#allocation4 + $0x18] sm:$0xff]  ;;  %6937 = vmatmul.msk.f32.vlgmr.msra.gmra.mxu0 %vm11292_vm3, %v7933_v52  ;;  %v2051_v38 = vsel %vm8282_vm6, %v8280_v49, 0.0  ;;  %vm8401_vm2 = vcmp.eq.s32.totalorder %v2029_v15, 1 }
 0x702   :  { %905 = vst [vmem:[#allocation4 + $0x268] sm:$0xf0] %v873_v43  ;;  %2005 = vmatpush.msrb.mxu0 %v1606_v45  ;;  %v2067_v27 = vsel %vm11306_vm15, %v2051_v38, 0.0  ;;  %v8373_v43 = vpop.f32.mrf.mxu3  ;;  %v2031_v38 = vperm.slane %v8323_v16, 5 }
 0x703   :  { %v2068_v13 = vadd.f32 %v2067_v27, %v2066_v57  ;;  %v2060_v61 = vsel %vm8375_vm12, %v8373_v43, 0.0 }
 0x704   :  { %v2085_v46 = vsel %vm11306_vm15, %v2060_v61, 0.0  ;;  %vm8407_vm0 = vcmp.eq.s32.totalorder %v2031_v38, 1 }
 0x705   :  { %v2070_v28 = vadd.f32 %v2069_v9, %v2068_v13  ;;  %v11422_v9 = vmov 0 }
 0x706   :  { %v11423_v9 = vsel %vm8407_vm0, 4294967295, %v11422_v9 }
 0x709   :  { %v1590_v55 = vld [vmem:[#allocation4 + $0x268] sm:$0xff] }
 0x70a   :  { %2006 = vmatpush.msrb.mxu0 %v1590_v55 }
 0x70c   :  { %2007 = vmatpush.msrb.mxu0 %v1574_v25  ;;  %v2059_v25 = vsel %vm8364_vm11, %v8358_v12, 0.0 }
 0x70d   :  { %6945 = vmatmul.msk.f32.vlgmr.msrb.gmra.mxu0 %vm11292_vm3, %v7933_v52  ;;  %vm8318_vm3 = vcmp.eq.s32.totalorder %v2023_v40, 1  ;;  %v2083_v57 = vsel %vm11306_vm15, %v2059_v25, 0.0 }
 0x70e   :  { %v2055_v48 = vsel %vm8318_vm3, %v8312_v36, 0.0 }
 0x70f   :  { %v2075_v54 = vsel %vm11306_vm15, %v2055_v48, 0.0 }
 0x737   :  { %v8405_v13 = vpop.f32.mrf.mxu2 }
 0x738   :  { %v2063_v5 = vsel %vm8407_vm0, %v8405_v13, 0.0 }
 0x739   :  { %v2091_v23 = vsel %vm11306_vm15, %v2063_v5, 0.0 }
 0x73c   :  { %v8394_v63 = vpop.f32.mrf.mxu1 }
 0x766   :  { %v8298_v60 = vpop.f32.mrf.mxu0 }
 0x767   :  { %11401 = vst [vmem:[#allocation21_spill] sm:$0xff] %v8298_v60 }
 0x76e   :  { %v8330_v7 = vpop.f32.mrf.mxu0 }
 0x76f   :  { %v2053_v24 = vsel %vm8314_vm5, %v8330_v7, 0.0 }
 0x770   :  { %v2071_v50 = vsel %vm11306_vm15, %v2053_v24, 0.0 }
 0x771   :  { %v2072_v59 = vadd.f32 %v2071_v50, %v2070_v28  ;;  %v2062_v28 = vsel %vm8396_vm14, %v8394_v63, 0.0 }
 0x773   :  { %v2074_v41 = vadd.f32 %v2073_v0, %v2072_v59  ;;  %v2089_v0 = vsel %vm11306_vm15, %v2062_v28, 0.0  ;;  %v8425_v59 = vpop.f32.mrf.mxu3 }
 0x774   :  { %v2064_v19 = vsel %vm8427_vm1, %v8425_v59, 0.0 }
 0x775   :  { %v2076_v39 = vadd.f32 %v2075_v54, %v2074_v41  ;;  %v2033_v54 = vperm.slane %v8323_v16, 7 }
 0x776   :  { %v8371_v44 = vpop.f32.mrf.mxu0 }
 0x777   :  { %v2078_v30 = vadd.f32 %v2077_v58, %v2076_v39  ;;  %v2057_v55 = vsel %vm8360_vm13, %v8371_v44, 0.0  ;;  %v2093_v39 = vsel %vm11306_vm15, %v2064_v19, 0.0  ;;  %vm8437_vm0 = vcmp.eq.s32.totalorder %v2033_v54, 1 }
 0x778   :  { %v2079_v53 = vsel %vm11306_vm15, %v2057_v55, 0.0 }
 0x779   :  { %v2080_v51 = vadd.f32 %v2079_v53, %v2078_v30 }
 0x77b   :  { %v2082_v27 = vadd.f32 %v2081_v32, %v2080_v51 }
 0x77d   :  { %v2084_v56 = vadd.f32 %v2083_v57, %v2082_v27 }
 0x77e   :  { %v8415_v24 = vpop.f32.mrf.mxu0 }
 0x77f   :  { %v2086_v2 = vadd.f32 %v2085_v46, %v2084_v56  ;;  %v2061_v48 = vsel %vm8401_vm2, %v8415_v24, 0.0 }
 0x780   :  { %v2087_v50 = vsel %vm11306_vm15, %v2061_v48, 0.0 }
 0x781   :  { %v2088_v31 = vadd.f32 %v2087_v50, %v2086_v2 }
 0x783   :  { %v2090_v41 = vadd.f32 %v2089_v0, %v2088_v31 }
 0x785   :  { %v2092_v58 = vadd.f32 %v2091_v23, %v2090_v41 }
 0x787   :  { %v2094_v55 = vadd.f32 %v2093_v39, %v2092_v58 }
 0x78a   :  { %v8441_v30 = vpop.f32.mrf.mxu0 }
 0x78b   :  { %v2065_v25 = vsel %vm8437_vm0, %v8441_v30, 0.0 }
 0x78c   :  { %v2095_v16 = vsel %vm11306_vm15, %v2065_v25, 0.0 }
 0x78d   :  { %v2096_v20 = vadd.f32 %v2095_v16, %v2094_v55 }
 0x78f   :  { %2097 = vadd.xlane.f32.xlu1 %v2096_v20 }
 0x802   :  { %v2098_v53 = vpop.xlane.xlu1 %2097 }
 0x803   :  { %v8447_v32 = vmul.f32 0.0006377551, %v2098_v53 }
 0x805   :  { %v2100_v51 = vsub.f32 %v8274_v22, %v8447_v32  ;;  %v2101_v61 = vsub.f32 %v8280_v49, %v8447_v32  ;;  %v2102_v15 = vsub.f32 %v8292_v6, %v8447_v32  ;;  %v2103_v38 = vsub.f32 %v8330_v7, %v8447_v32 }
 0x806   :  { %v2104_v46 = vsub.f32 %v8305_v17, %v8447_v32  ;;  %v2105_v47 = vsub.f32 %v8312_v36, %v8447_v32  ;;  %v2106_v5 = vsub.f32 %v8328_v14, %v8447_v32  ;;  %v2107_v54 = vsub.f32 %v8371_v44, %v8447_v32 }
 0x807   :  { %v2116_v57 = vmul.f32 %v2100_v51, %v2100_v51  ;;  %v2117_v27 = vmul.f32 %v2101_v61, %v2101_v61  ;;  %v2118_v56 = vmul.f32 %v2102_v15, %v2102_v15  ;;  %v2119_v28 = vmul.f32 %v2103_v38, %v2103_v38 }
 0x808   :  { %v2120_v50 = vmul.f32 %v2104_v46, %v2104_v46  ;;  %v2121_v41 = vmul.f32 %v2105_v47, %v2105_v47  ;;  %v2108_v58 = vsub.f32 %v8350_v21, %v8447_v32  ;;  %v2122_v39 = vmul.f32 %v2106_v5, %v2106_v5 }
 0x809   :  { %v2132_v2 = vsel %vm8276_vm4, %v2116_v57, 0.0  ;;  %v2133_v48 = vsel %vm8282_vm6, %v2117_v27, 0.0  ;;  %v2134_v0 = vsel %vm8294_vm7, %v2118_v56, 0.0  ;;  %v2135_v52 = vsel %vm8314_vm5, %v2119_v28, 0.0 }
 0x80a   :  { %v2148_v31 = vsel %vm11306_vm15, %v2132_v2, 0.0  ;;  %v2149_v23 = vsel %vm11306_vm15, %v2133_v48, 0.0  ;;  %v2151_v19 = vsel %vm11306_vm15, %v2134_v0, 0.0  ;;  %v2136_v29 = vsel %vm8308_vm9, %v2120_v50, 0.0 }
 0x80b   :  { %v2150_v4 = vadd.f32 %v2149_v23, %v2148_v31  ;;  %v2153_v25 = vsel %vm11306_vm15, %v2135_v52, 0.0  ;;  %v2109_v16 = vsub.f32 %v8358_v12, %v8447_v32  ;;  %v2123_v20 = vmul.f32 %v2107_v54, %v2107_v54 }
 0x80c   :  { %v2137_v34 = vsel %vm8318_vm3, %v2121_v41, 0.0  ;;  %v2155_v51 = vsel %vm11306_vm15, %v2136_v29, 0.0  ;;  %v2110_v61 = vsub.f32 %v8373_v43, %v8447_v32  ;;  %v2124_v15 = vmul.f32 %v2108_v58, %v2108_v58 }
 0x80d   :  { %v2152_v55 = vadd.f32 %v2151_v19, %v2150_v4  ;;  %v2138_v62 = vsel %vm8332_vm10, %v2122_v39, 0.0  ;;  %v2157_v57 = vsel %vm11306_vm15, %v2137_v34, 0.0  ;;  %v2111_v27 = vsub.f32 %v8415_v24, %v8447_v32 }
 0x80e   :  { %v2125_v46 = vmul.f32 %v2109_v16, %v2109_v16  ;;  %v2139_v10 = vsel %vm8360_vm13, %v2123_v20, 0.0  ;;  %v2159_v47 = vsel %vm11306_vm15, %v2138_v62, 0.0  ;;  %v2112_v28 = vsub.f32 %v8394_v63, %v8447_v32 }
 0x80f   :  { %v2154_v53 = vadd.f32 %v2153_v25, %v2152_v55  ;;  %v2126_v2 = vmul.f32 %v2110_v61, %v2110_v61  ;;  %v2140_v11 = vsel %vm8352_vm8, %v2124_v15, 0.0  ;;  %v2161_v5 = vsel %vm11306_vm15, %v2139_v10, 0.0 }
 0x810   :  { %v2113_v50 = vsub.f32 %v8405_v13, %v8447_v32  ;;  %v2127_v0 = vmul.f32 %v2111_v27, %v2111_v27  ;;  %v2141_v26 = vsel %vm8364_vm11, %v2125_v46, 0.0  ;;  %v2163_v23 = vsel %vm11306_vm15, %v2140_v11, 0.0 }
 0x811   :  { %v2156_v38 = vadd.f32 %v2155_v51, %v2154_v53  ;;  %v2114_v54 = vsub.f32 %v8425_v59, %v8447_v32  ;;  %v2128_v41 = vmul.f32 %v2112_v28, %v2112_v28  ;;  %v2142_v1 = vsel %vm8375_vm12, %v2126_v2, 0.0 }
 0x812   :  { %v2165_v4 = vsel %vm11306_vm15, %v2141_v26, 0.0  ;;  %v2115_v19 = vsub.f32 %v8441_v30, %v8447_v32  ;;  %v2129_v58 = vmul.f32 %v2113_v50, %v2113_v50  ;;  %v2143_v35 = vsel %vm8401_vm2, %v2127_v0, 0.0  ;;  %v2195_v26 = vld [vmem:[%s6882_s17] sm:$0xf]  ;;  %s10907_s17 = sld [smem:[%s11286_s0 + %s7177_s14]]  }
 0x813   :  { %v2158_v56 = vadd.f32 %v2157_v57, %v2156_v38  ;;  %v2167_v29 = vsel %vm11306_vm15, %v2142_v1, 0.0  ;;  %v2130_v55 = vmul.f32 %v2114_v54, %v2114_v54  ;;  %v2144_v25 = vsel %vm8396_vm14, %v2128_v41, 0.0 }
 0x814   :  { %v2169_v45 = vsel %vm11306_vm15, %v2143_v35, 0.0  ;;  %v2131_v20 = vmul.f32 %v2115_v19, %v2115_v19  ;;  %vm11428_vm5 = vnez %v11423_v9  ;;  %v2171_v51 = vsel %vm11306_vm15, %v2144_v25, 0.0 }
 0x815   :  { %v2160_v48 = vadd.f32 %v2159_v47, %v2158_v56  ;;  %v2145_v34 = vsel %vm11428_vm5, %v2129_v58, 0.0  ;;  %v2146_v40 = vsel %vm8427_vm1, %v2130_v55, 0.0 }
 0x816   :  { %v2173_v15 = vsel %vm11306_vm15, %v2145_v34, 0.0  ;;  %v2147_v8 = vsel %vm8437_vm0, %v2131_v20, 0.0  ;;  %v2175_v38 = vsel %vm11306_vm15, %v2146_v40, 0.0 }
 0x817   :  { %v2162_v31 = vadd.f32 %v2161_v5, %v2160_v48  ;;  %v2177_v27 = vsel %vm11306_vm15, %v2147_v8, 0.0  ;;  %v2182_v48 = vld [vmem:[%s6881_s13] sm:$0xf]  ;;  %s6886_s13 = sld [smem:[%s11286_s0 + %s7174_s10]]   ;;  %s7181_s10 = smov 19  }
 0x819   :  { %v2164_v52 = vadd.f32 %v2163_v23, %v2162_v31 }
 0x81b   :  { %v2166_v39 = vadd.f32 %v2165_v4, %v2164_v52 }
 0x81d   :  { %v2168_v16 = vadd.f32 %v2167_v29, %v2166_v39 }
 0x81f   :  { %v2170_v53 = vadd.f32 %v2169_v45, %v2168_v16 }
 0x821   :  { %v2172_v61 = vadd.f32 %v2171_v51, %v2170_v53 }
 0x823   :  { %v2174_v62 = vadd.f32 %v2173_v15, %v2172_v61 }
 0x825   :  { %v2176_v57 = vadd.f32 %v2175_v38, %v2174_v62 }
 0x827   :  { %v2178_v9 = vadd.f32 %v2177_v27, %v2176_v57 }
 0x829   :  { %2179 = vadd.xlane.f32.xlu2 %v2178_v9 }
 0x89c   :  { %v2180_v46 = vpop.xlane.xlu2 %2179 }
 0x89d   :  { %v2181_v10 = vmul.f32 0.0006377551, %v2180_v46 }
 0x89f   :  { %v2183_v56 = vadd.f32 1e-05, %v2181_v10 }
 0x8a1   :  { %7105 = vrsqrt.f32 %v2183_v56  ;;  %vm2190_vm11 = vweird.f32 %v2183_v56 }
 0x8a7   :  { %v7106_v37 = vpop.eup %7105 }
 0x8a8   :  { %v2185_v47 = vmul.f32 %v7106_v37, %v2183_v56  ;;  %vm2191_vm10 = vweird.f32 %v7106_v37 }
 0x8a9   :  { %vm2192_vm12 = vmor %vm2190_vm11, %vm2191_vm10 }
 0x8aa   :  { %v2186_v18 = vmul.f32 %v7106_v37, %v2185_v47 }
 0x8ac   :  { %v2187_v28 = vmul.f32 0.5, %v2186_v18 }
 0x8ae   :  { %v2188_v2 = vsub.f32 1.5, %v2187_v28 }
 0x8b0   :  { %v2189_v11 = vmul.f32 %v7106_v37, %v2188_v2 }
 0x8b2   :  { %v2193_v5 = vsel %vm2192_vm12, %v7106_v37, %v2189_v11 }
 0x8b3   :  { %v2194_v50 = vmul.f32 %v2193_v5, %v2182_v48 }
 0x8b5   :  { %2200 = vperm.xlu0 %7073, %v2194_v50   ;;  %v2196_v0 = vmul.f32 %v2194_v50, %v8447_v32 }
 0x8b7   :  { %v2197_v31 = vsub.f32 %v2195_v26, %v2196_v0 }
 0x8bd   :  { %2221 = vperm.xlu0 %7073, %v2197_v31  }
 0x927   :  { %v8536_v23 = vpop.permute.xlu0 %2200 }
 0x928   :  { %v2204_v41 = vmul.f32 %v8536_v23, %v8280_v49  ;;  %v2206_v1 = vmul.f32 %v8536_v23, %v8330_v7  ;;  %v2208_v52 = vmul.f32 %v8536_v23, %v8312_v36  ;;  %v2210_v4 = vmul.f32 %v8536_v23, %v8371_v44 }
 0x929   :  { %v2203_v58 = vmul.f32 %v8536_v23, %v8274_v22  ;;  %v2205_v35 = vmul.f32 %v8536_v23, %v8292_v6  ;;  %v2207_v36 = vmul.f32 %v8536_v23, %v8305_v17  ;;  %v2209_v44 = vmul.f32 %v8536_v23, %v8328_v14 }
 0x92a   :  { %v2211_v39 = vmul.f32 %v8536_v23, %v8350_v21  ;;  %v2212_v29 = vmul.f32 %v8536_v23, %v8358_v12  ;;  %v2213_v22 = vmul.f32 %v8536_v23, %v8373_v43  ;;  %v2214_v12 = vmul.f32 %v8536_v23, %v8415_v24 }
 0x92b   :  { %v2215_v43 = vmul.f32 %v8536_v23, %v8394_v63  ;;  %v2216_v20 = vmul.f32 %v8536_v23, %v8405_v13  ;;  %v2218_v63 = vmul.f32 %v8536_v23, %v8441_v30  ;;  %v2217_v5 = vmul.f32 %v8536_v23, %v8425_v59 }
 0x92f   :  { %v8538_v54 = vpop.permute.xlu0 %2221 }
 0x930   :  { %v2225_v32 = vadd.f32 %v8538_v54, %v2204_v41  ;;  %v2227_v19 = vadd.f32 %v8538_v54, %v2206_v1  ;;  %v2229_v49 = vadd.f32 %v8538_v54, %v2208_v52  ;;  %v2231_v7 = vadd.f32 %v8538_v54, %v2210_v4 }
 0x931   :  { %v2224_v6 = vadd.f32 %v8538_v54, %v2203_v58  ;;  %v2226_v55 = vadd.f32 %v8538_v54, %v2205_v35  ;;  %v2228_v25 = vadd.f32 %v8538_v54, %v2207_v36  ;;  %v2230_v17 = vadd.f32 %v8538_v54, %v2209_v44 }
 0x932   :  { %v2257_v16 = vmul.f32 0.2, %v2225_v32  ;;  %v2259_v45 = vmul.f32 0.2, %v2227_v19  ;;  %vm2241_vm13 = vcmp.gt.f32.partialorder %v2225_v32, 0.0  ;;  %vm2243_vm14 = vcmp.gt.f32.partialorder %v2227_v19, 0.0 }
 0x933   :  { %v2261_v14 = vmul.f32 0.2, %v2229_v49  ;;  %v2263_v21 = vmul.f32 0.2, %v2231_v7  ;;  %vm2245_vm0 = vcmp.gt.f32.partialorder %v2229_v49, 0.0  ;;  %vm2247_vm1 = vcmp.gt.f32.partialorder %v2231_v7, 0.0 }
 0x934   :  { %v2233_v34 = vadd.f32 %v8538_v54, %v2212_v29  ;;  %vm2240_vm2 = vcmp.gt.f32.partialorder %v2224_v6, 0.0  ;;  %v2256_v53 = vmul.f32 0.2, %v2224_v6  ;;  %vm2242_vm3 = vcmp.gt.f32.partialorder %v2226_v55, 0.0 }
 0x935   :  { %v2258_v51 = vmul.f32 0.2, %v2226_v55  ;;  %v2273_v40 = vsel %vm2241_vm13, %v2225_v32, %v2257_v16  ;;  %v2275_v61 = vsel %vm2243_vm14, %v2227_v19, %v2259_v45  ;;  %v2260_v15 = vmul.f32 0.2, %v2228_v25 }
 0x936   :  { %v2262_v8 = vmul.f32 0.2, %v2230_v17  ;;  %v2277_v62 = vsel %vm2245_vm0, %v2229_v49, %v2261_v14  ;;  %v2279_v24 = vsel %vm2247_vm1, %v2231_v7, %v2263_v21  ;;  %v2235_v38 = vadd.f32 %v8538_v54, %v2214_v12 }
 0x937   :  { %vm2244_vm4 = vcmp.gt.f32.partialorder %v2228_v25, 0.0  ;;  %vm2246_vm6 = vcmp.gt.f32.partialorder %v2230_v17, 0.0  ;;  %v2237_v13 = vadd.f32 %v8538_v54, %v2216_v20  ;;  %v2272_v57 = vsel %vm2240_vm2, %v2224_v6, %v2256_v53 }
 0x938   :  { %v2304_v27 = vrot.slane %v2273_v40, 4  ;;  %v2305_v9 = vrot.slane %v2275_v61, 4  ;;  %v2265_v46 = vmul.f32 0.2, %v2233_v34  ;;  %v2274_v10 = vsel %vm2242_vm3, %v2226_v55, %v2258_v51 }
 0x939   :  { %v2306_v56 = vrot.slane %v2277_v62, 4  ;;  %v2307_v37 = vrot.slane %v2279_v24, 4  ;;  %v2276_v47 = vsel %vm2244_vm4, %v2228_v25, %v2260_v15  ;;  %v2278_v18 = vsel %vm2246_vm6, %v2230_v17, %v2262_v8 }
 0x93a   :  { %v8583_v28 = vsel %vm11306_vm15, %v2272_v57, %v2304_v27  ;;  %v8586_v30 = vsel %vm11306_vm15, %v2274_v10, %v2305_v9  ;;  %v2239_v2 = vadd.f32 %v8538_v54, %v2218_v63  ;;  %vm2249_vm7 = vcmp.gt.f32.partialorder %v2233_v34, 0.0 }
 0x93b   :  { %v8590_v11 = vsel %vm11306_vm15, %v2276_v47, %v2306_v56  ;;  %v8593_v48 = vsel %vm11306_vm15, %v2278_v18, %v2307_v37  ;;  %2352 = vst [vmem:[#allocation1] ss:$2 sm:$0xff] %v8583_v28  ;;  %v2232_v50 = vadd.f32 %v8538_v54, %v2211_v39  ;;  %v2234_v0 = vadd.f32 %v8538_v54, %v2213_v22  ;;  %v2419_v47 = vld [vmem:[#allocation2 + $0x40] sm:$0xf] }
 0x93c   :  { %2354 = vst [vmem:[#allocation1 + $0x10] ss:$2 sm:$0xff] %v8586_v30  ;;  %v2236_v26 = vadd.f32 %v8538_v54, %v2215_v43  ;;  %v2267_v31 = vmul.f32 0.2, %v2235_v38  ;;  %v2269_v41 = vmul.f32 0.2, %v2237_v13  ;;  %v2238_v1 = vadd.f32 %v8538_v54, %v2217_v5 }
 0x93d   :  { %2356 = vst [vmem:[#allocation1 + $0x20] ss:$2 sm:$0xff] %v8590_v11  ;;  %vm2251_vm9 = vcmp.gt.f32.partialorder %v2235_v38, 0.0  ;;  %vm2253_vm8 = vcmp.gt.f32.partialorder %v2237_v13, 0.0  ;;  %v2281_v52 = vsel %vm2249_vm7, %v2233_v34, %v2265_v46  ;;  %v2271_v59 = vmul.f32 0.2, %v2239_v2 }
 0x93e   :  { %2358 = vst [vmem:[#allocation1 + $0x30] ss:$2 sm:$0xff] %v8593_v48  ;;  %vm2248_vm5 = vcmp.gt.f32.partialorder %v2232_v50, 0.0  ;;  %vm2250_vm10 = vcmp.gt.f32.partialorder %v2234_v0, 0.0  ;;  %vm2255_vm11 = vcmp.gt.f32.partialorder %v2239_v2, 0.0  ;;  %vm2252_vm12 = vcmp.gt.f32.partialorder %v2236_v26, 0.0 }
 0x93f   :  { %v2264_v23 = vmul.f32 0.2, %v2232_v50  ;;  %v2283_v4 = vsel %vm2251_vm9, %v2235_v38, %v2267_v31  ;;  %v2285_v32 = vsel %vm2253_vm8, %v2237_v13, %v2269_v41  ;;  %v2308_v19 = vrot.slane %v2281_v52, 4 }
 0x940   :  { %v2266_v58 = vmul.f32 0.2, %v2234_v0  ;;  %v2268_v35 = vmul.f32 0.2, %v2236_v26  ;;  %v2270_v49 = vmul.f32 0.2, %v2238_v1  ;;  %v2287_v7 = vsel %vm2255_vm11, %v2239_v2, %v2271_v59 }
 0x941   :  { %vm2254_vm13 = vcmp.gt.f32.partialorder %v2238_v1, 0.0  ;;  %v2280_v44 = vsel %vm2248_vm5, %v2232_v50, %v2264_v23  ;;  %v2309_v39 = vrot.slane %v2283_v4, 4  ;;  %v2310_v29 = vrot.slane %v2285_v32, 4 }
 0x942   :  { %v2359_v36 = vld.sshfl [vmem:[#allocation1] sm:$0xff pattern:$0x75316420]  ;;  %v2360_v54 = vld.sshfl [vmem:[#allocation1 + $0x8] sm:$0xff pattern:$0x75316420]  ;;  %v8606_v6 = vsel %vm11306_vm15, %v2280_v44, %v2308_v19  ;;  %v2282_v45 = vsel %vm2250_vm10, %v2234_v0, %v2266_v58  ;;  %v2284_v21 = vsel %vm2252_vm12, %v2236_v26, %v2268_v35  ;;  %v2286_v20 = vsel %vm2254_vm13, %v2238_v1, %v2270_v49 }
 0x943   :  { %v2361_v22 = vld.sshfl [vmem:[#allocation1 + $0x10] sm:$0xff pattern:$0x75316420]  ;;  %v2362_v55 = vld.sshfl [vmem:[#allocation1 + $0x18] sm:$0xff pattern:$0x75316420]  ;;  %v8612_v12 = vsel %vm11306_vm15, %v2282_v45, %v2309_v39  ;;  %v8616_v34 = vsel %vm11306_vm15, %v2284_v21, %v2310_v29 }
 0x944   :  { %v2363_v25 = vld.sshfl [vmem:[#allocation1 + $0x20] sm:$0xff pattern:$0x75316420]  ;;  %v2311_v17 = vrot.slane %v2287_v7, 4  ;;  %2367 = vst [vmem:[#allocation1] ss:$2 sm:$0xff] %v8606_v6 }
 0x945   :  { %v2364_v16 = vld.sshfl [vmem:[#allocation1 + $0x28] sm:$0xff pattern:$0x75316420]  ;;  %v2365_v14 = vld.sshfl [vmem:[#allocation1 + $0x30] sm:$0xff pattern:$0x75316420] }
 0x946   :  { %2395 = vst [vmem:[#allocation4 + $0xc8] sm:$0xf] %v2359_v36  ;;  %v2366_v43 = vld.sshfl [vmem:[#allocation1 + $0x38] sm:$0xff pattern:$0x75316420]  ;;  %v8620_v53 = vsel %vm11306_vm15, %v2286_v20, %v2311_v17  ;;  %vm11446_vm14 = vcmask 1039360  }
 0x947   :  { %2396 = vst [vmem:[#allocation4 + $0x8] sm:$0xf] %v2360_v54  ;;  %v2549_v39 = vld [vmem:[#allocation2 + $0x40] sm:$0xf]  ;;  %vm11447_vm0 = vmmov %vm11446_vm14  ;;  %vm11458_vm10 = vcmask 1031168  }
 0x948   :  { %2368 = vst [vmem:[#allocation1 + $0x10] ss:$2 sm:$0xff] %v8612_v12  ;;  %vm11448_vm1 = vmmov %vm11447_vm0 }
 0x949   :  { %2369 = vst [vmem:[#allocation1 + $0x20] ss:$2 sm:$0xff] %v8616_v34  ;;  %vm11450_vm2 = vmmov %vm11447_vm0 }
 0x94a   :  { %2370 = vst [vmem:[#allocation1 + $0x30] ss:$2 sm:$0xff] %v8620_v53  ;;  %vm11451_vm3 = vmmov %vm11447_vm0 }
 0x94b   :  { %2397 = vst [vmem:[#allocation4 + $0x40] sm:$0xf] %v2361_v22  ;;  %v2371_v61 = vld.sshfl [vmem:[#allocation1] sm:$0xff pattern:$0x75316420]  ;;  %vm11452_vm4 = vmmov %vm11447_vm0 }
 0x94c   :  { %2398 = vst [vmem:[#allocation4 + $0x28] sm:$0xf] %v2362_v55  ;;  %v2372_v15 = vld.sshfl [vmem:[#allocation1 + $0x8] sm:$0xff pattern:$0x75316420]  ;;  %vm11453_vm6 = vmmov %vm11447_vm0 }
 0x94d   :  { %2399 = vst [vmem:[#allocation4 + $0xe8] sm:$0xf] %v2363_v25  ;;  %vm11454_vm7 = vmmov %vm11447_vm0 }
 0x94e   :  { %2400 = vst [vmem:[#allocation4 + $0xf0] sm:$0xf] %v2364_v16  ;;  %vm11455_vm9 = vmmov %vm11447_vm0 }
 0x94f   :  { %v2373_v51 = vld.sshfl [vmem:[#allocation1 + $0x10] sm:$0xff pattern:$0x75316420]  ;;  %v2374_v40 = vld.sshfl [vmem:[#allocation1 + $0x18] sm:$0xff pattern:$0x75316420]  ;;  %vm11456_vm8 = vmmov %vm11447_vm0 }
 0x950   :  { %2432 = vst [vmem:[#allocation1 + $0x11] ss:$2 sm:$0xff] %v8586_v30  ;;  %v2375_v24 = vld.sshfl [vmem:[#allocation1 + $0x20] sm:$0xff pattern:$0x75316420]  ;;  %vm11457_vm5 = vmmov %vm11447_vm0 }
 0x951   :  { %2401 = vst [vmem:[#allocation4 + $0x70] sm:$0xf] %v2365_v14  ;;  %v2376_v63 = vld.sshfl [vmem:[#allocation1 + $0x28] sm:$0xff pattern:$0x75316420]  ;;  %vm11459_vm11 = vmmov %vm11458_vm10 }
 0x952   :  { %2402 = vst [vmem:[#allocation4 + $0x120] sm:$0xf] %v2366_v43  ;;  %v2377_v38 = vld.sshfl [vmem:[#allocation1 + $0x30] sm:$0xff pattern:$0x75316420]  ;;  %vm11460_vm12 = vmmov %vm11458_vm10 }
 0x953   :  { %2405 = vst [vmem:[#allocation4 + $0x158] sm:$0xf] %v2373_v51  ;;  %v2378_v13 = vld.sshfl [vmem:[#allocation1 + $0x38] sm:$0xff pattern:$0x75316420]  ;;  %vm11461_vm13 = vmmov %vm11458_vm10 }
 0x954   :  { %2406 = vst [vmem:[#allocation4 + $0x108] sm:$0xf] %v2374_v40 }
 0x955   :  { %2403 = vst [vmem:[#allocation4 + $0xd8] sm:$0xf] %v2371_v61 }
 0x956   :  { %2404 = vst [vmem:[#allocation4 + $0x148] sm:$0xf] %v2372_v15 }
 0x957   :  { %v2440_v8 = vld.sshfl [vmem:[#allocation1 + $0x18] sm:$0xff pattern:$0x75316420]  ;;  %v2439_v62 = vld.sshfl [vmem:[#allocation1 + $0x10] sm:$0xff pattern:$0x75316420] }
 0x958   :  { %2465 = vrot.lane.b32.xlu0 %v2440_v8, %s7164_s30  ;;  %2463 = vrot.lane.b32.xlu1 %v2439_v62, %s7164_s30  ;;  %2430 = vst [vmem:[#allocation1 + $0x1] ss:$2 sm:$0xff] %v8583_v28 }
 0x959   :  { %2446 = vst [vmem:[#allocation1 + $0x11] ss:$2 sm:$0xff] %v8612_v12 }
 0x95a   :  { %2407 = vst [vmem:[#allocation4 + $0x220] sm:$0xf] %v2375_v24 }
 0x95b   :  { %2408 = vst [vmem:[#allocation4 + $0xc0] sm:$0xf] %v2376_v63 }
 0x95c   :  { %2409 = vst [vmem:[#allocation4 + $0x140] sm:$0xf] %v2377_v38 }
 0x95d   :  { %2410 = vst [vmem:[#allocation4 + $0x200] sm:$0xf] %v2378_v13 }
 0x95e   :  { %2434 = vst [vmem:[#allocation1 + $0x21] ss:$2 sm:$0xff] %v8590_v11 }
 0x95f   :  { %v2438_v57 = vld.sshfl [vmem:[#allocation1 + $0x8] sm:$0xff pattern:$0x75316420]  ;;  %2436 = vst [vmem:[#allocation1 + $0x31] ss:$2 sm:$0xff] %v8593_v48 }
 0x960   :  { %2461 = vrot.lane.b32.xlu2 %v2438_v57, %s7164_s30  ;;  %v2437_v27 = vld.sshfl [vmem:[#allocation1] sm:$0xff pattern:$0x75316420]  ;;  %v2451_v9 = vld.sshfl [vmem:[#allocation1 + $0x10] sm:$0xff pattern:$0x75316420] }
 0x961   :  { %2459 = vrot.lane.b32.xlu0 %v2437_v27, %s7164_s30  ;;  %2445 = vst [vmem:[#allocation1 + $0x1] ss:$2 sm:$0xff] %v8606_v6  ;;  %v2452_v46 = vld.sshfl [vmem:[#allocation1 + $0x18] sm:$0xff pattern:$0x75316420] }
 0x962   :  { %2561 = vst [vmem:[#allocation1 + $0x10] ss:$2 sm:$0xff] %v8586_v30 }
 0x965   :  { %v2442_v10 = vld.sshfl [vmem:[#allocation1 + $0x28] sm:$0xff pattern:$0x75316420]  ;;  %v2441_v56 = vld.sshfl [vmem:[#allocation1 + $0x20] sm:$0xff pattern:$0x75316420] }
 0x966   :  { %2469 = vrot.lane.b32.xlu1 %v2442_v10, %s7164_s30  ;;  %2447 = vst [vmem:[#allocation1 + $0x21] ss:$2 sm:$0xff] %v8616_v34  ;;  %v2444_v37 = vld.sshfl [vmem:[#allocation1 + $0x38] sm:$0xff pattern:$0x75316420] }
 0x967   :  { %v2443_v18 = vld.sshfl [vmem:[#allocation1 + $0x30] sm:$0xff pattern:$0x75316420] }
 0x968   :  { %2467 = vrot.lane.b32.xlu2 %v2441_v56, %s7164_s30  ;;  %2448 = vst [vmem:[#allocation1 + $0x31] ss:$2 sm:$0xff] %v8620_v53  ;;  %v2450_v2 = vld.sshfl [vmem:[#allocation1 + $0x8] sm:$0xff pattern:$0x75316420] }
 0x969   :  { %2471 = vrot.lane.b32.xlu0 %v2443_v18, %s7164_s30  ;;  %v2449_v5 = vld.sshfl [vmem:[#allocation1] sm:$0xff pattern:$0x75316420]  ;;  %v2568_v50 = vld.sshfl [vmem:[#allocation1 + $0x10] sm:$0xff pattern:$0x75316420] }
 0x96a   :  { %2457 = vst [vmem:[#allocation1 + $0x1] ss:$2 sm:$0xff] %v2419_v47  ;;  %v2569_v0 = vld.sshfl [vmem:[#allocation1 + $0x18] sm:$0xff pattern:$0x75316420] }
 0x96b   :  { %2575 = vst [vmem:[#allocation1 + $0x10] ss:$2 sm:$0xff] %v8612_v12 }
 0x96d   :  { %v8641_v26 = vld.sshfl [vmem:[#allocation1 + $0x20] sm:$0xff pattern:$0x75316420]  ;;  %v8643_v31 = vld.sshfl [vmem:[#allocation1 + $0x28] sm:$0xff pattern:$0x75316420] }
 0x96e   :  { %11429 = vst [vmem:[#allocation9_spill] sm:$0xff] %v8641_v26  ;;  %2473 = vrot.lane.b32.xlu1 %v2444_v37, %s7164_s30 }
 0x96f   :  { %11430 = vst [vmem:[#allocation16_spill] sm:$0xff] %v8643_v31  ;;  %v8647_v41 = vld.sshfl [vmem:[#allocation1 + $0x30] sm:$0xff pattern:$0x75316420] }
 0x970   :  { %2563 = vst [vmem:[#allocation1 + $0x20] ss:$2 sm:$0xff] %v8590_v11  ;;  %v8649_v1 = vld.sshfl [vmem:[#allocation1 + $0x38] sm:$0xff pattern:$0x75316420]  ;;  %2477 = vrot.lane.b32.xlu2 %v2450_v2, %s7164_s30 }
 0x971   :  { %11431 = vst [vmem:[#allocation18_spill] sm:$0xff] %v8647_v41  ;;  %2475 = vrot.lane.b32.xlu0 %v2449_v5, %s7164_s30  ;;  %v8654_v52 = vld.sshfl [vmem:[#allocation1] sm:$0xff pattern:$0x75316420] }
 0x972   :  { %11432 = vst [vmem:[#allocation22_spill] sm:$0xff] %v8649_v1  ;;  %v2580_v59 = vld.sshfl [vmem:[#allocation1 + $0x10] sm:$0xff pattern:$0x75316420] }
 0x973   :  { %2565 = vst [vmem:[#allocation1 + $0x30] ss:$2 sm:$0xff] %v8593_v48  ;;  %v8657_v23 = vld.sshfl [vmem:[#allocation1 + $0x18] sm:$0xff pattern:$0x75316420] }
 0x974   :  { %11433 = vst [vmem:[#allocation13_spill] sm:$0xff] %v8654_v52 }
 0x975   :  { %2559 = vst [vmem:[#allocation1] ss:$2 sm:$0xff] %v8583_v28 }
 0x976   :  { %2691 = vst [vmem:[#allocation1 + $0x11] ss:$2 sm:$0xff] %v8586_v30  ;;  %2479 = vrot.lane.b32.xlu1 %v2451_v9, %s7164_s30  ;;  %v2678_v9 = vld [vmem:[#allocation2 + $0x40] sm:$0xf] }
 0x977   :  { %v2570_v4 = vld.sshfl [vmem:[#allocation1 + $0x20] sm:$0xff pattern:$0x75316420]  ;;  %v2571_v32 = vld.sshfl [vmem:[#allocation1 + $0x28] sm:$0xff pattern:$0x75316420] }
 0x978   :  { %2576 = vst [vmem:[#allocation1 + $0x20] ss:$2 sm:$0xff] %v8616_v34  ;;  %2481 = vrot.lane.b32.xlu2 %v2452_v46, %s7164_s30 }
 0x979   :  { %2592 = vrot.lane.b32.xlu0 %v2568_v50, %s7165_s1 }
 0x97a   :  { %v2573_v19 = vld.sshfl [vmem:[#allocation1 + $0x38] sm:$0xff pattern:$0x75316420]  ;;  %v2572_v58 = vld.sshfl [vmem:[#allocation1 + $0x30] sm:$0xff pattern:$0x75316420] }
 0x97b   :  { %2577 = vst [vmem:[#allocation1 + $0x30] ss:$2 sm:$0xff] %v8620_v53 }
 0x97c   :  { %v2567_v35 = vld.sshfl [vmem:[#allocation1 + $0x8] sm:$0xff pattern:$0x75316420]  ;;  %v2566_v49 = vld.sshfl [vmem:[#allocation1] sm:$0xff pattern:$0x75316420] }
 0x97d   :  { %2574 = vst [vmem:[#allocation1] ss:$2 sm:$0xff] %v8606_v6  ;;  %v2698_v7 = vld.sshfl [vmem:[#allocation1 + $0x10] sm:$0xff pattern:$0x75316420] }
 0x97e   :  { %v8666_v36 = vld.sshfl [vmem:[#allocation1 + $0x18] sm:$0xff pattern:$0x75316420]  ;;  %2602 = vrot.lane.b32.xlu1 %v2573_v19, %s7165_s1 }
 0x97f   :  { %2705 = vst [vmem:[#allocation1 + $0x11] ss:$2 sm:$0xff] %v8612_v12  ;;  %v8669_v54 = vld.sshfl [vmem:[#allocation1 + $0x20] sm:$0xff pattern:$0x75316420] }
 0x980   :  { %11434 = vst [vmem:[#allocation15_spill] sm:$0xff] %v8669_v54  ;;  %v8671_v44 = vld.sshfl [vmem:[#allocation1 + $0x28] sm:$0xff pattern:$0x75316420]  ;;  %2600 = vrot.lane.b32.xlu2 %v2572_v58, %s7165_s1 }
 0x981   :  { %2693 = vst [vmem:[#allocation1 + $0x21] ss:$2 sm:$0xff] %v8590_v11  ;;  %2594 = vrot.lane.b32.xlu0 %v2569_v0, %s7165_s1 }
 0x982   :  { %v2584_v29 = vld.sshfl [vmem:[#allocation1 + $0x30] sm:$0xff pattern:$0x75316420]  ;;  %v8675_v22 = vld.sshfl [vmem:[#allocation1 + $0x38] sm:$0xff pattern:$0x75316420] }
 0x983   :  { %11435 = vst [vmem:[#allocation19_spill] sm:$0xff] %v8675_v22 }
 0x984   :  { %2695 = vst [vmem:[#allocation1 + $0x31] ss:$2 sm:$0xff] %v8593_v48  ;;  %v8680_v55 = vld.sshfl [vmem:[#allocation1 + $0x8] sm:$0xff pattern:$0x75316420] }
 0x985   :  { %v8682_v25 = vld.sshfl [vmem:[#allocation1] sm:$0xff pattern:$0x75316420] }
 0x986   :  { %2586 = vst [vmem:[#allocation1] ss:$2 sm:$0xff] %v2549_v39  ;;  %v8684_v17 = vld.sshfl [vmem:[#allocation1 + $0x10] sm:$0xff pattern:$0x75316420]  ;;  %2590 = vrot.lane.b32.xlu1 %v2567_v35, %s7165_s1 }
 0x987   :  { %v8686_v16 = vld.sshfl [vmem:[#allocation1 + $0x18] sm:$0xff pattern:$0x75316420] }
 0x988   :  { %2820 = vst [vmem:[#allocation1 + $0x10] ss:$2 sm:$0xff] %v8586_v30  ;;  %v2701_v45 = vld.sshfl [vmem:[#allocation1 + $0x28] sm:$0xff pattern:$0x75316420]  ;;  %2596 = vrot.lane.b32.xlu2 %v2570_v4, %s7165_s1 }
 0x989   :  { %v2700_v14 = vld.sshfl [vmem:[#allocation1 + $0x20] sm:$0xff pattern:$0x75316420]  ;;  %2598 = vrot.lane.b32.xlu0 %v2571_v32, %s7165_s1 }
 0x98a   :  { %2706 = vst [vmem:[#allocation1 + $0x21] ss:$2 sm:$0xff] %v8616_v34 }
 0x98b   :  { %v2702_v21 = vld.sshfl [vmem:[#allocation1 + $0x30] sm:$0xff pattern:$0x75316420]  ;;  %v8691_v43 = vld.sshfl [vmem:[#allocation1 + $0x38] sm:$0xff pattern:$0x75316420] }
 0x98c   :  { %2707 = vst [vmem:[#allocation1 + $0x31] ss:$2 sm:$0xff] %v8620_v53 }
 0x98d   :  { %v8696_v20 = vld.sshfl [vmem:[#allocation1] sm:$0xff pattern:$0x75316420] }
 0x98e   :  { %11436 = vst [vmem:[#allocation36_spill] sm:$0xff] %v8696_v20  ;;  %2616 = vrot.lane.b32.xlu1 %v2584_v29, %s7165_s1 }
 0x98f   :  { %2689 = vst [vmem:[#allocation1 + $0x1] ss:$2 sm:$0xff] %v8583_v28  ;;  %v8699_v51 = vld.sshfl [vmem:[#allocation1 + $0x10] sm:$0xff pattern:$0x75316420] }
 0x990   :  { %v8701_v40 = vld.sshfl [vmem:[#allocation1 + $0x18] sm:$0xff pattern:$0x75316420]  ;;  %2588 = vrot.lane.b32.xlu2 %v2566_v49, %s7165_s1 }
 0x991   :  { %2834 = vst [vmem:[#allocation1 + $0x10] ss:$2 sm:$0xff] %v8612_v12  ;;  %v8704_v61 = vld.sshfl [vmem:[#allocation1 + $0x20] sm:$0xff pattern:$0x75316420]  ;;  %2608 = vrot.lane.b32.xlu0 %v2580_v59, %s7165_s1 }
 0x992   :  { %11437 = vst [vmem:[#allocation8_spill] sm:$0xff] %v8704_v61  ;;  %v8706_v15 = vld.sshfl [vmem:[#allocation1 + $0x28] sm:$0xff pattern:$0x75316420] }
 0x993   :  { %2822 = vst [vmem:[#allocation1 + $0x20] ss:$2 sm:$0xff] %v8590_v11  ;;  %v8710_v8 = vld.sshfl [vmem:[#allocation1 + $0x30] sm:$0xff pattern:$0x75316420] }
 0x994   :  { %v8712_v62 = vld.sshfl [vmem:[#allocation1 + $0x38] sm:$0xff pattern:$0x75316420] }
 0x995   :  { %11438 = vst [vmem:[#allocation37_spill] sm:$0xff] %v8712_v62 }
 0x996   :  { %2824 = vst [vmem:[#allocation1 + $0x30] ss:$2 sm:$0xff] %v8593_v48  ;;  %v8717_v24 = vld.sshfl [vmem:[#allocation1 + $0x8] sm:$0xff pattern:$0x75316420]  ;;  %2722 = vrot.lane.b32.xlu1 %v2698_v7, %s7163_s29 }
 0x997   :  { %v8719_v63 = vld.sshfl [vmem:[#allocation1] sm:$0xff pattern:$0x75316420] }
 0x998   :  { %2704 = vst [vmem:[#allocation1 + $0x1] ss:$2 sm:$0xff] %v8606_v6  ;;  %v8722_v38 = vld.sshfl [vmem:[#allocation1 + $0x10] sm:$0xff pattern:$0x75316420]  ;;  %2610 = vrot.lane.b32.xlu2 %v8657_v23, %s7165_s1 }
 0x999   :  { %v8724_v13 = vld.sshfl [vmem:[#allocation1 + $0x18] sm:$0xff pattern:$0x75316420]  ;;  %2730 = vrot.lane.b32.xlu0 %v2702_v21, %s7163_s29 }
 0x99a   :  { %2950 = vst [vmem:[#allocation1 + $0x11] ss:$2 sm:$0xff] %v8586_v30  ;;  %v8727_v57 = vld.sshfl [vmem:[#allocation1 + $0x28] sm:$0xff pattern:$0x75316420] }
 0x99b   :  { %v8729_v27 = vld.sshfl [vmem:[#allocation1 + $0x20] sm:$0xff pattern:$0x75316420] }
 0x99c   :  { %2835 = vst [vmem:[#allocation1 + $0x20] ss:$2 sm:$0xff] %v8616_v34 }
 0x99d   :  { %v8733_v46 = vld.sshfl [vmem:[#allocation1 + $0x30] sm:$0xff pattern:$0x75316420]  ;;  %v8735_v10 = vld.sshfl [vmem:[#allocation1 + $0x38] sm:$0xff pattern:$0x75316420] }
 0x99e   :  { %2836 = vst [vmem:[#allocation1 + $0x30] ss:$2 sm:$0xff] %v8620_v53  ;;  %2728 = vrot.lane.b32.xlu1 %v2701_v45, %s7163_s29 }
 0x99f   :  { %v8741_v56 = vld.sshfl [vmem:[#allocation1] sm:$0xff pattern:$0x75316420]  ;;  %v8743_v37 = vld.sshfl [vmem:[#allocation1 + $0x8] sm:$0xff pattern:$0x75316420] }
 0x9a0   :  { %2716 = vst [vmem:[#allocation1 + $0x1] ss:$2 sm:$0xff] %v2678_v9  ;;  %2614 = vrot.lane.b32.xlu2 %v8671_v44, %s7165_s1 }
 0x9a1   :  { %v8745_v47 = vld.sshfl [vmem:[#allocation1 + $0x10] sm:$0xff pattern:$0x75316420]  ;;  %v8747_v18 = vld.sshfl [vmem:[#allocation1 + $0x18] sm:$0xff pattern:$0x75316420]  ;;  %2726 = vrot.lane.b32.xlu0 %v2700_v14, %s7163_s29 }
 0x9a2   :  { %2964 = vst [vmem:[#allocation1 + $0x11] ss:$2 sm:$0xff] %v8612_v12 }
 0x9a3   :  { %v8750_v2 = vld.sshfl [vmem:[#allocation1 + $0x20] sm:$0xff pattern:$0x75316420]  ;;  %v8752_v5 = vld.sshfl [vmem:[#allocation1 + $0x28] sm:$0xff pattern:$0x75316420] }
 0x9a4   :  { %2952 = vst [vmem:[#allocation1 + $0x21] ss:$2 sm:$0xff] %v8590_v11 }
 0x9a5   :  { %v8756_v50 = vld.sshfl [vmem:[#allocation1 + $0x30] sm:$0xff pattern:$0x75316420]  ;;  %v8758_v0 = vld.sshfl [vmem:[#allocation1 + $0x38] sm:$0xff pattern:$0x75316420] }
 0x9a6   :  { %2954 = vst [vmem:[#allocation1 + $0x31] ss:$2 sm:$0xff] %v8593_v48  ;;  %2606 = vrot.lane.b32.xlu1 %v8680_v55, %s7165_s1  ;;  %v2808_v55 = vld [vmem:[#allocation2 + $0x40] sm:$0xf] }
 0x9a7   :  { %v8764_v59 = vld.sshfl [vmem:[#allocation1] sm:$0xff pattern:$0x75316420] }
 0x9a8   :  { %11439 = vst [vmem:[#allocation44_spill] sm:$0xff] %v8764_v59  ;;  %2724 = vrot.lane.b32.xlu2 %v8666_v36, %s7163_s29 }
 0x9a9   :  { %2818 = vst [vmem:[#allocation1] ss:$2 sm:$0xff] %v8583_v28  ;;  %v8767_v23 = vld.sshfl [vmem:[#allocation1 + $0x10] sm:$0xff pattern:$0x75316420]  ;;  %2604 = vrot.lane.b32.xlu0 %v8682_v25, %s7165_s1 }
 0x9aa   :  { %v8769_v4 = vld.sshfl [vmem:[#allocation1 + $0x18] sm:$0xff pattern:$0x75316420] }
 0x9ab   :  { %3079 = vst [vmem:[#allocation1 + $0x10] ss:$2 sm:$0xff] %v8586_v30  ;;  %v8772_v32 = vld.sshfl [vmem:[#allocation1 + $0x28] sm:$0xff pattern:$0x75316420] }
 0x9ac   :  { %v8774_v19 = vld.sshfl [vmem:[#allocation1 + $0x20] sm:$0xff pattern:$0x75316420] }
 0x9ad   :  { %2965 = vst [vmem:[#allocation1 + $0x21] ss:$2 sm:$0xff] %v8616_v34  ;;  %v8779_v58 = vld.sshfl [vmem:[#allocation1 + $0x30] sm:$0xff pattern:$0x75316420] }
 0x9ae   :  { %v8781_v35 = vld.sshfl [vmem:[#allocation1 + $0x38] sm:$0xff pattern:$0x75316420]  ;;  %2738 = vrot.lane.b32.xlu1 %v8684_v17, %s7163_s29 }
 0x9af   :  { %2966 = vst [vmem:[#allocation1 + $0x31] ss:$2 sm:$0xff] %v8620_v53 }
 0x9b0   :  { %v8788_v49 = vld.sshfl [vmem:[#allocation1] sm:$0xff pattern:$0x75316420]  ;;  %v8790_v7 = vld.sshfl [vmem:[#allocation1 + $0x8] sm:$0xff pattern:$0x75316420]  ;;  %2732 = vrot.lane.b32.xlu2 %v8691_v43, %s7163_s29 }
 0x9b1   :  { %2833 = vst [vmem:[#allocation1] ss:$2 sm:$0xff] %v8606_v6  ;;  %2740 = vrot.lane.b32.xlu0 %v8686_v16, %s7163_s29 }
 0x9b2   :  { %v8793_v44 = vld.sshfl [vmem:[#allocation1 + $0x10] sm:$0xff pattern:$0x75316420]  ;;  %v8795_v39 = vld.sshfl [vmem:[#allocation1 + $0x18] sm:$0xff pattern:$0x75316420] }
 0x9b3   :  { %3093 = vst [vmem:[#allocation1 + $0x10] ss:$2 sm:$0xff] %v8612_v12 }
 0x9b4   :  { %v8798_v29 = vld.sshfl [vmem:[#allocation1 + $0x20] sm:$0xff pattern:$0x75316420]  ;;  %v8800_v36 = vld.sshfl [vmem:[#allocation1 + $0x28] sm:$0xff pattern:$0x75316420] }
 0x9b5   :  { %3081 = vst [vmem:[#allocation1 + $0x20] ss:$2 sm:$0xff] %v8590_v11 }
 0x9b6   :  { %v8805_v25 = vld.sshfl [vmem:[#allocation1 + $0x30] sm:$0xff pattern:$0x75316420]  ;;  %v8807_v45 = vld.sshfl [vmem:[#allocation1 + $0x38] sm:$0xff pattern:$0x75316420]  ;;  %2851 = vrot.lane.b32.xlu1 %v8699_v51, %s7160_s26 }
 0x9b7   :  { %3083 = vst [vmem:[#allocation1 + $0x30] ss:$2 sm:$0xff] %v8593_v48 }
 0x9b8   :  { %v8814_v14 = vld.sshfl [vmem:[#allocation1 + $0x8] sm:$0xff pattern:$0x75316420]  ;;  %v8816_v21 = vld.sshfl [vmem:[#allocation1] sm:$0xff pattern:$0x75316420]  ;;  %2746 = vrot.lane.b32.xlu2 %v8710_v8, %s7163_s29 }
 0x9b9   :  { %2845 = vst [vmem:[#allocation1] ss:$2 sm:$0xff] %v2808_v55  ;;  %2744 = vrot.lane.b32.xlu0 %v8706_v15, %s7163_s29 }
 0x9ba   :  { %v8818_v17 = vld.sshfl [vmem:[#allocation1 + $0x18] sm:$0xff pattern:$0x75316420]  ;;  %v8820_v9 = vld.sshfl [vmem:[#allocation1 + $0x10] sm:$0xff pattern:$0x75316420]  ;;  %v2462_v33 = vpop.permute.xlu2 %2461 }
 0x9bb   :  { %3209 = vst [vmem:[#allocation1 + $0x11] ss:$2 sm:$0xff] %v8586_v30 }
 0x9bc   :  { %v8823_v3 = vld.sshfl [vmem:[#allocation1 + $0x28] sm:$0xff pattern:$0x75316420]  ;;  %v8825_v42 = vld.sshfl [vmem:[#allocation1 + $0x20] sm:$0xff pattern:$0x75316420] }
 0x9bd   :  { %3094 = vst [vmem:[#allocation1 + $0x20] ss:$2 sm:$0xff] %v8616_v34 }
 0x9be   :  { %v8830_v16 = vld.sshfl [vmem:[#allocation1 + $0x30] sm:$0xff pattern:$0x75316420]  ;;  %v8832_v43 = vld.sshfl [vmem:[#allocation1 + $0x38] sm:$0xff pattern:$0x75316420]  ;;  %2718 = vrot.lane.b32.xlu1 %v8719_v63, %s7163_s29 }
 0x9bf   :  { %3095 = vst [vmem:[#allocation1 + $0x30] ss:$2 sm:$0xff] %v8620_v53 }
 0x9c0   :  { %v8839_v55 = vld.sshfl [vmem:[#allocation1] sm:$0xff pattern:$0x75316420]  ;;  %2720 = vrot.lane.b32.xlu2 %v8717_v24, %s7163_s29 }
 0x9c1   :  { %11440 = vst [vmem:[#allocation35_spill] sm:$0xff] %v8839_v55  ;;  %2853 = vrot.lane.b32.xlu0 %v8701_v40, %s7160_s26  ;;  %v2937_v55 = vld [vmem:[#allocation2 + $0x40] sm:$0xf] }
 0x9c2   :  { %2948 = vst [vmem:[#allocation1 + $0x1] ss:$2 sm:$0xff] %v8583_v28  ;;  %v8842_v51 = vld.sshfl [vmem:[#allocation1 + $0x10] sm:$0xff pattern:$0x75316420]  ;;  %v2468_v22 = vpop.permute.xlu2 %2467 }
 0x9c3   :  { %v8844_v60 = vld.sshfl [vmem:[#allocation1 + $0x18] sm:$0xff pattern:$0x75316420] }
 0x9c4   :  { %3223 = vst [vmem:[#allocation1 + $0x11] ss:$2 sm:$0xff] %v8612_v12  ;;  %v8847_v52 = vld.sshfl [vmem:[#allocation1 + $0x20] sm:$0xff pattern:$0x75316420] }
 0x9c5   :  { %v8849_v26 = vld.sshfl [vmem:[#allocation1 + $0x28] sm:$0xff pattern:$0x75316420] }
 0x9c6   :  { %3211 = vst [vmem:[#allocation1 + $0x21] ss:$2 sm:$0xff] %v8590_v11  ;;  %v8854_v15 = vld.sshfl [vmem:[#allocation1 + $0x30] sm:$0xff pattern:$0x75316420]  ;;  %2859 = vrot.lane.b32.xlu1 %v8733_v46, %s7160_s26 }
 0x9c7   :  { %v8856_v8 = vld.sshfl [vmem:[#allocation1 + $0x38] sm:$0xff pattern:$0x75316420] }
 0x9c8   :  { %3213 = vst [vmem:[#allocation1 + $0x31] ss:$2 sm:$0xff] %v8593_v48  ;;  %2857 = vrot.lane.b32.xlu2 %v8727_v57, %s7160_s26 }
 0x9c9   :  { %v8863_v20 = vld.sshfl [vmem:[#allocation1 + $0x8] sm:$0xff pattern:$0x75316420]  ;;  %v8865_v59 = vld.sshfl [vmem:[#allocation1] sm:$0xff pattern:$0x75316420]  ;;  %2875 = vrot.lane.b32.xlu0 %v8756_v50, %s7160_s26 }
 0x9ca   :  { %11441 = vst [vmem:[#allocation43_spill] sm:$0xff] %v8865_v59  ;;  %v2464_v62 = vpop.permute.xlu1 %2463  ;;  %v8893_v46 = vpop.permute.xlu2 %2477 }
 0x9cb   :  { %2963 = vst [vmem:[#allocation1 + $0x1] ss:$2 sm:$0xff] %v8606_v6  ;;  %v8868_v63 = vld.sshfl [vmem:[#allocation1 + $0x18] sm:$0xff pattern:$0x75316420] }
 0x9cc   :  { %11442 = vst [vmem:[#allocation14_spill] sm:$0xff] %v8868_v63  ;;  %v8870_v31 = vld.sshfl [vmem:[#allocation1 + $0x10] sm:$0xff pattern:$0x75316420] }
 0x9cd   :  { %11443 = vst [vmem:[#allocation47_spill] sm:$0xff] %v8870_v31  ;;  %v8873_v1 = vld.sshfl [vmem:[#allocation1 + $0x20] sm:$0xff pattern:$0x75316420] }
 0x9ce   :  { %3338 = vst [vmem:[#allocation1 + $0x10] ss:$2 sm:$0xff] %v8586_v30  ;;  %v8875_v24 = vld.sshfl [vmem:[#allocation1 + $0x28] sm:$0xff pattern:$0x75316420]  ;;  %v2466_v30 = vpop.permute.xlu0 %2465  ;;  %2861 = vrot.lane.b32.xlu1 %v8735_v10, %s7160_s26 }
 0x9cf   :  { %3224 = vst [vmem:[#allocation1 + $0x21] ss:$2 sm:$0xff] %v8616_v34  ;;  %v8880_v40 = vld.sshfl [vmem:[#allocation1 + $0x38] sm:$0xff pattern:$0x75316420]  ;;  %v2496_v31 = vsel %vm11446_vm14, %v2466_v30, %v2468_v22  ;;  %v2495_v63 = vsel %vm11448_vm1, %v2464_v62, %v2466_v30  ;;  %vm11462_vm14 = vmmov %vm11458_vm10 }
 0x9d0   :  { %v8882_v61 = vld.sshfl [vmem:[#allocation1 + $0x30] sm:$0xff pattern:$0x75316420]  ;;  %2528 = vst [vmem:[#allocation4 + $0x28] sm:$0xf0] %v2496_v31  ;;  %2855 = vrot.lane.b32.xlu2 %v8729_v27, %s7160_s26 }
 0x9d1   :  { %11444 = vst [vmem:[#allocation46_spill] sm:$0xff] %v8882_v61  ;;  %v2494_v61 = vsel %vm11447_vm0, %v2462_v33, %v2464_v62  ;;  %2877 = vrot.lane.b32.xlu0 %v8758_v0, %s7160_s26  ;;  %vm11463_vm0 = vmmov %vm11458_vm10 }
 0x9d2   :  { %3225 = vst [vmem:[#allocation1 + $0x31] ss:$2 sm:$0xff] %v8620_v53  ;;  %v8889_v54 = vld.sshfl [vmem:[#allocation1 + $0x8] sm:$0xff pattern:$0x75316420]  ;;  %v8921_v10 = vpop.permute.xlu2 %2481  ;;  %vm11464_vm1 = vmmov %vm11463_vm0 }
 0x9d3   :  { %v8891_v41 = vld.sshfl [vmem:[#allocation1] sm:$0xff pattern:$0x75316420]  ;;  %2526 = vst [vmem:[#allocation4 + $0x8] sm:$0xf0] %v2494_v61 }
 0x9d4   :  { %11445 = vst [vmem:[#allocation28_spill] sm:$0xff] %v8891_v41 }
 0x9d5   :  { %2975 = vst [vmem:[#allocation1 + $0x1] ss:$2 sm:$0xff] %v2937_v55  ;;  %v8898_v57 = vld.sshfl [vmem:[#allocation1 + $0x10] sm:$0xff pattern:$0x75316420] }
 0x9d6   :  { %v8900_v50 = vld.sshfl [vmem:[#allocation1 + $0x18] sm:$0xff pattern:$0x75316420]  ;;  %2527 = vst [vmem:[#allocation4 + $0x40] sm:$0xf0] %v2495_v63  ;;  %2734 = vrot.lane.b32.xlu1 %v8741_v56, %s7163_s29 }
 0x9d7   :  { %v8902_v59 = vld.sshfl [vmem:[#allocation1 + $0x20] sm:$0xff pattern:$0x75316420]  ;;  %v8906_v41 = vld.sshfl [vmem:[#allocation1 + $0x28] sm:$0xff pattern:$0x75316420] }
 0x9d8   :  { %3352 = vst [vmem:[#allocation1 + $0x10] ss:$2 sm:$0xff] %v8612_v12  ;;  %v2460_v12 = vpop.permute.xlu0 %2459  ;;  %2867 = vrot.lane.b32.xlu2 %v8722_v38, %s7160_s26 }
 0x9d9   :  { %3340 = vst [vmem:[#allocation1 + $0x20] ss:$2 sm:$0xff] %v8590_v11  ;;  %v8910_v62 = vld.sshfl [vmem:[#allocation1 + $0x30] sm:$0xff pattern:$0x75316420]  ;;  %v2493_v11 = vsel %vm11450_vm2, %v2460_v12, %v2462_v33  ;;  %2987 = vrot.lane.b32.xlu0 %v8772_v32, %s7162_s28  ;;  %vm11465_vm2 = vmmov %vm11463_vm0 }
 0x9da   :  { %v8914_v31 = vld.sshfl [vmem:[#allocation1 + $0x38] sm:$0xff pattern:$0x75316420]  ;;  %2525 = vst [vmem:[#allocation4 + $0xc8] sm:$0xf0] %v2493_v11  ;;  %v2601_v30 = vpop.permute.xlu2 %2600 }
 0x9db   :  { %3342 = vst [vmem:[#allocation1 + $0x30] ss:$2 sm:$0xff] %v8593_v48  ;;  %v2470_v48 = vpop.permute.xlu1 %2469 }
 0x9dc   :  { %v8919_v61 = vld.sshfl [vmem:[#allocation1] sm:$0xff pattern:$0x75316420]  ;;  %v2497_v33 = vsel %vm11451_vm3, %v2468_v22, %v2470_v48  ;;  %vm11466_vm3 = vmmov %vm11463_vm0 }
 0x9dd   :  { %11449 = vst [vmem:[#allocation31_spill] sm:$0xff] %v8919_v61 }
 0x9de   :  { %3077 = vst [vmem:[#allocation1] ss:$2 sm:$0xff] %v8583_v28  ;;  %2873 = vrot.lane.b32.xlu1 %v8752_v5, %s7160_s26 }
 0x9df   :  { %2529 = vst [vmem:[#allocation4 + $0xe8] sm:$0xf0] %v2497_v33 }
 0x9e0   :  { %v8927_v27 = vld.sshfl [vmem:[#allocation1 + $0x28] sm:$0xff pattern:$0x75316420]  ;;  %v8929_v55 = vld.sshfl [vmem:[#allocation1 + $0x20] sm:$0xff pattern:$0x75316420]  ;;  %v2472_v12 = vpop.permute.xlu0 %2471  ;;  %2736 = vrot.lane.b32.xlu2 %v8743_v37, %s7163_s29 }
 0x9e1   :  { %3353 = vst [vmem:[#allocation1 + $0x20] ss:$2 sm:$0xff] %v8616_v34  ;;  %v2498_v38 = vsel %vm11452_vm4, %v2470_v48, %v2472_v12  ;;  %2985 = vrot.lane.b32.xlu0 %v8774_v19, %s7162_s28  ;;  %vm11467_vm4 = vcmask 801792  }
 0x9e2   :  { %v8934_v0 = vld.sshfl [vmem:[#allocation1 + $0x30] sm:$0xff pattern:$0x75316420]  ;;  %v8936_v63 = vld.sshfl [vmem:[#allocation1 + $0x38] sm:$0xff pattern:$0x75316420]  ;;  %v2597_v11 = vpop.permute.xlu2 %2596 }
 0x9e3   :  { %3354 = vst [vmem:[#allocation1 + $0x30] ss:$2 sm:$0xff] %v8620_v53  ;;  %v2474_v22 = vpop.permute.xlu1 %2473  ;;  %v3067_v53 = vld [vmem:[#allocation2 + $0x40] sm:$0xf] }
 0x9e4   :  { %2530 = vst [vmem:[#allocation4 + $0xf0] sm:$0xf0] %v2498_v38  ;;  %v2499_v32 = vsel %vm11453_vm6, %v2472_v12, %v2474_v22  ;;  %vm11468_vm6 = vmmov %vm11467_vm4 }
 0x9e5   :  { %v8942_v56 = vld.sshfl [vmem:[#allocation1 + $0x8] sm:$0xff pattern:$0x75316420]  ;;  %v8944_v34 = vld.sshfl [vmem:[#allocation1] sm:$0xff pattern:$0x75316420] }
 0x9e6   :  { %3092 = vst [vmem:[#allocation1] ss:$2 sm:$0xff] %v8606_v6  ;;  %2871 = vrot.lane.b32.xlu1 %v8750_v2, %s7160_s26 }
 0x9e7   :  { %2531 = vst [vmem:[#allocation4 + $0x70] sm:$0xf0] %v2499_v32 }
 0x9e8   :  { %v2476_v61 = vpop.permute.xlu0 %2475  ;;  %2869 = vrot.lane.b32.xlu2 %v8724_v13, %s7160_s26 }
 0x9e9   :  { %v2500_v38 = vsel %vm11454_vm7, %v2474_v22, %v2476_v61  ;;  %v2501_v5 = vsel %vm11455_vm9, %v2476_v61, %v8893_v46  ;;  %2997 = vrot.lane.b32.xlu0 %v8767_v23, %s7162_s28  ;;  %vm11469_vm7 = vmmov %vm11467_vm4 }
 0x9ea   :  { %2532 = vst [vmem:[#allocation4 + $0x120] sm:$0xf0] %v2500_v38  ;;  %v2589_v61 = vpop.permute.xlu2 %2588  ;;  %vm11470_vm9 = vmmov %vm11467_vm4 }
 0x9eb   :  { %2533 = vst [vmem:[#allocation4 + $0xd8] sm:$0xf0] %v2501_v5  ;;  %v2480_v37 = vpop.permute.xlu1 %2479 }
 0x9ec   :  { %v2502_v19 = vsel %vm11456_vm8, %v8893_v46, %v2480_v37  ;;  %v2503_v12 = vsel %vm11457_vm5, %v2480_v37, %v8921_v10  ;;  %vm11471_vm8 = vmmov %vm11467_vm4 }
 0x9ed   :  { %v8955_v33 = vld.sshfl [vmem:[#allocation1] sm:$0xff pattern:$0x75316420]  ;;  %v8957_v48 = vld.sshfl [vmem:[#allocation1 + $0x8] sm:$0xff pattern:$0x75316420]  ;;  %vm11472_vm5 = vmmov %vm11463_vm0 }
 0x9ee   :  { %3104 = vst [vmem:[#allocation1] ss:$2 sm:$0xff] %v3067_v53  ;;  %2847 = vrot.lane.b32.xlu1 %v8788_v49, %s7160_s26 }
 0x9ef   :  { %2534 = vst [vmem:[#allocation4 + $0x148] sm:$0xf0] %v2502_v19 }
 0x9f0   :  { %2535 = vst [vmem:[#allocation4 + $0x158] sm:$0xf0] %v2503_v12  ;;  %v2593_v22 = vpop.permute.xlu0 %2592  ;;  %2981 = vrot.lane.b32.xlu2 %v8745_v47, %s7162_s28  ;;  %v3196_v12 = vld [vmem:[#allocation2 + $0x40] sm:$0xf] }
 0x9f1   :  { %2999 = vrot.lane.b32.xlu0 %v8769_v4, %s7162_s28 }
 0x9f2   :  { %v8985_v23 = vpop.permute.xlu2 %2610 }
 0x9f3   :  { %v8979_v13 = vpop.permute.xlu1 %2602 }
 0x9f4   :  { %v2628_v2 = vsel %vm11458_vm10, %v2601_v30, %v8979_v13  ;;  %vm11473_vm10 = vmmov %vm11467_vm4 }
 0x9f5   :  { %v8972_v53 = vld.sshfl [vmem:[#allocation1] sm:$0xff pattern:$0x75316420]  ;;  %2660 = vst [vmem:[#allocation4 + $0x248] sm:$0xf] %v2628_v2 }
 0x9f6   :  { %3207 = vst [vmem:[#allocation1 + $0x1] ss:$2 sm:$0xff] %v8583_v28  ;;  %3005 = vrot.lane.b32.xlu1 %v8805_v25, %s7162_s28 }
 0x9f8   :  { %v2595_v46 = vpop.permute.xlu0 %2594  ;;  %2983 = vrot.lane.b32.xlu2 %v8747_v18, %s7162_s28 }
 0x9f9   :  { %v2624_v49 = vsel %vm11459_vm11, %v2593_v22, %v2595_v46  ;;  %v2625_v47 = vsel %vm11460_vm12, %v2595_v46, %v2597_v11  ;;  %3116 = vrot.lane.b32.xlu0 %v8823_v3, %s7158_s24  ;;  %vm11474_vm11 = vmmov %vm11463_vm0 }
 0x9fa   :  { %2656 = vst [vmem:[#allocation4 + $0x10] sm:$0xf] %v2624_v49  ;;  %v9002_v19 = vpop.permute.xlu2 %2614  ;;  %vm11475_vm12 = vmmov %vm11463_vm0 }
 0x9fb   :  { %2657 = vst [vmem:[#allocation4 + $0x160] sm:$0xf] %v2625_v47  ;;  %v2591_v4 = vpop.permute.xlu1 %2590 }
 0x9fc   :  { %v2622_v5 = vsel %vm11461_vm13, %v2589_v61, %v2591_v4  ;;  %v2623_v37 = vsel %vm11462_vm14, %v2591_v4, %v2593_v22  ;;  %vm11476_vm13 = vmmov %vm11467_vm4  ;;  %vm11477_vm14 = vcmask 793600  }
 0x9fd   :  { %v8987_v32 = vld.sshfl [vmem:[#allocation1] sm:$0xff pattern:$0x75316420]  ;;  %v8989_v38 = vld.sshfl [vmem:[#allocation1 + $0x8] sm:$0xff pattern:$0x75316420] }
 0x9fe   :  { %3222 = vst [vmem:[#allocation1 + $0x1] ss:$2 sm:$0xff] %v8606_v6  ;;  %3007 = vrot.lane.b32.xlu1 %v8807_v45, %s7162_s28 }
 0x9ff   :  { %2654 = vst [vmem:[#allocation4 + $0x80] sm:$0xf] %v2622_v5 }
 0xa00   :  { %2655 = vst [vmem:[#allocation4 + $0x30] sm:$0xf] %v2623_v37  ;;  %v2599_v2 = vpop.permute.xlu0 %2598  ;;  %2989 = vrot.lane.b32.xlu2 %v8779_v58, %s7162_s28 }
 0xa01   :  { %v2626_v25 = vsel %vm11463_vm0, %v2597_v11, %v2599_v2  ;;  %v2627_v46 = vsel %vm11464_vm1, %v2599_v2, %v2601_v30  ;;  %3120 = vrot.lane.b32.xlu0 %v8832_v43, %s7158_s24  ;;  %vm11478_vm0 = vmmov %vm11467_vm4 }
 0xa02   :  { %2658 = vst [vmem:[#allocation4 + $0x1d8] sm:$0xf] %v2626_v25  ;;  %v2725_v30 = vpop.permute.xlu2 %2724  ;;  %v3326_v25 = vld [vmem:[#allocation2 + $0x40] sm:$0xf]  ;;  %vm11479_vm1 = vmmov %vm11478_vm0 }
 0xa03   :  { %2659 = vst [vmem:[#allocation4 + $0x1a0] sm:$0xf] %v2627_v46  ;;  %v9014_v3 = vpop.permute.xlu1 %2616 }
 0xa04   :  { %v2635_v11 = vsel %vm11465_vm2, %v9002_v19, %v9014_v3  ;;  %vm11480_vm2 = vmmov %vm11477_vm14 }
 0xa05   :  { %v9006_v49 = vld.sshfl [vmem:[#allocation1 + $0x8] sm:$0xff pattern:$0x75316420]  ;;  %v9008_v18 = vld.sshfl [vmem:[#allocation1] sm:$0xff pattern:$0x75316420] }
 0xa06   :  { %3234 = vst [vmem:[#allocation1 + $0x1] ss:$2 sm:$0xff] %v3196_v12  ;;  %3110 = vrot.lane.b32.xlu1 %v8793_v44, %s7158_s24 }
 0xa07   :  { %2667 = vst [vmem:[#allocation4 + $0x250] sm:$0xf] %v2635_v11 }
 0xa08   :  { %v2609_v61 = vpop.permute.xlu0 %2608  ;;  %2991 = vrot.lane.b32.xlu2 %v8781_v35, %s7162_s28 }
 0xa09   :  { %v2632_v45 = vsel %vm11466_vm3, %v2609_v61, %v8985_v23  ;;  %2865 = vrot.lane.b32.xlu0 %v8814_v14, %s7160_s26  ;;  %vm11481_vm3 = vmmov %vm11480_vm2 }
 0xa0a   :  { %2664 = vst [vmem:[#allocation4 + $0x68] sm:$0xf] %v2632_v45  ;;  %v9033_v47 = vpop.permute.xlu2 %2732 }
 0xa0b   :  { %v2723_v22 = vpop.permute.xlu1 %2722 }
 0xa0c   :  { %v2754_v43 = vsel %vm11467_vm4, %v2723_v22, %v2725_v30  ;;  %vm11482_vm4 = vmmov %vm11480_vm2 }
 0xa0d   :  { %v9025_v58 = vld.sshfl [vmem:[#allocation1] sm:$0xff pattern:$0x75316420]  ;;  %2786 = vst [vmem:[#allocation4 + $0x10] sm:$0xf0] %v2754_v43 }
 0xa0e   :  { %3336 = vst [vmem:[#allocation1] ss:$2 sm:$0xff] %v8583_v28  ;;  %3112 = vrot.lane.b32.xlu1 %v8795_v39, %s7158_s24 }
 0xa10   :  { %v2731_v4 = vpop.permute.xlu0 %2730  ;;  %2849 = vrot.lane.b32.xlu2 %v8790_v7, %s7160_s26 }
 0xa11   :  { %v2758_v44 = vsel %vm11468_vm6, %v2731_v4, %v9033_v47  ;;  %2863 = vrot.lane.b32.xlu0 %v8816_v21, %s7160_s26  ;;  %vm11483_vm6 = vmmov %vm11478_vm0 }
 0xa12   :  { %2790 = vst [vmem:[#allocation4 + $0x248] sm:$0xf0] %v2758_v44  ;;  %v9049_v37 = vpop.permute.xlu2 %2746 }
 0xa13   :  { %v2729_v14 = vpop.permute.xlu1 %2728 }
 0xa14   :  { %v2757_v5 = vsel %vm11469_vm7, %v2729_v14, %v2731_v4  ;;  %vm11484_vm7 = vmmov %vm11480_vm2 }
 0xa15   :  { %v9039_v28 = vld.sshfl [vmem:[#allocation1] sm:$0xff pattern:$0x75316420]  ;;  %v9041_v35 = vld.sshfl [vmem:[#allocation1 + $0x8] sm:$0xff pattern:$0x75316420] }
 0xa16   :  { %3351 = vst [vmem:[#allocation1] ss:$2 sm:$0xff] %v8606_v6  ;;  %3114 = vrot.lane.b32.xlu1 %v8825_v42, %s7158_s24 }
 0xa17   :  { %2789 = vst [vmem:[#allocation4 + $0x1a0] sm:$0xf0] %v2757_v5 }
 0xa18   :  { %v2727_v12 = vpop.permute.xlu0 %2726  ;;  %3003 = vrot.lane.b32.xlu2 %v8800_v36, %s7162_s28 }
 0xa19   :  { %v2755_v39 = vsel %vm11470_vm9, %v2725_v30, %v2727_v12  ;;  %v2756_v2 = vsel %vm11471_vm8, %v2727_v12, %v2729_v14  ;;  %3134 = vrot.lane.b32.xlu0 %v8854_v15, %s7158_s24  ;;  %vm11486_vm9 = vmmov %vm11480_vm2 }
 0xa1a   :  { %2787 = vst [vmem:[#allocation4 + $0x160] sm:$0xf0] %v2755_v39  ;;  %v2721_v11 = vpop.permute.xlu2 %2720  ;;  %vm11487_vm8 = vmmov %vm11480_vm2 }
 0xa1b   :  { %2788 = vst [vmem:[#allocation4 + $0x1d8] sm:$0xf0] %v2756_v2  ;;  %v2607_v21 = vpop.permute.xlu1 %2606  ;;  %v2753_v30 = vsel %vm11473_vm10, %v2721_v11, %v2723_v22  ;;  %v11485_v2 = vld [vmem:[#allocation43_spill] sm:$0xff]  ;;  %vm11491_vm10 = vmmov %vm11478_vm0 }
 0xa1c   :  { %v2631_v46 = vsel %vm11472_vm5, %v2607_v21, %v2609_v61  ;;  %2785 = vst [vmem:[#allocation4 + $0x30] sm:$0xf0] %v2753_v30  ;;  %vm11490_vm5 = vmmov %vm11478_vm0 }
 0xa1d   :  { %v9055_v6 = vld.sshfl [vmem:[#allocation1 + $0x8] sm:$0xff pattern:$0x75316420]  ;;  %v9057_v7 = vld.sshfl [vmem:[#allocation1] sm:$0xff pattern:$0x75316420] }
 0xa1e   :  { %3363 = vst [vmem:[#allocation1] ss:$2 sm:$0xff] %v3326_v25  ;;  %3128 = vrot.lane.b32.xlu1 %v8818_v17, %s7158_s24 }
 0xa1f   :  { %2663 = vst [vmem:[#allocation4 + $0x48] sm:$0xf] %v2631_v46  ;;  %v11489_v46 = vld [vmem:[#allocation14_spill] sm:$0xff] }
 0xa20   :  { %v2605_v42 = vpop.permute.xlu0 %2604  ;;  %3001 = vrot.lane.b32.xlu2 %v8798_v29, %s7162_s28 }
 0xa21   :  { %v2629_v45 = vsel %vm11474_vm11, %v8979_v13, %v2605_v42  ;;  %v2630_v43 = vsel %vm11475_vm12, %v2605_v42, %v2607_v21  ;;  %3130 = vrot.lane.b32.xlu0 %v8847_v52, %s7158_s24  ;;  %vm11493_vm11 = vmmov %vm11480_vm2  ;;  %vm11495_vm12 = vcmask 785408  }
 0xa22   :  { %2661 = vst [vmem:[#allocation4 + $0x218] sm:$0xf] %v2629_v45  ;;  %v2858_v15 = vpop.permute.xlu2 %2857  ;;  %v11492_v45 = vld [vmem:[#allocation46_spill] sm:$0xff] }
 0xa23   :  { %2662 = vst [vmem:[#allocation4 + $0x190] sm:$0xf] %v2630_v43  ;;  %v2739_v36 = vpop.permute.xlu1 %2738 }
 0xa26   :  { %3132 = vrot.lane.b32.xlu1 %v8849_v26, %s7158_s24 }
 0xa28   :  { %v9074_v61 = vpop.permute.xlu0 %2740  ;;  %3118 = vrot.lane.b32.xlu2 %v8830_v16, %s7158_s24 }
 0xa29   :  { %v2762_v13 = vsel %vm11476_vm13, %v2739_v36, %v9074_v61  ;;  %3240 = vrot.lane.b32.xlu0 %v8842_v51, %s7159_s25  ;;  %vm11496_vm13 = vmmov %vm11495_vm12 }
 0xa2a   :  { %2794 = vst [vmem:[#allocation4 + $0x68] sm:$0xf0] %v2762_v13  ;;  %v2856_v29 = vpop.permute.xlu2 %2855 }
 0xa2b   :  { %v9082_v17 = vpop.permute.xlu1 %2851  ;;  %v2885_v52 = vsel %vm11477_vm14, %v2856_v29, %v2858_v15  ;;  %vm11497_vm14 = vmmov %vm11495_vm12 }
 0xa2c   :  { %2917 = vst [vmem:[#allocation4 + $0x1d0] sm:$0xf] %v2885_v52 }
 0xa2e   :  { %3246 = vrot.lane.b32.xlu1 %v8875_v24, %s7159_s25 }
 0xa30   :  { %v9087_v22 = vpop.permute.xlu0 %2744  ;;  %3126 = vrot.lane.b32.xlu2 %v8820_v9, %s7158_s24 }
 0xa31   :  { %v2765_v4 = vsel %vm11478_vm0, %v9087_v22, %v9049_v37  ;;  %2979 = vrot.lane.b32.xlu0 %v8863_v20, %s7162_s28  ;;  %vm11498_vm0 = vmmov %vm11480_vm2 }
 0xa32   :  { %2797 = vst [vmem:[#allocation4 + $0x250] sm:$0xf0] %v2765_v4  ;;  %v9099_v51 = vpop.permute.xlu2 %2867 }
 0xa33   :  { %v2719_v26 = vpop.permute.xlu1 %2718 }
 0xa34   :  { %v2752_v16 = vsel %vm11479_vm1, %v2719_v26, %v2721_v11  ;;  %vm11499_vm1 = vmmov %vm11498_vm0 }
 0xa35   :  { %2784 = vst [vmem:[#allocation4 + $0x80] sm:$0xf0] %v2752_v16 }
 0xa36   :  { %3250 = vrot.lane.b32.xlu1 %v8880_v40, %s7159_s25 }
 0xa38   :  { %v2854_v44 = vpop.permute.xlu0 %2853  ;;  %3136 = vrot.lane.b32.xlu2 %v8856_v8, %s7158_s24 }
 0xa39   :  { %v2883_v14 = vsel %vm11480_vm2, %v9082_v17, %v2854_v44  ;;  %v2884_v5 = vsel %vm11481_vm3, %v2854_v44, %v2856_v29  ;;  %3242 = vrot.lane.b32.xlu0 %v8844_v60, %s7159_s25  ;;  %vm11500_vm2 = vmmov %vm11495_vm12 }
 0xa3a   :  { %2915 = vst [vmem:[#allocation4 + $0xe0] sm:$0xf] %v2883_v14  ;;  %v2737_v24 = vpop.permute.xlu2 %2736  ;;  %vm11501_vm3 = vmmov %vm11500_vm2 }
 0xa3b   :  { %2916 = vst [vmem:[#allocation4 + $0x198] sm:$0xf] %v2884_v5  ;;  %v2860_v9 = vpop.permute.xlu1 %2859  ;;  %v2761_v12 = vsel %vm11483_vm6, %v2737_v24, %v2739_v36  ;;  %vm11503_vm6 = vmmov %vm11498_vm0 }
 0xa3c   :  { %v2886_v20 = vsel %vm11482_vm4, %v2858_v15, %v2860_v9  ;;  %2793 = vst [vmem:[#allocation4 + $0x48] sm:$0xf0] %v2761_v12  ;;  %vm11502_vm4 = vmmov %vm11500_vm2 }
 0xa3d   :  { %2918 = vst [vmem:[#allocation4 + $0x1e0] sm:$0xf] %v2886_v20 }
 0xa3e   :  { %2995 = vrot.lane.b32.xlu1 %v8889_v54, %s7162_s28 }
 0xa40   :  { %v2876_v39 = vpop.permute.xlu0 %2875  ;;  %3244 = vrot.lane.b32.xlu2 %v8873_v1, %s7159_s25  ;;  %v11488_v1 = vld [vmem:[#allocation28_spill] sm:$0xff] }
 0xa41   :  { %2977 = vrot.lane.b32.xlu0 %v11485_v2, %s7162_s28 }
 0xa42   :  { %v2870_v60 = vpop.permute.xlu2 %2869 }
 0xa43   :  { %v9116_v40 = vpop.permute.xlu1 %2861  ;;  %v2891_v25 = vsel %vm11486_vm9, %v9099_v51, %v2870_v60  ;;  %vm11505_vm9 = vmmov %vm11500_vm2 }
 0xa44   :  { %v2887_v8 = vsel %vm11484_vm7, %v2860_v9, %v9116_v40  ;;  %2923 = vst [vmem:[#allocation4 + $0x90] sm:$0xf] %v2891_v25  ;;  %vm11504_vm7 = vmmov %vm11498_vm0  ;;  %v3358_v25 = vld.sshfl [vmem:[#allocation1 + $0x18] sm:$0xff pattern:$0x75316420] }
 0xa45   :  { %2919 = vst [vmem:[#allocation4 + $0x1a8] sm:$0xf] %v2887_v8  ;;  %v3357_v8 = vld.sshfl [vmem:[#allocation1 + $0x10] sm:$0xff pattern:$0x75316420] }
 0xa46   :  { %2993 = vrot.lane.b32.xlu1 %v11488_v1, %s7162_s28  ;;  %v3359_v1 = vld.sshfl [vmem:[#allocation1 + $0x20] sm:$0xff pattern:$0x75316420] }
 0xa48   :  { %v9124_v21 = vpop.permute.xlu0 %2877  ;;  %3258 = vrot.lane.b32.xlu2 %v11489_v46, %s7159_s25 }
 0xa49   :  { %v2895_v54 = vsel %vm11487_vm8, %v2876_v39, %v9124_v21  ;;  %3248 = vrot.lane.b32.xlu0 %v11492_v45, %s7159_s25  ;;  %vm11506_vm8 = vmmov %vm11500_vm2 }
 0xa4a   :  { %2927 = vst [vmem:[#allocation4 + $0x1c8] sm:$0xf] %v2895_v54  ;;  %v9137_v43 = vpop.permute.xlu2 %2981 }
 0xa4b   :  { %v2735_v11 = vpop.permute.xlu1 %2734 }
 0xa4c   :  { %v2759_v30 = vsel %vm11490_vm5, %v9033_v47, %v2735_v11  ;;  %v2760_v42 = vsel %vm11491_vm10, %v2735_v11, %v2737_v24  ;;  %v11494_v47 = vld [vmem:[#allocation47_spill] sm:$0xff]  ;;  %vm11507_vm5 = vmmov %vm11500_vm2 }
 0xa4d   :  { %2791 = vst [vmem:[#allocation4 + $0x218] sm:$0xf0] %v2759_v30  ;;  %vm11508_vm10 = vmmov %vm11500_vm2 }
 0xa4e   :  { %2792 = vst [vmem:[#allocation4 + $0x190] sm:$0xf0] %v2760_v42  ;;  %3264 = vrot.lane.b32.xlu1 %v8910_v62, %s7159_s25 }
 0xa50   :  { %v2988_v36 = vpop.permute.xlu0 %2987  ;;  %3262 = vrot.lane.b32.xlu2 %v8906_v41, %s7159_s25 }
 0xa51   :  { %3256 = vrot.lane.b32.xlu0 %v11494_v47, %s7159_s25 }
 0xa52   :  { %v2984_v29 = vpop.permute.xlu2 %2983 }
 0xa53   :  { %v2874_v15 = vpop.permute.xlu1 %2873  ;;  %v3013_v52 = vsel %vm11495_vm12, %v9137_v43, %v2984_v29  ;;  %vm11510_vm12 = vcmask 556032  }
 0xa54   :  { %v2894_v13 = vsel %vm11493_vm11, %v2874_v15, %v2876_v39  ;;  %3045 = vst [vmem:[#allocation4 + $0xe0] sm:$0xf0] %v3013_v52  ;;  %vm11509_vm11 = vmmov %vm11498_vm0 }
 0xa55   :  { %2926 = vst [vmem:[#allocation4 + $0x38] sm:$0xf] %v2894_v13 }
 0xa56   :  { %3260 = vrot.lane.b32.xlu1 %v8902_v59, %s7159_s25 }
 0xa58   :  { %v2986_v4 = vpop.permute.xlu0 %2985  ;;  %3375 = vrot.lane.b32.xlu2 %v8927_v27, %s7161_s27 }
 0xa59   :  { %v3014_v26 = vsel %vm11496_vm13, %v2984_v29, %v2986_v4  ;;  %v3015_v62 = vsel %vm11497_vm14, %v2986_v4, %v2988_v36  ;;  %3266 = vrot.lane.b32.xlu0 %v8914_v31, %s7159_s25  ;;  %vm11511_vm13 = vmmov %vm11510_vm12 }
 0xa5a   :  { %3046 = vst [vmem:[#allocation4 + $0x198] sm:$0xf0] %v3014_v26  ;;  %v2990_v14 = vpop.permute.xlu2 %2989  ;;  %vm11512_vm14 = vmmov %vm11510_vm12 }
 0xa5b   :  { %3047 = vst [vmem:[#allocation4 + $0x1d0] sm:$0xf0] %v3015_v62  ;;  %v2872_v41 = vpop.permute.xlu1 %2871  ;;  %v3016_v5 = vsel %vm11500_vm2, %v2988_v36, %v2990_v14  ;;  %v3361_v36 = vld.sshfl [vmem:[#allocation1 + $0x30] sm:$0xff pattern:$0x75316420]  ;;  %vm11515_vm2 = vmmov %vm11510_vm12 }
 0xa5c   :  { %v2892_v16 = vsel %vm11498_vm0, %v2870_v60, %v2872_v41  ;;  %v2893_v44 = vsel %vm11499_vm1, %v2872_v41, %v2874_v15  ;;  %3048 = vst [vmem:[#allocation4 + $0x1e0] sm:$0xf0] %v3016_v5  ;;  %vm11513_vm1 = vmmov %vm11498_vm0 }
 0xa5d   :  { %2924 = vst [vmem:[#allocation4 + $0x270] sm:$0xf] %v2892_v16 }
 0xa5e   :  { %2925 = vst [vmem:[#allocation4 + $0x1e8] sm:$0xf] %v2893_v44  ;;  %3377 = vrot.lane.b32.xlu1 %v8934_v0, %s7161_s27 }
 0xa60   :  { %v9159_v9 = vpop.permute.xlu0 %2997  ;;  %3373 = vrot.lane.b32.xlu2 %v8929_v55, %s7161_s27 }
 0xa61   :  { %3369 = vrot.lane.b32.xlu0 %v8898_v57, %s7161_s27 }
 0xa62   :  { %v9167_v27 = vpop.permute.xlu2 %2991 }
 0xa63   :  { %v2848_v59 = vpop.permute.xlu1 %2847  ;;  %v3017_v31 = vsel %vm11501_vm3, %v2990_v14, %v9167_v27  ;;  %vm11516_vm3 = vmmov %vm11515_vm2 }
 0xa64   :  { %3049 = vst [vmem:[#allocation4 + $0x1a8] sm:$0xf0] %v3017_v31 }
 0xa66   :  { %3379 = vrot.lane.b32.xlu1 %v8936_v63, %s7161_s27  ;;  %v3360_v63 = vld.sshfl [vmem:[#allocation1 + $0x28] sm:$0xff pattern:$0x75316420] }
 0xa68   :  { %v3000_v20 = vpop.permute.xlu0 %2999  ;;  %3108 = vrot.lane.b32.xlu2 %v8942_v56, %s7158_s24 }
 0xa69   :  { %v3021_v24 = vsel %vm11502_vm4, %v9159_v9, %v3000_v20  ;;  %3371 = vrot.lane.b32.xlu0 %v8900_v50, %s7161_s27  ;;  %vm11518_vm4 = vmmov %vm11515_vm2 }
 0xa6a   :  { %3053 = vst [vmem:[#allocation4 + $0x90] sm:$0xf0] %v3021_v24  ;;  %v2850_v57 = vpop.permute.xlu2 %2849 }
 0xa6b   :  { %v3006_v55 = vpop.permute.xlu1 %3005  ;;  %v2881_v0 = vsel %vm11503_vm6, %v2848_v59, %v2850_v57  ;;  %v2882_v12 = vsel %vm11504_vm7, %v2850_v57, %v9082_v17  ;;  %vm11519_vm6 = vmmov %vm11515_vm2 }
 0xa6c   :  { %2913 = vst [vmem:[#allocation4 + $0xf8] sm:$0xf] %v2881_v0  ;;  %vm11520_vm7 = vmmov %vm11515_vm2 }
 0xa6d   :  { %2914 = vst [vmem:[#allocation4 + $0x98] sm:$0xf] %v2882_v12 }
 0xa6e   :  { %3106 = vrot.lane.b32.xlu1 %v8944_v34, %s7158_s24  ;;  %v3362_v34 = vld.sshfl [vmem:[#allocation1 + $0x38] sm:$0xff pattern:$0x75316420] }
 0xa70   :  { %v3117_v39 = vpop.permute.xlu0 %3116  ;;  %3391 = vrot.lane.b32.xlu2 %v3360_v63, %s7161_s27 }
 0xa71   :  { %3385 = vrot.lane.b32.xlu0 %v3357_v8, %s7161_s27 }
 0xa72   :  { %v3004_v2 = vpop.permute.xlu2 %3003 }
 0xa73   :  { %v9185_v56 = vpop.permute.xlu1 %3007  ;;  %v3024_v17 = vsel %vm11506_vm8, %v3004_v2, %v3006_v55  ;;  %vm11524_vm8 = vmmov %vm11515_vm2 }
 0xa74   :  { %v3025_v50 = vsel %vm11505_vm9, %v3006_v55, %v9185_v56  ;;  %3056 = vst [vmem:[#allocation4 + $0x38] sm:$0xf0] %v3024_v17  ;;  %vm11523_vm9 = vmmov %vm11515_vm2 }
 0xa75   :  { %3057 = vst [vmem:[#allocation4 + $0x1c8] sm:$0xf0] %v3025_v50  ;;  %v11526_v50 = vld [vmem:[#allocation35_spill] sm:$0xff] }
 0xa76   :  { %3387 = vrot.lane.b32.xlu1 %v3358_v25, %s7161_s27 }
 0xa78   :  { %v9191_v60 = vpop.permute.xlu0 %3120  ;;  %3395 = vrot.lane.b32.xlu2 %v3362_v34, %s7161_s27 }
 0xa79   :  { %3389 = vrot.lane.b32.xlu0 %v3359_v1, %s7161_s27 }
 0xa7a   :  { %v3002_v46 = vpop.permute.xlu2 %3001 }
 0xa7b   :  { %v9195_v54 = vpop.permute.xlu1 %3110  ;;  %v3022_v11 = vsel %vm11507_vm5, %v3000_v20, %v3002_v46  ;;  %v3023_v30 = vsel %vm11508_vm10, %v3002_v46, %v3004_v2  ;;  %v11522_v20 = vld [vmem:[#allocation8_spill] sm:$0xff]  ;;  %vm11525_vm5 = vcmask 547840  }
 0xa7c   :  { %3054 = vst [vmem:[#allocation4 + $0x270] sm:$0xf0] %v3022_v11  ;;  %v11528_v2 = vld [vmem:[#allocation16_spill] sm:$0xff]  ;;  %v11532_v11 = vld [vmem:[#allocation19_spill] sm:$0xff] }
 0xa7d   :  { %3055 = vst [vmem:[#allocation4 + $0x1e8] sm:$0xf0] %v3023_v30 }
 0xa7e   :  { %3393 = vrot.lane.b32.xlu1 %v3361_v36, %s7161_s27  ;;  %v11534_v36 = vld [vmem:[#allocation44_spill] sm:$0xff] }
 0xa80   :  { %v2866_v42 = vpop.permute.xlu0 %2865  ;;  %3122 = vrot.lane.b32.xlu2 %v8955_v33, %s7158_s24 }
 0xa81   :  { %v2890_v45 = vsel %vm11509_vm11, %v2866_v42, %v9099_v51  ;;  %3124 = vrot.lane.b32.xlu0 %v8957_v48, %s7158_s24  ;;  %v11514_v48 = vld [vmem:[#allocation18_spill] sm:$0xff]  ;;  %vm11529_vm11 = vmmov %vm11525_vm5 }
 0xa82   :  { %2922 = vst [vmem:[#allocation4 + $0x1b0] sm:$0xf] %v2890_v45  ;;  %v3119_v47 = vpop.permute.xlu2 %3118 }
 0xa83   :  { %v3113_v15 = vpop.permute.xlu1 %3112  ;;  %v3145_v29 = vsel %vm11511_vm13, %v3117_v39, %v3119_v47  ;;  %v3146_v51 = vsel %vm11512_vm14, %v3119_v47, %v9191_v60  ;;  %vm11531_vm13 = vmmov %vm11508_vm10  ;;  %v11538_v47 = vld [vmem:[#allocation9_spill] sm:$0xff] }
 0xa84   :  { %v3142_v13 = vsel %vm11510_vm12, %v9195_v54, %v3113_v15  ;;  %3177 = vst [vmem:[#allocation4 + $0x258] sm:$0xf] %v3145_v29  ;;  %vm11530_vm12 = vmmov %vm11525_vm5 }
 0xa85   :  { %3174 = vst [vmem:[#allocation4 + $0xa0] sm:$0xf] %v3142_v13  ;;  %vm11533_vm14 = vmmov %vm11508_vm10  ;;  %v11535_v13 = vld [vmem:[#allocation36_spill] sm:$0xff] }
 0xa86   :  { %3178 = vst [vmem:[#allocation4 + $0x260] sm:$0xf] %v3146_v51  ;;  %3254 = vrot.lane.b32.xlu1 %v9006_v49, %s7159_s25  ;;  %v11517_v49 = vld [vmem:[#allocation15_spill] sm:$0xff] }
 0xa88   :  { %v2864_v52 = vpop.permute.xlu0 %2863  ;;  %2487 = vrot.lane.b32.xlu2 %v11514_v48, %s7164_s30 }
 0xa89   :  { %v2888_v4 = vsel %vm11498_vm0, %v9116_v40, %v2864_v52  ;;  %v2889_v33 = vsel %vm11513_vm1, %v2864_v52, %v2866_v42  ;;  %3238 = vrot.lane.b32.xlu0 %v8989_v38, %s7159_s25  ;;  %vm11536_vm0 = vmmov %vm11508_vm10 }
 0xa8a   :  { %2920 = vst [vmem:[#allocation4 + $0x228] sm:$0xf] %v2888_v4  ;;  %v9223_v40 = vpop.permute.xlu2 %3126  ;;  %vm11537_vm1 = vmmov %vm11536_vm0 }
 0xa8b   :  { %2921 = vst [vmem:[#allocation4] sm:$0xf] %v2889_v33  ;;  %v3115_v26 = vpop.permute.xlu1 %3114 }
 0xa8c   :  { %v3143_v62 = vsel %vm11515_vm2, %v3113_v15, %v3115_v26  ;;  %v3144_v41 = vsel %vm11516_vm3, %v3115_v26, %v3117_v39  ;;  %vm11539_vm2 = vcmask 539648   ;;  %vm11540_vm3 = vmmov %vm11525_vm5 }
 0xa8d   :  { %3175 = vst [vmem:[#allocation4 + $0x1f8] sm:$0xf] %v3143_v62 }
 0xa8e   :  { %3176 = vst [vmem:[#allocation4 + $0x58] sm:$0xf] %v3144_v41  ;;  %2612 = vrot.lane.b32.xlu1 %v11517_v49, %s7165_s1 }
 0xa90   :  { %v3135_v16 = vpop.permute.xlu0 %3134  ;;  %3365 = vrot.lane.b32.xlu2 %v9039_v28, %s7161_s27  ;;  %v11521_v28 = vld [vmem:[#allocation37_spill] sm:$0xff] }
 0xa91   :  { %3236 = vrot.lane.b32.xlu0 %v8987_v32, %s7159_s25 }
 0xa92   :  { %v9233_v5 = vpop.permute.xlu2 %3136 }
 0xa93   :  { %v3129_v44 = vpop.permute.xlu1 %3128  ;;  %v3154_v38 = vsel %vm11519_vm6, %v3135_v16, %v9233_v5  ;;  %vm11542_vm6 = vmmov %vm11540_vm3 }
 0xa94   :  { %v3150_v14 = vsel %vm11518_vm4, %v9223_v40, %v3129_v44  ;;  %3186 = vst [vmem:[#allocation4 + $0x130] sm:$0xf] %v3154_v38  ;;  %vm11541_vm4 = vmmov %vm11540_vm3  ;;  %v11546_v38 = vld [vmem:[#allocation31_spill] sm:$0xff] }
 0xa95   :  { %3182 = vst [vmem:[#allocation4 + $0xd0] sm:$0xf] %v3150_v14 }
 0xa96   :  { %2748 = vrot.lane.b32.xlu1 %v11521_v28, %s7163_s29 }
 0xa98   :  { %v3131_v59 = vpop.permute.xlu0 %3130  ;;  %2742 = vrot.lane.b32.xlu2 %v11522_v20, %s7163_s29  ;;  %v11549_v20 = vld [vmem:[#allocation13_spill] sm:$0xff] }
 0xa99   :  { %v3151_v31 = vsel %vm11520_vm7, %v3129_v44, %v3131_v59  ;;  %3252 = vrot.lane.b32.xlu0 %v9008_v18, %s7159_s25 }
 0xa9a   :  { %3183 = vst [vmem:[#allocation4 + $0x278] sm:$0xf] %v3151_v31  ;;  %v3245_v57 = vpop.permute.xlu2 %3244 }
 0xa9b   :  { %v3133_v24 = vpop.permute.xlu1 %3132 }
 0xa9c   :  { %v3153_v32 = vsel %vm11523_vm9, %v3133_v24, %v3135_v16  ;;  %v3152_v55 = vsel %vm11524_vm8, %v3131_v59, %v3133_v24  ;;  %vm11543_vm9 = vmmov %vm11540_vm3 }
 0xa9d   :  { %3185 = vst [vmem:[#allocation4 + $0x180] sm:$0xf] %v3153_v32  ;;  %vm11544_vm8 = vmmov %vm11540_vm3 }
 0xa9e   :  { %3184 = vst [vmem:[#allocation4 + $0x210] sm:$0xf] %v3152_v55  ;;  %3383 = vrot.lane.b32.xlu1 %v9055_v6, %s7161_s27  ;;  %v11527_v6 = vld [vmem:[#allocation22_spill] sm:$0xff] }
 0xaa0   :  { %v9246_v0 = vpop.permute.xlu0 %3240  ;;  %3381 = vrot.lane.b32.xlu2 %v9057_v7, %s7161_s27 }
 0xaa1   :  { %3367 = vrot.lane.b32.xlu0 %v9041_v35, %s7161_s27  ;;  %v3364_v35 = vld.sshfl [vmem:[#allocation1] sm:$0xff pattern:$0x75316420] }
 0xaa2   :  { %v3259_v63 = vpop.permute.xlu2 %3258 }
 0xaa3   :  { %v3247_v12 = vpop.permute.xlu1 %3246 }
 0xaa4   :  { %v3274_v39 = vsel %vm11525_vm5, %v3245_v57, %v3247_v12  ;;  %vm11545_vm5 = vmmov %vm11540_vm3 }
 0xaa5   :  { %3306 = vst [vmem:[#allocation4 + $0x58] sm:$0xf0] %v3274_v39 }
 0xaa6   :  { %2879 = vrot.lane.b32.xlu1 %v11526_v50, %s7160_s26 }
 0xaa8   :  { %v2980_v18 = vpop.permute.xlu0 %2979  ;;  %2489 = vrot.lane.b32.xlu2 %v11527_v6, %s7164_s30 }
 0xaa9   :  { %v3012_v8 = vsel %vm11508_vm10, %v2980_v18, %v9137_v43  ;;  %2485 = vrot.lane.b32.xlu0 %v11528_v2, %s7164_s30  ;;  %vm11547_vm10 = vmmov %vm11540_vm3 }
 0xaaa   :  { %3044 = vst [vmem:[#allocation4 + $0x98] sm:$0xf0] %v3012_v8  ;;  %v3263_v17 = vpop.permute.xlu2 %3262 }
 0xaab   :  { %v9261_v7 = vpop.permute.xlu1 %3250 }
 0xaae   :  { %3397 = vrot.lane.b32.xlu1 %v3364_v35, %s7161_s27 }
 0xab0   :  { %v3243_v25 = vpop.permute.xlu0 %3242  ;;  %3268 = vrot.lane.b32.xlu2 %v9025_v58, %s7159_s25 }
 0xab1   :  { %v3272_v34 = vsel %vm11529_vm11, %v9246_v0, %v3243_v25  ;;  %v3273_v43 = vsel %vm11530_vm12, %v3243_v25, %v3245_v57  ;;  %2618 = vrot.lane.b32.xlu0 %v11532_v11, %s7165_s1  ;;  %vm11548_vm11 = vmmov %vm11539_vm2  ;;  %v3483_v11 = vld [vmem:[#allocation4 + $0x198] sm:$0xff] }
 0xab2   :  { %3304 = vst [vmem:[#allocation4 + $0xa0] sm:$0xf0] %v3272_v34  ;;  %v3376_v30 = vpop.permute.xlu2 %3375  ;;  %vm11550_vm12 = vmmov %vm11539_vm2 }
 0xab3   :  { %3305 = vst [vmem:[#allocation4 + $0x1f8] sm:$0xf0] %v3273_v43  ;;  %v2996_v1 = vpop.permute.xlu1 %2995 }
 0xab4   :  { %v3020_v46 = vsel %vm11531_vm13, %v2996_v1, %v9159_v9  ;;  %vm11551_vm13 = vmmov %vm11520_vm7 }
 0xab5   :  { %3052 = vst [vmem:[#allocation4 + $0x1b0] sm:$0xf0] %v3020_v46 }
 0xab6   :  { %2750 = vrot.lane.b32.xlu1 %v11534_v36, %s7163_s29 }
 0xab8   :  { %v2978_v42 = vpop.permute.xlu0 %2977  ;;  %2620 = vrot.lane.b32.xlu2 %v11535_v13, %s7165_s1 }
 0xab9   :  { %v3011_v45 = vsel %vm11533_vm14, %v2978_v42, %v2980_v18  ;;  %2483 = vrot.lane.b32.xlu0 %v11538_v47, %s7164_s30  ;;  %vm11552_vm14 = vmmov %vm11539_vm2  ;;  %v3498_v25 = vld [vmem:[#allocation4 + $0xa0] sm:$0xff]  ;;  %v3466_v42 = vld [vmem:[#allocation4 + $0x10] sm:$0xff] }
 0xaba   :  { %3043 = vst [vmem:[#allocation4 + $0xf8] sm:$0xf0] %v3011_v45  ;;  %v3374_v29 = vpop.permute.xlu2 %3373  ;;  %v3499_v34 = vld [vmem:[#allocation4 + $0x1f8] sm:$0xff]  ;;  %v3467_v45 = vld [vmem:[#allocation4 + $0x160] sm:$0xff]  ;;  %v3451_v47 = vld [vmem:[#allocation4 + $0x28] sm:$0xff] }
 0xabb   :  { %v2994_v15 = vpop.permute.xlu1 %2993  ;;  %v3403_v51 = vsel %vm11539_vm2, %v3374_v29, %v3376_v30 }
 0xabc   :  { %v3018_v58 = vsel %vm11536_vm0, %v9167_v27, %v2994_v15  ;;  %v3019_v9 = vsel %vm11537_vm1, %v2994_v15, %v2996_v1  ;;  %3435 = vst [vmem:[#allocation4 + $0x240] sm:$0xf] %v3403_v51  ;;  %vm11553_vm0 = vmmov %vm11539_vm2  ;;  %v3482_v1 = vld [vmem:[#allocation4 + $0xe0] sm:$0xff] }
 0xabd   :  { %3050 = vst [vmem:[#allocation4 + $0x228] sm:$0xf0] %v3018_v58  ;;  %vm11554_vm1 = vmmov %vm11520_vm7  ;;  %v3450_v58 = vld [vmem:[#allocation4 + $0x40] sm:$0xff] }
 0xabe   :  { %3051 = vst [vmem:[#allocation4] sm:$0xf0] %v3019_v9  ;;  %vm11555_vm2 = vmmov %vm11553_vm0  ;;  %v9344_v9 = vld [vmem:[%s6884_s23] sm:$0xf]  ;;  %s6889_s23 = sld [smem:[%s11286_s0 + %s7178_s20]]  }
 0xabf   :  { %s6904_s20 = sld [smem:[%s11286_s0 + %s7192_s15]]  }
 0xac0   :  { %v3249_v52 = vpop.permute.xlu0 %3248 }
 0xac1   :  { %v3275_v4 = vsel %vm11540_vm3, %v3247_v12, %v3249_v52  ;;  %v3276_v33 = vsel %vm11541_vm4, %v3249_v52, %v9261_v7  ;;  %3138 = vrot.lane.b32.xlu0 %v8972_v53, %s7158_s24  ;;  %vm11556_vm3 = vmmov %vm11553_vm0 }
 0xac2   :  { %3307 = vst [vmem:[#allocation4 + $0x258] sm:$0xf0] %v3275_v4  ;;  %v3109_v26 = vpop.permute.xlu2 %3108  ;;  %vm11557_vm4 = vmmov %vm11553_vm0 }
 0xac3   :  { %3308 = vst [vmem:[#allocation4 + $0x260] sm:$0xf0] %v3276_v33  ;;  %v3265_v27 = vpop.permute.xlu1 %3264  ;;  %v3141_v62 = vsel %vm11520_vm7, %v3109_v26, %v9195_v54 }
 0xac4   :  { %v3283_v48 = vsel %vm11542_vm6, %v3263_v17, %v3265_v27  ;;  %3173 = vst [vmem:[#allocation4 + $0x1f0] sm:$0xf] %v3141_v62  ;;  %vm11558_vm6 = vcmask 293888  }
 0xac5   :  { %3315 = vst [vmem:[#allocation4 + $0x180] sm:$0xf0] %v3283_v48  ;;  %vm11559_vm7 = vmmov %vm11558_vm6 }
 0xac8   :  { %v9294_v41 = vpop.permute.xlu0 %3256 }
 0xac9   :  { %v3280_v16 = vsel %vm11543_vm9, %v9294_v41, %v3259_v63  ;;  %3009 = vrot.lane.b32.xlu0 %v11546_v38, %s7162_s28  ;;  %vm11560_vm9 = vmmov %vm11553_vm0  ;;  %v3454_v38 = vld [vmem:[#allocation4 + $0x70] sm:$0xff] }
 0xaca   :  { %3312 = vst [vmem:[#allocation4 + $0xd0] sm:$0xf0] %v3280_v16  ;;  %v9302_v53 = vpop.permute.xlu2 %3391  ;;  %v3502_v51 = vld [vmem:[#allocation4 + $0x260] sm:$0xff] }
 0xacb   :  { %v3261_v49 = vpop.permute.xlu1 %3260 }
 0xacc   :  { %v3281_v44 = vsel %vm11544_vm8, %v3259_v63, %v3261_v49  ;;  %v3282_v14 = vsel %vm11545_vm5, %v3261_v49, %v3263_v17  ;;  %vm11561_vm8 = vmmov %vm11553_vm0  ;;  %vm11562_vm5 = vcmask 801792   ;;  %v3470_v49 = vld [vmem:[#allocation4 + $0x248] sm:$0xff] }
 0xacd   :  { %3313 = vst [vmem:[#allocation4 + $0x278] sm:$0xf0] %v3281_v44 }
 0xace   :  { %3314 = vst [vmem:[#allocation4 + $0x210] sm:$0xf0] %v3282_v14 }
 0xad0   :  { %v9304_v54 = vpop.permute.xlu0 %3266 }
 0xad1   :  { %v3284_v59 = vsel %vm11547_vm10, %v3265_v27, %v9304_v54  ;;  %2491 = vrot.lane.b32.xlu0 %v11549_v20, %s7164_s30  ;;  %v3486_v27 = vld [vmem:[#allocation4 + $0x1a8] sm:$0xff]  ;;  %vm11563_vm10 = vmmov %vm11562_vm5 }
 0xad2   :  { %3316 = vst [vmem:[#allocation4 + $0x130] sm:$0xf0] %v3284_v59  ;;  %v9311_v24 = vpop.permute.xlu2 %3395 }
 0xad3   :  { %v3378_v31 = vpop.permute.xlu1 %3377 }
 0xad4   :  { %v3404_v28 = vsel %vm11548_vm11, %v3376_v30, %v3378_v31  ;;  %vm11564_vm11 = vmmov %vm11554_vm1 }
 0xad5   :  { %3436 = vst [vmem:[#allocation4 + $0x88] sm:$0xf] %v3404_v28 }
 0xad8   :  { %v9313_v32 = vpop.permute.xlu0 %3369 }
 0xada   :  { %v9319_v12 = vpop.permute.xlu2 %3122 }
 0xadb   :  { %v9315_v55 = vpop.permute.xlu1 %3379  ;;  %v3147_v39 = vsel %vm11551_vm13, %v9191_v60, %v9319_v12  ;;  %vm11566_vm13 = vmmov %vm11558_vm6 }
 0xadc   :  { %v3405_v57 = vsel %vm11550_vm12, %v3378_v31, %v9315_v55  ;;  %3179 = vst [vmem:[#allocation4 + $0x100] sm:$0xf] %v3147_v39  ;;  %vm11565_vm12 = vmmov %vm11554_vm1  ;;  %v3490_v31 = vld [vmem:[#allocation4 + $0x90] sm:$0xff]  ;;  %v3458_v39 = vld [vmem:[#allocation4 + $0x158] sm:$0xff] }
 0xadd   :  { %3437 = vst [vmem:[#allocation4 + $0x118] sm:$0xf] %v3405_v57 }
 0xae0   :  { %v3372_v63 = vpop.permute.xlu0 %3371 }
 0xae1   :  { %v3401_v18 = vsel %vm11552_vm14, %v9313_v32, %v3372_v63  ;;  %v3402_v8 = vsel %vm11553_vm0, %v3372_v63, %v3374_v29  ;;  %vm11567_vm14 = vcmask 547840  }
 0xae2   :  { %3433 = vst [vmem:[#allocation4 + $0x138] sm:$0xf] %v3401_v18  ;;  %v9328_v2 = vpop.permute.xlu2 %2487 }
 0xae3   :  { %3434 = vst [vmem:[#allocation4 + $0x208] sm:$0xf] %v3402_v8  ;;  %v3107_v50 = vpop.permute.xlu1 %3106  ;;  %v3510_v8 = vld [vmem:[#allocation4 + $0x130] sm:$0xff] }
 0xae4   :  { %v3140_v6 = vsel %vm11554_vm1, %v3107_v50, %v3109_v26  ;;  %v3518_v29 = vld [vmem:[#allocation4 + $0x118] sm:$0xf]  ;;  %vm11568_vm1 = vmmov %vm11567_vm14 }
 0xae5   :  { %3172 = vst [vmem:[#allocation4 + $0x78] sm:$0xf] %v3140_v6 }
 0xae8   :  { %v9330_v17 = vpop.permute.xlu0 %3385 }
 0xae9   :  { %v3514_v35 = vld [vmem:[#allocation4 + $0x138] sm:$0xf] }
 0xaea   :  { %6950 = vmatpush.msk.msra.mxu3 %vm11306_vm15, %v3514_v35  ;;  %v3515_v60 = vld [vmem:[#allocation4 + $0x208] sm:$0xf]  ;;  %v9339_v30 = vpop.permute.xlu2 %3365 }
 0xaeb   :  { %6952 = vmatpush.msk.msra.mxu0 %vm11306_vm15, %v3515_v60  ;;  %v3388_v43 = vpop.permute.xlu1 %3387  ;;  %v3494_v60 = vld [vmem:[#allocation4 + $0x1c8] sm:$0xff] }
 0xaec   :  { %3631 = vmatpush.msra.mxu3 %v3498_v25  ;;  %v3409_v46 = vsel %vm11555_vm2, %v9330_v17, %v3388_v43  ;;  %vm11569_vm2 = vcmask 1031168  }
 0xaed   :  { %3651 = vmatpush.msra.mxu0 %v3499_v34  ;;  %3441 = vst [vmem:[#allocation4 + $0x170] sm:$0xf] %v3409_v46 }
 0xaee   :  { %3632 = vmatpush.msra.mxu3 %v3482_v1 }
 0xaef   :  { %3652 = vmatpush.msra.mxu0 %v3483_v11 }
 0xaf0   :  { %3633 = vmatpush.msra.mxu3 %v3466_v42  ;;  %v3390_v36 = vpop.permute.xlu0 %3389 }
 0xaf1   :  { %3653 = vmatpush.msra.mxu0 %v3467_v45  ;;  %v3410_v15 = vsel %vm11556_vm3, %v3388_v43, %v3390_v36  ;;  %v3411_v13 = vsel %vm11557_vm4, %v3390_v36, %v9302_v53  ;;  %vm11570_vm3 = vmmov %vm11569_vm2 }
 0xaf2   :  { %3442 = vst [vmem:[#allocation4 + $0x150] sm:$0xf] %v3410_v15  ;;  %3634 = vmatpush.msra.mxu3 %v3450_v58  ;;  %v2743_v48 = vpop.permute.xlu2 %2742  ;;  %vm11571_vm4 = vmmov %vm11558_vm6 }
 0xaf3   :  { %3443 = vst [vmem:[#allocation4 + $0x20] sm:$0xf] %v3411_v13  ;;  %3654 = vmatpush.msra.mxu0 %v3451_v47  ;;  %6951 = vmatmul.msk.f32.vlgmr.msra.gmra.mxu3 %vm11558_vm6, %v9344_v9  ;;  %v3394_v52 = vpop.permute.xlu1 %3393  ;;  %v2763_v26 = vsel %vm11562_vm5, %v9074_v61, %v2743_v48  ;;  %v2764_v62 = vsel %vm11563_vm10, %v2743_v48, %v9087_v22  ;;  %v3506_v22 = vld [vmem:[#allocation4 + $0xd0] sm:$0xff]  ;;  %vm11572_vm6 = vcmask 1039360   ;;  %vm11577_vm10 = vmmov %vm11568_vm1  ;;  %v3487_v13 = vld [vmem:[#allocation4 + $0x228] sm:$0xff] }
 0xaf4   :  { %6958 = vmatpush.msk.msrb.mxu3 %vm11306_vm15, %v3518_v29  ;;  %6953 = vmatmul.msk.f32.vlgmr.msra.gmra.mxu0 %vm11559_vm7, %v9344_v9  ;;  %v3412_v4 = vsel %vm11560_vm9, %v9302_v53, %v3394_v52  ;;  %v3413_v33 = vsel %vm11561_vm8, %v3394_v52, %v9311_v24  ;;  %2795 = vst [vmem:[#allocation4 + $0x238] sm:$0xf0] %v2763_v26  ;;  %v3522_v53 = vld [vmem:[#allocation4 + $0x170] sm:$0xf]  ;;  %vm11573_vm7 = vmmov %vm11568_vm1  ;;  %v3471_v47 = vld [vmem:[#allocation4 + $0x218] sm:$0xff] }
 0xaf5   :  { %3444 = vst [vmem:[#allocation4 + $0x178] sm:$0xf] %v3412_v4  ;;  %vm11574_vm9 = vmmov %vm11562_vm5  ;;  %v3455_v29 = vld [vmem:[#allocation4 + $0x120] sm:$0xff]  ;;  %v3491_v48 = vld [vmem:[#allocation4 + $0x270] sm:$0xff] }
 0xaf6   :  { %3711 = vmatpush.msrb.mxu3 %v3502_v51  ;;  %3445 = vst [vmem:[#allocation4 + $0x50] sm:$0xf] %v3413_v33  ;;  %vm11575_vm8 = vmmov %vm11568_vm1  ;;  %v3507_v33 = vld [vmem:[#allocation4 + $0x278] sm:$0xff] }
 0xaf7   :  { %2796 = vst [vmem:[#allocation4 + $0x188] sm:$0xf0] %v2764_v62  ;;  %vm11576_vm5 = vmmov %vm11568_vm1 }
 0xaf8   :  { %3712 = vmatpush.msrb.mxu3 %v3486_v27  ;;  %v3125_v16 = vpop.permute.xlu0 %3124 }
 0xaf9   :  { %v3148_v44 = vsel %vm11564_vm11, %v9319_v12, %v3125_v16  ;;  %v3149_v14 = vsel %vm11565_vm12, %v3125_v16, %v9223_v40  ;;  %v3474_v12 = vld [vmem:[#allocation4 + $0x68] sm:$0xff]  ;;  %vm11578_vm11 = vmmov %vm11553_vm0  ;;  %v3481_v16 = vld [vmem:[#allocation4 + $0x98] sm:$0xff] }
 0xafa   :  { %3713 = vmatpush.msrb.mxu3 %v3470_v49  ;;  %3180 = vst [vmem:[#allocation4 + $0x1b8] sm:$0xf] %v3148_v44  ;;  %v3382_v40 = vpop.permute.xlu2 %3381  ;;  %vm11579_vm12 = vmmov %vm11553_vm0 }
 0xafb   :  { %3181 = vst [vmem:[#allocation4 + $0x168] sm:$0xf] %v3149_v14  ;;  %v3255_v61 = vpop.permute.xlu1 %3254  ;;  %v3406_v28 = vsel %vm11553_vm0, %v9315_v55, %v3382_v40  ;;  %v3464_v14 = vld [vmem:[#allocation4 + $0x80] sm:$0xff] }
 0xafc   :  { %3714 = vmatpush.msrb.mxu3 %v3454_v38  ;;  %v3279_v59 = vsel %vm11567_vm14, %v3255_v61, %v9294_v41  ;;  %3438 = vst [vmem:[#allocation4 + $0x128] sm:$0xf] %v3406_v28  ;;  %vm11581_vm14 = vmmov %vm11553_vm0  ;;  %v3465_v38 = vld [vmem:[#allocation4 + $0x30] sm:$0xff]  ;;  %v3500_v28 = vld [vmem:[#allocation4 + $0x58] sm:$0xff] }
 0xafd   :  { %6959 = vmatmul.msk.f32.vlgmr.msrb.gmra.mxu3 %vm11566_vm13, %v9344_v9  ;;  %3311 = vst [vmem:[#allocation4 + $0x168] sm:$0xf0] %v3279_v59  ;;  %v3526_v63 = vld [vmem:[#allocation4 + $0x50] sm:$0xf]  ;;  %vm11580_vm13 = vmmov %vm11553_vm0  ;;  %vm11582_vm0 = vcmask 793600   ;;  %v3448_v59 = vld [vmem:[#allocation4 + $0xc8] sm:$0xff] }
 0xafe   :  { %6966 = vmatpush.msk.msra.mxu3 %vm11306_vm15, %v3522_v53 }
 0xb00   :  { %3791 = vmatpush.msra.mxu3 %v3506_v22  ;;  %v3239_v20 = vpop.permute.xlu0 %3238 }
 0xb01   :  { %v3271_v57 = vsel %vm11568_vm1, %v3239_v20, %v9246_v0  ;;  %vm11583_vm1 = vmmov %vm11572_vm6 }
 0xb02   :  { %3792 = vmatpush.msra.mxu3 %v3490_v31  ;;  %3303 = vst [vmem:[#allocation4 + $0x1f0] sm:$0xf0] %v3271_v57  ;;  %v9379_v0 = vpop.permute.xlu2 %2489  ;;  %v3517_v31 = vld [vmem:[#allocation4 + $0x88] sm:$0xf] }
 0xb03   :  { %v2613_v41 = vpop.permute.xlu1 %2612  ;;  %v2507_v50 = vsel %vm11572_vm6, %v9328_v2, %v9379_v0  ;;  %v3519_v6 = vld [vmem:[#allocation4 + $0x128] sm:$0xf] }
 0xb04   :  { %3793 = vmatpush.msra.mxu3 %v3474_v12  ;;  %v2633_v18 = vsel %vm11569_vm2, %v8985_v23, %v2613_v41  ;;  %v2634_v55 = vsel %vm11570_vm3, %v2613_v41, %v9002_v19  ;;  %2539 = vst [vmem:[#allocation4 + $0x140] sm:$0xf0] %v2507_v50  ;;  %6960 = vmatpush.msk.msrb.mxu0 %vm11306_vm15, %v3519_v6  ;;  %vm11584_vm2 = vmmov %vm11571_vm4  ;;  %v3484_v12 = vld [vmem:[#allocation4 + $0x1d0] sm:$0xff]  ;;  %v3468_v41 = vld [vmem:[#allocation4 + $0x1d8] sm:$0xff] }
 0xb05   :  { %2665 = vst [vmem:[#allocation4 + $0x238] sm:$0xf] %v2633_v18  ;;  %vm11585_vm3 = vmmov %vm11578_vm11  ;;  %v3452_v6 = vld [vmem:[#allocation4 + $0xe8] sm:$0xff] }
 0xb06   :  { %3794 = vmatpush.msra.mxu3 %v3458_v39  ;;  %2666 = vst [vmem:[#allocation4 + $0x188] sm:$0xf] %v2634_v55  ;;  %v3485_v39 = vld [vmem:[#allocation4 + $0x1e0] sm:$0xff] }
 0xb07   :  { %6967 = vmatmul.msk.f32.vlgmr.msra.gmra.mxu3 %vm11571_vm4, %v9344_v9  ;;  %vm11586_vm4 = vcmask 1031168  }
 0xb08   :  { %6974 = vmatpush.msk.msrb.mxu3 %vm11306_vm15, %v3526_v63  ;;  %v3237_v35 = vpop.permute.xlu0 %3236  ;;  %vm11587_vm6 = vmmov %vm11586_vm4 }
 0xb09   :  { %v3270_v23 = vsel %vm11573_vm7, %v3237_v35, %v3239_v20  ;;  %v3497_v27 = vld [vmem:[#allocation4 + $0x1f0] sm:$0xff]  ;;  %vm11588_vm7 = vmmov %vm11584_vm2 }
 0xb0a   :  { %3871 = vmatpush.msrb.mxu3 %v3510_v8  ;;  %3302 = vst [vmem:[#allocation4 + $0x78] sm:$0xf0] %v3270_v23  ;;  %v3269_v34 = vpop.permute.xlu2 %3268  ;;  %v3469_v8 = vld [vmem:[#allocation4 + $0x1a0] sm:$0xff]  ;;  %v3453_v35 = vld [vmem:[#allocation4 + $0xf0] sm:$0xff] }
 0xb0b   :  { %v9386_v19 = vpop.permute.xlu1 %2748  ;;  %v3285_v43 = vsel %vm11575_vm8, %v9304_v54, %v3269_v34  ;;  %vm11590_vm8 = vcmask 801792   ;;  %v3488_v34 = vld [vmem:[#allocation4] sm:$0xff] }
 0xb0c   :  { %3872 = vmatpush.msrb.mxu3 %v3494_v60  ;;  %v2766_v25 = vsel %vm11574_vm9, %v9049_v37, %v9386_v19  ;;  %3317 = vst [vmem:[#allocation4 + $0x110] sm:$0xf0] %v3285_v43  ;;  %v3475_v49 = vld [vmem:[#allocation4 + $0x238] sm:$0xff]  ;;  %vm11589_vm9 = vmmov %vm11584_vm2 }
 0xb0d   :  { %2798 = vst [vmem:[#allocation4 + $0xb8] sm:$0xf0] %v2766_v25  ;;  %v3505_v25 = vld [vmem:[#allocation4 + $0x168] sm:$0xff] }
 0xb10   :  { %v3253_v1 = vpop.permute.xlu0 %3252 }
 0xb11   :  { %v3277_v46 = vsel %vm11576_vm5, %v9261_v7, %v3253_v1  ;;  %v3278_v11 = vsel %vm11577_vm10, %v3253_v1, %v3255_v61  ;;  %vm11591_vm5 = vmmov %vm11583_vm1  ;;  %v3489_v1 = vld [vmem:[#allocation4 + $0x1b0] sm:$0xff] }
 0xb12   :  { %3309 = vst [vmem:[#allocation4 + $0x100] sm:$0xf0] %v3277_v46  ;;  %v2621_v44 = vpop.permute.xlu2 %2620  ;;  %vm11592_vm10 = vmmov %vm11583_vm1 }
 0xb13   :  { %3310 = vst [vmem:[#allocation4 + $0x1b8] sm:$0xf0] %v3278_v11  ;;  %v3384_v42 = vpop.permute.xlu1 %3383  ;;  %v3472_v11 = vld [vmem:[#allocation4 + $0x190] sm:$0xff] }
 0xb14   :  { %v3407_v45 = vsel %vm11578_vm11, %v3382_v40, %v3384_v42  ;;  %v3408_v37 = vsel %vm11579_vm12, %v3384_v42, %v9330_v17  ;;  %v3516_v40 = vld [vmem:[#allocation4 + $0x240] sm:$0xf]  ;;  %vm11593_vm11 = vmmov %vm11584_vm2 }
 0xb15   :  { %3439 = vst [vmem:[#allocation4 + $0x1c0] sm:$0xf] %v3407_v45  ;;  %vm11594_vm12 = vmmov %vm11584_vm2  ;;  %v3473_v45 = vld [vmem:[#allocation4 + $0x48] sm:$0xff] }
 0xb16   :  { %3440 = vst [vmem:[#allocation4 + $0x230] sm:$0xf] %v3408_v37 }
 0xb18   :  { %v3368_v36 = vpop.permute.xlu0 %3367 }
 0xb19   :  { %v3399_v54 = vsel %vm11580_vm13, %v9339_v30, %v3368_v36  ;;  %v3400_v15 = vsel %vm11581_vm14, %v3368_v36, %v9313_v32  ;;  %v3503_v7 = vld [vmem:[#allocation4 + $0x100] sm:$0xff]  ;;  %v3523_v30 = vld [vmem:[#allocation4 + $0x150] sm:$0xf]  ;;  %vm11595_vm13 = vmmov %vm11584_vm2  ;;  %vm11596_vm14 = vcmask 556032  }
 0xb1a   :  { %3431 = vst [vmem:[#allocation4 + $0xa8] sm:$0xf] %v3399_v54  ;;  %3731 = vmatpush.msrb.mxu0 %v3503_v7  ;;  %v3456_v36 = vld [vmem:[#allocation4 + $0xd8] sm:$0xff]  ;;  %v3457_v54 = vld [vmem:[#allocation4 + $0x148] sm:$0xff]  ;;  %v3508_v7 = vld [vmem:[#allocation4 + $0x210] sm:$0xff] }
 0xb1b   :  { %3432 = vst [vmem:[#allocation4 + $0x60] sm:$0xf] %v3400_v15  ;;  %v2880_v58 = vpop.permute.xlu1 %2879  ;;  %v3524_v15 = vld [vmem:[#allocation4 + $0x20] sm:$0xf] }
 0xb1c   :  { %3732 = vmatpush.msrb.mxu0 %v3487_v13  ;;  %v2896_v17 = vsel %vm11582_vm0, %v9124_v21, %v2880_v58  ;;  %v3496_v21 = vld [vmem:[#allocation4 + $0x78] sm:$0xff]  ;;  %v3520_v60 = vld [vmem:[#allocation4 + $0x1c0] sm:$0xf]  ;;  %vm11597_vm0 = vmmov %vm11584_vm2 }
 0xb1d   :  { %2928 = vst [vmem:[#allocation4 + $0x18] sm:$0xf] %v2896_v17  ;;  %v3521_v23 = vld [vmem:[#allocation4 + $0x230] sm:$0xf]  ;;  %v3509_v13 = vld [vmem:[#allocation4 + $0x180] sm:$0xff] }
 0xb1e   :  { %3733 = vmatpush.msrb.mxu0 %v3471_v47  ;;  %v3492_v47 = vld [vmem:[#allocation4 + $0x1e8] sm:$0xff] }
 0xb20   :  { %v9405_v51 = vpop.permute.xlu0 %2485  ;;  %3734 = vmatpush.msrb.mxu0 %v3455_v29  ;;  %v3493_v29 = vld [vmem:[#allocation4 + $0x38] sm:$0xff] }
 0xb21   :  { %v2506_v32 = vsel %vm11583_vm1, %v9405_v51, %v9328_v2  ;;  %v3512_v52 = vld [vmem:[#allocation4 + $0xa8] sm:$0xf]  ;;  %6961 = vmatmul.msk.f32.vlgmr.msrb.gmra.mxu0 %vm11584_vm2, %v9344_v9  ;;  %v3480_v2 = vld [vmem:[#allocation4 + $0xf8] sm:$0xff]  ;;  %vm11598_vm1 = vmmov %vm11597_vm0 }
 0xb22   :  { %6968 = vmatpush.msk.msra.mxu0 %vm11306_vm15, %v3523_v30  ;;  %2538 = vst [vmem:[#allocation4 + $0xc0] sm:$0xf0] %v2506_v32  ;;  %6946 = vmatpush.msk.msra.mxu1 %vm11306_vm15, %v3512_v52  ;;  %v3513_v4 = vld [vmem:[#allocation4 + $0x60] sm:$0xf]  ;;  %vm11599_vm2 = vmmov %vm11597_vm0  ;;  %v3476_v30 = vld [vmem:[#allocation4 + $0x188] sm:$0xff] }
 0xb23   :  { %6948 = vmatpush.msk.msrb.mxu2 %vm11306_vm15, %v3513_v4  ;;  %v3398_v26 = vpop.permute.xlu1 %3397  ;;  %v3477_v32 = vld [vmem:[#allocation4 + $0x250] sm:$0xff] }
 0xb24   :  { %3811 = vmatpush.msra.mxu0 %v3507_v33  ;;  %3591 = vmatpush.msra.mxu1 %v3496_v21  ;;  %v3414_v62 = vsel %vm11585_vm3, %v9311_v24, %v3398_v26  ;;  %v3449_v24 = vld [vmem:[#allocation4 + $0x8] sm:$0xff]  ;;  %vm11600_vm3 = vcmask 785408   ;;  %v3899_v26 = vld [vmem:[%s6887_s5] sm:$0xff] }
 0xb25   :  { %3611 = vmatpush.msrb.mxu2 %v3497_v27  ;;  %3446 = vst [vmem:[#allocation4 + $0xb0] sm:$0xf] %v3414_v62 }
 0xb26   :  { %3812 = vmatpush.msra.mxu0 %v3491_v48  ;;  %3592 = vmatpush.msra.mxu1 %v3480_v2  ;;  %v11605_v2 = vmov 0  }
 0xb27   :  { %3612 = vmatpush.msrb.mxu2 %v3481_v16 }
 0xb28   :  { %3813 = vmatpush.msra.mxu0 %v3475_v49  ;;  %v2619_v53 = vpop.permute.xlu0 %2618  ;;  %3593 = vmatpush.msra.mxu1 %v3464_v14 }
 0xb29   :  { %3613 = vmatpush.msrb.mxu2 %v3465_v38  ;;  %v2636_v61 = vsel %vm11586_vm4, %v9014_v3, %v2619_v53  ;;  %v2637_v22 = vsel %vm11587_vm6, %v2619_v53, %v2621_v44  ;;  %v3501_v3 = vld [vmem:[#allocation4 + $0x258] sm:$0xff]  ;;  %v3461_v4 = vld [vmem:[#allocation4 + $0xc0] sm:$0xff]  ;;  %vm11601_vm4 = vmmov %vm11597_vm0 }
 0xb2a   :  { %2668 = vst [vmem:[#allocation4 + $0xb8] sm:$0xf] %v2636_v61  ;;  %3594 = vmatpush.msra.mxu1 %v3448_v59  ;;  %vm11602_vm6 = vmmov %vm11597_vm0 }
 0xb2b   :  { %2669 = vst [vmem:[#allocation4 + $0x268] sm:$0xf] %v2637_v22  ;;  %3614 = vmatpush.msrb.mxu2 %v3449_v24  ;;  %6947 = vmatmul.msk.f32.vlgmr.msra.gmra.mxu1 %vm11588_vm7, %v9344_v9  ;;  %v2751_v20 = vpop.permute.xlu1 %2750  ;;  %vm11603_vm7 = vmmov %vm11591_vm5 }
 0xb2c   :  { %6954 = vmatpush.msk.msrb.mxu1 %vm11306_vm15, %v3516_v40  ;;  %6949 = vmatmul.msk.f32.vlgmr.msrb.gmra.mxu2 %vm11589_vm9, %v9344_v9  ;;  %v2767_v57 = vsel %vm11590_vm8, %v9386_v19, %v2751_v20  ;;  %v3462_v19 = vld [vmem:[#allocation4 + $0x140] sm:$0xff]  ;;  %v3527_v37 = vld [vmem:[#allocation4 + $0xb0] sm:$0xf]  ;;  %vm11604_vm9 = vmmov %vm11597_vm0  ;;  %vm3901_vm8 = vcmp.gt.f32.partialorder %v3899_v26, 0.5 }
 0xb2d   :  { %6956 = vmatpush.msk.msra.mxu2 %vm11306_vm15, %v3517_v31  ;;  %2799 = vst [vmem:[#allocation4 + $0x268] sm:$0xf0] %v2767_v57  ;;  %v3903_v62 = vsel %vm3901_vm8, 1, %v11605_v2  ;;  %v3900_v31 = vld [vmem:[%s6887_s5 + $0x8] sm:$0xff]  ;;  %s6890_s5 = sld [smem:[%s11286_s0 + %s7179_s2]]  }
 0xb2e   :  { %3671 = vmatpush.msrb.mxu1 %v3500_v28  ;;  %v3907_v16 = vperm.slane %v3903_v62, 2  ;;  %v3906_v14 = vperm.slane %v3903_v62, 1  ;;  %v3909_v40 = vperm.slane %v3903_v62, 4 }
 0xb2f   :  { %3691 = vmatpush.msra.mxu2 %v3501_v3 }
 0xb30   :  { %3672 = vmatpush.msrb.mxu1 %v3484_v12  ;;  %v2484_v63 = vpop.permute.xlu0 %2483 }
 0xb31   :  { %3692 = vmatpush.msra.mxu2 %v3485_v39  ;;  %v2504_v18 = vsel %vm11591_vm5, %v8921_v10, %v2484_v63  ;;  %v2505_v55 = vsel %vm11592_vm10, %v2484_v63, %v9405_v51  ;;  %v3478_v50 = vld [vmem:[#allocation4 + $0xb8] sm:$0xff]  ;;  %vm9473_vm10 = vcmp.eq.s32.totalorder %v3907_v16, 1  ;;  %v3911_v39 = vperm.slane %v3903_v62, 6 }
 0xb32   :  { %3673 = vmatpush.msrb.mxu1 %v3468_v41  ;;  %2536 = vst [vmem:[#allocation4 + $0x108] sm:$0xf0] %v2504_v18  ;;  %3873 = vmatpush.msrb.mxu3 %v3478_v50  ;;  %v3504_v10 = vld [vmem:[#allocation4 + $0x1b8] sm:$0xff]  ;;  %v3912_v50 = vperm.slane %v3903_v62, 7 }
 0xb33   :  { %3693 = vmatpush.msra.mxu2 %v3469_v8  ;;  %2537 = vst [vmem:[#allocation4 + $0x220] sm:$0xf0] %v2505_v55  ;;  %v3910_v8 = vperm.slane %v3903_v62, 5 }
 0xb34   :  { %3674 = vmatpush.msrb.mxu1 %v3452_v6  ;;  %3874 = vmatpush.msrb.mxu3 %v3462_v19  ;;  %v3479_v27 = vld [vmem:[#allocation4 + $0x268] sm:$0xff] }
 0xb35   :  { %3694 = vmatpush.msra.mxu2 %v3453_v35  ;;  %6955 = vmatmul.msk.f32.vlgmr.msrb.gmra.mxu1 %vm11594_vm12, %v9344_v9 }
 0xb36   :  { %6962 = vmatpush.msk.msra.mxu1 %vm11306_vm15, %v3520_v60  ;;  %6957 = vmatmul.msk.f32.vlgmr.msra.gmra.mxu2 %vm11593_vm11, %v9344_v9  ;;  %vm9482_vm11 = vcmp.eq.s32.totalorder %v3906_v14, 1 }
 0xb37   :  { %6964 = vmatpush.msk.msrb.mxu2 %vm11306_vm15, %v3521_v23  ;;  %6975 = vmatmul.msk.f32.vlgmr.msrb.gmra.mxu3 %vm11595_vm13, %v9344_v9  ;;  %vm3902_vm13 = vcmp.gt.f32.partialorder %v3900_v31, 0.5 }
 0xb38   :  { %3751 = vmatpush.msra.mxu1 %v3504_v10  ;;  %v3139_v43 = vpop.permute.xlu0 %3138  ;;  %v3904_v23 = vsel %vm3902_vm13, 1, %v11605_v2 }
 0xb39   :  { %3771 = vmatpush.msrb.mxu2 %v3505_v25  ;;  %v3155_v46 = vsel %vm11596_vm14, %v9233_v5, %v3139_v43  ;;  %v3459_v42 = vld [vmem:[#allocation4 + $0x108] sm:$0xff]  ;;  %v3525_v5 = vld [vmem:[#allocation4 + $0x178] sm:$0xf]  ;;  %vm9504_vm14 = vcmp.eq.s32.totalorder %v3909_v40, 1  ;;  %v11630_v40 = vmov 0 }
 0xb3a   :  { %3752 = vmatpush.msra.mxu1 %v3488_v34  ;;  %3187 = vst [vmem:[#allocation4 + $0x110] sm:$0xf] %v3155_v46  ;;  %3814 = vmatpush.msra.mxu0 %v3459_v42  ;;  %v3460_v52 = vld [vmem:[#allocation4 + $0x220] sm:$0xff]  ;;  %v3913_v42 = vperm.slane %v3904_v23, 0 }
 0xb3b   :  { %3772 = vmatpush.msrb.mxu2 %v3489_v1  ;;  %6969 = vmatmul.msk.f32.vlgmr.msra.gmra.mxu0 %vm11597_vm0, %v9344_v9  ;;  %vm9517_vm0 = vcmp.eq.s32.totalorder %v3911_v39, 1 }
 0xb3c   :  { %3753 = vmatpush.msra.mxu1 %v3472_v11  ;;  %6976 = vmatpush.msk.msrb.mxu0 %vm11306_vm15, %v3527_v37 }
 0xb3d   :  { %3773 = vmatpush.msrb.mxu2 %v3473_v45 }
 0xb3e   :  { %3754 = vmatpush.msra.mxu1 %v3456_v36 }
 0xb3f   :  { %3774 = vmatpush.msrb.mxu2 %v3457_v54  ;;  %6963 = vmatmul.msk.f32.vlgmr.msra.gmra.mxu1 %vm11599_vm2, %v9344_v9  ;;  %vm9528_vm2 = vcmp.eq.s32.totalorder %v3912_v50, 1 }
 0xb40   :  { %6970 = vmatpush.msk.msrb.mxu1 %vm11306_vm15, %v3524_v15  ;;  %6965 = vmatmul.msk.f32.vlgmr.msrb.gmra.mxu2 %vm11598_vm1, %v9344_v9  ;;  %v3010_v58 = vpop.permute.xlu0 %3009  ;;  %vm9524_vm1 = vcmp.eq.s32.totalorder %v3910_v8, 1 }
 0xb41   :  { %6972 = vmatpush.msk.msra.mxu2 %vm11306_vm15, %v3525_v5  ;;  %v3026_v17 = vsel %vm11600_vm3, %v9185_v56, %v3010_v58  ;;  %v3511_v51 = vld [vmem:[#allocation4 + $0x110] sm:$0xff]  ;;  %v3915_v5 = vperm.slane %v3904_v23, 2  ;;  %vm9545_vm3 = vcmp.eq.s32.totalorder %v3913_v42, 1 }
 0xb42   :  { %3831 = vmatpush.msrb.mxu1 %v3508_v7  ;;  %3058 = vst [vmem:[#allocation4 + $0x18] sm:$0xf0] %v3026_v17  ;;  %3891 = vmatpush.msrb.mxu0 %v3511_v51  ;;  %v3914_v17 = vperm.slane %v3904_v23, 1 }
 0xb43   :  { %3851 = vmatpush.msra.mxu2 %v3509_v13 }
 0xb44   :  { %3832 = vmatpush.msrb.mxu1 %v3492_v47 }
 0xb45   :  { %3852 = vmatpush.msra.mxu2 %v3493_v29  ;;  %v3916_v29 = vperm.slane %v3904_v23, 3 }
 0xb46   :  { %3833 = vmatpush.msrb.mxu1 %v3476_v30 }
 0xb47   :  { %3853 = vmatpush.msra.mxu2 %v3477_v32 }
 0xb48   :  { %3834 = vmatpush.msrb.mxu1 %v3460_v52  ;;  %v2492_v33 = vpop.permute.xlu0 %2491 }
 0xb49   :  { %3854 = vmatpush.msra.mxu2 %v3461_v4  ;;  %6971 = vmatmul.msk.f32.vlgmr.msrb.gmra.mxu1 %vm11602_vm6, %v9344_v9  ;;  %v2508_v56 = vsel %vm11603_vm7, %v9379_v0, %v2492_v33  ;;  %v3495_v21 = vld [vmem:[#allocation4 + $0x18] sm:$0xff]  ;;  %v3905_v0 = vperm.slane %v3903_v62, 0  ;;  %vm9562_vm6 = vcmp.eq.s32.totalorder %v3914_v17, 1  ;;  %vm9568_vm7 = vcmp.eq.s32.totalorder %v3916_v29, 1 }
 0xb4a   :  { %6973 = vmatmul.msk.f32.vlgmr.msra.gmra.mxu2 %vm11601_vm4, %v9344_v9  ;;  %2540 = vst [vmem:[#allocation4 + $0x200] sm:$0xf0] %v2508_v56  ;;  %3892 = vmatpush.msrb.mxu0 %v3495_v21  ;;  %vm9557_vm4 = vcmp.eq.s32.totalorder %v3915_v5, 1  ;;  %v3917_v21 = vperm.slane %v3904_v23, 4 }
 0xb4b   :  { %vm9467_vm5 = vcmp.eq.s32.totalorder %v3905_v0, 1 }
 0xb4c   :  { %3893 = vmatpush.msrb.mxu0 %v3479_v27 }
 0xb51   :  { %v3463_v48 = vld [vmem:[#allocation4 + $0x200] sm:$0xff] }
 0xb52   :  { %3894 = vmatpush.msrb.mxu0 %v3463_v48 }
 0xb53   :  { %6977 = vmatmul.msk.f32.vlgmr.msrb.gmra.mxu0 %vm11604_vm9, %v9344_v9  ;;  %v3908_v9 = vperm.slane %v3903_v62, 3  ;;  %vm9583_vm9 = vcmp.eq.s32.totalorder %v3917_v21, 1 }
 0xb54   :  { %v11631_v40 = vsel %vm9583_vm9, 4294967295, %v11630_v40 }
 0xb55   :  { %vm9486_vm12 = vcmp.eq.s32.totalorder %v3908_v9, 1 }
 0xb71   :  { %v9477_v61 = vpop.f32.mrf.mxu0 }
 0xb72   :  { %v3940_v12 = vsel %vm9486_vm12, %v9477_v61, 0.0 }
 0xb73   :  { %v3958_v6 = vsel %vm11306_vm15, %v3940_v12, 0.0 }
 0xb76   :  { %v9471_v38 = vpop.f32.mrf.mxu3 }
 0xb77   :  { %v3939_v28 = vsel %vm9473_vm10, %v9471_v38, 0.0 }
 0xb78   :  { %v3956_v41 = vsel %vm11306_vm15, %v3939_v28, 0.0 }
 0xb80   :  { %v9511_v60 = vpop.f32.mrf.mxu3 }
 0xb81   :  { %v3943_v45 = vsel %vm9517_vm0, %v9511_v60, 0.0 }
 0xb82   :  { %v3964_v13 = vsel %vm11306_vm15, %v3943_v45, 0.0 }
 0xb8a   :  { %v9555_v4 = vpop.f32.mrf.mxu3 }
 0xb8b   :  { %v3947_v0 = vsel %vm9557_vm4, %v9555_v4, 0.0 }
 0xb8c   :  { %v3972_v28 = vsel %vm11306_vm15, %v3947_v0, 0.0 }
 0xb9e   :  { %v9522_v43 = vpop.f32.mrf.mxu0 }
 0xb9f   :  { %v3944_v15 = vsel %vm9528_vm2, %v9522_v43, 0.0 }
 0xba0   :  { %v3966_v51 = vsel %vm11306_vm15, %v3944_v15, 0.0 }
 0xba8   :  { %v9465_v49 = vpop.f32.mrf.mxu1 }
 0xba9   :  { %v3937_v22 = vsel %vm9467_vm5, %v9465_v49, 0.0 }
 0xbaa   :  { %v3953_v20 = vsel %vm11306_vm15, %v3937_v22, 0.0 }
 0xbaf   :  { %v9494_v3 = vpop.f32.mrf.mxu2 }
 0xbb0   :  { %v3938_v57 = vsel %vm9482_vm11, %v9494_v3, 0.0 }
 0xbb1   :  { %v3954_v63 = vsel %vm11306_vm15, %v3938_v57, 0.0  ;;  %v3919_v57 = vperm.slane %v3904_v23, 6 }
 0xbb2   :  { %v3955_v55 = vadd.f32 %v3954_v63, %v3953_v20  ;;  %v9509_v35 = vpop.f32.mrf.mxu1  ;;  %v3918_v20 = vperm.slane %v3904_v23, 5 }
 0xbb3   :  { %v3941_v10 = vsel %vm9504_vm14, %v9509_v35, 0.0  ;;  %vm9602_vm13 = vcmp.eq.s32.totalorder %v3919_v57, 1 }
 0xbb4   :  { %v3957_v19 = vadd.f32 %v3956_v41, %v3955_v55  ;;  %v3960_v34 = vsel %vm11306_vm15, %v3941_v10, 0.0  ;;  %vm9596_vm8 = vcmp.eq.s32.totalorder %v3918_v20, 1 }
 0xbb6   :  { %v3959_v1 = vadd.f32 %v3958_v6, %v3957_v19 }
 0xbb8   :  { %v3961_v37 = vadd.f32 %v3960_v34, %v3959_v1  ;;  %v9566_v26 = vpop.f32.mrf.mxu0  ;;  %v3920_v1 = vperm.slane %v3904_v23, 7 }
 0xbb9   :  { %v9535_v36 = vpop.f32.mrf.mxu2  ;;  %v3948_v22 = vsel %vm9568_vm7, %v9566_v26, 0.0 }
 0xbba   :  { %v3942_v54 = vsel %vm9524_vm1, %v9535_v36, 0.0  ;;  %v3974_v63 = vsel %vm11306_vm15, %v3948_v22, 0.0  ;;  %v9600_v6 = vpop.f32.mrf.mxu3 }
 0xbbb   :  { %v3962_v7 = vsel %vm11306_vm15, %v3942_v54, 0.0 }
 0xbbc   :  { %v3963_v47 = vadd.f32 %v3962_v7, %v3961_v37  ;;  %v9550_v30 = vpop.f32.mrf.mxu1  ;;  %v3951_v37 = vsel %vm9602_vm13, %v9600_v6, 0.0 }
 0xbbd   :  { %v3945_v52 = vsel %vm9545_vm3, %v9550_v30, 0.0  ;;  %v3980_v5 = vsel %vm11306_vm15, %v3951_v37, 0.0 }
 0xbbe   :  { %v3965_v32 = vadd.f32 %v3964_v13, %v3963_v47  ;;  %v3968_v56 = vsel %vm11306_vm15, %v3945_v52, 0.0 }
 0xbc0   :  { %v3967_v27 = vadd.f32 %v3966_v51, %v3965_v32 }
 0xbc2   :  { %v3969_v16 = vadd.f32 %v3968_v56, %v3967_v27 }
 0xbc3   :  { %v9575_v14 = vpop.f32.mrf.mxu2 }
 0xbc4   :  { %v3946_v9 = vsel %vm9562_vm6, %v9575_v14, 0.0 }
 0xbc5   :  { %v3970_v31 = vsel %vm11306_vm15, %v3946_v9, 0.0 }
 0xbc6   :  { %v3971_v12 = vadd.f32 %v3970_v31, %v3969_v16  ;;  %v9589_v39 = vpop.f32.mrf.mxu1 }
 0xbc7   :  { %v3949_v41 = vsel %vm9583_vm9, %v9589_v39, 0.0  ;;  %vm9616_vm9 = vcmp.eq.s32.totalorder %v3920_v1, 1 }
 0xbc8   :  { %v3973_v55 = vadd.f32 %v3972_v28, %v3971_v12  ;;  %v3976_v8 = vsel %vm11306_vm15, %v3949_v41, 0.0 }
 0xbca   :  { %v3975_v10 = vadd.f32 %v3974_v63, %v3973_v55 }
 0xbcc   :  { %v3977_v42 = vadd.f32 %v3976_v8, %v3975_v10 }
 0xbcd   :  { %v9606_v34 = vpop.f32.mrf.mxu2 }
 0xbce   :  { %v3950_v45 = vsel %vm9596_vm8, %v9606_v34, 0.0 }
 0xbcf   :  { %v3978_v54 = vsel %vm11306_vm15, %v3950_v45, 0.0 }
 0xbd0   :  { %v3979_v15 = vadd.f32 %v3978_v54, %v3977_v42  ;;  %v9620_v13 = vpop.f32.mrf.mxu0 }
 0xbd1   :  { %v3952_v47 = vsel %vm9616_vm9, %v9620_v13, 0.0 }
 0xbd2   :  { %v3981_v23 = vadd.f32 %v3980_v5, %v3979_v15  ;;  %v3982_v17 = vsel %vm11306_vm15, %v3952_v47, 0.0 }
 0xbd4   :  { %v3983_v29 = vadd.f32 %v3982_v17, %v3981_v23 }
 0xbd6   :  { %3984 = vadd.xlane.f32.xlu2 %v3983_v29 }
 0xc49   :  { %v3985_v51 = vpop.xlane.xlu2 %3984 }
 0xc4a   :  { %v9626_v32 = vmul.f32 0.000739645, %v3985_v51 }
 0xc4c   :  { %v3987_v52 = vsub.f32 %v9465_v49, %v9626_v32  ;;  %v3988_v56 = vsub.f32 %v9494_v3, %v9626_v32  ;;  %v3989_v21 = vsub.f32 %v9471_v38, %v9626_v32  ;;  %v3990_v27 = vsub.f32 %v9477_v61, %v9626_v32 }
 0xc4d   :  { %v3991_v9 = vsub.f32 %v9509_v35, %v9626_v32  ;;  %v3992_v31 = vsub.f32 %v9535_v36, %v9626_v32  ;;  %v3993_v12 = vsub.f32 %v9511_v60, %v9626_v32  ;;  %v3994_v10 = vsub.f32 %v9522_v43, %v9626_v32 }
 0xc4e   :  { %v4003_v0 = vmul.f32 %v3987_v52, %v3987_v52  ;;  %v4004_v16 = vmul.f32 %v3988_v56, %v3988_v56  ;;  %v4005_v22 = vmul.f32 %v3989_v21, %v3989_v21  ;;  %v4006_v28 = vmul.f32 %v3990_v27, %v3990_v27 }
 0xc4f   :  { %v4007_v63 = vmul.f32 %v3991_v9, %v3991_v9  ;;  %v4008_v1 = vmul.f32 %v3992_v31, %v3992_v31  ;;  %v3995_v45 = vsub.f32 %v9550_v30, %v9626_v32  ;;  %v4009_v37 = vmul.f32 %v3993_v12, %v3993_v12 }
 0xc50   :  { %v4019_v20 = vsel %vm9467_vm5, %v4003_v0, 0.0  ;;  %v4020_v57 = vsel %vm9482_vm11, %v4004_v16, 0.0  ;;  %v4021_v41 = vsel %vm9473_vm10, %v4005_v22, 0.0  ;;  %v4022_v44 = vsel %vm9486_vm12, %v4006_v28, 0.0 }
 0xc51   :  { %v4035_v55 = vsel %vm11306_vm15, %v4019_v20, 0.0  ;;  %v4036_v8 = vsel %vm11306_vm15, %v4020_v57, 0.0  ;;  %v4038_v42 = vsel %vm11306_vm15, %v4021_v41, 0.0  ;;  %v4023_v53 = vsel %vm9504_vm14, %v4007_v63, 0.0 }
 0xc52   :  { %v4037_v59 = vadd.f32 %v4036_v8, %v4035_v55  ;;  %v4040_v15 = vsel %vm11306_vm15, %v4022_v44, 0.0  ;;  %v3996_v5 = vsub.f32 %v9575_v14, %v9626_v32  ;;  %v4010_v23 = vmul.f32 %v3994_v10, %v3994_v10 }
 0xc53   :  { %v4024_v24 = vsel %vm9524_vm1, %v4008_v1, 0.0  ;;  %v4042_v17 = vsel %vm11306_vm15, %v4023_v53, 0.0  ;;  %v3997_v29 = vsub.f32 %v9555_v4, %v9626_v32  ;;  %v4011_v51 = vmul.f32 %v3995_v45, %v3995_v45 }
 0xc54   :  { %v4039_v54 = vadd.f32 %v4038_v42, %v4037_v59  ;;  %v4025_v18 = vsel %vm9517_vm0, %v4009_v37, 0.0  ;;  %v4044_v56 = vsel %vm11306_vm15, %v4024_v24, 0.0  ;;  %v3998_v21 = vsub.f32 %v9566_v26, %v9626_v32 }
 0xc55   :  { %v4012_v27 = vmul.f32 %v3996_v5, %v3996_v5  ;;  %v4026_v46 = vsel %vm9528_vm2, %v4010_v23, 0.0  ;;  %v4046_v16 = vsel %vm11306_vm15, %v4025_v18, 0.0  ;;  %v3999_v9 = vsub.f32 %v9589_v39, %v9626_v32 }
 0xc56   :  { %v4041_v47 = vadd.f32 %v4040_v15, %v4039_v54  ;;  %v4013_v22 = vmul.f32 %v3997_v29, %v3997_v29  ;;  %v4027_v25 = vsel %vm9545_vm3, %v4011_v51, 0.0  ;;  %v4048_v28 = vsel %vm11306_vm15, %v4026_v46, 0.0 }
 0xc57   :  { %v4000_v20 = vsub.f32 %v9606_v34, %v9626_v32  ;;  %v4014_v57 = vmul.f32 %v3998_v21, %v3998_v21  ;;  %v4028_v11 = vsel %vm9562_vm6, %v4012_v27, 0.0  ;;  %v4050_v63 = vsel %vm11306_vm15, %v4027_v25, 0.0 }
 0xc58   :  { %v4043_v52 = vadd.f32 %v4042_v17, %v4041_v47  ;;  %v4001_v41 = vsub.f32 %v9600_v6, %v9626_v32  ;;  %v4015_v55 = vmul.f32 %v3999_v9, %v3999_v9  ;;  %v4029_v58 = vsel %vm9557_vm4, %v4013_v22, 0.0  ;;  %v4069_v9 = vld [vmem:[%s6885_s9] sm:$0xf]  ;;  %s10941_s9 = sld [smem:[%s11286_s0 + %s7180_s6]]  }
 0xc59   :  { %v4052_v10 = vsel %vm11306_vm15, %v4028_v11, 0.0  ;;  %v4002_v1 = vsub.f32 %v9620_v13, %v9626_v32  ;;  %v4016_v44 = vmul.f32 %v4000_v20, %v4000_v20  ;;  %v4030_v48 = vsel %vm9568_vm7, %v4014_v57, 0.0 }
 0xc5a   :  { %v4045_v0 = vadd.f32 %v4044_v56, %v4043_v52  ;;  %v4054_v42 = vsel %vm11306_vm15, %v4029_v58, 0.0  ;;  %v4017_v45 = vmul.f32 %v4001_v41, %v4001_v41  ;;  %vm11638_vm5 = vnez %v11631_v40 }
 0xc5b   :  { %v4031_v37 = vsel %vm11638_vm5, %v4015_v55, 0.0  ;;  %v4056_v33 = vsel %vm11306_vm15, %v4030_v48, 0.0  ;;  %v4018_v54 = vmul.f32 %v4002_v1, %v4002_v1  ;;  %v4032_v15 = vsel %vm9596_vm8, %v4016_v44, 0.0 }
 0xc5c   :  { %v4047_v31 = vadd.f32 %v4046_v16, %v4045_v0  ;;  %v4058_v23 = vsel %vm11306_vm15, %v4031_v37, 0.0  ;;  %v4033_v62 = vsel %vm9602_vm13, %v4017_v45, 0.0  ;;  %v4060_v47 = vsel %vm11306_vm15, %v4032_v15, 0.0 }
 0xc5d   :  { %v4034_v40 = vsel %vm9616_vm9, %v4018_v54, 0.0  ;;  %v4062_v29 = vsel %vm11306_vm15, %v4033_v62, 0.0 }
 0xc5e   :  { %v4049_v12 = vadd.f32 %v4048_v28, %v4047_v31  ;;  %v4064_v18 = vsel %vm11306_vm15, %v4034_v40, 0.0  ;;  %v4082_v28 = vld [vmem:[%s6886_s13] sm:$0xf]  ;;  %s11058_s13 = sld [smem:[%s11286_s0 + %s7181_s10]]  }
 0xc60   :  { %v4051_v8 = vadd.f32 %v4050_v63, %v4049_v12 }
 0xc62   :  { %v4053_v59 = vadd.f32 %v4052_v10, %v4051_v8 }
 0xc64   :  { %v4055_v53 = vadd.f32 %v4054_v42, %v4053_v59 }
 0xc66   :  { %v4057_v5 = vadd.f32 %v4056_v33, %v4055_v53 }
 0xc68   :  { %v4059_v24 = vadd.f32 %v4058_v23, %v4057_v5 }
 0xc6a   :  { %v4061_v17 = vadd.f32 %v4060_v47, %v4059_v24 }
 0xc6c   :  { %v4063_v51 = vadd.f32 %v4062_v29, %v4061_v17 }
 0xc6e   :  { %v4065_v50 = vadd.f32 %v4064_v18, %v4063_v51 }
 0xc70   :  { %4066 = vadd.xlane.f32.xlu1 %v4065_v50 }
 0xce3   :  { %v4067_v52 = vpop.xlane.xlu1 %4066 }
 0xce4   :  { %v4068_v56 = vmul.f32 0.000739645, %v4067_v52 }
 0xce6   :  { %v4070_v21 = vadd.f32 1e-05, %v4068_v56 }
 0xce8   :  { %7107 = vrsqrt.f32 %v4070_v21  ;;  %vm4077_vm11 = vweird.f32 %v4070_v21 }
 0xcee   :  { %v7108_v19 = vpop.eup %7107 }
 0xcef   :  { %v4072_v27 = vmul.f32 %v7108_v19, %v4070_v21  ;;  %vm4078_vm10 = vweird.f32 %v7108_v19 }
 0xcf0   :  { %vm4079_vm12 = vmor %vm4077_vm11, %vm4078_vm10 }
 0xcf1   :  { %v4073_v7 = vmul.f32 %v7108_v19, %v4072_v27 }
 0xcf3   :  { %v4074_v46 = vmul.f32 0.5, %v4073_v7 }
 0xcf5   :  { %v4075_v0 = vsub.f32 1.5, %v4074_v46 }
 0xcf7   :  { %v4076_v16 = vmul.f32 %v7108_v19, %v4075_v0 }
 0xcf9   :  { %v4080_v22 = vsel %vm4079_vm12, %v7108_v19, %v4076_v16 }
 0xcfa   :  { %v4081_v25 = vmul.f32 %v4080_v22, %v4069_v9 }
 0xcfc   :  { %4087 = vperm.xlu0 %7073, %v4081_v25   ;;  %v4083_v31 = vmul.f32 %v4081_v25, %v9626_v32 }
 0xcfe   :  { %v4084_v20 = vsub.f32 %v4082_v28, %v4083_v31 }
 0xd04   :  { %4108 = vperm.xlu0 %7073, %v4084_v20  }
 0xd6e   :  { %v4088_v57 = vpop.permute.xlu0 %4087 }
 0xd6f   :  { %v4090_v11 = vmul.f32 %v4088_v57, %v9465_v49  ;;  %v4091_v12 = vmul.f32 %v4088_v57, %v9494_v3  ;;  %v4092_v63 = vmul.f32 %v4088_v57, %v9471_v38  ;;  %v4093_v41 = vmul.f32 %v4088_v57, %v9477_v61 }
 0xd70   :  { %v4094_v55 = vmul.f32 %v4088_v57, %v9509_v35  ;;  %v4095_v58 = vmul.f32 %v4088_v57, %v9535_v36  ;;  %v4096_v8 = vmul.f32 %v4088_v57, %v9511_v60  ;;  %v4097_v32 = vmul.f32 %v4088_v57, %v9522_v43 }
 0xd71   :  { %v4098_v1 = vmul.f32 %v4088_v57, %v9550_v30  ;;  %v4099_v44 = vmul.f32 %v4088_v57, %v9575_v14  ;;  %v4100_v49 = vmul.f32 %v4088_v57, %v9555_v4  ;;  %v4101_v3 = vmul.f32 %v4088_v57, %v9566_v26 }
 0xd72   :  { %v4102_v38 = vmul.f32 %v4088_v57, %v9589_v39  ;;  %v4103_v61 = vmul.f32 %v4088_v57, %v9606_v34  ;;  %v4104_v35 = vmul.f32 %v4088_v57, %v9600_v6  ;;  %v4105_v36 = vmul.f32 %v4088_v57, %v9620_v13 }
 0xd76   :  { %v4109_v10 = vpop.permute.xlu0 %4108 }
 0xd77   :  { %v4111_v60 = vadd.f32 %v4109_v10, %v4090_v11  ;;  %v4112_v48 = vadd.f32 %v4109_v10, %v4091_v12  ;;  %v4113_v43 = vadd.f32 %v4109_v10, %v4092_v63  ;;  %v4114_v59 = vadd.f32 %v4109_v10, %v4093_v41 }
 0xd78   :  { %v4115_v42 = vadd.f32 %v4109_v10, %v4094_v55  ;;  %v4116_v30 = vadd.f32 %v4109_v10, %v4095_v58  ;;  %v4117_v45 = vadd.f32 %v4109_v10, %v4096_v8  ;;  %v4118_v14 = vadd.f32 %v4109_v10, %v4097_v32 }
 0xd79   :  { %v4119_v37 = vadd.f32 %v4109_v10, %v4098_v1  ;;  %v4120_v4 = vadd.f32 %v4109_v10, %v4099_v44  ;;  %v9731_v53 = vadd.f32 %v4109_v10, %v4100_v49  ;;  %v4122_v26 = vadd.f32 %v4109_v10, %v4101_v3 }
 0xd7a   :  { %v9733_v39 = vadd.f32 %v4109_v10, %v4102_v38  ;;  %v4124_v34 = vadd.f32 %v4109_v10, %v4103_v61  ;;  %v9735_v33 = vadd.f32 %v4109_v10, %v4104_v35  ;;  %v4126_v6 = vadd.f32 %v4109_v10, %v4105_v36 }
 0xd7b   :  { %vm4127_vm14 = vcmp.gt.f32.partialorder %v4111_v60, 0.0  ;;  %vm4128_vm0 = vcmp.gt.f32.partialorder %v4112_v48, 0.0  ;;  %vm4129_vm1 = vcmp.gt.f32.partialorder %v4113_v43, 0.0  ;;  %vm4130_vm2 = vcmp.gt.f32.partialorder %v4114_v59, 0.0 }
 0xd7c   :  { %vm4131_vm3 = vcmp.gt.f32.partialorder %v4115_v42, 0.0  ;;  %vm4132_vm4 = vcmp.gt.f32.partialorder %v4116_v30, 0.0  ;;  %vm4133_vm6 = vcmp.gt.f32.partialorder %v4117_v45, 0.0  ;;  %vm4134_vm7 = vcmp.gt.f32.partialorder %v4118_v14, 0.0 }
 0xd7d   :  { %vm4135_vm9 = vcmp.gt.f32.partialorder %v4119_v37, 0.0  ;;  %vm4136_vm8 = vcmp.gt.f32.partialorder %v4120_v4, 0.0  ;;  %vm4138_vm13 = vcmp.gt.f32.partialorder %v4122_v26, 0.0  ;;  %v4143_v13 = vmul.f32 0.2, %v4111_v60 }
 0xd7e   :  { %vm4137_vm5 = vcmp.gt.f32.partialorder %v9731_v53, 0.0  ;;  %vm4140_vm10 = vcmp.gt.f32.partialorder %v4124_v34, 0.0  ;;  %vm4142_vm11 = vcmp.gt.f32.partialorder %v4126_v6, 0.0  ;;  %v4144_v54 = vmul.f32 0.2, %v4112_v48 }
 0xd7f   :  { %v4146_v15 = vmul.f32 0.2, %v4114_v59  ;;  %vm4139_vm12 = vcmp.gt.f32.partialorder %v9733_v39, 0.0  ;;  %v4145_v5 = vmul.f32 0.2, %v4113_v43  ;;  %vm4141_vm15 = vcmp.gt.f32.partialorder %v9735_v33, 0.0 }
 0xd80   :  { %v4148_v23 = vmul.f32 0.2, %v4116_v30  ;;  %v4150_v62 = vmul.f32 0.2, %v4118_v14  ;;  %v4147_v24 = vmul.f32 0.2, %v4115_v42  ;;  %v4159_v18 = vsel %vm4127_vm14, %v4111_v60, %v4143_v13 }
 0xd81   :  { %v4152_v47 = vmul.f32 0.2, %v4120_v4  ;;  %v4154_v40 = vmul.f32 0.2, %v4122_v26  ;;  %v4149_v17 = vmul.f32 0.2, %v4117_v45  ;;  %v4160_v56 = vsel %vm4128_vm0, %v4112_v48, %v4144_v54 }
 0xd82   :  { %v4151_v29 = vmul.f32 0.2, %v4119_v37  ;;  %v4156_v51 = vmul.f32 0.2, %v4124_v34  ;;  %v4153_v50 = vmul.f32 0.2, %v9731_v53  ;;  %v4162_v21 = vsel %vm4130_vm2, %v4114_v59, %v4146_v15 }
 0xd83   :  { %v4158_v52 = vmul.f32 0.2, %v4126_v6  ;;  %v4155_v19 = vmul.f32 0.2, %v9733_v39  ;;  %v4164_v27 = vsel %vm4132_vm4, %v4116_v30, %v4148_v23  ;;  %v4166_v7 = vsel %vm4134_vm7, %v4118_v14, %v4150_v62 }
 0xd84   :  { %v4168_v46 = vsel %vm4136_vm8, %v4120_v4, %v4152_v47  ;;  %v4157_v0 = vmul.f32 0.2, %v9735_v33  ;;  %v4161_v16 = vsel %vm4129_vm1, %v4113_v43, %v4145_v5  ;;  %v4170_v9 = vsel %vm4138_vm13, %v4122_v26, %v4154_v40 }
 0xd85   :  { %v4172_v22 = vsel %vm4140_vm10, %v4124_v34, %v4156_v51  ;;  %v4163_v25 = vsel %vm4131_vm3, %v4115_v42, %v4147_v24  ;;  %v4174_v31 = vsel %vm4142_vm11, %v4126_v6, %v4158_v52  ;;  %v4191_v28 = vrot.slane %v4160_v56, 4 }
 0xd86   :  { %v4192_v20 = vrot.slane %v4162_v21, 4  ;;  %v4193_v57 = vrot.slane %v4164_v27, 4  ;;  %v4194_v11 = vrot.slane %v4166_v7, 4  ;;  %v4195_v12 = vrot.slane %v4168_v46, 4 }
 0xd87   :  { %v4196_v63 = vrot.slane %v4170_v9, 4  ;;  %v4165_v41 = vsel %vm4133_vm6, %v4117_v45, %v4149_v17  ;;  %v4197_v55 = vrot.slane %v4172_v22, 4  ;;  %vm11639_vm14 = vcmask 1043456   ;;  %v4306_v17 = vld [vmem:[#allocation3 + $0x40] sm:$0xf] }
 0xd88   :  { %v9756_v58 = vsel %vm11639_vm14, %v4159_v18, %v4191_v28  ;;  %vm11640_vm0 = vmmov %vm11639_vm14  ;;  %v4167_v32 = vsel %vm4135_vm9, %v4119_v37, %v4151_v29  ;;  %v4198_v10 = vrot.slane %v4174_v31, 4  ;;  %v4169_v49 = vsel %vm4137_vm5, %v9731_v53, %v4153_v50 }
 0xd89   :  { %v9759_v8 = vsel %vm11640_vm0, %v4161_v16, %v4192_v20  ;;  %vm11641_vm1 = vmmov %vm11640_vm0  ;;  %v4171_v38 = vsel %vm4139_vm12, %v9733_v39, %v4155_v19  ;;  %v4173_v35 = vsel %vm4141_vm15, %v9735_v33, %v4157_v0  ;;  %4239 = vst [vmem:[#allocation1] ss:$2 sm:$0xff] %v9756_v58  ;;  %vm11663_vm15 = vcmask 1039360  }
 0xd8a   :  { %v9763_v1 = vsel %vm11641_vm1, %v4163_v25, %v4193_v57  ;;  %vm11642_vm2 = vmmov %vm11640_vm0  ;;  %4241 = vst [vmem:[#allocation1 + $0x10] ss:$2 sm:$0xff] %v9759_v8 }
 0xd8b   :  { %v9766_v44 = vsel %vm11642_vm2, %v4165_v41, %v4194_v11  ;;  %vm11643_vm3 = vmmov %vm11640_vm0  ;;  %4243 = vst [vmem:[#allocation1 + $0x20] ss:$2 sm:$0xff] %v9763_v1 }
 0xd8c   :  { %v9772_v3 = vsel %vm11643_vm3, %v4167_v32, %v4195_v12  ;;  %vm11644_vm4 = vmmov %vm11640_vm0  ;;  %4245 = vst [vmem:[#allocation1 + $0x30] ss:$2 sm:$0xff] %v9766_v44  ;;  %v4436_v12 = vld [vmem:[#allocation3 + $0x40] sm:$0xf]  ;;  %vm11676_vm3 = vcmask 1031168  }
 0xd8d   :  { %v9778_v61 = vsel %vm11644_vm4, %v4169_v49, %v4196_v63  ;;  %vm11645_vm6 = vmmov %vm11640_vm0 }
 0xd8e   :  { %v9784_v36 = vsel %vm11645_vm6, %v4171_v38, %v4197_v55  ;;  %vm11646_vm7 = vmmov %vm11640_vm0 }
 0xd8f   :  { %v9787_v60 = vsel %vm11646_vm7, %v4173_v35, %v4198_v10  ;;  %vm11664_vm9 = vmmov %vm11663_vm15 }
 0xd90   :  { %v4246_v48 = vld.sshfl [vmem:[#allocation1] sm:$0xff pattern:$0x75316420]  ;;  %v4247_v43 = vld.sshfl [vmem:[#allocation1 + $0x8] sm:$0xff pattern:$0x75316420]  ;;  %vm11666_vm8 = vmmov %vm11664_vm9 }
 0xd91   :  { %v4248_v59 = vld.sshfl [vmem:[#allocation1 + $0x10] sm:$0xff pattern:$0x75316420]  ;;  %v4249_v42 = vld.sshfl [vmem:[#allocation1 + $0x18] sm:$0xff pattern:$0x75316420]  ;;  %vm11667_vm13 = vmmov %vm11666_vm8 }
 0xd92   :  { %v4250_v30 = vld.sshfl [vmem:[#allocation1 + $0x20] sm:$0xff pattern:$0x75316420]  ;;  %v4251_v45 = vld.sshfl [vmem:[#allocation1 + $0x28] sm:$0xff pattern:$0x75316420]  ;;  %vm11668_vm5 = vmmov %vm11666_vm8 }
 0xd93   :  { %v4252_v14 = vld.sshfl [vmem:[#allocation1 + $0x30] sm:$0xff pattern:$0x75316420]  ;;  %v4253_v37 = vld.sshfl [vmem:[#allocation1 + $0x38] sm:$0xff pattern:$0x75316420]  ;;  %vm11669_vm10 = vmmov %vm11668_vm5 }
 0xd94   :  { %4254 = vst [vmem:[#allocation1] ss:$2 sm:$0xff] %v9772_v3  ;;  %vm11670_vm11 = vmmov %vm11668_vm5 }
 0xd95   :  { %4255 = vst [vmem:[#allocation1 + $0x10] ss:$2 sm:$0xff] %v9778_v61  ;;  %vm11671_vm12 = vmmov %vm11668_vm5 }
 0xd96   :  { %4256 = vst [vmem:[#allocation1 + $0x20] ss:$2 sm:$0xff] %v9784_v36  ;;  %vm11672_vm14 = vmmov %vm11668_vm5 }
 0xd97   :  { %4257 = vst [vmem:[#allocation1 + $0x30] ss:$2 sm:$0xff] %v9787_v60  ;;  %vm11673_vm0 = vmmov %vm11668_vm5 }
 0xd98   :  { %4282 = vst [vmem:[#allocation4 + $0xc8] sm:$0xf] %v4246_v48  ;;  %vm11674_vm1 = vmmov %vm11673_vm0 }
 0xd99   :  { %4283 = vst [vmem:[#allocation4 + $0x8] sm:$0xf] %v4247_v43  ;;  %vm11675_vm2 = vmmov %vm11673_vm0 }
 0xd9a   :  { %4284 = vst [vmem:[#allocation4 + $0x40] sm:$0xf] %v4248_v59  ;;  %vm11677_vm4 = vmmov %vm11676_vm3 }
 0xd9b   :  { %v4258_v4 = vld.sshfl [vmem:[#allocation1] sm:$0xff pattern:$0x75316420]  ;;  %v4259_v53 = vld.sshfl [vmem:[#allocation1 + $0x8] sm:$0xff pattern:$0x75316420]  ;;  %vm11678_vm6 = vmmov %vm11676_vm3 }
 0xd9c   :  { %v4260_v26 = vld.sshfl [vmem:[#allocation1 + $0x10] sm:$0xff pattern:$0x75316420]  ;;  %v4261_v39 = vld.sshfl [vmem:[#allocation1 + $0x18] sm:$0xff pattern:$0x75316420]  ;;  %vm11679_vm7 = vmmov %vm11676_vm3 }
 0xd9d   :  { %v4262_v34 = vld.sshfl [vmem:[#allocation1 + $0x20] sm:$0xff pattern:$0x75316420]  ;;  %v9797_v33 = vld.sshfl [vmem:[#allocation1 + $0x28] sm:$0xff pattern:$0x75316420] }
 0xd9e   :  { %v9799_v6 = vld.sshfl [vmem:[#allocation1 + $0x30] sm:$0xff pattern:$0x75316420]  ;;  %v9801_v13 = vld.sshfl [vmem:[#allocation1 + $0x38] sm:$0xff pattern:$0x75316420] }
 0xd9f   :  { %4317 = vst [vmem:[#allocation1 + $0x1] ss:$2 sm:$0xff] %v9756_v58 }
 0xda0   :  { %4319 = vst [vmem:[#allocation1 + $0x11] ss:$2 sm:$0xff] %v9759_v8 }
 0xda1   :  { %4321 = vst [vmem:[#allocation1 + $0x21] ss:$2 sm:$0xff] %v9763_v1 }
 0xda2   :  { %4323 = vst [vmem:[#allocation1 + $0x31] ss:$2 sm:$0xff] %v9766_v44 }
 0xda3   :  { %4285 = vst [vmem:[#allocation4 + $0x28] sm:$0xf] %v4249_v42 }
 0xda4   :  { %4286 = vst [vmem:[#allocation4 + $0xe8] sm:$0xf] %v4250_v30 }
 0xda5   :  { %4287 = vst [vmem:[#allocation4 + $0xf0] sm:$0xf] %v4251_v45 }
 0xda6   :  { %v4324_v54 = vld.sshfl [vmem:[#allocation1] sm:$0xff pattern:$0x75316420]  ;;  %v4325_v15 = vld.sshfl [vmem:[#allocation1 + $0x8] sm:$0xff pattern:$0x75316420] }
 0xda7   :  { %v4326_v5 = vld.sshfl [vmem:[#allocation1 + $0x10] sm:$0xff pattern:$0x75316420]  ;;  %v4327_v23 = vld.sshfl [vmem:[#allocation1 + $0x18] sm:$0xff pattern:$0x75316420]  ;;  %4348 = vrot.lane.b32.xlu0 %v4325_v15, %s7164_s30 }
 0xda8   :  { %v4328_v62 = vld.sshfl [vmem:[#allocation1 + $0x20] sm:$0xff pattern:$0x75316420]  ;;  %4352 = vrot.lane.b32.xlu1 %v4327_v23, %s7164_s30  ;;  %4350 = vrot.lane.b32.xlu2 %v4326_v5, %s7164_s30  ;;  %v4329_v24 = vld.sshfl [vmem:[#allocation1 + $0x28] sm:$0xff pattern:$0x75316420] }
 0xda9   :  { %v4330_v47 = vld.sshfl [vmem:[#allocation1 + $0x30] sm:$0xff pattern:$0x75316420]  ;;  %v4331_v40 = vld.sshfl [vmem:[#allocation1 + $0x38] sm:$0xff pattern:$0x75316420] }
 0xdaa   :  { %4332 = vst [vmem:[#allocation1 + $0x1] ss:$2 sm:$0xff] %v9772_v3 }
 0xdab   :  { %4333 = vst [vmem:[#allocation1 + $0x11] ss:$2 sm:$0xff] %v9778_v61 }
 0xdac   :  { %4334 = vst [vmem:[#allocation1 + $0x21] ss:$2 sm:$0xff] %v9784_v36 }
 0xdad   :  { %4335 = vst [vmem:[#allocation1 + $0x31] ss:$2 sm:$0xff] %v9787_v60 }
 0xdae   :  { %4288 = vst [vmem:[#allocation4 + $0x70] sm:$0xf] %v4252_v14 }
 0xdaf   :  { %4289 = vst [vmem:[#allocation4 + $0x120] sm:$0xf] %v4253_v37  ;;  %4354 = vrot.lane.b32.xlu0 %v4328_v62, %s7164_s30 }
 0xdb0   :  { %4290 = vst [vmem:[#allocation4 + $0xd8] sm:$0xf] %v4258_v4  ;;  %4356 = vrot.lane.b32.xlu2 %v4329_v24, %s7164_s30  ;;  %4346 = vrot.lane.b32.xlu1 %v4324_v54, %s7164_s30 }
 0xdb1   :  { %v4336_v29 = vld.sshfl [vmem:[#allocation1] sm:$0xff pattern:$0x75316420]  ;;  %v4337_v51 = vld.sshfl [vmem:[#allocation1 + $0x8] sm:$0xff pattern:$0x75316420] }
 0xdb2   :  { %v4338_v18 = vld.sshfl [vmem:[#allocation1 + $0x10] sm:$0xff pattern:$0x75316420]  ;;  %v4339_v50 = vld.sshfl [vmem:[#allocation1 + $0x18] sm:$0xff pattern:$0x75316420] }
 0xdb3   :  { %v9817_v52 = vld.sshfl [vmem:[#allocation1 + $0x20] sm:$0xff pattern:$0x75316420]  ;;  %v4341_v56 = vld.sshfl [vmem:[#allocation1 + $0x28] sm:$0xff pattern:$0x75316420] }
 0xdb4   :  { %11647 = vst [vmem:[#allocation42_spill] sm:$0xff] %v9817_v52  ;;  %v4342_v21 = vld.sshfl [vmem:[#allocation1 + $0x30] sm:$0xff pattern:$0x75316420] }
 0xdb5   :  { %v9819_v19 = vld.sshfl [vmem:[#allocation1 + $0x38] sm:$0xff pattern:$0x75316420]  ;;  %4344 = vst [vmem:[#allocation1 + $0x1] ss:$2 sm:$0xff] %v4306_v17 }
 0xdb6   :  { %11648 = vst [vmem:[#allocation45_spill] sm:$0xff] %v9819_v19 }
 0xdb7   :  { %4448 = vst [vmem:[#allocation1 + $0x10] ss:$2 sm:$0xff] %v9759_v8  ;;  %4364 = vrot.lane.b32.xlu0 %v4337_v51, %s7164_s30 }
 0xdb8   :  { %4450 = vst [vmem:[#allocation1 + $0x20] ss:$2 sm:$0xff] %v9763_v1  ;;  %4360 = vrot.lane.b32.xlu2 %v4331_v40, %s7164_s30  ;;  %4358 = vrot.lane.b32.xlu1 %v4330_v47, %s7164_s30 }
 0xdb9   :  { %4452 = vst [vmem:[#allocation1 + $0x30] ss:$2 sm:$0xff] %v9766_v44 }
 0xdba   :  { %4291 = vst [vmem:[#allocation4 + $0x148] sm:$0xf] %v4259_v53 }
 0xdbb   :  { %4292 = vst [vmem:[#allocation4 + $0x158] sm:$0xf] %v4260_v26 }
 0xdbc   :  { %4293 = vst [vmem:[#allocation4 + $0x108] sm:$0xf] %v4261_v39  ;;  %v9827_v27 = vld.sshfl [vmem:[#allocation1] sm:$0xff pattern:$0x75316420] }
 0xdbd   :  { %11649 = vst [vmem:[#allocation40_spill] sm:$0xff] %v9827_v27  ;;  %v4565_v39 = vld [vmem:[#allocation3 + $0x40] sm:$0xf] }
 0xdbe   :  { %4294 = vst [vmem:[#allocation4 + $0x220] sm:$0xf] %v4262_v34  ;;  %v4455_v7 = vld.sshfl [vmem:[#allocation1 + $0x10] sm:$0xff pattern:$0x75316420] }
 0xdbf   :  { %4446 = vst [vmem:[#allocation1] ss:$2 sm:$0xff] %v9756_v58  ;;  %v4456_v46 = vld.sshfl [vmem:[#allocation1 + $0x18] sm:$0xff pattern:$0x75316420]  ;;  %4368 = vrot.lane.b32.xlu0 %v4339_v50, %s7164_s30 }
 0xdc0   :  { %v4457_v0 = vld.sshfl [vmem:[#allocation1 + $0x20] sm:$0xff pattern:$0x75316420]  ;;  %v4458_v16 = vld.sshfl [vmem:[#allocation1 + $0x28] sm:$0xff pattern:$0x75316420]  ;;  %4366 = vrot.lane.b32.xlu2 %v4338_v18, %s7164_s30  ;;  %4362 = vrot.lane.b32.xlu1 %v4336_v29, %s7164_s30 }
 0xdc1   :  { %v4459_v9 = vld.sshfl [vmem:[#allocation1 + $0x30] sm:$0xff pattern:$0x75316420]  ;;  %v4460_v22 = vld.sshfl [vmem:[#allocation1 + $0x38] sm:$0xff pattern:$0x75316420] }
 0xdc2   :  { %4462 = vst [vmem:[#allocation1 + $0x10] ss:$2 sm:$0xff] %v9778_v61 }
 0xdc3   :  { %4463 = vst [vmem:[#allocation1 + $0x20] ss:$2 sm:$0xff] %v9784_v36 }
 0xdc4   :  { %4464 = vst [vmem:[#allocation1 + $0x30] ss:$2 sm:$0xff] %v9787_v60 }
 0xdc5   :  { %4295 = vst [vmem:[#allocation4 + $0xc0] sm:$0xf] %v9797_v33 }
 0xdc6   :  { %v4453_v25 = vld.sshfl [vmem:[#allocation1] sm:$0xff pattern:$0x75316420]  ;;  %v4454_v31 = vld.sshfl [vmem:[#allocation1 + $0x8] sm:$0xff pattern:$0x75316420] }
 0xdc7   :  { %4461 = vst [vmem:[#allocation1] ss:$2 sm:$0xff] %v9772_v3  ;;  %4374 = vrot.lane.b32.xlu0 %v4342_v21, %s7164_s30 }
 0xdc8   :  { %4296 = vst [vmem:[#allocation4 + $0x140] sm:$0xf] %v9799_v6  ;;  %4489 = vrot.lane.b32.xlu2 %v4460_v22, %s7165_s1  ;;  %4372 = vrot.lane.b32.xlu1 %v4341_v56, %s7164_s30  ;;  %v4695_v56 = vld [vmem:[#allocation3 + $0x40] sm:$0xf] }
 0xdc9   :  { %v4467_v28 = vld.sshfl [vmem:[#allocation1 + $0x10] sm:$0xff pattern:$0x75316420]  ;;  %v4468_v20 = vld.sshfl [vmem:[#allocation1 + $0x18] sm:$0xff pattern:$0x75316420] }
 0xdca   :  { %v4469_v57 = vld.sshfl [vmem:[#allocation1 + $0x20] sm:$0xff pattern:$0x75316420]  ;;  %v4470_v11 = vld.sshfl [vmem:[#allocation1 + $0x28] sm:$0xff pattern:$0x75316420] }
 0xdcb   :  { %v4471_v63 = vld.sshfl [vmem:[#allocation1 + $0x30] sm:$0xff pattern:$0x75316420]  ;;  %4578 = vst [vmem:[#allocation1 + $0x11] ss:$2 sm:$0xff] %v9759_v8 }
 0xdcc   :  { %v4472_v41 = vld.sshfl [vmem:[#allocation1 + $0x38] sm:$0xff pattern:$0x75316420]  ;;  %4580 = vst [vmem:[#allocation1 + $0x21] ss:$2 sm:$0xff] %v9763_v1 }
 0xdcd   :  { %4582 = vst [vmem:[#allocation1 + $0x31] ss:$2 sm:$0xff] %v9766_v44 }
 0xdce   :  { %v9844_v55 = vld.sshfl [vmem:[#allocation1] sm:$0xff pattern:$0x75316420]  ;;  %v9846_v32 = vld.sshfl [vmem:[#allocation1 + $0x8] sm:$0xff pattern:$0x75316420] }
 0xdcf   :  { %4473 = vst [vmem:[#allocation1] ss:$2 sm:$0xff] %v4436_v12  ;;  %4487 = vrot.lane.b32.xlu0 %v4459_v9, %s7165_s1 }
 0xdd0   :  { %4297 = vst [vmem:[#allocation4 + $0x200] sm:$0xf] %v9801_v13  ;;  %4479 = vrot.lane.b32.xlu1 %v4455_v7, %s7165_s1  ;;  %4477 = vrot.lane.b32.xlu2 %v4454_v31, %s7165_s1 }
 0xdd2   :  { %v4585_v10 = vld.sshfl [vmem:[#allocation1 + $0x10] sm:$0xff pattern:$0x75316420]  ;;  %v4586_v49 = vld.sshfl [vmem:[#allocation1 + $0x18] sm:$0xff pattern:$0x75316420] }
 0xdd3   :  { %v9853_v38 = vld.sshfl [vmem:[#allocation1 + $0x20] sm:$0xff pattern:$0x75316420]  ;;  %v4588_v35 = vld.sshfl [vmem:[#allocation1 + $0x28] sm:$0xff pattern:$0x75316420] }
 0xdd4   :  { %4592 = vst [vmem:[#allocation1 + $0x11] ss:$2 sm:$0xff] %v9778_v61  ;;  %v4589_v43 = vld.sshfl [vmem:[#allocation1 + $0x30] sm:$0xff pattern:$0x75316420] }
 0xdd5   :  { %4593 = vst [vmem:[#allocation1 + $0x21] ss:$2 sm:$0xff] %v9784_v36  ;;  %v9860_v59 = vld.sshfl [vmem:[#allocation1 + $0x38] sm:$0xff pattern:$0x75316420] }
 0xdd6   :  { %v9856_v48 = vld.sshfl [vmem:[#allocation1] sm:$0xff pattern:$0x75316420]  ;;  %4594 = vst [vmem:[#allocation1 + $0x31] ss:$2 sm:$0xff] %v9787_v60 }
 0xdd7   :  { %11650 = vst [vmem:[#allocation25_spill] sm:$0xff] %v9856_v48  ;;  %4483 = vrot.lane.b32.xlu0 %v4457_v0, %s7165_s1 }
 0xdd8   :  { %4576 = vst [vmem:[#allocation1 + $0x1] ss:$2 sm:$0xff] %v9756_v58  ;;  %4481 = vrot.lane.b32.xlu1 %v4456_v46, %s7165_s1  ;;  %4503 = vrot.lane.b32.xlu2 %v4471_v63, %s7165_s1 }
 0xddb   :  { %v9866_v42 = vld.sshfl [vmem:[#allocation1 + $0x10] sm:$0xff pattern:$0x75316420]  ;;  %v9868_v30 = vld.sshfl [vmem:[#allocation1 + $0x18] sm:$0xff pattern:$0x75316420] }
 0xddc   :  { %v9870_v45 = vld.sshfl [vmem:[#allocation1 + $0x20] sm:$0xff pattern:$0x75316420]  ;;  %v9877_v4 = vld.sshfl [vmem:[#allocation1 + $0x28] sm:$0xff pattern:$0x75316420] }
 0xddd   :  { %11651 = vst [vmem:[#allocation38_spill] sm:$0xff] %v9870_v45  ;;  %v9879_v53 = vld.sshfl [vmem:[#allocation1 + $0x30] sm:$0xff pattern:$0x75316420] }
 0xdde   :  { %v9881_v26 = vld.sshfl [vmem:[#allocation1 + $0x38] sm:$0xff pattern:$0x75316420]  ;;  %4707 = vst [vmem:[#allocation1 + $0x10] ss:$2 sm:$0xff] %v9759_v8 }
 0xddf   :  { %v9872_v14 = vld.sshfl [vmem:[#allocation1] sm:$0xff pattern:$0x75316420]  ;;  %v9874_v37 = vld.sshfl [vmem:[#allocation1 + $0x8] sm:$0xff pattern:$0x75316420]  ;;  %4475 = vrot.lane.b32.xlu0 %v4453_v25, %s7165_s1 }
 0xde0   :  { %4591 = vst [vmem:[#allocation1 + $0x1] ss:$2 sm:$0xff] %v9772_v3  ;;  %4485 = vrot.lane.b32.xlu1 %v4458_v16, %s7165_s1  ;;  %4499 = vrot.lane.b32.xlu2 %v4469_v57, %s7165_s1 }
 0xde1   :  { %11652 = vst [vmem:[#allocation24_spill] sm:$0xff] %v9881_v26 }
 0xde2   :  { %4709 = vst [vmem:[#allocation1 + $0x20] ss:$2 sm:$0xff] %v9763_v1 }
 0xde3   :  { %4711 = vst [vmem:[#allocation1 + $0x30] ss:$2 sm:$0xff] %v9766_v44 }
 0xde5   :  { %v4714_v6 = vld.sshfl [vmem:[#allocation1 + $0x10] sm:$0xff pattern:$0x75316420]  ;;  %v9893_v13 = vld.sshfl [vmem:[#allocation1 + $0x18] sm:$0xff pattern:$0x75316420] }
 0xde6   :  { %4721 = vst [vmem:[#allocation1 + $0x10] ss:$2 sm:$0xff] %v9778_v61 }
 0xde7   :  { %v9889_v34 = vld.sshfl [vmem:[#allocation1] sm:$0xff pattern:$0x75316420]  ;;  %v9891_v33 = vld.sshfl [vmem:[#allocation1 + $0x8] sm:$0xff pattern:$0x75316420]  ;;  %4497 = vrot.lane.b32.xlu0 %v4468_v20, %s7165_s1 }
 0xde8   :  { %4603 = vst [vmem:[#allocation1 + $0x1] ss:$2 sm:$0xff] %v4565_v39  ;;  %4495 = vrot.lane.b32.xlu1 %v4467_v28, %s7165_s1  ;;  %4609 = vrot.lane.b32.xlu2 %v4585_v10, %s7163_s29 }
 0xde9   :  { %v9895_v54 = vld.sshfl [vmem:[#allocation1 + $0x20] sm:$0xff pattern:$0x75316420]  ;;  %v9897_v15 = vld.sshfl [vmem:[#allocation1 + $0x28] sm:$0xff pattern:$0x75316420] }
 0xdea   :  { %v9900_v5 = vld.sshfl [vmem:[#allocation1 + $0x30] sm:$0xff pattern:$0x75316420]  ;;  %v9902_v23 = vld.sshfl [vmem:[#allocation1 + $0x38] sm:$0xff pattern:$0x75316420] }
 0xdeb   :  { %4722 = vst [vmem:[#allocation1 + $0x20] ss:$2 sm:$0xff] %v9784_v36 }
 0xdec   :  { %4723 = vst [vmem:[#allocation1 + $0x30] ss:$2 sm:$0xff] %v9787_v60 }
 0xded   :  { %v9913_v24 = vld.sshfl [vmem:[#allocation1 + $0x10] sm:$0xff pattern:$0x75316420]  ;;  %v9915_v47 = vld.sshfl [vmem:[#allocation1 + $0x18] sm:$0xff pattern:$0x75316420] }
 0xdee   :  { %4837 = vst [vmem:[#allocation1 + $0x11] ss:$2 sm:$0xff] %v9759_v8 }
 0xdef   :  { %v9909_v62 = vld.sshfl [vmem:[#allocation1] sm:$0xff pattern:$0x75316420]  ;;  %4501 = vrot.lane.b32.xlu0 %v4470_v11, %s7165_s1 }
 0xdf0   :  { %11653 = vst [vmem:[#allocation27_spill] sm:$0xff] %v9909_v62  ;;  %4505 = vrot.lane.b32.xlu1 %v4472_v41, %s7165_s1  ;;  %4615 = vrot.lane.b32.xlu2 %v4588_v35, %s7163_s29 }
 0xdf1   :  { %4705 = vst [vmem:[#allocation1] ss:$2 sm:$0xff] %v9756_v58 }
 0xdf2   :  { %v9919_v40 = vld.sshfl [vmem:[#allocation1 + $0x20] sm:$0xff pattern:$0x75316420]  ;;  %v9921_v17 = vld.sshfl [vmem:[#allocation1 + $0x28] sm:$0xff pattern:$0x75316420] }
 0xdf3   :  { %v9923_v29 = vld.sshfl [vmem:[#allocation1 + $0x30] sm:$0xff pattern:$0x75316420]  ;;  %v9925_v51 = vld.sshfl [vmem:[#allocation1 + $0x38] sm:$0xff pattern:$0x75316420] }
 0xdf4   :  { %4839 = vst [vmem:[#allocation1 + $0x21] ss:$2 sm:$0xff] %v9763_v1 }
 0xdf5   :  { %4841 = vst [vmem:[#allocation1 + $0x31] ss:$2 sm:$0xff] %v9766_v44  ;;  %v9939_v21 = vld.sshfl [vmem:[#allocation1 + $0x18] sm:$0xff pattern:$0x75316420] }
 0xdf6   :  { %v9941_v7 = vld.sshfl [vmem:[#allocation1 + $0x10] sm:$0xff pattern:$0x75316420] }
 0xdf7   :  { %4611 = vrot.lane.b32.xlu0 %v4586_v49, %s7163_s29  ;;  %4851 = vst [vmem:[#allocation1 + $0x11] ss:$2 sm:$0xff] %v9778_v61 }
 0xdf8   :  { %v9928_v18 = vld.sshfl [vmem:[#allocation1] sm:$0xff pattern:$0x75316420]  ;;  %v9930_v50 = vld.sshfl [vmem:[#allocation1 + $0x8] sm:$0xff pattern:$0x75316420]  ;;  %4617 = vrot.lane.b32.xlu1 %v4589_v43, %s7163_s29  ;;  %4493 = vrot.lane.b32.xlu2 %v9846_v32, %s7165_s1 }
 0xdf9   :  { %4720 = vst [vmem:[#allocation1] ss:$2 sm:$0xff] %v9772_v3 }
 0xdfb   :  { %v9948_v16 = vld.sshfl [vmem:[#allocation1 + $0x20] sm:$0xff pattern:$0x75316420]  ;;  %v9950_v9 = vld.sshfl [vmem:[#allocation1 + $0x28] sm:$0xff pattern:$0x75316420] }
 0xdfc   :  { %v9952_v22 = vld.sshfl [vmem:[#allocation1 + $0x30] sm:$0xff pattern:$0x75316420]  ;;  %v9954_v25 = vld.sshfl [vmem:[#allocation1 + $0x38] sm:$0xff pattern:$0x75316420] }
 0xdfd   :  { %4852 = vst [vmem:[#allocation1 + $0x21] ss:$2 sm:$0xff] %v9784_v36 }
 0xdfe   :  { %4853 = vst [vmem:[#allocation1 + $0x31] ss:$2 sm:$0xff] %v9787_v60  ;;  %v9964_v31 = vld.sshfl [vmem:[#allocation1 + $0x10] sm:$0xff pattern:$0x75316420] }
 0xdff   :  { %4619 = vrot.lane.b32.xlu0 %v9860_v59, %s7163_s29  ;;  %v9966_v28 = vld.sshfl [vmem:[#allocation1 + $0x18] sm:$0xff pattern:$0x75316420]  ;;  %v4824_v59 = vld [vmem:[#allocation3 + $0x40] sm:$0xf] }
 0xe00   :  { %v9944_v46 = vld.sshfl [vmem:[#allocation1] sm:$0xff pattern:$0x75316420]  ;;  %v9946_v0 = vld.sshfl [vmem:[#allocation1 + $0x8] sm:$0xff pattern:$0x75316420]  ;;  %4613 = vrot.lane.b32.xlu1 %v9853_v38, %s7163_s29  ;;  %4625 = vrot.lane.b32.xlu2 %v9866_v42, %s7163_s29 }
 0xe01   :  { %4732 = vst [vmem:[#allocation1] ss:$2 sm:$0xff] %v4695_v56 }
 0xe02   :  { %4966 = vst [vmem:[#allocation1 + $0x10] ss:$2 sm:$0xff] %v9759_v8  ;;  %v4351_v42 = vpop.permute.xlu2 %4350 }
 0xe04   :  { %v9972_v57 = vld.sshfl [vmem:[#allocation1 + $0x20] sm:$0xff pattern:$0x75316420]  ;;  %v9974_v11 = vld.sshfl [vmem:[#allocation1 + $0x28] sm:$0xff pattern:$0x75316420] }
 0xe05   :  { %4968 = vst [vmem:[#allocation1 + $0x20] ss:$2 sm:$0xff] %v9763_v1  ;;  %v9979_v12 = vld.sshfl [vmem:[#allocation1 + $0x30] sm:$0xff pattern:$0x75316420] }
 0xe06   :  { %v9984_v63 = vld.sshfl [vmem:[#allocation1 + $0x38] sm:$0xff pattern:$0x75316420] }
 0xe07   :  { %4633 = vrot.lane.b32.xlu0 %v9879_v53, %s7163_s29  ;;  %4970 = vst [vmem:[#allocation1 + $0x30] ss:$2 sm:$0xff] %v9766_v44 }
 0xe08   :  { %v9969_v20 = vld.sshfl [vmem:[#allocation1] sm:$0xff pattern:$0x75316420]  ;;  %4738 = vrot.lane.b32.xlu2 %v4714_v6, %s7160_s26  ;;  %4491 = vrot.lane.b32.xlu1 %v9844_v55, %s7165_s1 }
 0xe09   :  { %11654 = vst [vmem:[#allocation26_spill] sm:$0xff] %v9969_v20  ;;  %v9987_v41 = vld.sshfl [vmem:[#allocation1 + $0x10] sm:$0xff pattern:$0x75316420] }
 0xe0a   :  { %4835 = vst [vmem:[#allocation1 + $0x1] ss:$2 sm:$0xff] %v9756_v58  ;;  %v9989_v32 = vld.sshfl [vmem:[#allocation1 + $0x18] sm:$0xff pattern:$0x75316420] }
 0xe0b   :  { %4980 = vst [vmem:[#allocation1 + $0x10] ss:$2 sm:$0xff] %v9778_v61 }
 0xe0c   :  { %v9997_v38 = vld.sshfl [vmem:[#allocation1 + $0x20] sm:$0xff pattern:$0x75316420]  ;;  %v9999_v35 = vld.sshfl [vmem:[#allocation1 + $0x28] sm:$0xff pattern:$0x75316420] }
 0xe0d   :  { %4981 = vst [vmem:[#allocation1 + $0x20] ss:$2 sm:$0xff] %v9784_v36 }
 0xe0e   :  { %v10008_v55 = vld.sshfl [vmem:[#allocation1 + $0x38] sm:$0xff pattern:$0x75316420]  ;;  %v10010_v43 = vld.sshfl [vmem:[#allocation1 + $0x30] sm:$0xff pattern:$0x75316420] }
 0xe0f   :  { %4607 = vrot.lane.b32.xlu0 %v9874_v37, %s7163_s29  ;;  %4982 = vst [vmem:[#allocation1 + $0x30] ss:$2 sm:$0xff] %v9787_v60 }
 0xe10   :  { %4627 = vrot.lane.b32.xlu1 %v9868_v30, %s7163_s29  ;;  %4605 = vrot.lane.b32.xlu2 %v9872_v14, %s7163_s29 }
 0xe11   :  { %v9992_v10 = vld.sshfl [vmem:[#allocation1] sm:$0xff pattern:$0x75316420]  ;;  %v9994_v49 = vld.sshfl [vmem:[#allocation1 + $0x8] sm:$0xff pattern:$0x75316420] }
 0xe12   :  { %4850 = vst [vmem:[#allocation1 + $0x1] ss:$2 sm:$0xff] %v9772_v3  ;;  %v10013_v53 = vld.sshfl [vmem:[#allocation1 + $0x18] sm:$0xff pattern:$0x75316420] }
 0xe13   :  { %v10015_v39 = vld.sshfl [vmem:[#allocation1 + $0x10] sm:$0xff pattern:$0x75316420] }
 0xe14   :  { %5096 = vst [vmem:[#allocation1 + $0x11] ss:$2 sm:$0xff] %v9759_v8  ;;  %v10022_v14 = vld.sshfl [vmem:[#allocation1 + $0x20] sm:$0xff pattern:$0x75316420] }
 0xe15   :  { %v10024_v6 = vld.sshfl [vmem:[#allocation1 + $0x28] sm:$0xff pattern:$0x75316420] }
 0xe16   :  { %5098 = vst [vmem:[#allocation1 + $0x21] ss:$2 sm:$0xff] %v9763_v1  ;;  %v10033_v56 = vld.sshfl [vmem:[#allocation1 + $0x30] sm:$0xff pattern:$0x75316420] }
 0xe17   :  { %4744 = vrot.lane.b32.xlu0 %v9897_v15, %s7160_s26  ;;  %v10035_v2 = vld.sshfl [vmem:[#allocation1 + $0x38] sm:$0xff pattern:$0x75316420] }
 0xe18   :  { %4631 = vrot.lane.b32.xlu1 %v9877_v4, %s7163_s29  ;;  %4746 = vrot.lane.b32.xlu2 %v9900_v5, %s7160_s26  ;;  %5100 = vst [vmem:[#allocation1 + $0x31] ss:$2 sm:$0xff] %v9766_v44 }
 0xe19   :  { %v10018_v37 = vld.sshfl [vmem:[#allocation1] sm:$0xff pattern:$0x75316420]  ;;  %v10020_v30 = vld.sshfl [vmem:[#allocation1 + $0x8] sm:$0xff pattern:$0x75316420] }
 0xe1a   :  { %4862 = vst [vmem:[#allocation1 + $0x1] ss:$2 sm:$0xff] %v4824_v59  ;;  %v10037_v59 = vpop.permute.xlu2 %4356 }
 0xe1b   :  { %v10040_v48 = vld.sshfl [vmem:[#allocation1 + $0x10] sm:$0xff pattern:$0x75316420]  ;;  %v10042_v19 = vld.sshfl [vmem:[#allocation1 + $0x18] sm:$0xff pattern:$0x75316420] }
 0xe1c   :  { %5110 = vst [vmem:[#allocation1 + $0x11] ss:$2 sm:$0xff] %v9778_v61 }
 0xe1d   :  { %v10048_v4 = vld.sshfl [vmem:[#allocation1 + $0x20] sm:$0xff pattern:$0x75316420]  ;;  %v10050_v5 = vld.sshfl [vmem:[#allocation1 + $0x28] sm:$0xff pattern:$0x75316420] }
 0xe1e   :  { %5111 = vst [vmem:[#allocation1 + $0x21] ss:$2 sm:$0xff] %v9784_v36 }
 0xe1f   :  { %4742 = vrot.lane.b32.xlu0 %v9895_v54, %s7160_s26  ;;  %v10059_v62 = vld.sshfl [vmem:[#allocation1 + $0x38] sm:$0xff pattern:$0x75316420]  ;;  %v10061_v27 = vld.sshfl [vmem:[#allocation1 + $0x30] sm:$0xff pattern:$0x75316420] }
 0xe20   :  { %4740 = vrot.lane.b32.xlu1 %v9893_v13, %s7160_s26  ;;  %4748 = vrot.lane.b32.xlu2 %v9902_v23, %s7160_s26  ;;  %5112 = vst [vmem:[#allocation1 + $0x31] ss:$2 sm:$0xff] %v9787_v60 }
 0xe21   :  { %v10045_v15 = vld.sshfl [vmem:[#allocation1] sm:$0xff pattern:$0x75316420] }
 0xe22   :  { %11655 = vst [vmem:[#allocation23_spill] sm:$0xff] %v10045_v15  ;;  %v10063_v45 = vpop.permute.xlu2 %4360 }
 0xe23   :  { %4964 = vst [vmem:[#allocation1] ss:$2 sm:$0xff] %v9756_v58  ;;  %v10066_v15 = vld.sshfl [vmem:[#allocation1 + $0x18] sm:$0xff pattern:$0x75316420] }
 0xe24   :  { %v10068_v20 = vld.sshfl [vmem:[#allocation1 + $0x10] sm:$0xff pattern:$0x75316420] }
 0xe25   :  { %11656 = vst [vmem:[#allocation10_spill] sm:$0xff] %v10068_v20  ;;  %v10076_v23 = vld.sshfl [vmem:[#allocation1 + $0x20] sm:$0xff pattern:$0x75316420]  ;;  %v4349_v20 = vpop.permute.xlu0 %4348 }
 0xe26   :  { %5225 = vst [vmem:[#allocation1 + $0x10] ss:$2 sm:$0xff] %v9759_v8  ;;  %v10078_v52 = vld.sshfl [vmem:[#allocation1 + $0x28] sm:$0xff pattern:$0x75316420] }
 0xe27   :  { %11659 = vst [vmem:[#allocation39_spill] sm:$0xff] %v10076_v23  ;;  %4754 = vrot.lane.b32.xlu0 %v9913_v24, %s7160_s26  ;;  %v10087_v8 = vld.sshfl [vmem:[#allocation1 + $0x30] sm:$0xff pattern:$0x75316420]  ;;  %v4954_v23 = vld [vmem:[#allocation3 + $0x40] sm:$0xf]  ;;  %v4381_v24 = vsel %vm11664_vm9, %v4349_v20, %v4351_v42  ;;  %vm11681_vm9 = vmmov %vm11676_vm3 }
 0xe28   :  { %11660 = vst [vmem:[#allocation33_spill] sm:$0xff] %v10078_v52  ;;  %4762 = vrot.lane.b32.xlu1 %v9923_v29, %s7160_s26  ;;  %4621 = vrot.lane.b32.xlu2 %v9889_v34, %s7163_s29  ;;  %v10089_v26 = vld.sshfl [vmem:[#allocation1 + $0x38] sm:$0xff pattern:$0x75316420] }
 0xe29   :  { %5227 = vst [vmem:[#allocation1 + $0x20] ss:$2 sm:$0xff] %v9763_v1 }
 0xe2a   :  { %v10071_v54 = vld.sshfl [vmem:[#allocation1] sm:$0xff pattern:$0x75316420]  ;;  %v10073_v13 = vld.sshfl [vmem:[#allocation1 + $0x8] sm:$0xff pattern:$0x75316420] }
 0xe2b   :  { %11657 = vst [vmem:[#allocation29_spill] sm:$0xff] %v10071_v54  ;;  %v4367_v54 = vpop.permute.xlu2 %4366 }
 0xe2c   :  { %11658 = vst [vmem:[#allocation41_spill] sm:$0xff] %v10073_v13  ;;  %v4353_v13 = vpop.permute.xlu1 %4352 }
 0xe2d   :  { %4979 = vst [vmem:[#allocation1] ss:$2 sm:$0xff] %v9772_v3  ;;  %v4382_v1 = vsel %vm11663_vm15, %v4351_v42, %v4353_v13  ;;  %v10093_v52 = vld.sshfl [vmem:[#allocation1 + $0x10] sm:$0xff pattern:$0x75316420]  ;;  %vm11680_vm15 = vmmov %vm11676_vm3 }
 0xe2e   :  { %11661 = vst [vmem:[#allocation30_spill] sm:$0xff] %v10087_v8  ;;  %v10096_v29 = vld.sshfl [vmem:[#allocation1 + $0x18] sm:$0xff pattern:$0x75316420] }
 0xe2f   :  { %11662 = vst [vmem:[#allocation34_spill] sm:$0xff] %v10089_v26  ;;  %4623 = vrot.lane.b32.xlu0 %v9891_v33, %s7163_s29  ;;  %v4355_v33 = vpop.permute.xlu0 %4354 }
 0xe30   :  { %5229 = vst [vmem:[#allocation1 + $0x30] ss:$2 sm:$0xff] %v9766_v44  ;;  %v10102_v26 = vld.sshfl [vmem:[#allocation1 + $0x20] sm:$0xff pattern:$0x75316420]  ;;  %4764 = vrot.lane.b32.xlu1 %v9925_v51, %s7160_s26  ;;  %4760 = vrot.lane.b32.xlu2 %v9921_v17, %s7160_s26  ;;  %v4384_v51 = vsel %vm11668_vm5, %v4355_v33, %v10037_v59  ;;  %vm11684_vm5 = vmmov %vm11676_vm3 }
 0xe31   :  { %4414 = vst [vmem:[#allocation4 + $0x40] sm:$0xf0] %v4382_v1  ;;  %v10107_v44 = vld.sshfl [vmem:[#allocation1 + $0x28] sm:$0xff pattern:$0x75316420] }
 0xe32   :  { %4413 = vst [vmem:[#allocation4 + $0x8] sm:$0xf0] %v4381_v24 }
 0xe33   :  { %5239 = vst [vmem:[#allocation1 + $0x10] ss:$2 sm:$0xff] %v9778_v61 }
 0xe34   :  { %v10098_v34 = vld.sshfl [vmem:[#allocation1] sm:$0xff pattern:$0x75316420]  ;;  %v10100_v8 = vld.sshfl [vmem:[#allocation1 + $0x8] sm:$0xff pattern:$0x75316420]  ;;  %v4347_v24 = vpop.permute.xlu1 %4346 }
 0xe35   :  { %11665 = vst [vmem:[#allocation32_spill] sm:$0xff] %v10098_v34  ;;  %v4380_v61 = vsel %vm11666_vm8, %v4347_v24, %v4349_v20  ;;  %v4383_v34 = vsel %vm11667_vm13, %v4353_v13, %v4355_v33  ;;  %v5083_v33 = vld [vmem:[#allocation3 + $0x40] sm:$0xf]  ;;  %vm11682_vm8 = vmmov %vm11676_vm3 }
 0xe36   :  { %4991 = vst [vmem:[#allocation1] ss:$2 sm:$0xff] %v4954_v23  ;;  %v10117_v23 = vpop.permute.xlu2 %4489  ;;  %vm11683_vm13 = vmmov %vm11676_vm3 }
 0xe37   :  { %v10113_v42 = vld.sshfl [vmem:[#allocation1 + $0x30] sm:$0xff pattern:$0x75316420]  ;;  %v10115_v1 = vld.sshfl [vmem:[#allocation1 + $0x38] sm:$0xff pattern:$0x75316420]  ;;  %4756 = vrot.lane.b32.xlu0 %v9915_v47, %s7160_s26  ;;  %v4365_v13 = vpop.permute.xlu0 %4364 }
 0xe38   :  { %5241 = vst [vmem:[#allocation1 + $0x30] ss:$2 sm:$0xff] %v9787_v60  ;;  %4874 = vrot.lane.b32.xlu1 %v9950_v9, %s7162_s28  ;;  %4758 = vrot.lane.b32.xlu2 %v9919_v40, %s7160_s26  ;;  %v4389_v9 = vsel %vm11671_vm12, %v4365_v13, %v4367_v54  ;;  %vm11687_vm12 = vmmov %vm11676_vm3 }
 0xe39   :  { %5240 = vst [vmem:[#allocation1 + $0x20] ss:$2 sm:$0xff] %v9784_v36 }
 0xe3a   :  { %4412 = vst [vmem:[#allocation4 + $0xc8] sm:$0xf0] %v4380_v61 }
 0xe3b   :  { %4415 = vst [vmem:[#allocation4 + $0x28] sm:$0xf0] %v4383_v34 }
 0xe3c   :  { %4416 = vst [vmem:[#allocation4 + $0xe8] sm:$0xf0] %v4384_v51  ;;  %v4359_v36 = vpop.permute.xlu1 %4358 }
 0xe3d   :  { %v10125_v17 = vld.sshfl [vmem:[#allocation1] sm:$0xff pattern:$0x75316420]  ;;  %v4385_v20 = vsel %vm11669_vm10, %v10037_v59, %v4359_v36  ;;  %v4386_v34 = vsel %vm11670_vm11, %v4359_v36, %v10063_v45  ;;  %4421 = vst [vmem:[#allocation4 + $0x148] sm:$0xf0] %v4389_v9  ;;  %vm11685_vm10 = vmmov %vm11676_vm3 }
 0xe3e   :  { %5094 = vst [vmem:[#allocation1 + $0x1] ss:$2 sm:$0xff] %v9756_v58  ;;  %v10134_v60 = vpop.permute.xlu2 %4477  ;;  %vm11686_vm11 = vmmov %vm11676_vm3 }
 0xe3f   :  { %4417 = vst [vmem:[#allocation4 + $0xf0] sm:$0xf0] %v4385_v20  ;;  %4868 = vrot.lane.b32.xlu0 %v9941_v7, %s7162_s28  ;;  %v10154_v61 = vpop.permute.xlu0 %4368 }
 0xe40   :  { %4418 = vst [vmem:[#allocation4 + $0x70] sm:$0xf0] %v4386_v34  ;;  %4872 = vrot.lane.b32.xlu1 %v9948_v16, %s7162_s28  ;;  %4734 = vrot.lane.b32.xlu2 %v9928_v18, %s7160_s26  ;;  %v4390_v36 = vsel %vm11673_vm0, %v4367_v54, %v10154_v61  ;;  %vm11689_vm0 = vcmask 801792  }
 0xe41   :  { %4422 = vst [vmem:[#allocation4 + $0x158] sm:$0xf0] %v4390_v36 }
 0xe44   :  { %v4363_v40 = vpop.permute.xlu1 %4362 }
 0xe45   :  { %v10140_v24 = vld.sshfl [vmem:[#allocation1] sm:$0xff pattern:$0x75316420]  ;;  %v10142_v47 = vld.sshfl [vmem:[#allocation1 + $0x8] sm:$0xff pattern:$0x75316420]  ;;  %v4387_v51 = vsel %vm11672_vm14, %v10063_v45, %v4363_v40  ;;  %v4388_v16 = vsel %vm11674_vm1, %v4363_v40, %v4365_v13  ;;  %vm11688_vm14 = vmmov %vm11676_vm3 }
 0xe46   :  { %5109 = vst [vmem:[#allocation1 + $0x1] ss:$2 sm:$0xff] %v9772_v3  ;;  %v10152_v59 = vpop.permute.xlu2 %4503  ;;  %vm11690_vm1 = vmmov %vm11689_vm0 }
 0xe47   :  { %4419 = vst [vmem:[#allocation4 + $0x120] sm:$0xf0] %v4387_v51  ;;  %4870 = vrot.lane.b32.xlu0 %v9939_v21, %s7162_s28  ;;  %v10175_v54 = vpop.permute.xlu0 %4374 }
 0xe48   :  { %4420 = vst [vmem:[#allocation4 + $0xd8] sm:$0xf0] %v4388_v16  ;;  %4884 = vrot.lane.b32.xlu1 %v9964_v31, %s7162_s28  ;;  %4892 = vrot.lane.b32.xlu2 %v9979_v12, %s7162_s28 }
 0xe4c   :  { %v10171_v45 = vpop.permute.xlu1 %4372 }
 0xe4d   :  { %v10160_v7 = vld.sshfl [vmem:[#allocation1] sm:$0xff pattern:$0x75316420]  ;;  %v10162_v20 = vld.sshfl [vmem:[#allocation1 + $0x8] sm:$0xff pattern:$0x75316420]  ;;  %v4393_v13 = vsel %vm11675_vm2, %v10171_v45, %v10175_v54  ;;  %vm11691_vm2 = vmmov %vm11689_vm0 }
 0xe4e   :  { %5121 = vst [vmem:[#allocation1 + $0x1] ss:$2 sm:$0xff] %v5083_v33  ;;  %v10173_v18 = vpop.permute.xlu2 %4499 }
 0xe4f   :  { %4425 = vst [vmem:[#allocation4 + $0xc0] sm:$0xf0] %v4393_v13  ;;  %4876 = vrot.lane.b32.xlu0 %v9952_v22, %s7162_s28  ;;  %v4488_v12 = vpop.permute.xlu0 %4487 }
 0xe50   :  { %4886 = vrot.lane.b32.xlu1 %v9966_v28, %s7162_s28  ;;  %4894 = vrot.lane.b32.xlu2 %v9984_v63, %s7162_s28  ;;  %v4515_v40 = vsel %vm11677_vm4, %v4488_v12, %v10117_v23  ;;  %vm11693_vm4 = vmmov %vm11689_vm0 }
 0xe51   :  { %4547 = vst [vmem:[#allocation4 + $0x248] sm:$0xf] %v4515_v40 }
 0xe54   :  { %v4480_v21 = vpop.permute.xlu1 %4479 }
 0xe55   :  { %v10180_v34 = vld.sshfl [vmem:[#allocation1] sm:$0xff pattern:$0x75316420]  ;;  %v4510_v9 = vsel %vm11676_vm3, %v10134_v60, %v4480_v21  ;;  %vm11692_vm3 = vmmov %vm11689_vm0 }
 0xe56   :  { %5223 = vst [vmem:[#allocation1] ss:$2 sm:$0xff] %v9756_v58  ;;  %v10189_v31 = vpop.permute.xlu2 %4609 }
 0xe57   :  { %4542 = vst [vmem:[#allocation4 + $0x30] sm:$0xf] %v4510_v9  ;;  %4878 = vrot.lane.b32.xlu0 %v9954_v25, %s7162_s28  ;;  %v4484_v33 = vpop.permute.xlu0 %4483 }
 0xe58   :  { %5003 = vrot.lane.b32.xlu1 %v9999_v35, %s7158_s24  ;;  %4997 = vrot.lane.b32.xlu2 %v9987_v41, %s7158_s24 }
 0xe5c   :  { %v4482_v28 = vpop.permute.xlu1 %4481 }
 0xe5d   :  { %v10195_v58 = vld.sshfl [vmem:[#allocation1] sm:$0xff pattern:$0x75316420]  ;;  %v10197_v22 = vld.sshfl [vmem:[#allocation1 + $0x8] sm:$0xff pattern:$0x75316420]  ;;  %v4511_v51 = vsel %vm11678_vm6, %v4480_v21, %v4482_v28  ;;  %v4512_v36 = vsel %vm11679_vm7, %v4482_v28, %v4484_v33  ;;  %vm11694_vm6 = vmmov %vm11684_vm5 }
 0xe5e   :  { %5238 = vst [vmem:[#allocation1] ss:$2 sm:$0xff] %v9772_v3  ;;  %v10206_v63 = vpop.permute.xlu2 %4615  ;;  %v5213_v21 = vld [vmem:[#allocation3 + $0x40] sm:$0xf]  ;;  %vm11695_vm7 = vmmov %vm11684_vm5 }
 0xe5f   :  { %4543 = vst [vmem:[#allocation4 + $0x10] sm:$0xf] %v4511_v51  ;;  %4736 = vrot.lane.b32.xlu0 %v9930_v50, %s7160_s26  ;;  %v4476_v16 = vpop.permute.xlu0 %4475 }
 0xe60   :  { %4544 = vst [vmem:[#allocation4 + $0x160] sm:$0xf] %v4512_v36  ;;  %5007 = vrot.lane.b32.xlu1 %v10008_v55, %s7158_s24  ;;  %4999 = vrot.lane.b32.xlu2 %v9989_v32, %s7158_s24  ;;  %v4509_v13 = vsel %vm11682_vm8, %v4476_v16, %v10134_v60  ;;  %vm11698_vm8 = vmmov %vm11689_vm0 }
 0xe61   :  { %4541 = vst [vmem:[#allocation4 + $0x80] sm:$0xf] %v4509_v13 }
 0xe64   :  { %v4486_v3 = vpop.permute.xlu1 %4485 }
 0xe65   :  { %v4513_v41 = vsel %vm11680_vm15, %v4484_v33, %v4486_v3  ;;  %v4514_v35 = vsel %vm11681_vm9, %v4486_v3, %v4488_v12  ;;  %v10222_v50 = vld.sshfl [vmem:[#allocation1] sm:$0xff pattern:$0x75316420]  ;;  %v10224_v55 = vld.sshfl [vmem:[#allocation1 + $0x8] sm:$0xff pattern:$0x75316420]  ;;  %vm11697_vm9 = vmmov %vm11689_vm0 }
 0xe66   :  { %v10216_v25 = vpop.permute.xlu2 %4493  ;;  %4545 = vst [vmem:[#allocation4 + $0x1d8] sm:$0xf] %v4513_v41  ;;  %vm11696_vm15 = vcmask 793600  }
 0xe67   :  { %4546 = vst [vmem:[#allocation4 + $0x1a0] sm:$0xf] %v4514_v35  ;;  %4890 = vrot.lane.b32.xlu0 %v9974_v11, %s7162_s28  ;;  %v4498_v9 = vpop.permute.xlu0 %4497 }
 0xe68   :  { %5250 = vst [vmem:[#allocation1] ss:$2 sm:$0xff] %v5213_v21  ;;  %5001 = vrot.lane.b32.xlu2 %v9997_v38, %s7158_s24  ;;  %4752 = vrot.lane.b32.xlu1 %v9946_v0, %s7160_s26  ;;  %v4520_v11 = vsel %vm11685_vm10, %v4498_v9, %v10173_v18  ;;  %vm11701_vm10 = vmmov %vm11689_vm0 }
 0xe69   :  { %4552 = vst [vmem:[#allocation4 + $0x238] sm:$0xf] %v4520_v11 }
 0xe6c   :  { %v4496_v32 = vpop.permute.xlu1 %4495 }
 0xe6d   :  { %v4518_v60 = vsel %vm11683_vm13, %v10216_v25, %v4496_v32  ;;  %v4519_v40 = vsel %vm11684_vm5, %v4496_v32, %v4498_v9  ;;  %vm11699_vm13 = vmmov %vm11689_vm0 }
 0xe6e   :  { %v10232_v12 = vpop.permute.xlu2 %4625  ;;  %4550 = vst [vmem:[#allocation4 + $0x48] sm:$0xf] %v4518_v60  ;;  %vm11700_vm5 = vmmov %vm11689_vm0 }
 0xe6f   :  { %4551 = vst [vmem:[#allocation4 + $0x68] sm:$0xf] %v4519_v40  ;;  %4888 = vrot.lane.b32.xlu0 %v9972_v57, %s7162_s28  ;;  %v4502_v33 = vpop.permute.xlu0 %4501 }
 0xe70   :  { %5015 = vrot.lane.b32.xlu2 %v10013_v53, %s7158_s24  ;;  %4750 = vrot.lane.b32.xlu1 %v9944_v46, %s7160_s26  ;;  %v4521_v51 = vsel %vm11687_vm12, %v10173_v18, %v4502_v33  ;;  %v4522_v57 = vsel %vm11688_vm14, %v4502_v33, %v10152_v59 }
 0xe71   :  { %4553 = vst [vmem:[#allocation4 + $0x188] sm:$0xf] %v4521_v51  ;;  %v11710_v51 = vld [vmem:[#allocation39_spill] sm:$0xff] }
 0xe72   :  { %4554 = vst [vmem:[#allocation4 + $0x250] sm:$0xf] %v4522_v57 }
 0xe74   :  { %v10245_v0 = vpop.permute.xlu1 %4505 }
 0xe75   :  { %v4523_v28 = vsel %vm11686_vm11, %v10152_v59, %v10245_v0  ;;  %vm11702_vm11 = vmmov %vm11696_vm15 }
 0xe76   :  { %v10247_v38 = vpop.permute.xlu2 %4738  ;;  %4555 = vst [vmem:[#allocation4 + $0xb8] sm:$0xf] %v4523_v28  ;;  %vm11704_vm12 = vmmov %vm11702_vm11 }
 0xe77   :  { %5005 = vrot.lane.b32.xlu0 %v10010_v43, %s7158_s24  ;;  %v4612_v18 = vpop.permute.xlu0 %4611  ;;  %vm11705_vm14 = vmmov %vm11702_vm11 }
 0xe78   :  { %5019 = vrot.lane.b32.xlu2 %v10024_v6, %s7158_s24  ;;  %5021 = vrot.lane.b32.xlu1 %v10033_v56, %s7158_s24  ;;  %v4641_v59 = vsel %vm11690_vm1, %v10189_v31, %v4612_v18 }
 0xe79   :  { %4673 = vst [vmem:[#allocation4 + $0x10] sm:$0xf0] %v4641_v59 }
 0xe7c   :  { %v4618_v46 = vpop.permute.xlu1 %4617 }
 0xe7d   :  { %v4644_v36 = vsel %vm11689_vm0, %v10206_v63, %v4618_v46  ;;  %vm11706_vm0 = vmmov %vm11702_vm11 }
 0xe7e   :  { %v4606_v53 = vpop.permute.xlu2 %4605  ;;  %4676 = vst [vmem:[#allocation4 + $0x1a0] sm:$0xf0] %v4644_v36  ;;  %vm11707_vm1 = vmmov %vm11706_vm0 }
 0xe7f   :  { %5013 = vrot.lane.b32.xlu0 %v10015_v39, %s7158_s24  ;;  %v4620_v41 = vpop.permute.xlu0 %4619 }
 0xe80   :  { %5133 = vrot.lane.b32.xlu2 %v10050_v5, %s7159_s25  ;;  %5017 = vrot.lane.b32.xlu1 %v10022_v14, %s7158_s24  ;;  %v4645_v35 = vsel %vm11693_vm4, %v4618_v46, %v4620_v41 }
 0xe81   :  { %4677 = vst [vmem:[#allocation4 + $0x248] sm:$0xf0] %v4645_v35 }
 0xe84   :  { %v4614_v43 = vpop.permute.xlu1 %4613 }
 0xe85   :  { %v4642_v56 = vsel %vm11691_vm2, %v4612_v18, %v4614_v43  ;;  %v4643_v3 = vsel %vm11692_vm3, %v4614_v43, %v10206_v63  ;;  %vm11711_vm2 = vmmov %vm11706_vm0  ;;  %v11712_v18 = vld [vmem:[#allocation34_spill] sm:$0xff] }
 0xe86   :  { %v4747_v6 = vpop.permute.xlu2 %4746  ;;  %4674 = vst [vmem:[#allocation4 + $0x160] sm:$0xf0] %v4642_v56  ;;  %vm11713_vm3 = vmmov %vm11706_vm0 }
 0xe87   :  { %4675 = vst [vmem:[#allocation4 + $0x1d8] sm:$0xf0] %v4643_v3  ;;  %5023 = vrot.lane.b32.xlu0 %v10035_v2, %s7158_s24  ;;  %v10284_v5 = vpop.permute.xlu0 %4633 }
 0xe88   :  { %5137 = vrot.lane.b32.xlu2 %v10059_v62, %s7159_s25  ;;  %4866 = vrot.lane.b32.xlu1 %v9994_v49, %s7162_s28 }
 0xe8c   :  { %v4492_v39 = vpop.permute.xlu1 %4491 }
 0xe8d   :  { %v4516_v63 = vsel %vm11694_vm6, %v10117_v23, %v4492_v39  ;;  %v4517_v16 = vsel %vm11695_vm7, %v4492_v39, %v10216_v25  ;;  %vm11714_vm6 = vmmov %vm11693_vm4  ;;  %vm11715_vm7 = vcmask 785408  }
 0xe8e   :  { %v10282_v14 = vpop.permute.xlu2 %4748  ;;  %4548 = vst [vmem:[#allocation4 + $0x218] sm:$0xf] %v4516_v63 }
 0xe8f   :  { %v4774_v2 = vsel %vm11696_vm15, %v4747_v6, %v10282_v14  ;;  %4549 = vst [vmem:[#allocation4 + $0x190] sm:$0xf] %v4517_v16  ;;  %5127 = vrot.lane.b32.xlu0 %v10040_v48, %s7159_s25  ;;  %v4608_v25 = vpop.permute.xlu0 %4607  ;;  %vm11716_vm15 = vmmov %vm11706_vm0 }
 0xe90   :  { %4806 = vst [vmem:[#allocation4 + $0x1a8] sm:$0xf] %v4774_v2  ;;  %5129 = vrot.lane.b32.xlu1 %v10042_v19, %s7159_s25  ;;  %4882 = vrot.lane.b32.xlu2 %v10020_v30, %s7162_s28  ;;  %v4639_v13 = vsel %vm11698_vm8, %v4606_v53, %v4608_v25  ;;  %v4640_v48 = vsel %vm11699_vm13, %v4608_v25, %v10189_v31  ;;  %vm11719_vm8 = vmmov %vm11715_vm7  ;;  %vm11720_vm13 = vcmask 556032  }
 0xe91   :  { %4671 = vst [vmem:[#allocation4 + $0x80] sm:$0xf0] %v4639_v13  ;;  %v5245_v13 = vld.sshfl [vmem:[#allocation1 + $0x18] sm:$0xff pattern:$0x75316420] }
 0xe92   :  { %4672 = vst [vmem:[#allocation4 + $0x30] sm:$0xf0] %v4640_v48 }
 0xe94   :  { %v10298_v62 = vpop.permute.xlu1 %4627 }
 0xe95   :  { %v4649_v23 = vsel %vm11697_vm9, %v10232_v12, %v10298_v62  ;;  %vm11717_vm9 = vmmov %vm11706_vm0 }
 0xe96   :  { %v4622_v49 = vpop.permute.xlu2 %4621  ;;  %4681 = vst [vmem:[#allocation4 + $0x68] sm:$0xf0] %v4649_v23 }
 0xe97   :  { %v4646_v21 = vsel %vm11700_vm5, %v4620_v41, %v4622_v49  ;;  %5131 = vrot.lane.b32.xlu0 %v10048_v4, %s7159_s25  ;;  %v4745_v32 = vpop.permute.xlu0 %4744  ;;  %vm11721_vm5 = vmmov %vm11715_vm7 }
 0xe98   :  { %4678 = vst [vmem:[#allocation4 + $0x218] sm:$0xf0] %v4646_v21  ;;  %4864 = vrot.lane.b32.xlu1 %v9992_v10, %s7162_s28  ;;  %4880 = vrot.lane.b32.xlu2 %v10018_v37, %s7162_s28  ;;  %v4773_v60 = vsel %vm11702_vm11, %v4745_v32, %v4747_v6  ;;  %v11703_v10 = vld [vmem:[#allocation30_spill] sm:$0xff]  ;;  %vm11724_vm11 = vmmov %vm11721_vm5 }
 0xe99   :  { %4805 = vst [vmem:[#allocation4 + $0x1e0] sm:$0xf] %v4773_v60  ;;  %v5248_v60 = vld.sshfl [vmem:[#allocation1 + $0x30] sm:$0xff pattern:$0x75316420] }
 0xe9c   :  { %v10313_v19 = vpop.permute.xlu1 %4631 }
 0xe9d   :  { %v4652_v31 = vsel %vm11701_vm10, %v10313_v19, %v10284_v5  ;;  %vm11722_vm10 = vmmov %vm11721_vm5 }
 0xe9e   :  { %v4761_v30 = vpop.permute.xlu2 %4760  ;;  %4684 = vst [vmem:[#allocation4 + $0x250] sm:$0xf0] %v4652_v31 }
 0xe9f   :  { %5145 = vrot.lane.b32.xlu0 %v10066_v15, %s7159_s25  ;;  %v4743_v40 = vpop.permute.xlu0 %4742  ;;  %v11709_v15 = vld [vmem:[#allocation10_spill] sm:$0xff] }
 0xea0   :  { %5135 = vrot.lane.b32.xlu1 %v10061_v27, %s7159_s25  ;;  %5151 = vrot.lane.b32.xlu2 %v11703_v10, %s7159_s25  ;;  %v4772_v28 = vsel %vm11706_vm0, %v4743_v40, %v4745_v32  ;;  %v11708_v27 = vld [vmem:[#allocation33_spill] sm:$0xff] }
 0xea1   :  { %4804 = vst [vmem:[#allocation4 + $0x1d0] sm:$0xf] %v4772_v28 }
 0xea4   :  { %v4741_v37 = vpop.permute.xlu1 %4740 }
 0xea5   :  { %v4770_v9 = vsel %vm11704_vm12, %v10247_v38, %v4741_v37  ;;  %v4771_v11 = vsel %vm11705_vm14, %v4741_v37, %v4743_v40  ;;  %vm11725_vm12 = vmmov %vm11720_vm13 }
 0xea6   :  { %v4759_v4 = vpop.permute.xlu2 %4758  ;;  %4802 = vst [vmem:[#allocation4 + $0xe0] sm:$0xf] %v4770_v9  ;;  %vm11726_vm14 = vmmov %vm11721_vm5 }
 0xea7   :  { %v4780_v33 = vsel %vm11707_vm1, %v4759_v4, %v4761_v30  ;;  %4803 = vst [vmem:[#allocation4 + $0x198] sm:$0xf] %v4771_v11  ;;  %5149 = vrot.lane.b32.xlu0 %v11708_v27, %s7159_s25  ;;  %v10339_v36 = vpop.permute.xlu0 %4754  ;;  %v5247_v11 = vld.sshfl [vmem:[#allocation1 + $0x28] sm:$0xff pattern:$0x75316420]  ;;  %vm11727_vm0 = vmmov %vm11725_vm12 }
 0xea8   :  { %4812 = vst [vmem:[#allocation4 + $0x1e8] sm:$0xf] %v4780_v33  ;;  %5143 = vrot.lane.b32.xlu1 %v11709_v15, %s7159_s25  ;;  %5147 = vrot.lane.b32.xlu2 %v11710_v51, %s7159_s25  ;;  %vm11728_vm1 = vmmov %vm11721_vm5  ;;  %v5249_v51 = vld.sshfl [vmem:[#allocation1 + $0x38] sm:$0xff pattern:$0x75316420] }
 0xeac   :  { %v4763_v57 = vpop.permute.xlu1 %4762 }
 0xead   :  { %v4781_v53 = vsel %vm11711_vm2, %v4761_v30, %v4763_v57 }
 0xeae   :  { %v10336_v46 = vpop.permute.xlu2 %4734  ;;  %4813 = vst [vmem:[#allocation4 + $0x38] sm:$0xf] %v4781_v53 }
 0xeaf   :  { %5256 = vrot.lane.b32.xlu0 %v10093_v52, %s7161_s27  ;;  %v4624_v56 = vpop.permute.xlu0 %4623 }
 0xeb0   :  { %5153 = vrot.lane.b32.xlu1 %v11712_v18, %s7159_s25  ;;  %5264 = vrot.lane.b32.xlu2 %v10113_v42, %s7161_s27  ;;  %v4647_v3 = vsel %vm11693_vm4, %v4622_v49, %v4624_v56  ;;  %v4648_v52 = vsel %vm11714_vm6, %v4624_v56, %v10232_v12  ;;  %v5244_v42 = vld.sshfl [vmem:[#allocation1 + $0x10] sm:$0xff pattern:$0x75316420]  ;;  %vm11733_vm4 = vmmov %vm11711_vm2 }
 0xeb1   :  { %4679 = vst [vmem:[#allocation4 + $0x190] sm:$0xf0] %v4647_v3  ;;  %v11731_v56 = vld [vmem:[#allocation32_spill] sm:$0xff]  ;;  %v11732_v3 = vld [vmem:[#allocation42_spill] sm:$0xff]  ;;  %vm11734_vm6 = vmmov %vm11728_vm1 }
 0xeb2   :  { %4680 = vst [vmem:[#allocation4 + $0x48] sm:$0xf0] %v4648_v52 }
 0xeb4   :  { %v10347_v59 = vpop.permute.xlu1 %4764 }
 0xeb5   :  { %v4782_v6 = vsel %vm11713_vm3, %v4763_v57, %v10347_v59  ;;  %vm11730_vm3 = vmmov %vm11711_vm2 }
 0xeb6   :  { %v10349_v43 = vpop.permute.xlu2 %4892  ;;  %4814 = vst [vmem:[#allocation4 + $0x1c8] sm:$0xf] %v4782_v6 }
 0xeb7   :  { %5258 = vrot.lane.b32.xlu0 %v10096_v29, %s7161_s27  ;;  %v4757_v39 = vpop.permute.xlu0 %4756  ;;  %v5246_v29 = vld.sshfl [vmem:[#allocation1 + $0x20] sm:$0xff pattern:$0x75316420] }
 0xeb8   :  { %5272 = vrot.lane.b32.xlu1 %v5244_v42, %s7161_s27  ;;  %5266 = vrot.lane.b32.xlu2 %v10115_v1, %s7161_s27  ;;  %v4778_v12 = vsel %vm11716_vm15, %v10339_v36, %v4757_v39  ;;  %v4779_v16 = vsel %vm11717_vm9, %v4757_v39, %v4759_v4  ;;  %v11718_v1 = vld [vmem:[#allocation29_spill] sm:$0xff]  ;;  %vm11737_vm15 = vmmov %vm11728_vm1 }
 0xeb9   :  { %4810 = vst [vmem:[#allocation4 + $0x90] sm:$0xf] %v4778_v12  ;;  %vm11738_vm9 = vmmov %vm11728_vm1 }
 0xeba   :  { %4811 = vst [vmem:[#allocation4 + $0x270] sm:$0xf] %v4779_v16 }
 0xebc   :  { %v4875_v41 = vpop.permute.xlu1 %4874 }
 0xebe   :  { %v10361_v35 = vpop.permute.xlu2 %4894 }
 0xebf   :  { %v4912_v63 = vsel %vm11715_vm7, %v10349_v43, %v10361_v35  ;;  %5262 = vrot.lane.b32.xlu0 %v10107_v44, %s7161_s27  ;;  %v10377_v25 = vpop.permute.xlu0 %4868  ;;  %vm11736_vm7 = vmmov %vm11711_vm2 }
 0xec0   :  { %4944 = vst [vmem:[#allocation4 + $0x1c8] sm:$0xf0] %v4912_v63  ;;  %5276 = vrot.lane.b32.xlu1 %v5246_v29, %s7161_s27  ;;  %4993 = vrot.lane.b32.xlu2 %v11718_v1, %s7158_s24 }
 0xec4   :  { %v4873_v2 = vpop.permute.xlu1 %4872 }
 0xec5   :  { %v4902_v23 = vsel %vm11719_vm8, %v4873_v2, %v4875_v41  ;;  %vm11739_vm8 = vmmov %vm11711_vm2 }
 0xec6   :  { %v10374_v49 = vpop.permute.xlu2 %4997  ;;  %4934 = vst [vmem:[#allocation4 + $0x1d0] sm:$0xf0] %v4902_v23 }
 0xec7   :  { %5260 = vrot.lane.b32.xlu0 %v10102_v26, %s7161_s27  ;;  %v4871_v21 = vpop.permute.xlu0 %4870  ;;  %v11723_v26 = vld [vmem:[#allocation41_spill] sm:$0xff] }
 0xec8   :  { %5274 = vrot.lane.b32.xlu2 %v5245_v13, %s7161_s27  ;;  %5011 = vrot.lane.b32.xlu1 %v10100_v8, %s7158_s24  ;;  %v4900_v31 = vsel %vm11721_vm5, %v10377_v25, %v4871_v21  ;;  %v4901_v32 = vsel %vm11722_vm10, %v4871_v21, %v4873_v2  ;;  %vm11742_vm5 = vmmov %vm11727_vm0  ;;  %v11746_v21 = vld [vmem:[#allocation40_spill] sm:$0xff] }
 0xec9   :  { %4932 = vst [vmem:[#allocation4 + $0xe0] sm:$0xf0] %v4900_v31  ;;  %vm11743_vm10 = vmmov %vm11727_vm0 }
 0xeca   :  { %4933 = vst [vmem:[#allocation4 + $0x198] sm:$0xf0] %v4901_v32 }
 0xecc   :  { %v10384_v44 = vpop.permute.xlu1 %4884 }
 0xece   :  { %v5000_v48 = vpop.permute.xlu2 %4999 }
 0xecf   :  { %v5029_v30 = vsel %vm11720_vm13, %v10374_v49, %v5000_v48  ;;  %4995 = vrot.lane.b32.xlu0 %v11723_v26, %s7158_s24  ;;  %v4877_v4 = vpop.permute.xlu0 %4876  ;;  %vm11741_vm13 = vmmov %vm11727_vm0 }
 0xed0   :  { %5061 = vst [vmem:[#allocation4 + $0xa0] sm:$0xf] %v5029_v30  ;;  %5280 = vrot.lane.b32.xlu2 %v5248_v60, %s7161_s27  ;;  %5125 = vrot.lane.b32.xlu1 %v10142_v47, %s7159_s25  ;;  %v4903_v40 = vsel %vm11726_vm14, %v4875_v41, %v4877_v4  ;;  %v11747_v30 = vld [vmem:[#allocation27_spill] sm:$0xff]  ;;  %vm11749_vm14 = vmmov %vm11727_vm0 }
 0xed1   :  { %4935 = vst [vmem:[#allocation4 + $0x1e0] sm:$0xf0] %v4903_v40 }
 0xed4   :  { %v4887_v8 = vpop.permute.xlu1 %4886 }
 0xed5   :  { %v4908_v37 = vsel %vm11724_vm11, %v10384_v44, %v4887_v8  ;;  %vm11744_vm11 = vmmov %vm11728_vm1 }
 0xed6   :  { %v5002_v10 = vpop.permute.xlu2 %5001  ;;  %4940 = vst [vmem:[#allocation4 + $0x90] sm:$0xf0] %v4908_v37 }
 0xed7   :  { %v5030_v9 = vsel %vm11725_vm12, %v5000_v48, %v5002_v10  ;;  %5278 = vrot.lane.b32.xlu0 %v5247_v11, %s7161_s27  ;;  %v10408_v27 = vpop.permute.xlu0 %4878  ;;  %vm11748_vm12 = vmmov %vm11727_vm0 }
 0xed8   :  { %5062 = vst [vmem:[#allocation4 + $0x1f8] sm:$0xf] %v5030_v9  ;;  %5123 = vrot.lane.b32.xlu1 %v10140_v24, %s7159_s25  ;;  %5141 = vrot.lane.b32.xlu2 %v10162_v20, %s7159_s25  ;;  %v4904_v15 = vsel %vm11728_vm1, %v4877_v4, %v10408_v27  ;;  %v11729_v24 = vld [vmem:[#allocation24_spill] sm:$0xff] }
 0xed9   :  { %4936 = vst [vmem:[#allocation4 + $0x1a8] sm:$0xf0] %v4904_v15 }
 0xedc   :  { %v5004_v47 = vpop.permute.xlu1 %5003 }
 0xedd   :  { %v5031_v33 = vsel %vm11727_vm0, %v5002_v10, %v5004_v47 }
 0xede   :  { %v10405_v28 = vpop.permute.xlu2 %5015  ;;  %5063 = vst [vmem:[#allocation4 + $0x58] sm:$0xf] %v5031_v33 }
 0xedf   :  { %5282 = vrot.lane.b32.xlu0 %v5249_v51, %s7161_s27  ;;  %v4737_v53 = vpop.permute.xlu0 %4736 }
 0xee0   :  { %4635 = vrot.lane.b32.xlu2 %v11729_v24, %s7163_s29  ;;  %5139 = vrot.lane.b32.xlu1 %v10160_v7, %s7159_s25  ;;  %v4768_v18 = vsel %vm11711_vm2, %v10336_v46, %v4737_v53  ;;  %v4769_v6 = vsel %vm11730_vm3, %v4737_v53, %v10247_v38  ;;  %vm11750_vm2 = vmmov %vm11728_vm1 }
 0xee1   :  { %4800 = vst [vmem:[#allocation4 + $0xf8] sm:$0xf] %v4768_v18  ;;  %vm11751_vm3 = vmmov %vm11728_vm1 }
 0xee2   :  { %4801 = vst [vmem:[#allocation4 + $0x98] sm:$0xf] %v4769_v6  ;;  %v11758_v6 = vld [vmem:[#allocation25_spill] sm:$0xff] }
 0xee4   :  { %v10417_v20 = vpop.permute.xlu1 %5007 }
 0xee6   :  { %v5020_v57 = vpop.permute.xlu2 %5019 }
 0xee7   :  { %5009 = vrot.lane.b32.xlu0 %v11731_v56, %s7158_s24  ;;  %v4891_v42 = vpop.permute.xlu0 %4890 }
 0xee8   :  { %4370 = vrot.lane.b32.xlu1 %v11732_v3, %s7164_s30  ;;  %5270 = vrot.lane.b32.xlu2 %v10224_v55, %s7161_s27  ;;  %v4911_v38 = vsel %vm11734_vm6, %v4891_v42, %v10349_v43  ;;  %v11735_v55 = vld [vmem:[#allocation26_spill] sm:$0xff]  ;;  %vm11754_vm6 = vcmask 547840  }
 0xee9   :  { %4943 = vst [vmem:[#allocation4 + $0x38] sm:$0xf0] %v4911_v38 }
 0xeec   :  { %v4753_v52 = vpop.permute.xlu1 %4752 }
 0xeed   :  { %v4777_v46 = vsel %vm11733_vm4, %v4753_v52, %v10339_v36  ;;  %vm11752_vm4 = vmmov %vm11727_vm0 }
 0xeee   :  { %v10429_v7 = vpop.permute.xlu2 %5133  ;;  %4809 = vst [vmem:[#allocation4 + $0x1b0] sm:$0xf] %v4777_v46 }
 0xeef   :  { %5254 = vrot.lane.b32.xlu0 %v10197_v22, %s7161_s27  ;;  %v4889_v63 = vpop.permute.xlu0 %4888  ;;  %v11740_v22 = vld [vmem:[#allocation23_spill] sm:$0xff] }
 0xef0   :  { %5025 = vrot.lane.b32.xlu1 %v10125_v17, %s7158_s24  ;;  %4766 = vrot.lane.b32.xlu2 %v11735_v55, %s7160_s26  ;;  %v4909_v43 = vsel %vm11737_vm15, %v4887_v8, %v4889_v63  ;;  %v4910_v12 = vsel %vm11738_vm9, %v4889_v63, %v4891_v42  ;;  %v5251_v17 = vld.sshfl [vmem:[#allocation1] sm:$0xff pattern:$0x75316420]  ;;  %vm11756_vm15 = vmmov %vm11754_vm6  ;;  %s7175_s24 = smov 14   ;;  %s7190_s26 = smov 28  }
 0xef1   :  { %4941 = vst [vmem:[#allocation4 + $0x270] sm:$0xf0] %v4909_v43  ;;  %vm11757_vm9 = vmmov %vm11754_vm6 }
 0xef2   :  { %4942 = vst [vmem:[#allocation4 + $0x1e8] sm:$0xf0] %v4910_v12 }
 0xef4   :  { %v4751_v39 = vpop.permute.xlu1 %4750 }
 0xef5   :  { %v4775_v36 = vsel %vm11736_vm7, %v10282_v14, %v4751_v39  ;;  %v4776_v16 = vsel %vm11739_vm8, %v4751_v39, %v4753_v52  ;;  %vm11755_vm7 = vmmov %vm11728_vm1 }
 0xef6   :  { %v10441_v41 = vpop.permute.xlu2 %5137  ;;  %4807 = vst [vmem:[#allocation4 + $0x228] sm:$0xf] %v4775_v36  ;;  %vm11759_vm8 = vmmov %vm11754_vm6 }
 0xef7   :  { %4808 = vst [vmem:[#allocation4] sm:$0xf] %v4776_v16  ;;  %5252 = vrot.lane.b32.xlu0 %v10195_v58, %s7161_s27  ;;  %v5006_v1 = vpop.permute.xlu0 %5005  ;;  %v11745_v58 = vld [vmem:[#allocation38_spill] sm:$0xff] }
 0xef8   :  { %4896 = vrot.lane.b32.xlu1 %v11740_v22, %s7162_s28  ;;  %5284 = vrot.lane.b32.xlu2 %v5251_v17, %s7161_s27  ;;  %v5032_v23 = vsel %vm11742_vm5, %v5004_v47, %v5006_v1  ;;  %v5033_v13 = vsel %vm11743_vm10, %v5006_v1, %v10417_v20  ;;  %vm11761_vm5 = vmmov %vm11754_vm6  ;;  %vm11762_vm10 = vcmask 539648   ;;  %s7176_s28 = smov 17  }
 0xef9   :  { %5064 = vst [vmem:[#allocation4 + $0x258] sm:$0xf] %v5032_v23 }
 0xefa   :  { %5065 = vst [vmem:[#allocation4 + $0x260] sm:$0xf] %v5033_v13 }
 0xefc   :  { %v5022_v14 = vpop.permute.xlu1 %5021 }
 0xefd   :  { %v5040_v2 = vsel %vm11741_vm13, %v5020_v57, %v5022_v14  ;;  %vm11760_vm13 = vmmov %vm11754_vm6 }
 0xefe   :  { %v4883_v29 = vpop.permute.xlu2 %4882  ;;  %5072 = vst [vmem:[#allocation4 + $0x180] sm:$0xf] %v5040_v2 }
 0xeff   :  { %v4907_v48 = vsel %vm11744_vm11, %v4883_v29, %v10384_v44  ;;  %4629 = vrot.lane.b32.xlu0 %v11745_v58, %s7163_s29  ;;  %v10465_v26 = vpop.permute.xlu0 %5013  ;;  %vm11763_vm11 = vmmov %vm11761_vm5 }
 0xf00   :  { %4939 = vst [vmem:[#allocation4 + $0x1b0] sm:$0xf0] %v4907_v48  ;;  %4378 = vrot.lane.b32.xlu1 %v11746_v21, %s7164_s30  ;;  %4637 = vrot.lane.b32.xlu2 %v11747_v30, %s7163_s29  ;;  %v5037_v8 = vsel %vm11727_vm0, %v10465_v26, %v10405_v28  ;;  %vm11766_vm0 = vmmov %vm11761_vm5  ;;  %s6902_s29 = sld [smem:[%s11286_s0 + %s7190_s26]]  }
 0xf01   :  { %5069 = vst [vmem:[#allocation4 + $0xd0] sm:$0xf] %v5037_v8  ;;  %v5353_v8 = vld [vmem:[#allocation4 + $0x10] sm:$0xff] }
 0xf04   :  { %v5018_v31 = vpop.permute.xlu1 %5017 }
 0xf05   :  { %v5038_v60 = vsel %vm11748_vm12, %v10405_v28, %v5018_v31  ;;  %v5039_v44 = vsel %vm11749_vm14, %v5018_v31, %v5020_v57  ;;  %v11753_v28 = vld [vmem:[#allocation45_spill] sm:$0xff]  ;;  %vm11764_vm12 = vmmov %vm11761_vm5 }
 0xf06   :  { %v4881_v32 = vpop.permute.xlu2 %4880  ;;  %5070 = vst [vmem:[#allocation4 + $0x278] sm:$0xf] %v5038_v60  ;;  %vm11765_vm14 = vmmov %vm11761_vm5 }
 0xf07   :  { %v4905_v10 = vsel %vm11728_vm1, %v10408_v27, %v4881_v32  ;;  %v4906_v37 = vsel %vm11750_vm2, %v4881_v32, %v4883_v29  ;;  %5071 = vst [vmem:[#allocation4 + $0x210] sm:$0xf] %v5039_v44  ;;  %5268 = vrot.lane.b32.xlu0 %v10222_v50, %s7161_s27  ;;  %v10478_v40 = vpop.permute.xlu0 %5023  ;;  %vm11767_vm1 = vmmov %vm11762_vm10  ;;  %s6888_s27 = sld [smem:[%s11286_s0 + %s7175_s24]]   ;;  %v5369_v44 = vld [vmem:[#allocation4 + $0xe0] sm:$0xff]  ;;  %s7182_s24 = smov 21  }
 0xf08   :  { %4937 = vst [vmem:[#allocation4 + $0x228] sm:$0xf0] %v4905_v10  ;;  %v5041_v47 = vsel %vm11752_vm4, %v5022_v14, %v10478_v40  ;;  %vm11768_vm2 = vmmov %vm11767_vm1 }
 0xf09   :  { %4938 = vst [vmem:[#allocation4] sm:$0xf0] %v4906_v37  ;;  %vm11770_vm4 = vmmov %vm11766_vm0 }
 0xf0a   :  { %5073 = vst [vmem:[#allocation4 + $0x130] sm:$0xf] %v5041_v47 }
 0xf0c   :  { %v4867_v4 = vpop.permute.xlu1 %4866 }
 0xf0d   :  { %v4899_v11 = vsel %vm11751_vm3, %v4867_v4, %v10377_v25  ;;  %vm11769_vm3 = vmmov %vm11767_vm1 }
 0xf0e   :  { %v5152_v9 = vpop.permute.xlu2 %5151  ;;  %4931 = vst [vmem:[#allocation4 + $0x98] sm:$0xf0] %v4899_v11 }
 0xf0f   :  { %4376 = vrot.lane.b32.xlu0 %v11753_v28, %s7164_s30  ;;  %v10486_v15 = vpop.permute.xlu0 %5127  ;;  %s7191_s30 = smov 29  }
 0xf10   :  { %s6903_s14 = sld [smem:[%s11286_s0 + %s7191_s30]]  }
 0xf14   :  { %v5130_v33 = vpop.permute.xlu1 %5129 }
 0xf15   :  { %v5159_v50 = vsel %vm11754_vm6, %v10486_v15, %v5130_v33  ;;  %vm11771_vm6 = vmmov %vm11767_vm1 }
 0xf16   :  { %v5148_v27 = vpop.permute.xlu2 %5147  ;;  %5191 = vst [vmem:[#allocation4 + $0xa0] sm:$0xf0] %v5159_v50 }
 0xf17   :  { %5155 = vrot.lane.b32.xlu0 %v10180_v34, %s7159_s25  ;;  %v5132_v24 = vpop.permute.xlu0 %5131  ;;  %s11259_s25 = sld [smem:[%s11286_s0 + %s7189_s12]]  }
 0xf18   :  { %v5160_v53 = vsel %vm11756_vm15, %v5130_v33, %v5132_v24  ;;  %v5161_v18 = vsel %vm11757_vm9, %v5132_v24, %v10429_v7  ;;  %vm11773_vm15 = vcmask 556032   ;;  %vm11774_vm9 = vmmov %vm11767_vm1  ;;  %v5337_v33 = vld [vmem:[#allocation4 + $0x40] sm:$0xff] }
 0xf19   :  { %5192 = vst [vmem:[#allocation4 + $0x1f8] sm:$0xf0] %v5160_v53  ;;  %v5357_v53 = vld [vmem:[#allocation4 + $0x248] sm:$0xff] }
 0xf1a   :  { %5193 = vst [vmem:[#allocation4 + $0x58] sm:$0xf0] %v5161_v18 }
 0xf1c   :  { %v4865_v25 = vpop.permute.xlu1 %4864 }
 0xf1d   :  { %v4898_v57 = vsel %vm11755_vm7, %v4865_v25, %v4867_v4  ;;  %vm11772_vm7 = vcmask 1043456   ;;  %v5385_v60 = vld [vmem:[#allocation4 + $0xa0] sm:$0xff]  ;;  %v5373_v25 = vld [vmem:[#allocation4 + $0x1a8] sm:$0xff] }
 0xf1e   :  { %v5265_v51 = vpop.permute.xlu2 %5264  ;;  %4930 = vst [vmem:[#allocation4 + $0xf8] sm:$0xf0] %v4898_v57 }
 0xf1f   :  { %4507 = vrot.lane.b32.xlu0 %v11758_v6, %s7165_s1  ;;  %v5146_v34 = vpop.permute.xlu0 %5145  ;;  %s10656_s1 = sld [smem:[%s11286_s0 + %s7176_s28]]   ;;  %s7183_s28 = smov 22  }
 0xf20   :  { %v5168_v46 = vsel %vm11761_vm5, %v5146_v34, %v5148_v27  ;;  %vm11777_vm5 = vmmov %vm11772_vm7 }
 0xf21   :  { %5200 = vst [vmem:[#allocation4 + $0x278] sm:$0xf0] %v5168_v46  ;;  %v5370_v46 = vld [vmem:[#allocation4 + $0x198] sm:$0xff] }
 0xf24   :  { %v5136_v56 = vpop.permute.xlu1 %5135 }
 0xf25   :  { %v5162_v52 = vsel %vm11759_vm8, %v10429_v7, %v5136_v56  ;;  %v5163_v42 = vsel %vm11760_vm13, %v5136_v56, %v10441_v41  ;;  %vm11775_vm8 = vmmov %vm11767_vm1  ;;  %vm11776_vm13 = vcmask 801792  }
 0xf26   :  { %v10498_v3 = vpop.permute.xlu2 %5266  ;;  %5194 = vst [vmem:[#allocation4 + $0x258] sm:$0xf0] %v5162_v52  ;;  %v5341_v52 = vld [vmem:[#allocation4 + $0x70] sm:$0xff] }
 0xf27   :  { %v5292_v38 = vsel %vm11762_vm10, %v5265_v51, %v10498_v3  ;;  %5195 = vst [vmem:[#allocation4 + $0x260] sm:$0xf0] %v5163_v42  ;;  %v5150_v63 = vpop.permute.xlu0 %5149  ;;  %vm11778_vm10 = vcmask 293888  }
 0xf28   :  { %5324 = vst [vmem:[#allocation4 + $0x118] sm:$0xf] %v5292_v38  ;;  %v5169_v7 = vsel %vm11764_vm12, %v5148_v27, %v5150_v63  ;;  %v5170_v43 = vsel %vm11765_vm14, %v5150_v63, %v5152_v9  ;;  %v10548_v27 = vld [vmem:[%s6888_s27] sm:$0xf]  ;;  %vm11780_vm12 = vmmov %vm11773_vm15  ;;  %v5354_v38 = vld [vmem:[#allocation4 + $0x160] sm:$0xff]  ;;  %s6895_s27 = sld [smem:[%s11286_s0 + %s7182_s24]]  }
 0xf29   :  { %5201 = vst [vmem:[#allocation4 + $0x210] sm:$0xf0] %v5169_v7  ;;  %vm11781_vm14 = vmmov %vm11780_vm12 }
 0xf2a   :  { %5202 = vst [vmem:[#allocation4 + $0x180] sm:$0xf0] %v5170_v43 }
 0xf2c   :  { %v5144_v55 = vpop.permute.xlu1 %5143 }
 0xf2d   :  { %v5167_v36 = vsel %vm11763_vm11, %v5144_v55, %v5146_v34  ;;  %vm11779_vm11 = vmmov %vm11766_vm0 }
 0xf2e   :  { %v10507_v39 = vpop.permute.xlu2 %4993  ;;  %5199 = vst [vmem:[#allocation4 + $0xd0] sm:$0xf0] %v5167_v36 }
 0xf2f   :  { %v10514_v17 = vpop.permute.xlu0 %5256  ;;  %v5405_v50 = vld [vmem:[#allocation4 + $0x118] sm:$0xf] }
 0xf34   :  { %v10512_v12 = vpop.permute.xlu1 %5153 }
 0xf35   :  { %v5171_v22 = vsel %vm11766_vm0, %v5152_v9, %v10512_v12  ;;  %vm11782_vm0 = vmmov %vm11767_vm1 }
 0xf36   :  { %v5275_v16 = vpop.permute.xlu2 %5274  ;;  %5203 = vst [vmem:[#allocation4 + $0x130] sm:$0xf0] %v5171_v22 }
 0xf37   :  { %v5259_v1 = vpop.permute.xlu0 %5258 }
 0xf38   :  { %v5288_v23 = vsel %vm11768_vm2, %v10514_v17, %v5259_v1 }
 0xf39   :  { %5320 = vst [vmem:[#allocation4 + $0x138] sm:$0xf] %v5288_v23 }
 0xf3c   :  { %v5273_v14 = vpop.permute.xlu1 %5272 }
 0xf3d   :  { %v5296_v2 = vsel %vm11767_vm1, %v5273_v14, %v5275_v16  ;;  %vm11783_vm1 = vmmov %vm11777_vm5 }
 0xf3e   :  { %v10518_v29 = vpop.permute.xlu2 %5280  ;;  %5328 = vst [vmem:[#allocation4 + $0x170] sm:$0xf] %v5296_v2  ;;  %vm11784_vm2 = vmmov %vm11783_vm1  ;;  %v5345_v2 = vld [vmem:[#allocation4 + $0x158] sm:$0xff] }
 0xf3f   :  { %v5263_v58 = vpop.permute.xlu0 %5262 }
 0xf40   :  { %v5291_v31 = vsel %vm11771_vm6, %v5263_v58, %v5265_v51  ;;  %v5401_v32 = vld [vmem:[#allocation4 + $0x138] sm:$0xf]  ;;  %vm11786_vm6 = vmmov %vm11782_vm0 }
 0xf41   :  { %5323 = vst [vmem:[#allocation4 + $0x88] sm:$0xf] %v5291_v31  ;;  %6982 = vmatpush.msk.msra.mxu3 %vm11772_vm7, %v5401_v32  ;;  %vm11787_vm7 = vmmov %vm11782_vm0 }
 0xf43   :  { %5518 = vmatpush.msra.mxu3 %v5385_v60 }
 0xf44   :  { %v10523_v13 = vpop.permute.xlu1 %5276 }
 0xf45   :  { %v5297_v21 = vsel %vm11769_vm3, %v5275_v16, %v10523_v13  ;;  %5519 = vmatpush.msra.mxu3 %v5369_v44  ;;  %v5409_v42 = vld [vmem:[#allocation4 + $0x170] sm:$0xf]  ;;  %vm11785_vm3 = vmmov %vm11778_vm10 }
 0xf46   :  { %v10525_v48 = vpop.permute.xlu2 %5141  ;;  %5329 = vst [vmem:[#allocation4 + $0x150] sm:$0xf] %v5297_v21 }
 0xf47   :  { %v5166_v30 = vsel %vm11770_vm4, %v10525_v48, %v5144_v55  ;;  %v5261_v4 = vpop.permute.xlu0 %5260  ;;  %5520 = vmatpush.msra.mxu3 %v5353_v8  ;;  %v5377_v55 = vld [vmem:[#allocation4 + $0x90] sm:$0xff] }
 0xf48   :  { %5198 = vst [vmem:[#allocation4 + $0x168] sm:$0xf0] %v5166_v30  ;;  %v5289_v11 = vsel %vm11774_vm9, %v5259_v1, %v5261_v4  ;;  %v5290_v47 = vsel %vm11775_vm8, %v5261_v4, %v5263_v58  ;;  %v5361_v1 = vld [vmem:[#allocation4 + $0x68] sm:$0xff]  ;;  %vm11789_vm9 = vmmov %vm11785_vm3 }
 0xf49   :  { %5321 = vst [vmem:[#allocation4 + $0x208] sm:$0xf] %v5289_v11  ;;  %5521 = vmatpush.msra.mxu3 %v5337_v33  ;;  %vm11790_vm8 = vmmov %vm11785_vm3  ;;  %v5397_v11 = vld [vmem:[#allocation4 + $0x130] sm:$0xff] }
 0xf4a   :  { %5322 = vst [vmem:[#allocation4 + $0x240] sm:$0xf] %v5290_v47  ;;  %6983 = vmatmul.msk.f32.vlgmr.msra.gmra.mxu3 %vm11778_vm10, %v10548_v27  ;;  %vm11793_vm10 = vmmov %vm11782_vm0 }
 0xf4b   :  { %6990 = vmatpush.msk.msrb.mxu3 %vm11777_vm5, %v5405_v50  ;;  %vm11792_vm5 = vmmov %vm11770_vm4 }
 0xf4c   :  { %v10536_v10 = vpop.permute.xlu1 %5011 }
 0xf4d   :  { %v5036_v9 = vsel %vm11773_vm15, %v10536_v10, %v10465_v26  ;;  %v5389_v26 = vld [vmem:[#allocation4 + $0x260] sm:$0xff]  ;;  %vm11788_vm15 = vcmask 793600  }
 0xf4e   :  { %v10538_v37 = vpop.permute.xlu2 %4635  ;;  %5068 = vst [vmem:[#allocation4 + $0x168] sm:$0xf] %v5036_v9  ;;  %5598 = vmatpush.msrb.mxu3 %v5389_v26 }
 0xf4f   :  { %v4653_v28 = vsel %vm11776_vm13, %v10284_v5, %v10538_v37  ;;  %v4996_v5 = vpop.permute.xlu0 %4995  ;;  %vm11791_vm13 = vmmov %vm11770_vm4 }
 0xf50   :  { %4685 = vst [vmem:[#allocation4 + $0xb8] sm:$0xf0] %v4653_v28  ;;  %5599 = vmatpush.msrb.mxu3 %v5373_v25  ;;  %v5027_v18 = vsel %vm11780_vm12, %v10507_v39, %v4996_v5  ;;  %v5028_v6 = vsel %vm11781_vm14, %v4996_v5, %v10374_v49  ;;  %v5402_v34 = vld [vmem:[#allocation4 + $0x208] sm:$0xf]  ;;  %v5393_v49 = vld [vmem:[#allocation4 + $0xd0] sm:$0xff]  ;;  %vm11795_vm12 = vcmask 1039360  }
 0xf51   :  { %5059 = vst [vmem:[#allocation4 + $0x78] sm:$0xf] %v5027_v18  ;;  %6984 = vmatpush.msk.msra.mxu0 %vm11783_vm1, %v5402_v34  ;;  %vm11797_vm1 = vmmov %vm11795_vm12  ;;  %v5352_v5 = vld [vmem:[#allocation4 + $0x30] sm:$0xff]  ;;  %v5336_v18 = vld [vmem:[#allocation4 + $0x8] sm:$0xff] }
 0xf52   :  { %5600 = vmatpush.msrb.mxu3 %v5357_v53  ;;  %5060 = vst [vmem:[#allocation4 + $0x1f0] sm:$0xf] %v5028_v6  ;;  %v5404_v6 = vld [vmem:[#allocation4 + $0x88] sm:$0xf]  ;;  %v5388_v34 = vld [vmem:[#allocation4 + $0x258] sm:$0xff] }
 0xf54   :  { %v5126_v51 = vpop.permute.xlu1 %5125  ;;  %5601 = vmatpush.msrb.mxu3 %v5341_v52  ;;  %v5351_v52 = vld [vmem:[#allocation4 + $0x80] sm:$0xff] }
 0xf55   :  { %v5158_v57 = vsel %vm11779_vm11, %v5126_v51, %v10486_v15  ;;  %v5386_v15 = vld [vmem:[#allocation4 + $0x1f8] sm:$0xff]  ;;  %6991 = vmatmul.msk.f32.vlgmr.msrb.gmra.mxu3 %vm11785_vm3, %v10548_v27  ;;  %vm11794_vm11 = vmmov %vm11782_vm0  ;;  %vm11799_vm3 = vcmask 1043456  }
 0xf56   :  { %v10553_v24 = vpop.permute.xlu2 %5270  ;;  %5190 = vst [vmem:[#allocation4 + $0x1f0] sm:$0xf0] %v5158_v57  ;;  %5538 = vmatpush.msra.mxu0 %v5386_v15  ;;  %6998 = vmatpush.msk.msra.mxu3 %vm11784_vm2, %v5409_v42  ;;  %vm11798_vm2 = vcmask 801792   ;;  %v5356_v42 = vld [vmem:[#allocation4 + $0x1a0] sm:$0xff] }
 0xf57   :  { %v5295_v56 = vsel %vm11782_vm0, %v10553_v24, %v5273_v14  ;;  %v5279_v36 = vpop.permute.xlu0 %5278  ;;  %v5338_v14 = vld [vmem:[#allocation4 + $0x28] sm:$0xff]  ;;  %vm11796_vm0 = vmmov %vm11781_vm14 }
 0xf58   :  { %5327 = vst [vmem:[#allocation4 + $0x230] sm:$0xf] %v5295_v56  ;;  %5539 = vmatpush.msra.mxu0 %v5370_v46  ;;  %5678 = vmatpush.msra.mxu3 %v5393_v49  ;;  %v5298_v43 = vsel %vm11786_vm6, %v10523_v13, %v5279_v36  ;;  %v5299_v16 = vsel %vm11787_vm7, %v5279_v36, %v10518_v29  ;;  %vm11801_vm7 = vcmask 785408   ;;  %v5392_v36 = vld [vmem:[#allocation4 + $0x168] sm:$0xff] }
 0xf59   :  { %5330 = vst [vmem:[#allocation4 + $0x20] sm:$0xf] %v5298_v43 }
 0xf5a   :  { %5540 = vmatpush.msra.mxu0 %v5354_v38  ;;  %5679 = vmatpush.msra.mxu3 %v5377_v55  ;;  %5331 = vst [vmem:[#allocation4 + $0x178] sm:$0xf] %v5299_v16  ;;  %v5335_v38 = vld [vmem:[#allocation4 + $0xc8] sm:$0xff]  ;;  %v5403_v55 = vld [vmem:[#allocation4 + $0x240] sm:$0xf] }
 0xf5c   :  { %v5124_v39 = vpop.permute.xlu1 %5123  ;;  %5541 = vmatpush.msra.mxu0 %v5338_v14  ;;  %5680 = vmatpush.msra.mxu3 %v5361_v1 }
 0xf5d   :  { %v5157_v7 = vsel %vm11770_vm4, %v5124_v39, %v5126_v51  ;;  %6985 = vmatmul.msk.f32.vlgmr.msra.gmra.mxu0 %vm11789_vm9, %v10548_v27  ;;  %vm11800_vm4 = vmmov %vm11796_vm0  ;;  %v5384_v51 = vld [vmem:[#allocation4 + $0x1f0] sm:$0xff] }
 0xf5e   :  { %v4767_v63 = vpop.permute.xlu2 %4766  ;;  %5189 = vst [vmem:[#allocation4 + $0x78] sm:$0xf0] %v5157_v7  ;;  %5681 = vmatpush.msra.mxu3 %v5345_v2  ;;  %vm11803_vm9 = vmmov %vm11799_vm3  ;;  %v5340_v39 = vld [vmem:[#allocation4 + $0xf0] sm:$0xff] }
 0xf5f   :  { %v4783_v22 = vsel %vm11788_vm15, %v10347_v59, %v4767_v63  ;;  %6999 = vmatmul.msk.f32.vlgmr.msra.gmra.mxu3 %vm11790_vm8, %v10548_v27  ;;  %v5283_v58 = vpop.permute.xlu0 %5282  ;;  %vm11802_vm15 = vmmov %vm11786_vm6  ;;  %v5408_v63 = vld [vmem:[#allocation4 + $0x230] sm:$0xf] }
 0xf60   :  { %4815 = vst [vmem:[#allocation4 + $0x18] sm:$0xf] %v4783_v22  ;;  %v5300_v30 = vsel %vm11793_vm10, %v10518_v29, %v5283_v58  ;;  %vm11804_vm8 = vmmov %vm11798_vm2  ;;  %v5376_v7 = vld [vmem:[#allocation4 + $0x1b0] sm:$0xff]  ;;  %v5355_v22 = vld [vmem:[#allocation4 + $0x1d8] sm:$0xff] }
 0xf61   :  { %5332 = vst [vmem:[#allocation4 + $0x50] sm:$0xf] %v5300_v30  ;;  %vm11807_vm10 = vmmov %vm11799_vm3  ;;  %v5374_v30 = vld [vmem:[#allocation4 + $0x228] sm:$0xff] }
 0xf64   :  { %v5140_v23 = vpop.permute.xlu1 %5139 }
 0xf65   :  { %v5164_v59 = vsel %vm11791_vm13, %v10441_v41, %v5140_v23  ;;  %v5165_v21 = vsel %vm11792_vm5, %v5140_v23, %v10525_v48  ;;  %vm11805_vm13 = vmmov %vm11798_vm2  ;;  %v5383_v56 = vld [vmem:[#allocation4 + $0x78] sm:$0xff]  ;;  %v5360_v23 = vld [vmem:[#allocation4 + $0x48] sm:$0xff] }
 0xf66   :  { %v5285_v13 = vpop.permute.xlu2 %5284  ;;  %5196 = vst [vmem:[#allocation4 + $0x100] sm:$0xf0] %v5164_v59  ;;  %vm11806_vm5 = vmmov %vm11799_vm3 }
 0xf67   :  { %v5301_v31 = vsel %vm11794_vm11, %v5283_v58, %v5285_v13  ;;  %5197 = vst [vmem:[#allocation4 + $0x1b8] sm:$0xf0] %v5165_v21  ;;  %v5010_v44 = vpop.permute.xlu0 %5009  ;;  %vm11808_vm11 = vcmask 293888   ;;  %v5339_v13 = vld [vmem:[#allocation4 + $0xe8] sm:$0xff] }
 0xf68   :  { %5333 = vst [vmem:[#allocation4 + $0xb0] sm:$0xf] %v5301_v31  ;;  %v5034_v41 = vsel %vm11781_vm14, %v10417_v20, %v5010_v44  ;;  %v5035_v48 = vsel %vm11796_vm0, %v5010_v44, %v10536_v10  ;;  %v5413_v4 = vld [vmem:[#allocation4 + $0x50] sm:$0xf]  ;;  %v5365_v20 = vld [vmem:[#allocation4 + $0xb8] sm:$0xff]  ;;  %vm11810_vm14 = vmmov %vm11786_vm6 }
 0xf69   :  { %5066 = vst [vmem:[#allocation4 + $0x100] sm:$0xf] %v5034_v41  ;;  %7006 = vmatpush.msk.msrb.mxu3 %vm11799_vm3, %v5413_v4  ;;  %vm11811_vm0 = vmmov %vm11799_vm3  ;;  %v5344_v21 = vld [vmem:[#allocation4 + $0x148] sm:$0xff]  ;;  %v5375_v44 = vld [vmem:[#allocation4] sm:$0xff] }
 0xf6a   :  { %5067 = vst [vmem:[#allocation4 + $0x1b8] sm:$0xf] %v5035_v48  ;;  %v5380_v48 = vld [vmem:[#allocation4 + $0x38] sm:$0xff] }
 0xf6b   :  { %5758 = vmatpush.msrb.mxu3 %v5397_v11  ;;  %v5364_v11 = vld [vmem:[#allocation4 + $0x250] sm:$0xff] }
 0xf6c   :  { %v4371_v32 = vpop.permute.xlu1 %4370 }
 0xf6d   :  { %v4391_v8 = vsel %vm11795_vm12, %v10154_v61, %v4371_v32  ;;  %v4392_v29 = vsel %vm11797_vm1, %v4371_v32, %v10171_v45  ;;  %v5381_v61 = vld [vmem:[#allocation4 + $0x1c8] sm:$0xff]  ;;  %vm11809_vm12 = vmmov %vm11786_vm6  ;;  %v5396_v32 = vld [vmem:[#allocation4 + $0x180] sm:$0xff] }
 0xf6e   :  { %v4638_v60 = vpop.permute.xlu2 %4637  ;;  %4423 = vst [vmem:[#allocation4 + $0x108] sm:$0xf0] %v4391_v8  ;;  %5759 = vmatpush.msrb.mxu3 %v5381_v61  ;;  %vm11812_vm1 = vmmov %vm11811_vm0  ;;  %v5410_v61 = vld [vmem:[#allocation4 + $0x150] sm:$0xf] }
 0xf6f   :  { %v4654_v9 = vsel %vm11798_vm2, %v10538_v37, %v4638_v60  ;;  %4424 = vst [vmem:[#allocation4 + $0x220] sm:$0xf0] %v4392_v29  ;;  %v5255_v47 = vpop.permute.xlu0 %5254  ;;  %vm11813_vm2 = vmmov %vm11808_vm11  ;;  %v5358_v60 = vld [vmem:[#allocation4 + $0x218] sm:$0xff]  ;;  %v5342_v29 = vld [vmem:[#allocation4 + $0x120] sm:$0xff] }
 0xf70   :  { %4686 = vst [vmem:[#allocation4 + $0x268] sm:$0xf0] %v4654_v9  ;;  %5760 = vmatpush.msrb.mxu3 %v5365_v20  ;;  %v5287_v37 = vsel %vm11786_vm6, %v5255_v47, %v10514_v17  ;;  %vm11814_vm3 = vmmov %vm11813_vm2  ;;  %v5390_v58 = vld [vmem:[#allocation4 + $0x100] sm:$0xff]  ;;  %v5359_v9 = vld [vmem:[#allocation4 + $0x190] sm:$0xff] }
 0xf71   :  { %5319 = vst [vmem:[#allocation4 + $0x60] sm:$0xf] %v5287_v37  ;;  %v5391_v31 = vld [vmem:[#allocation4 + $0x1b8] sm:$0xff]  ;;  %v5395_v37 = vld [vmem:[#allocation4 + $0x210] sm:$0xff] }
 0xf72   :  { %v5343_v20 = vld [vmem:[#allocation4 + $0xd8] sm:$0xff] }
 0xf74   :  { %v5026_v10 = vpop.permute.xlu1 %5025 }
 0xf75   :  { %v5042_v45 = vsel %vm11800_vm4, %v10478_v40, %v5026_v10  ;;  %v5368_v40 = vld [vmem:[#allocation4 + $0x98] sm:$0xff]  ;;  %vm11815_vm4 = vcmask 1039360  }
 0xf76   :  { %5074 = vst [vmem:[#allocation4 + $0x110] sm:$0xf] %v5042_v45  ;;  %vm11816_vm6 = vmmov %vm11815_vm4  ;;  %v5394_v10 = vld [vmem:[#allocation4 + $0x278] sm:$0xff]  ;;  %v5411_v45 = vld [vmem:[#allocation4 + $0x20] sm:$0xf] }
 0xf77   :  { %v5253_v50 = vpop.permute.xlu0 %5252 }
 0xf78   :  { %v5286_v26 = vsel %vm11802_vm15, %v5253_v50, %v5255_v47  ;;  %v5400_v25 = vld [vmem:[#allocation4 + $0x60] sm:$0xf]  ;;  %vm11818_vm15 = vmmov %vm11811_vm0  ;;  %v5378_v47 = vld [vmem:[#allocation4 + $0x270] sm:$0xff] }
 0xf79   :  { %5318 = vst [vmem:[#allocation4 + $0xa8] sm:$0xf] %v5286_v26  ;;  %6980 = vmatpush.msk.msrb.mxu2 %vm11803_vm9, %v5400_v25  ;;  %vm11819_vm9 = vmmov %vm11813_vm2  ;;  %v5379_v26 = vld [vmem:[#allocation4 + $0x1e8] sm:$0xff] }
 0xf7a   :  { %v5346_v25 = vld [vmem:[#allocation4 + $0x108] sm:$0xff] }
 0xf7b   :  { %5498 = vmatpush.msrb.mxu2 %v5384_v51 }
 0xf7c   :  { %v4897_v28 = vpop.permute.xlu1 %4896 }
 0xf7d   :  { %v4913_v33 = vsel %vm11801_vm7, %v10361_v35, %v4897_v28  ;;  %5499 = vmatpush.msrb.mxu2 %v5368_v40  ;;  %vm11817_vm7 = vmmov %vm11811_vm0  ;;  %v5414_v40 = vld [vmem:[#allocation4 + $0xb0] sm:$0xf] }
 0xf7e   :  { %4945 = vst [vmem:[#allocation4 + $0x18] sm:$0xf0] %v4913_v33 }
 0xf7f   :  { %5500 = vmatpush.msrb.mxu2 %v5352_v5  ;;  %v4630_v17 = vpop.permute.xlu0 %4629  ;;  %v5347_v5 = vld [vmem:[#allocation4 + $0x220] sm:$0xff] }
 0xf80   :  { %v4650_v57 = vsel %vm11804_vm8, %v10298_v62, %v4630_v17  ;;  %v4651_v35 = vsel %vm11805_vm13, %v4630_v17, %v10313_v19  ;;  %v5399_v53 = vld [vmem:[#allocation4 + $0xa8] sm:$0xf]  ;;  %v5367_v62 = vld [vmem:[#allocation4 + $0xf8] sm:$0xff]  ;;  %v5372_v19 = vld [vmem:[#allocation4 + $0x1e0] sm:$0xff] }
 0xf81   :  { %4682 = vst [vmem:[#allocation4 + $0x238] sm:$0xf0] %v4650_v57  ;;  %6978 = vmatpush.msk.msra.mxu1 %vm11806_vm5, %v5399_v53  ;;  %5501 = vmatpush.msrb.mxu2 %v5336_v18  ;;  %vm11820_vm8 = vmmov %vm11811_vm0  ;;  %vm11822_vm5 = vcmask 547840   ;;  %v5786_v53 = vld [vmem:[%s10656_s1] sm:$0xff]  ;;  %v11834_v18 = vmov 0  }
 0xf82   :  { %4683 = vst [vmem:[#allocation4 + $0x188] sm:$0xf0] %v4651_v35  ;;  %6981 = vmatmul.msk.f32.vlgmr.msrb.gmra.mxu2 %vm11808_vm11, %v10548_v27  ;;  %vm11821_vm13 = vmmov %vm11813_vm2 }
 0xf83   :  { %6988 = vmatpush.msk.msra.mxu2 %vm11807_vm10, %v5404_v6  ;;  %5478 = vmatpush.msra.mxu1 %v5383_v56  ;;  %vm11823_vm10 = vmmov %vm11813_vm2 }
 0xf84   :  { %v4379_v43 = vpop.permute.xlu1 %4378  ;;  %vm11824_vm11 = vmmov %vm11811_vm0 }
 0xf85   :  { %5578 = vmatpush.msra.mxu2 %v5388_v34  ;;  %5479 = vmatpush.msra.mxu1 %v5367_v62  ;;  %v5382_v17 = vld [vmem:[#allocation4 + $0x18] sm:$0xff] }
 0xf87   :  { %5579 = vmatpush.msra.mxu2 %v5372_v19  ;;  %5480 = vmatpush.msra.mxu1 %v5351_v52  ;;  %v5269_v15 = vpop.permute.xlu0 %5268 }
 0xf88   :  { %v5293_v46 = vsel %vm11809_vm12, %v10498_v3, %v5269_v15  ;;  %v5294_v49 = vsel %vm11810_vm14, %v5269_v15, %v10553_v24  ;;  %v5387_v3 = vld [vmem:[#allocation4 + $0x58] sm:$0xff]  ;;  %v5371_v24 = vld [vmem:[#allocation4 + $0x1d0] sm:$0xff]  ;;  %vm11825_vm12 = vmmov %vm11813_vm2 }
 0xf89   :  { %5580 = vmatpush.msra.mxu2 %v5356_v42  ;;  %5325 = vst [vmem:[#allocation4 + $0x128] sm:$0xf] %v5293_v46  ;;  %5481 = vmatpush.msra.mxu1 %v5335_v38  ;;  %vm11826_vm14 = vmmov %vm11811_vm0  ;;  %v5362_v50 = vld [vmem:[#allocation4 + $0x238] sm:$0xff]  ;;  %v5363_v51 = vld [vmem:[#allocation4 + $0x188] sm:$0xff] }
 0xf8a   :  { %5326 = vst [vmem:[#allocation4 + $0x1c0] sm:$0xf] %v5294_v49  ;;  %6979 = vmatmul.msk.f32.vlgmr.msra.gmra.mxu1 %vm11813_vm2, %v10548_v27 }
 0xf8b   :  { %6986 = vmatpush.msk.msrb.mxu1 %vm11811_vm0, %v5403_v55  ;;  %5581 = vmatpush.msra.mxu2 %v5340_v39  ;;  %vm11827_vm0 = vmmov %vm11813_vm2  ;;  %vm11829_vm2 = vcmask 1031168  }
 0xf8c   :  { %6989 = vmatmul.msk.f32.vlgmr.msra.gmra.mxu2 %vm11814_vm3, %v10548_v27  ;;  %vm11830_vm3 = vmmov %vm11827_vm0 }
 0xf8d   :  { %6996 = vmatpush.msk.msrb.mxu2 %vm11812_vm1, %v5408_v63  ;;  %5558 = vmatpush.msrb.mxu1 %v5387_v3  ;;  %vm11828_vm1 = vmmov %vm11827_vm0 }
 0xf8f   :  { %5658 = vmatpush.msrb.mxu2 %v5392_v36  ;;  %5559 = vmatpush.msrb.mxu1 %v5371_v24  ;;  %v4377_v16 = vpop.permute.xlu0 %4376 }
 0xf90   :  { %v4394_v14 = vsel %vm11815_vm4, %v10175_v54, %v4377_v16  ;;  %v4395_v1 = vsel %vm11816_vm6, %v4377_v16, %v4379_v43  ;;  %v5406_v2 = vld [vmem:[#allocation4 + $0x128] sm:$0xf]  ;;  %v5412_v54 = vld [vmem:[#allocation4 + $0x178] sm:$0xf]  ;;  %vm11831_vm4 = vmmov %vm11817_vm7 }
 0xf91   :  { %5659 = vmatpush.msrb.mxu2 %v5376_v7  ;;  %5560 = vmatpush.msrb.mxu1 %v5355_v22  ;;  %4426 = vst [vmem:[#allocation4 + $0x140] sm:$0xf0] %v4394_v14  ;;  %v5407_v59 = vld [vmem:[#allocation4 + $0x1c0] sm:$0xf]  ;;  %vm11832_vm6 = vmmov %vm11827_vm0 }
 0xf92   :  { %6992 = vmatpush.msk.msrb.mxu0 %vm11817_vm7, %v5406_v2  ;;  %4427 = vst [vmem:[#allocation4 + $0x200] sm:$0xf0] %v4395_v1  ;;  %vm11833_vm7 = vmmov %vm11827_vm0  ;;  %v5787_v2 = vld [vmem:[%s10656_s1 + $0x8] sm:$0xff] }
 0xf93   :  { %5660 = vmatpush.msrb.mxu2 %v5360_v23  ;;  %5561 = vmatpush.msrb.mxu1 %v5339_v13 }
 0xf94   :  { %5618 = vmatpush.msrb.mxu0 %v5390_v58  ;;  %6987 = vmatmul.msk.f32.vlgmr.msrb.gmra.mxu1 %vm11819_vm9, %v10548_v27 }
 0xf95   :  { %6994 = vmatpush.msk.msra.mxu1 %vm11818_vm15, %v5407_v59  ;;  %5661 = vmatpush.msrb.mxu2 %v5344_v21  ;;  %vm5788_vm15 = vcmp.gt.f32.partialorder %v5786_v53, 0.5 }
 0xf96   :  { %5619 = vmatpush.msrb.mxu0 %v5374_v30  ;;  %6997 = vmatmul.msk.f32.vlgmr.msrb.gmra.mxu2 %vm11821_vm13, %v10548_v27  ;;  %v5790_v6 = vsel %vm5788_vm15, 1, %v11834_v18 }
 0xf97   :  { %7004 = vmatpush.msk.msra.mxu2 %vm11820_vm8, %v5412_v54  ;;  %5638 = vmatpush.msra.mxu1 %v5391_v31  ;;  %v5156_v8 = vpop.permute.xlu0 %5155  ;;  %v5793_v56 = vperm.slane %v5790_v6, 1  ;;  %v5794_v34 = vperm.slane %v5790_v6, 2  ;;  %v5792_v62 = vperm.slane %v5790_v6, 0  ;;  %v5795_v19 = vperm.slane %v5790_v6, 3 }
 0xf98   :  { %5620 = vmatpush.msrb.mxu0 %v5358_v60  ;;  %v5172_v41 = vsel %vm11822_vm5, %v10512_v12, %v5156_v8  ;;  %v5349_v4 = vld [vmem:[#allocation4 + $0x140] sm:$0xff]  ;;  %v5797_v24 = vperm.slane %v5790_v6, 5  ;;  %v5796_v14 = vperm.slane %v5790_v6, 4  ;;  %v5798_v1 = vperm.slane %v5790_v6, 6 }
 0xf99   :  { %5738 = vmatpush.msra.mxu2 %v5396_v32  ;;  %5639 = vmatpush.msra.mxu1 %v5375_v44  ;;  %5204 = vst [vmem:[#allocation4 + $0x110] sm:$0xf0] %v5172_v41  ;;  %v5348_v12 = vld [vmem:[#allocation4 + $0xc0] sm:$0xff]  ;;  %vm10660_vm9 = vcmp.eq.s32.totalorder %v5793_v56, 1  ;;  %vm10666_vm8 = vcmp.eq.s32.totalorder %v5794_v34, 1  ;;  %vm10670_vm13 = vcmp.eq.s32.totalorder %v5792_v62, 1 }
 0xf9a   :  { %5621 = vmatpush.msrb.mxu0 %v5342_v29  ;;  %5761 = vmatpush.msrb.mxu3 %v5349_v4  ;;  %v5350_v35 = vld [vmem:[#allocation4 + $0x200] sm:$0xff]  ;;  %vm10684_vm5 = vcmp.eq.s32.totalorder %v5795_v19, 1 }
 0xf9b   :  { %5739 = vmatpush.msra.mxu2 %v5380_v48  ;;  %5640 = vmatpush.msra.mxu1 %v5359_v9  ;;  %v5799_v48 = vperm.slane %v5790_v6, 7 }
 0xf9c   :  { %6993 = vmatmul.msk.f32.vlgmr.msrb.gmra.mxu0 %vm11823_vm10, %v10548_v27  ;;  %7007 = vmatmul.msk.f32.vlgmr.msrb.gmra.mxu3 %vm11828_vm1, %v10548_v27  ;;  %vm11843_vm10 = vmmov %vm11831_vm4  ;;  %vm5789_vm1 = vcmp.gt.f32.partialorder %v5787_v2, 0.5 }
 0xf9d   :  { %5740 = vmatpush.msra.mxu2 %v5364_v11  ;;  %7000 = vmatpush.msk.msra.mxu0 %vm11824_vm11, %v5410_v61  ;;  %vm11844_vm11 = vmmov %vm11831_vm4  ;;  %v5791_v44 = vsel %vm5789_vm1, 1, %v11834_v18  ;;  %vm10732_vm15 = vcmp.eq.s32.totalorder %v5799_v48, 1 }
 0xf9e   :  { %5641 = vmatpush.msra.mxu1 %v5343_v20  ;;  %v5801_v9 = vperm.slane %v5791_v44, 1  ;;  %v5800_v61 = vperm.slane %v5791_v44, 0  ;;  %v5802_v20 = vperm.slane %v5791_v44, 2  ;;  %vm11864_vm1 = vmmov %vm11831_vm4  ;;  %v5803_v56 = vperm.slane %v5791_v44, 3 }
 0xf9f   :  { %6995 = vmatmul.msk.f32.vlgmr.msra.gmra.mxu1 %vm11825_vm12, %v10548_v27  ;;  %5741 = vmatpush.msra.mxu2 %v5348_v12  ;;  %v4508_v28 = vpop.permute.xlu0 %4507  ;;  %vm11845_vm12 = vmmov %vm11831_vm4  ;;  %v5805_v34 = vperm.slane %v5791_v44, 5 }
 0xfa0   :  { %5698 = vmatpush.msra.mxu0 %v5394_v10  ;;  %7002 = vmatpush.msk.msrb.mxu1 %vm11826_vm14, %v5411_v45  ;;  %v4524_v33 = vsel %vm11829_vm2, %v10245_v0, %v4508_v28  ;;  %v5398_v0 = vld [vmem:[#allocation4 + $0x110] sm:$0xff]  ;;  %vm11846_vm14 = vmmov %vm11831_vm4  ;;  %vm10707_vm2 = vcmp.eq.s32.totalorder %v5796_v14, 1  ;;  %v11873_v14 = vmov 0 }
 0xfa1   :  { %7005 = vmatmul.msk.f32.vlgmr.msra.gmra.mxu2 %vm11827_vm0, %v10548_v27  ;;  %4556 = vst [vmem:[#allocation4 + $0x268] sm:$0xf] %v4524_v33  ;;  %vm10701_vm0 = vcmp.eq.s32.totalorder %v5797_v24, 1  ;;  %v11869_v24 = vmov 0 }
 0xfa2   :  { %5699 = vmatpush.msra.mxu0 %v5378_v47  ;;  %5718 = vmatpush.msrb.mxu1 %v5395_v37 }
 0xfa4   :  { %5700 = vmatpush.msra.mxu0 %v5362_v50  ;;  %5719 = vmatpush.msrb.mxu1 %v5379_v26  ;;  %v11861_v26 = vmov 0 }
 0xfa6   :  { %5701 = vmatpush.msra.mxu0 %v5346_v25  ;;  %5720 = vmatpush.msrb.mxu1 %v5363_v51 }
 0xfa7   :  { %7001 = vmatmul.msk.f32.vlgmr.msra.gmra.mxu0 %vm11830_vm3, %v10548_v27  ;;  %vm10713_vm3 = vcmp.eq.s32.totalorder %v5798_v1, 1 }
 0xfa8   :  { %7008 = vmatpush.msk.msrb.mxu0 %vm11831_vm4, %v5414_v40  ;;  %5721 = vmatpush.msrb.mxu1 %v5347_v5  ;;  %v5366_v57 = vld [vmem:[#allocation4 + $0x268] sm:$0xff] }
 0xfa9   :  { %7003 = vmatmul.msk.f32.vlgmr.msrb.gmra.mxu1 %vm11832_vm6, %v10548_v27  ;;  %vm11853_vm6 = vmmov %vm11831_vm4 }
 0xfaa   :  { %5778 = vmatpush.msrb.mxu0 %v5398_v0 }
 0xfac   :  { %5779 = vmatpush.msrb.mxu0 %v5382_v17 }
 0xfae   :  { %5780 = vmatpush.msrb.mxu0 %v5366_v57 }
 0xfb0   :  { %5781 = vmatpush.msrb.mxu0 %v5350_v35 }
 0xfb1   :  { %7009 = vmatmul.msk.f32.vlgmr.msrb.gmra.mxu0 %vm11833_vm7, %v10548_v27  ;;  %vm11854_vm7 = vmmov %vm11831_vm4 }
 0xfcd   :  { %v10664_v27 = vpop.f32.mrf.mxu3 }
 0xfce   :  { %v5826_v38 = vsel %vm10666_vm8, %v10664_v27, 0.0 }
 0xfcf   :  { %v5843_v43 = vsel %vm11845_vm12, %v5826_v38, 0.0  ;;  %vm10748_vm12 = vcmp.eq.s32.totalorder %v5802_v20, 1  ;;  %v5806_v38 = vperm.slane %v5791_v44, 6 }
 0xfd0   :  { %v11862_v26 = vsel %vm10748_vm12, 4294967295, %v11861_v26 }
 0xfd8   :  { %v10705_v59 = vpop.f32.mrf.mxu3 }
 0xfd9   :  { %v5830_v41 = vsel %vm10713_vm3, %v10705_v59, 0.0 }
 0xfda   :  { %v10682_v55 = vpop.f32.mrf.mxu0  ;;  %v5851_v12 = vsel %vm11854_vm7, %v5830_v41, 0.0  ;;  %vm10772_vm7 = vcmp.eq.s32.totalorder %v5803_v56, 1 }
 0xfdb   :  { %v5827_v16 = vsel %vm10684_vm5, %v10682_v55, 0.0 }
 0xfdc   :  { %v5845_v13 = vsel %vm11846_vm14, %v5827_v16, 0.0  ;;  %vm11863_vm14 = vmmov %vm11831_vm4 }
 0xfe2   :  { %v10746_v50 = vpop.f32.mrf.mxu3 }
 0xfe3   :  { %v5834_v35 = vsel %vm10748_vm12, %v10746_v50, 0.0 }
0x1005   :  { %v10674_v46 = vpop.f32.mrf.mxu2 }
0x1006   :  { %v5825_v49 = vsel %vm10660_vm9, %v10674_v46, 0.0 }
0x1007   :  { %v10688_v63 = vpop.f32.mrf.mxu1  ;;  %v5841_v3 = vsel %vm11843_vm10, %v5825_v49, 0.0  ;;  %vm10736_vm10 = vcmp.eq.s32.totalorder %v5801_v9, 1  ;;  %v5804_v49 = vperm.slane %v5791_v44, 4 }
0x1008   :  { %v5824_v36 = vsel %vm10670_vm13, %v10688_v63, 0.0 }
0x1009   :  { %v5840_v7 = vsel %vm11844_vm11, %v5824_v36, 0.0  ;;  %vm10742_vm11 = vcmp.eq.s32.totalorder %v5800_v61, 1  ;;  %v11867_v36 = vmov 0 }
0x100a   :  { %v5842_v22 = vadd.f32 %v5841_v3, %v5840_v7  ;;  %v11868_v36 = vsel %vm10772_vm7, 4294967295, %v11867_v36 }
0x100c   :  { %v5844_v23 = vadd.f32 %v5843_v43, %v5842_v22 }
0x100e   :  { %v5846_v31 = vadd.f32 %v5845_v13, %v5844_v23 }
0x100f   :  { %v10711_v54 = vpop.f32.mrf.mxu2 }
0x1010   :  { %v5829_v32 = vsel %vm10701_vm0, %v10711_v54, 0.0 }
0x1011   :  { %v10720_v60 = vpop.f32.mrf.mxu1  ;;  %v5849_v4 = vsel %vm11853_vm6, %v5829_v32, 0.0  ;;  %vm11866_vm6 = vmmov %vm11864_vm1 }
0x1012   :  { %v5828_v8 = vsel %vm10707_vm2, %v10720_v60, 0.0  ;;  %v5859_v19 = vsel %vm11866_vm6, %v5834_v35, 0.0  ;;  %vm11876_vm12 = vmmov %vm11866_vm6 }
0x1013   :  { %v5847_v29 = vsel %vm11831_vm4, %v5828_v8, 0.0  ;;  %vm11865_vm4 = vmmov %vm11864_vm1 }
0x1014   :  { %v5848_v11 = vadd.f32 %v5847_v29, %v5846_v31 }
0x1016   :  { %v5850_v10 = vadd.f32 %v5849_v4, %v5848_v11  ;;  %v5807_v4 = vperm.slane %v5791_v44, 7 }
0x1018   :  { %v5852_v37 = vadd.f32 %v5851_v12, %v5850_v10 }
0x1019   :  { %v10740_v28 = vpop.f32.mrf.mxu0  ;;  %v10755_v51 = vpop.f32.mrf.mxu2 }
0x101a   :  { %v5831_v25 = vsel %vm10732_vm15, %v10740_v28, 0.0  ;;  %v5833_v0 = vsel %vm10736_vm10, %v10755_v51, 0.0 }
0x101b   :  { %v5853_v40 = vsel %vm11863_vm14, %v5831_v25, 0.0  ;;  %v5857_v6 = vsel %vm11865_vm4, %v5833_v0, 0.0  ;;  %vm10776_vm14 = vcmp.eq.s32.totalorder %v5805_v34, 1  ;;  %vm10788_vm4 = vcmp.eq.s32.totalorder %v5806_v38, 1 }
0x101c   :  { %v10758_v5 = vpop.f32.mrf.mxu1  ;;  %v5854_v17 = vadd.f32 %v5853_v40, %v5852_v37  ;;  %v11870_v24 = vsel %vm10776_vm14, 4294967295, %v11869_v24  ;;  %v11874_v14 = vsel %vm10788_vm4, 4294967295, %v11873_v14 }
0x101d   :  { %v5832_v57 = vsel %vm10742_vm11, %v10758_v5, 0.0 }
0x101e   :  { %v5855_v53 = vsel %vm11864_vm1, %v5832_v57, 0.0  ;;  %vm10782_vm1 = vcmp.eq.s32.totalorder %v5804_v49, 1 }
0x101f   :  { %v5856_v62 = vadd.f32 %v5855_v53, %v5854_v17  ;;  %v10798_v23 = vpop.f32.mrf.mxu3 }
0x1020   :  { %v5838_v41 = vsel %vm10788_vm4, %v10798_v23, 0.0 }
0x1021   :  { %v5858_v3 = vadd.f32 %v5857_v6, %v5856_v62 }
0x1023   :  { %v5860_v7 = vadd.f32 %v5859_v19, %v5858_v3 }
0x1024   :  { %v10780_v43 = vpop.f32.mrf.mxu0  ;;  %v10786_v22 = vpop.f32.mrf.mxu2 }
0x1025   :  { %v5835_v1 = vsel %vm10772_vm7, %v10780_v43, 0.0  ;;  %v5837_v2 = vsel %vm10776_vm14, %v10786_v22, 0.0  ;;  %vm11875_vm7 = vmmov %vm11866_vm6 }
0x1026   :  { %v5861_v13 = vsel %vm11866_vm6, %v5835_v1, 0.0  ;;  %v10801_v31 = vpop.f32.mrf.mxu1  ;;  %v5865_v29 = vsel %vm11876_vm12, %v5837_v2, 0.0  ;;  %vm11877_vm14 = vmmov %vm11866_vm6  ;;  %vm10812_vm6 = vcmp.eq.s32.totalorder %v5807_v4, 1 }
0x1027   :  { %v5862_v32 = vadd.f32 %v5861_v13, %v5860_v7  ;;  %v5836_v8 = vsel %vm10782_vm1, %v10801_v31, 0.0  ;;  %v5867_v11 = vsel %vm11877_vm14, %v5838_v41, 0.0  ;;  %vm11880_vm4 = vmmov %vm11875_vm7  ;;  %vm11892_vm14 = vnez %v11868_v36 }
0x1028   :  { %v5863_v48 = vsel %vm11875_vm7, %v5836_v8, 0.0  ;;  %vm11881_vm12 = vmmov %vm11880_vm4 }
0x1029   :  { %v5864_v9 = vadd.f32 %v5863_v48, %v5862_v32  ;;  %vm11882_vm7 = vmmov %vm11880_vm4 }
0x102b   :  { %v5866_v61 = vadd.f32 %v5865_v29, %v5864_v9 }
0x102d   :  { %v5868_v12 = vadd.f32 %v5867_v11, %v5866_v61 }
0x102e   :  { %v10816_v10 = vpop.f32.mrf.mxu0 }
0x102f   :  { %v5839_v37 = vsel %vm10812_vm6, %v10816_v10, 0.0 }
0x1030   :  { %v5869_v25 = vsel %vm11880_vm4, %v5839_v37, 0.0 }
0x1031   :  { %v5870_v40 = vadd.f32 %v5869_v25, %v5868_v12 }
0x1033   :  { %5871 = vadd.xlane.f32.xlu0 %v5870_v40 }
0x10a6   :  { %v5872_v44 = vpop.xlane.xlu0 %5871 }
0x10a7   :  { %v10822_v0 = vmul.f32 0.00086805556, %v5872_v44 }
0x10a9   :  { %v5874_v17 = vsub.f32 %v10688_v63, %v10822_v0  ;;  %v5875_v57 = vsub.f32 %v10674_v46, %v10822_v0  ;;  %v5876_v35 = vsub.f32 %v10664_v27, %v10822_v0  ;;  %v5877_v53 = vsub.f32 %v10682_v55, %v10822_v0 }
0x10aa   :  { %v5878_v34 = vsub.f32 %v10720_v60, %v10822_v0  ;;  %v5879_v19 = vsub.f32 %v10711_v54, %v10822_v0  ;;  %v5880_v7 = vsub.f32 %v10705_v59, %v10822_v0  ;;  %v5881_v8 = vsub.f32 %v10740_v28, %v10822_v0 }
0x10ab   :  { %v5890_v6 = vmul.f32 %v5874_v17, %v5874_v17  ;;  %v5891_v56 = vmul.f32 %v5875_v57, %v5875_v57  ;;  %v5892_v62 = vmul.f32 %v5876_v35, %v5876_v35  ;;  %v5893_v49 = vmul.f32 %v5877_v53, %v5877_v53 }
0x10ac   :  { %v5894_v1 = vmul.f32 %v5878_v34, %v5878_v34  ;;  %v5895_v41 = vmul.f32 %v5879_v19, %v5879_v19  ;;  %v5882_v59 = vsub.f32 %v10758_v5, %v10822_v0  ;;  %v5896_v29 = vmul.f32 %v5880_v7, %v5880_v7 }
0x10ad   :  { %v5906_v38 = vsel %vm10670_vm13, %v5890_v6, 0.0  ;;  %v5907_v3 = vsel %vm10660_vm9, %v5891_v56, 0.0  ;;  %v5908_v2 = vsel %vm10666_vm8, %v5892_v62, 0.0  ;;  %v5909_v42 = vsel %vm10684_vm5, %v5893_v49, 0.0  ;;  %vm11883_vm9 = vmmov %vm11880_vm4 }
0x10ae   :  { %v5922_v13 = vsel %vm11881_vm12, %v5906_v38, 0.0  ;;  %v5923_v32 = vsel %vm11882_vm7, %v5907_v3, 0.0  ;;  %v5925_v48 = vsel %vm11883_vm9, %v5908_v2, 0.0  ;;  %v5910_v15 = vsel %vm10707_vm2, %v5894_v1, 0.0  ;;  %vm11884_vm8 = vmmov %vm11880_vm4 }
0x10af   :  { %v5924_v52 = vadd.f32 %v5923_v32, %v5922_v13  ;;  %v5927_v9 = vsel %vm11884_vm8, %v5909_v42, 0.0  ;;  %v5883_v28 = vsub.f32 %v10755_v51, %v10822_v0  ;;  %v5897_v11 = vmul.f32 %v5881_v8, %v5881_v8  ;;  %vm11885_vm13 = vmmov %vm11880_vm4 }
0x10b0   :  { %v5911_v39 = vsel %vm10701_vm0, %v5895_v41, 0.0  ;;  %v5929_v12 = vsel %vm11885_vm13, %v5910_v15, 0.0  ;;  %v5884_v37 = vsub.f32 %v10746_v50, %v10822_v0  ;;  %v5898_v25 = vmul.f32 %v5882_v59, %v5882_v59  ;;  %vm11886_vm5 = vmmov %vm11880_vm4 }
0x10b1   :  { %v5926_v4 = vadd.f32 %v5925_v48, %v5924_v52  ;;  %v5912_v21 = vsel %vm10713_vm3, %v5896_v29, 0.0  ;;  %v5931_v44 = vsel %vm11886_vm5, %v5911_v39, 0.0  ;;  %v5885_v17 = vsub.f32 %v10780_v43, %v10822_v0  ;;  %vm11887_vm0 = vmmov %vm11880_vm4 }
0x10b2   :  { %v5899_v57 = vmul.f32 %v5883_v28, %v5883_v28  ;;  %v5913_v58 = vsel %vm10732_vm15, %v5897_v11, 0.0  ;;  %v5933_v53 = vsel %vm11887_vm0, %v5912_v21, 0.0  ;;  %v5886_v6 = vsub.f32 %v10801_v31, %v10822_v0  ;;  %vm11888_vm2 = vmmov %vm11887_vm0  ;;  %v6209_v21 = vld [vmem:[%s10907_s17 + $0xf0] sm:$0xff] }
0x10b3   :  { %v5928_v61 = vadd.f32 %v5927_v9, %v5926_v4  ;;  %v5900_v56 = vmul.f32 %v5884_v37, %v5884_v37  ;;  %v5914_v30 = vsel %vm10742_vm11, %v5898_v25, 0.0  ;;  %v5935_v62 = vsel %vm11888_vm2, %v5913_v58, 0.0  ;;  %vm11889_vm3 = vmmov %vm11887_vm0  ;;  %v6210_v37 = vld [vmem:[%s10907_s17 + $0xf8] sm:$0xff]  ;;  %v6193_v25 = vld [vmem:[%s10907_s17 + $0x70] sm:$0xff] }
0x10b4   :  { %v5887_v19 = vsub.f32 %v10786_v22, %v10822_v0  ;;  %v5901_v49 = vmul.f32 %v5885_v17, %v5885_v17  ;;  %v5915_v45 = vsel %vm10736_vm10, %v5899_v57, 0.0  ;;  %v5937_v3 = vsel %vm11889_vm3, %v5914_v30, 0.0  ;;  %vm11891_vm11 = vmmov %vm11887_vm0  ;;  %6299 = vmatpush.msrb.mxu2 %v6210_v37  ;;  %v6208_v17 = vld [vmem:[%s10907_s17 + $0xe8] sm:$0xff]  ;;  %v6191_v57 = vld [vmem:[%s10907_s17 + $0x60] sm:$0xff] }
0x10b5   :  { %v5930_v40 = vadd.f32 %v5929_v12, %v5928_v61  ;;  %v5888_v7 = vsub.f32 %v10798_v23, %v10822_v0  ;;  %v5902_v1 = vmul.f32 %v5886_v6, %v5886_v6  ;;  %vm11890_vm15 = vnez %v11862_v26  ;;  %vm11893_vm10 = vmmov %vm11887_vm0  ;;  %v6194_v12 = vld [vmem:[%s10907_s17 + $0x78] sm:$0xff]  ;;  %v6207_v58 = vld [vmem:[%s10907_s17 + $0xe0] sm:$0xff] }
0x10b6   :  { %v5916_v33 = vsel %vm11890_vm15, %v5900_v56, 0.0  ;;  %v5939_v13 = vsel %vm11891_vm11, %v5915_v45, 0.0  ;;  %v5889_v32 = vsub.f32 %v10816_v10, %v10822_v0  ;;  %v5903_v8 = vmul.f32 %v5887_v19, %v5887_v19  ;;  %vm11894_vm4 = vmmov %vm11887_vm0  ;;  %6279 = vmatpush.msra.mxu1 %v6194_v12  ;;  %6300 = vmatpush.msrb.mxu2 %v6209_v21  ;;  %v6189_v6 = vld [vmem:[%s10907_s17 + $0x50] sm:$0xff]  ;;  %v6203_v45 = vld [vmem:[%s10907_s17 + $0xc0] sm:$0xff] }
0x10b7   :  { %v5932_v35 = vadd.f32 %v5931_v44, %v5930_v40  ;;  %v5917_v47 = vsel %vm11892_vm14, %v5901_v49, 0.0  ;;  %v5941_v42 = vsel %vm11893_vm10, %v5916_v33, 0.0  ;;  %v5904_v52 = vmul.f32 %v5888_v7, %v5888_v7  ;;  %vm11896_vm7 = vmmov %vm11887_vm0  ;;  %v6192_v44 = vld [vmem:[%s10907_s17 + $0x68] sm:$0xff]  ;;  %v6205_v56 = vld [vmem:[%s10907_s17 + $0xd0] sm:$0xff] }
0x10b8   :  { %v5918_v23 = vsel %vm10782_vm1, %v5902_v1, 0.0  ;;  %v5943_v26 = vsel %vm11894_vm4, %v5917_v47, 0.0  ;;  %v5905_v59 = vmul.f32 %v5889_v32, %v5889_v32  ;;  %vm11895_vm12 = vnez %v11870_v24  ;;  %vm11898_vm8 = vmmov %vm11887_vm0  ;;  %6280 = vmatpush.msra.mxu1 %v6193_v25  ;;  %6301 = vmatpush.msrb.mxu2 %v6208_v17  ;;  %v6187_v49 = vld [vmem:[%s10907_s17 + $0x40] sm:$0xff]  ;;  %v6202_v7 = vld [vmem:[%s10907_s17 + $0xb8] sm:$0xff] }
0x10b9   :  { %v5934_v34 = vadd.f32 %v5933_v53, %v5932_v35  ;;  %v5919_v29 = vsel %vm11895_vm12, %v5903_v8, 0.0  ;;  %v5945_v10 = vsel %vm11896_vm7, %v5918_v23, 0.0  ;;  %vm11897_vm9 = vnez %v11874_v14  ;;  %vm11899_vm1 = vmmov %vm11887_vm0  ;;  %v6190_v35 = vld [vmem:[%s10907_s17 + $0x58] sm:$0xff]  ;;  %v6185_v33 = vld [vmem:[%s10907_s17 + $0x30] sm:$0xff] }
0x10ba   :  { %v5920_v36 = vsel %vm11897_vm9, %v5904_v52, 0.0  ;;  %v5947_v9 = vsel %vm11898_vm8, %v5919_v29, 0.0  ;;  %v5921_v16 = vsel %vm10812_vm6, %v5905_v59, 0.0  ;;  %vm11900_vm13 = vmmov %vm11887_vm0  ;;  %6281 = vmatpush.msra.mxu1 %v6192_v44  ;;  %v6206_v53 = vld [vmem:[%s10907_s17 + $0xd8] sm:$0xff]  ;;  %6302 = vmatpush.msrb.mxu2 %v6207_v58  ;;  %v6184_v32 = vld [vmem:[%s10907_s17 + $0x28] sm:$0xff] }
0x10bb   :  { %v5936_v38 = vadd.f32 %v5935_v62, %v5934_v34  ;;  %v5949_v11 = vsel %vm11899_vm1, %v5920_v36, 0.0  ;;  %v5951_v61 = vsel %vm11900_vm13, %v5921_v16, 0.0  ;;  %v6188_v34 = vld [vmem:[%s10907_s17 + $0x48] sm:$0xff]  ;;  %v6183_v59 = vld [vmem:[%s10907_s17 + $0x20] sm:$0xff]  ;;  %v6198_v36 = vld [vmem:[%s10907_s17 + $0x98] sm:$0xff] }
0x10bc   :  { %6282 = vmatpush.msra.mxu1 %v6191_v57  ;;  %6303 = vmatpush.msrb.mxu2 %v6206_v53  ;;  %v6204_v62 = vld [vmem:[%s10907_s17 + $0xc8] sm:$0xff]  ;;  %v6199_v29 = vld [vmem:[%s10907_s17 + $0xa0] sm:$0xff]  ;;  %v6181_v16 = vld [vmem:[%s10907_s17 + $0x10] sm:$0xff] }
0x10bd   :  { %v5938_v2 = vadd.f32 %v5937_v3, %v5936_v38  ;;  %v6186_v3 = vld [vmem:[%s10907_s17 + $0x38] sm:$0xff]  ;;  %v6200_v8 = vld [vmem:[%s10907_s17 + $0xa8] sm:$0xff]  ;;  %v6179_v12 = vld [vmem:[%s10907_s17] sm:$0xff] }
0x10be   :  { %6283 = vmatpush.msra.mxu1 %v6190_v35  ;;  %6304 = vmatpush.msrb.mxu2 %v6205_v56  ;;  %v6195_v37 = vld [vmem:[%s10907_s17 + $0x80] sm:$0xff]  ;;  %v6222_v25 = vld [vmem:[%s10907_s17 + $0x158] sm:$0xff]  ;;  %v6221_v57 = vld [vmem:[%s10907_s17 + $0x150] sm:$0xff] }
0x10bf   :  { %v5940_v41 = vadd.f32 %v5939_v13, %v5938_v2  ;;  %v6201_v2 = vld [vmem:[%s10907_s17 + $0xb0] sm:$0xff]  ;;  %v6238_v21 = vld [vmem:[%s10907_s17 + $0x1d8] sm:$0xff]  ;;  %v6236_v56 = vld [vmem:[%s10907_s17 + $0x1c8] sm:$0xff] }
0x10c0   :  { %6284 = vmatpush.msra.mxu1 %v6189_v6  ;;  %6305 = vmatpush.msrb.mxu2 %v6204_v62  ;;  %v6274_v44 = vld [vmem:[%s10907_s17 + $0x2f8] sm:$0xff]  ;;  %v6237_v58 = vld [vmem:[%s10907_s17 + $0x1d0] sm:$0xff]  ;;  %v6220_v6 = vld [vmem:[%s10907_s17 + $0x148] sm:$0xff] }
0x10c1   :  { %v5942_v48 = vadd.f32 %v5941_v42, %v5940_v41  ;;  %v5956_v41 = vld [vmem:[%s6889_s23] sm:$0xf]  ;;  %v6257_v35 = vld [vmem:[%s10907_s17 + $0x270] sm:$0xff]  ;;  %s6905_s23 = sld [smem:[%s11286_s0 + %s7193_s21]]  }
0x10c2   :  { %6285 = vmatpush.msra.mxu1 %v6188_v34  ;;  %6306 = vmatpush.msrb.mxu2 %v6203_v45  ;;  %v6273_v53 = vld [vmem:[%s10907_s17 + $0x2f0] sm:$0xff]  ;;  %v6272_v34 = vld [vmem:[%s10907_s17 + $0x2e8] sm:$0xff]  ;;  %v6219_v62 = vld [vmem:[%s10907_s17 + $0x140] sm:$0xff] }
0x10c3   :  { %v5944_v15 = vadd.f32 %v5943_v26, %v5942_v48  ;;  %v5969_v48 = vld [vmem:[%s6890_s5] sm:$0xf] }
0x10c4   :  { %6286 = vmatpush.msra.mxu1 %v6187_v49  ;;  %6307 = vmatpush.msrb.mxu2 %v6202_v7  ;;  %v6255_v45 = vld [vmem:[%s10907_s17 + $0x260] sm:$0xff] }
0x10c5   :  { %v5946_v4 = vadd.f32 %v5945_v10, %v5944_v15  ;;  %v6226_v15 = vld [vmem:[%s10907_s17 + $0x178] sm:$0xff] }
0x10c6   :  { %6287 = vmatpush.msra.mxu1 %v6186_v3  ;;  %6308 = vmatpush.msrb.mxu2 %v6201_v2  ;;  %v6182_v10 = vld [vmem:[%s10907_s17 + $0x18] sm:$0xff] }
0x10c7   :  { %v5948_v28 = vadd.f32 %v5947_v9, %v5946_v4  ;;  %6319 = vmatpush.msra.mxu3 %v6226_v15  ;;  %v6225_v4 = vld [vmem:[%s10907_s17 + $0x170] sm:$0xff]  ;;  %v6232_v15 = vld [vmem:[%s10907_s17 + $0x1a8] sm:$0xff] }
0x10c8   :  { %6288 = vmatpush.msra.mxu1 %v6185_v33  ;;  %6309 = vmatpush.msrb.mxu2 %v6200_v8  ;;  %v6241_v9 = vld [vmem:[%s10907_s17 + $0x1f0] sm:$0xff]  ;;  %v6218_v33 = vld [vmem:[%s10907_s17 + $0x138] sm:$0xff] }
0x10c9   :  { %v5950_v39 = vadd.f32 %v5949_v11, %v5948_v28  ;;  %v6197_v28 = vld [vmem:[%s10907_s17 + $0x90] sm:$0xff]  ;;  %v6224_v11 = vld [vmem:[%s10907_s17 + $0x168] sm:$0xff]  ;;  %6320 = vmatpush.msra.mxu3 %v6225_v4  ;;  %v6215_v4 = vld [vmem:[%s10907_s17 + $0x120] sm:$0xff] }
0x10ca   :  { %6289 = vmatpush.msra.mxu1 %v6184_v32  ;;  %6310 = vmatpush.msrb.mxu2 %v6199_v29 }
0x10cb   :  { %v5952_v24 = vadd.f32 %v5951_v61, %v5950_v39  ;;  %v6240_v39 = vld [vmem:[%s10907_s17 + $0x1e8] sm:$0xff]  ;;  %6321 = vmatpush.msra.mxu3 %v6224_v11 }
0x10cc   :  { %6290 = vmatpush.msra.mxu1 %v6183_v59  ;;  %6311 = vmatpush.msrb.mxu2 %v6198_v36  ;;  %v6180_v61 = vld [vmem:[%s10907_s17 + $0x8] sm:$0xff] }
0x10cd   :  { %5953 = vadd.xlane.f32.xlu2 %v5952_v24  ;;  %v6196_v24 = vld [vmem:[%s10907_s17 + $0x88] sm:$0xff] }
0x10ce   :  { %6291 = vmatpush.msra.mxu1 %v6182_v10  ;;  %6312 = vmatpush.msrb.mxu2 %v6197_v28  ;;  %v6268_v10 = vld [vmem:[%s10907_s17 + $0x2c8] sm:$0xff] }
0x10d0   :  { %6292 = vmatpush.msra.mxu1 %v6181_v16  ;;  %6313 = vmatpush.msrb.mxu2 %v6196_v24  ;;  %v6251_v16 = vld [vmem:[%s10907_s17 + $0x240] sm:$0xff]  ;;  %v6214_v24 = vld [vmem:[%s10907_s17 + $0x118] sm:$0xff] }
0x10d2   :  { %6293 = vmatpush.msra.mxu1 %v6180_v61  ;;  %6314 = vmatpush.msrb.mxu2 %v6195_v37  ;;  %v6267_v61 = vld [vmem:[%s10907_s17 + $0x2c0] sm:$0xff]  ;;  %v6213_v37 = vld [vmem:[%s10907_s17 + $0x110] sm:$0xff] }
0x10d4   :  { %6294 = vmatpush.msra.mxu1 %v6179_v12  ;;  %6379 = vmatpush.msra.mxu2 %v6274_v44  ;;  %v6266_v12 = vld [vmem:[%s10907_s17 + $0x2b8] sm:$0xff] }
0x10d6   :  { %6380 = vmatpush.msra.mxu2 %v6273_v53 }
0x10d8   :  { %6381 = vmatpush.msra.mxu2 %v6272_v34 }
0x1140   :  { %v5954_v14 = vpop.xlane.xlu2 %5953 }
0x1141   :  { %v5955_v20 = vmul.f32 0.00086805556, %v5954_v14  ;;  %v6223_v14 = vld [vmem:[%s10907_s17 + $0x160] sm:$0xff] }
0x1142   :  { %6322 = vmatpush.msra.mxu3 %v6223_v14  ;;  %v6230_v14 = vld [vmem:[%s10907_s17 + $0x198] sm:$0xff] }
0x1143   :  { %v5957_v40 = vadd.f32 1e-05, %v5955_v20  ;;  %v6239_v20 = vld [vmem:[%s10907_s17 + $0x1e0] sm:$0xff] }
0x1144   :  { %6323 = vmatpush.msra.mxu3 %v6222_v25  ;;  %v6229_v25 = vld [vmem:[%s10907_s17 + $0x190] sm:$0xff] }
0x1145   :  { %7109 = vrsqrt.f32 %v5957_v40  ;;  %vm5964_vm5 = vweird.f32 %v5957_v40 }
0x1146   :  { %6324 = vmatpush.msra.mxu3 %v6221_v57 }
0x1148   :  { %6325 = vmatpush.msra.mxu3 %v6220_v6  ;;  %v6228_v6 = vld [vmem:[%s10907_s17 + $0x188] sm:$0xff] }
0x114a   :  { %6326 = vmatpush.msra.mxu3 %v6219_v62 }
0x114b   :  { %v7110_v30 = vpop.eup %7109 }
0x114c   :  { %v5959_v19 = vmul.f32 %v7110_v30, %v5957_v40  ;;  %vm5965_vm6 = vweird.f32 %v7110_v30  ;;  %v6258_v40 = vld [vmem:[%s10907_s17 + $0x278] sm:$0xff]  ;;  %6327 = vmatpush.msra.mxu3 %v6218_v33 }
0x114d   :  { %vm5966_vm0 = vmor %vm5964_vm5, %vm5965_vm6  ;;  %6359 = vmatpush.msrb.mxu1 %v6258_v40  ;;  %v6265_v40 = vld [vmem:[%s10907_s17 + $0x2b0] sm:$0xff] }
0x114e   :  { %v5960_v38 = vmul.f32 %v7110_v30, %v5959_v19  ;;  %v6235_v19 = vld [vmem:[%s10907_s17 + $0x1c0] sm:$0xff]  ;;  %vm11901_vm6 = vmmov %vm11900_vm13 }
0x114f   :  { %6360 = vmatpush.msrb.mxu1 %v6257_v35  ;;  %vm11902_vm5 = vmmov %vm11901_vm6 }
0x1150   :  { %v5961_v1 = vmul.f32 0.5, %v5960_v38  ;;  %v6271_v38 = vld [vmem:[%s10907_s17 + $0x2e0] sm:$0xff] }
0x1151   :  { %6382 = vmatpush.msra.mxu2 %v6271_v38 }
0x1152   :  { %v5962_v13 = vsub.f32 1.5, %v5961_v1 }
0x1154   :  { %v5963_v47 = vmul.f32 %v7110_v30, %v5962_v13 }
0x1156   :  { %v5967_v42 = vsel %vm5966_vm0, %v7110_v30, %v5963_v47  ;;  %v6256_v30 = vld [vmem:[%s10907_s17 + $0x268] sm:$0xff]  ;;  %vm11903_vm0 = vmmov %vm11902_vm5 }
0x1157   :  { %v5968_v52 = vmul.f32 %v5967_v42, %v5956_v41  ;;  %6361 = vmatpush.msrb.mxu1 %v6256_v30  ;;  %v6233_v42 = vld [vmem:[%s10907_s17 + $0x1b0] sm:$0xff] }
0x1159   :  { %5974 = vperm.xlu1 %7074, %v5968_v52   ;;  %v5970_v23 = vmul.f32 %v5968_v52, %v10822_v0  ;;  %v6242_v0 = vld [vmem:[%s10907_s17 + $0x1f8] sm:$0xff]  ;;  %6362 = vmatpush.msrb.mxu1 %v6255_v45 }
0x115a   :  { %6339 = vmatpush.msra.mxu0 %v6242_v0  ;;  %v6252_v0 = vld [vmem:[%s10907_s17 + $0x248] sm:$0xff] }
0x115b   :  { %v5971_v26 = vsub.f32 %v5969_v48, %v5970_v23  ;;  %v6253_v23 = vld [vmem:[%s10907_s17 + $0x250] sm:$0xff] }
0x115c   :  { %6340 = vmatpush.msra.mxu0 %v6241_v9  ;;  %v6269_v48 = vld [vmem:[%s10907_s17 + $0x2d0] sm:$0xff]  ;;  %v6231_v9 = vld [vmem:[%s10907_s17 + $0x1a0] sm:$0xff] }
0x115e   :  { %6341 = vmatpush.msra.mxu0 %v6240_v39 }
0x1160   :  { %6342 = vmatpush.msra.mxu0 %v6239_v20  ;;  %v6250_v20 = vld [vmem:[%s10907_s17 + $0x238] sm:$0xff] }
0x1161   :  { %5995 = vperm.xlu1 %7074, %v5971_v26   ;;  %v6216_v26 = vld [vmem:[%s10907_s17 + $0x128] sm:$0xff] }
0x1162   :  { %6343 = vmatpush.msra.mxu0 %v6238_v21  ;;  %v6249_v21 = vld [vmem:[%s10907_s17 + $0x230] sm:$0xff] }
0x1164   :  { %6344 = vmatpush.msra.mxu0 %v6237_v58  ;;  %v6212_v58 = vld [vmem:[%s10907_s17 + $0x108] sm:$0xff] }
0x1166   :  { %6345 = vmatpush.msra.mxu0 %v6236_v56 }
0x1168   :  { %6346 = vmatpush.msra.mxu0 %v6235_v19 }
0x11cb   :  { %v5975_v17 = vpop.permute.xlu1 %5974 }
0x11cc   :  { %v5977_v49 = vmul.f32 %v5975_v17, %v10688_v63  ;;  %v5978_v3 = vmul.f32 %v5975_v17, %v10674_v46  ;;  %v5979_v7 = vmul.f32 %v5975_v17, %v10664_v27  ;;  %v5980_v1 = vmul.f32 %v5975_v17, %v10682_v55  ;;  %v6234_v63 = vld [vmem:[%s10907_s17 + $0x1b8] sm:$0xff] }
0x11cd   :  { %v5981_v2 = vmul.f32 %v5975_v17, %v10720_v60  ;;  %v5982_v13 = vmul.f32 %v5975_v17, %v10711_v54  ;;  %v5985_v32 = vmul.f32 %v5975_v17, %v10758_v5  ;;  %v5986_v46 = vmul.f32 %v5975_v17, %v10755_v51  ;;  %v6254_v55 = vld [vmem:[%s10907_s17 + $0x258] sm:$0xff]  ;;  %6347 = vmatpush.msra.mxu0 %v6234_v63  ;;  %v6227_v63 = vld [vmem:[%s10907_s17 + $0x180] sm:$0xff] }
0x11ce   :  { %v5987_v8 = vmul.f32 %v5975_v17, %v10746_v50  ;;  %v5988_v60 = vmul.f32 %v5975_v17, %v10780_v43  ;;  %v5989_v54 = vmul.f32 %v5975_v17, %v10801_v31  ;;  %v5990_v47 = vmul.f32 %v5975_v17, %v10786_v22  ;;  %v6270_v5 = vld [vmem:[%s10907_s17 + $0x2d8] sm:$0xff]  ;;  %v6217_v50 = vld [vmem:[%s10907_s17 + $0x130] sm:$0xff]  ;;  %6363 = vmatpush.msrb.mxu1 %v6254_v55  ;;  %v6247_v55 = vld [vmem:[%s10907_s17 + $0x220] sm:$0xff] }
0x11cf   :  { %6383 = vmatpush.msra.mxu2 %v6270_v5  ;;  %6328 = vmatpush.msra.mxu3 %v6217_v50  ;;  %v6246_v50 = vld [vmem:[%s10907_s17 + $0x218] sm:$0xff] }
0x11d0   :  { %6348 = vmatpush.msra.mxu0 %v6233_v42  ;;  %6364 = vmatpush.msrb.mxu1 %v6253_v23  ;;  %v6262_v42 = vld [vmem:[%s10907_s17 + $0x298] sm:$0xff] }
0x11d1   :  { %6384 = vmatpush.msra.mxu2 %v6269_v48  ;;  %6329 = vmatpush.msra.mxu3 %v6216_v26  ;;  %v6245_v48 = vld [vmem:[%s10907_s17 + $0x210] sm:$0xff] }
0x11d2   :  { %6349 = vmatpush.msra.mxu0 %v6232_v15  ;;  %6365 = vmatpush.msrb.mxu1 %v6252_v0  ;;  %v6261_v26 = vld [vmem:[%s10907_s17 + $0x290] sm:$0xff] }
0x11d3   :  { %v5996_v27 = vpop.permute.xlu1 %5995  ;;  %6385 = vmatpush.msra.mxu2 %v6268_v10  ;;  %6330 = vmatpush.msra.mxu3 %v6215_v4  ;;  %v11115_v15 = vld [vmem:[%s11058_s13 + $0x10] sm:$0xff]  ;;  %v6260_v4 = vld [vmem:[%s10907_s17 + $0x288] sm:$0xff] }
0x11d4   :  { %v10993_v41 = vadd.f32 %v5996_v27, %v5977_v49  ;;  %v10995_v51 = vadd.f32 %v5996_v27, %v5978_v3  ;;  %v10999_v52 = vadd.f32 %v5996_v27, %v5979_v7  ;;  %v11001_v43 = vadd.f32 %v5996_v27, %v5980_v1  ;;  %6350 = vmatpush.msra.mxu0 %v6231_v9  ;;  %v6248_v3 = vld [vmem:[%s10907_s17 + $0x228] sm:$0xff] }
0x11d5   :  { %v11003_v31 = vadd.f32 %v5996_v27, %v5981_v2  ;;  %v11005_v22 = vadd.f32 %v5996_v27, %v5982_v13  ;;  %v11010_v59 = vadd.f32 %v5996_v27, %v5986_v46  ;;  %v11012_v29 = vadd.f32 %v5996_v27, %v5988_v60  ;;  %6366 = vmatpush.msrb.mxu1 %v6251_v16  ;;  %v6264_v7 = vld [vmem:[%s10907_s17 + $0x2a8] sm:$0xff]  ;;  %v6211_v13 = vld [vmem:[%s10907_s17 + $0x100] sm:$0xff] }
0x11d6   :  { %v11017_v36 = vadd.f32 %v5996_v27, %v5990_v47  ;;  %v11022_v28 = vadd.f32 %v5996_v27, %v5985_v32  ;;  %v11024_v11 = vadd.f32 %v5996_v27, %v5987_v8  ;;  %v11026_v39 = vadd.f32 %v5996_v27, %v5989_v54  ;;  %6386 = vmatpush.msra.mxu2 %v6267_v61  ;;  %v6263_v8 = vld [vmem:[%s10907_s17 + $0x2a0] sm:$0xff] }
0x11d7   :  { %vm6014_vm2 = vcmp.gt.f32.partialorder %v10993_v41, 0.0  ;;  %vm6015_vm3 = vcmp.gt.f32.partialorder %v10995_v51, 0.0  ;;  %vm6016_vm15 = vcmp.gt.f32.partialorder %v10999_v52, 0.0  ;;  %vm6017_vm11 = vcmp.gt.f32.partialorder %v11001_v43, 0.0  ;;  %6331 = vmatpush.msra.mxu3 %v6214_v24  ;;  %6351 = vmatpush.msra.mxu0 %v6230_v14  ;;  %v6243_v61 = vld [vmem:[%s10907_s17 + $0x200] sm:$0xff] }
0x11d8   :  { %vm6018_vm14 = vcmp.gt.f32.partialorder %v11003_v31, 0.0  ;;  %vm6019_vm10 = vcmp.gt.f32.partialorder %v11005_v22, 0.0  ;;  %vm6023_vm4 = vcmp.gt.f32.partialorder %v11010_v59, 0.0  ;;  %vm6025_vm12 = vcmp.gt.f32.partialorder %v11012_v29, 0.0  ;;  %6367 = vmatpush.msrb.mxu1 %v6250_v20  ;;  %6387 = vmatpush.msra.mxu2 %v6266_v12  ;;  %v6259_v24 = vld [vmem:[%s10907_s17 + $0x280] sm:$0xff] }
0x11d9   :  { %vm6027_vm7 = vcmp.gt.f32.partialorder %v11017_v36, 0.0  ;;  %vm6022_vm9 = vcmp.gt.f32.partialorder %v11022_v28, 0.0  ;;  %v6030_v44 = vmul.f32 0.2, %v10993_v41  ;;  %v6031_v17 = vmul.f32 0.2, %v10995_v51  ;;  %6332 = vmatpush.msra.mxu3 %v6213_v37  ;;  %6352 = vmatpush.msra.mxu0 %v6229_v25 }
0x11da   :  { %v6033_v57 = vmul.f32 0.2, %v11001_v43  ;;  %vm6024_vm8 = vcmp.gt.f32.partialorder %v11024_v11, 0.0  ;;  %v6032_v35 = vmul.f32 0.2, %v10999_v52  ;;  %vm6026_vm1 = vcmp.gt.f32.partialorder %v11026_v39, 0.0  ;;  %6368 = vmatpush.msrb.mxu1 %v6249_v21  ;;  %6388 = vmatpush.msra.mxu2 %v6265_v40 }
0x11db   :  { %v6035_v53 = vmul.f32 0.2, %v11005_v22  ;;  %v6034_v56 = vmul.f32 0.2, %v11003_v31  ;;  %v6039_v30 = vmul.f32 0.2, %v11010_v59  ;;  %v6046_v49 = vsel %vm6014_vm2, %v10993_v41, %v6030_v44  ;;  %6333 = vmatpush.msra.mxu3 %v6212_v58  ;;  %6353 = vmatpush.msra.mxu0 %v6228_v6  ;;  %vm11904_vm2 = vmmov %vm11903_vm0 }
0x11dc   :  { %v6041_v34 = vmul.f32 0.2, %v11012_v29  ;;  %v6038_v62 = vmul.f32 0.2, %v11022_v28  ;;  %v6043_v19 = vmul.f32 0.2, %v11017_v36  ;;  %v6047_v45 = vsel %vm6015_vm3, %v10995_v51, %v6031_v17  ;;  %6369 = vmatpush.msrb.mxu1 %v6248_v3  ;;  %6389 = vmatpush.msra.mxu2 %v6264_v7  ;;  %vm11905_vm3 = vmmov %vm11903_vm0 }
0x11dd   :  { %v6049_v38 = vsel %vm6017_vm11, %v11001_v43, %v6033_v57  ;;  %v6040_v1 = vmul.f32 0.2, %v11024_v11  ;;  %v6051_v33 = vsel %vm6019_vm10, %v11005_v22, %v6035_v53  ;;  %v6055_v2 = vsel %vm6023_vm4, %v11010_v59, %v6039_v30  ;;  %6334 = vmatpush.msra.mxu3 %v6211_v13  ;;  %6354 = vmatpush.msra.mxu0 %v6227_v63  ;;  %v11105_v22 = vld [vmem:[%s11058_s13 + $0x18] sm:$0xff]  ;;  %v11138_v14 = vld [vmem:[%s11058_s13] sm:$0xff] }
0x11de   :  { %v6042_v32 = vmul.f32 0.2, %v11026_v39  ;;  %v6048_v46 = vsel %vm6016_vm15, %v10999_v52, %v6032_v35  ;;  %v6057_v27 = vsel %vm6025_vm12, %v11012_v29, %v6041_v34  ;;  %v6059_v60 = vsel %vm6027_vm7, %v11017_v36, %v6043_v19  ;;  %6370 = vmatpush.msrb.mxu1 %v6247_v55  ;;  %6390 = vmatpush.msra.mxu2 %v6263_v8  ;;  %v6244_v36 = vld [vmem:[%s10907_s17 + $0x208] sm:$0xff]  ;;  %v6152_v12 = vld [vmem:[%s10656_s1] sm:$0x3f]  ;;  %s6896_s1 = sld [smem:[%s11286_s0 + %s7183_s28]]   ;;  %s7185_s17 = smov 2  }
0x11df   :  { %v6078_v54 = vrot.slane %v6047_v45, 4  ;;  %v6079_v47 = vrot.slane %v6049_v38, 4  ;;  %v6050_v5 = vsel %vm6018_vm14, %v11003_v31, %v6034_v56  ;;  %v6080_v41 = vrot.slane %v6051_v33, 4  ;;  %6415 = vmatpush.msrb.mxu3 %v11105_v22  ;;  %6478 = vmatpush.msrb.mxu0 %v11105_v22  ;;  %s6876_s22 = sld [smem:[%s11286_s0 + %s7185_s17]]  }
0x11e0   :  { %v6082_v51 = vrot.slane %v6055_v2, 4  ;;  %v6083_v52 = vrot.slane %v6057_v27, 4  ;;  %v6084_v23 = vrot.slane %v6059_v60, 4  ;;  %v6054_v59 = vsel %vm6022_vm9, %v11022_v28, %v6038_v62  ;;  %6371 = vmatpush.msrb.mxu1 %v6246_v50  ;;  %6391 = vmatpush.msra.mxu2 %v6262_v42  ;;  %v11130_v28 = vld [vmem:[%s11058_s13 + $0x8] sm:$0xff] }
0x11e1   :  { %v6086_v43 = vsel %vm11900_vm13, %v6046_v49, %v6078_v54  ;;  %v6087_v31 = vsel %vm11901_vm6, %v6048_v46, %v6079_v47  ;;  %v6088_v29 = vsel %vm11902_vm5, %v6050_v5, %v6080_v41  ;;  %v6056_v0 = vsel %vm6024_vm8, %v11024_v11, %v6040_v1  ;;  %6416 = vmatpush.msrb.mxu3 %v11115_v15  ;;  %v7076_v1 = vld [vmem:[%s10941_s9] ss:$0 sm:$0xff] }
0x11e2   :  { %6102 = vst [vmem:[#allocation2] sm:$0xff] %v6086_v43  ;;  %v6090_v10 = vsel %vm11903_vm0, %v6054_v59, %v6082_v51  ;;  %v6058_v9 = vsel %vm6026_vm1, %v11026_v39, %v6042_v32  ;;  %v6091_v16 = vsel %vm11904_vm2, %v6056_v0, %v6083_v52  ;;  %6372 = vmatpush.msrb.mxu1 %v6245_v48  ;;  %v6111_v39 = vlaneseq }
0x11e3   :  { %6103 = vst [vmem:[#allocation2 + $0x8] sm:$0xff] %v6087_v31  ;;  %6392 = vmatpush.msra.mxu2 %v6261_v26  ;;  %v6092_v11 = vsel %vm11905_vm3, %v6058_v9, %v6084_v23  ;;  %6479 = vmatpush.msrb.mxu0 %v11115_v15  ;;  %vm6153_vm11 = vcmp.gt.f32.partialorder %v6152_v12, 0.5  ;;  %v11908_v7 = vmov 0.0   ;;  %vm11909_vm5 = vcmask 261120  }
0x11e4   :  { %6104 = vst [vmem:[#allocation2 + $0x10] sm:$0xff] %v6088_v29  ;;  %6373 = vmatpush.msrb.mxu1 %v6244_v36  ;;  %6417 = vmatpush.msrb.mxu3 %v11130_v28  ;;  %vm11144_vm15 = vcmp.lt.s32.totalorder %v6111_v39, 768  ;;  %v6160_v35 = vsel %vm6153_vm11, 1, %v11834_v18  ;;  %vm11910_vm11 = vmmov %vm11909_vm5 }
0x11e5   :  { %6106 = vst [vmem:[#allocation2 + $0x20] sm:$0xff] %v6090_v10  ;;  %6393 = vmatpush.msra.mxu2 %v6260_v4  ;;  %6480 = vmatpush.msrb.mxu0 %v11130_v28  ;;  %v6161_v53 = vperm.slane %v6160_v35, 0  ;;  %v6162_v6 = vperm.slane %v6160_v35, 1  ;;  %v6163_v56 = vperm.slane %v6160_v35, 2  ;;  %v6164_v30 = vperm.slane %v6160_v35, 3 }
0x11e6   :  { %6107 = vst [vmem:[#allocation2 + $0x28] sm:$0xff] %v6091_v16  ;;  %6374 = vmatpush.msrb.mxu1 %v6243_v61  ;;  %6418 = vmatpush.msrb.mxu3 %v11138_v14  ;;  %v6165_v49 = vperm.slane %v6160_v35, 4  ;;  %v6166_v45 = vperm.slane %v6160_v35, 5 }
0x11e7   :  { %6108 = vst [vmem:[#allocation2 + $0x30] sm:$0xff] %v6092_v11  ;;  %6394 = vmatpush.msra.mxu2 %v6259_v24  ;;  %6481 = vmatpush.msrb.mxu0 %v11138_v14  ;;  %vm6167_vm14 = vcmp.eq.s32.totalorder %v6161_v53, 1  ;;  %vm6168_vm10 = vcmp.eq.s32.totalorder %v6162_v6, 1  ;;  %vm6169_vm4 = vcmp.eq.s32.totalorder %v6163_v56, 1  ;;  %vm6170_vm12 = vcmp.eq.s32.totalorder %v6164_v30, 1 }
0x11e8   :  { %vm6171_vm7 = vcmp.eq.s32.totalorder %v6165_v49, 1  ;;  %vm6172_vm9 = vcmp.eq.s32.totalorder %v6166_v45, 1 }
0x11eb   :  { %v6110_v37 = vld [vmem:[#allocation2] ss:$4 sm:$0x3f]  ;;  %v6123_v25 = vld [vmem:[#allocation2 + $0x1] ss:$4 sm:$0x3f] }
0x11ec   :  { %6115 = vst.msk [vmem:[#allocation5] ss:$8 sm:$0xf] %vm11144_vm15, %v6110_v37  ;;  %v6133_v21 = vld [vmem:[#allocation2 + $0x2] ss:$4 sm:$0x3f] }
0x11ed   :  { %6125 = vst.msk [vmem:[#allocation5 + $0x2] ss:$8 sm:$0xf] %vm11144_vm15, %v6123_v25  ;;  %v6143_v57 = vld [vmem:[#allocation2 + $0x3] ss:$4 sm:$0x3f] }
0x11ee   :  { %v6118_v40 = vld [vmem:[#allocation2 + $0x20] ss:$4 sm:$0x3f]  ;;  %v6128_v44 = vld [vmem:[#allocation2 + $0x21] ss:$4 sm:$0x3f] }
0x11ef   :  { %6120 = vst.msk [vmem:[#allocation5 + $0x1] ss:$8 sm:$0xf] %vm11144_vm15, %v6118_v40  ;;  %v6138_v17 = vld [vmem:[#allocation2 + $0x22] ss:$4 sm:$0x3f] }
0x11f0   :  { %6130 = vst.msk [vmem:[#allocation5 + $0x3] ss:$8 sm:$0xf] %vm11144_vm15, %v6128_v44  ;;  %v6148_v58 = vld [vmem:[#allocation2 + $0x23] ss:$4 sm:$0x3f] }
0x11f1   :  { %6135 = vst.msk [vmem:[#allocation5 + $0x4] ss:$8 sm:$0xf] %vm11144_vm15, %v6133_v21 }
0x11f2   :  { %6140 = vst.msk [vmem:[#allocation5 + $0x5] ss:$8 sm:$0xf] %vm11144_vm15, %v6138_v17 }
0x11f3   :  { %6145 = vst.msk [vmem:[#allocation5 + $0x6] ss:$8 sm:$0xf] %vm11144_vm15, %v6143_v57 }
0x11f4   :  { %6150 = vst.msk [vmem:[#allocation5 + $0x7] ss:$8 sm:$0xf] %vm11144_vm15, %v6148_v58 }
0x11f5   :  { %6116 = vst.msk [vmem:[#allocation5] ss:$8 sm:$0x30] %vm11144_vm15, %v6110_v37 }
0x11f6   :  { %6121 = vst.msk [vmem:[#allocation5 + $0x1] ss:$8 sm:$0x30] %vm11144_vm15, %v6118_v40 }
0x11f7   :  { %6126 = vst.msk [vmem:[#allocation5 + $0x2] ss:$8 sm:$0x30] %vm11144_vm15, %v6123_v25 }
0x11f8   :  { %6131 = vst.msk [vmem:[#allocation5 + $0x3] ss:$8 sm:$0x30] %vm11144_vm15, %v6128_v44 }
0x11f9   :  { %6136 = vst.msk [vmem:[#allocation5 + $0x4] ss:$8 sm:$0x30] %vm11144_vm15, %v6133_v21 }
0x11fa   :  { %6141 = vst.msk [vmem:[#allocation5 + $0x5] ss:$8 sm:$0x30] %vm11144_vm15, %v6138_v17 }
0x11fb   :  { %v6154_v18 = vld [vmem:[#allocation5] sm:$0xff]  ;;  %6146 = vst.msk [vmem:[#allocation5 + $0x6] ss:$8 sm:$0x30] %vm11144_vm15, %v6143_v57  ;;  %v6155_v34 = vld [vmem:[#allocation5 + $0x8] sm:$0xff]  ;;  %v6156_v62 = vld [vmem:[#allocation5 + $0x10] sm:$0xff] }
0x11fc   :  { %7010 = vmatmul.msk.f32.vlgmr.msra.gmra.mxu1 %vm6167_vm14, %v6154_v18  ;;  %6151 = vst.msk [vmem:[#allocation5 + $0x7] ss:$8 sm:$0x30] %vm11144_vm15, %v6148_v58  ;;  %7011 = vmatmul.msk.f32.vlgmr.msrb.gmra.mxu2 %vm6168_vm10, %v6155_v34  ;;  %v6157_v19 = vld [vmem:[#allocation5 + $0x18] sm:$0xff] }
0x11fd   :  { %7012 = vmatmul.msk.f32.vlgmr.msra.gmra.mxu3 %vm6169_vm4, %v6156_v62  ;;  %7013 = vmatmul.msk.f32.vlgmr.msra.gmra.mxu0 %vm6170_vm12, %v6157_v19 }
0x11fe   :  { %6548 = vmatpush.msra.mxu3 %v11105_v22  ;;  %6618 = vmatpush.msra.mxu0 %v11105_v22 }
0x1200   :  { %6549 = vmatpush.msra.mxu3 %v11115_v15  ;;  %6619 = vmatpush.msra.mxu0 %v11115_v15 }
0x1202   :  { %6550 = vmatpush.msra.mxu3 %v11130_v28  ;;  %6620 = vmatpush.msra.mxu0 %v11130_v28 }
0x1203   :  { %v6158_v38 = vld [vmem:[#allocation5 + $0x20] sm:$0xff]  ;;  %v6159_v3 = vld [vmem:[#allocation5 + $0x28] sm:$0xff] }
0x1204   :  { %7014 = vmatmul.msk.f32.vlgmr.msrb.gmra.mxu1 %vm6171_vm7, %v6158_v38  ;;  %7015 = vmatmul.msk.f32.vlgmr.msra.gmra.mxu2 %vm6172_vm9, %v6159_v3  ;;  %vm11913_vm7 = vmmov %vm11909_vm5 }
0x1205   :  { %6419 = vmatmul.f32.vlgmr.msrb.gmra.mxu3 %v11908_v7  ;;  %6621 = vmatpush.msra.mxu0 %v11138_v14 }
0x1206   :  { %6551 = vmatpush.msra.mxu3 %v11138_v14 }
0x1279   :  { %v6296_v33 = vpop.f32.mrf.mxu1 }
0x127a   :  { %v6297_v2 = vadd.f32 %v7076_v1, %v6296_v33  ;;  %v6356_v27 = vpop.f32.mrf.mxu0 }
0x127f   :  { %v6316_v13 = vpop.f32.mrf.mxu2 }
0x1280   :  { %v6317_v63 = vadd.f32 %v6316_v13, %v6297_v2  ;;  %v6336_v32 = vpop.f32.mrf.mxu3 }
0x1281   :  { %v6376_v8 = vpop.f32.mrf.mxu1 }
0x1282   :  { %v6337_v46 = vadd.f32 %v6336_v32, %v6317_v63 }
0x1284   :  { %v6357_v55 = vadd.f32 %v6356_v27, %v6337_v46 }
0x1286   :  { %v6377_v60 = vadd.f32 %v6376_v8, %v6357_v55 }
0x1287   :  { %v6396_v54 = vpop.f32.mrf.mxu2 }
0x1288   :  { %v11192_v47 = vadd.f32 %v6396_v54, %v6377_v60  ;;  %v6420_v5 = vpop.f32.mrf.mxu3 }
0x128a   :  { %v6423_v41 = vadd.f32 %v6420_v5, %v11192_v47 }
0x128c   :  { %7111 = vtanh.f32 %v6423_v41  ;;  %v7016_v50 = vmul.f32 -1.442695, %v6423_v41 }
0x128e   :  { %7113 = vpow2.f32 %v7016_v50 }
0x1292   :  { %v7112_v51 = vpop.eup %7111 }
0x1293   :  { %6446 = vrot.lane.b32.xlu1 %v7112_v51, %s7155_s18 }
0x1294   :  { %v7114_v42 = vpop.eup %7113 }
0x1295   :  { %v6427_v52 = vadd.f32 1.0, %v7114_v42 }
0x1297   :  { %7115 = vrcp.f32 %v6427_v52  ;;  %v6439_v26 = vand.u32 2147483648, %v6427_v52  ;;  %vm6433_vm1 = vweird.f32 %v6427_v52  ;;  %v6437_v59 = vand.u32 2147483647, %v6427_v52 }
0x1299   :  { %v6440_v15 = vor.u32 1.1754944e-38, %v6439_v26  ;;  %vm6438_vm6 = vcmp.eq.f32.partialorder %v6437_v59, 8.507059e+37 }
0x129d   :  { %v7116_v43 = vpop.eup %7115 }
0x129e   :  { %v6429_v22 = vmul.f32 %v7116_v43, %v6427_v52  ;;  %vm6434_vm8 = vweird.f32 %v7116_v43 }
0x129f   :  { %vm6435_vm13 = vmor %vm6433_vm1, %vm6434_vm8 }
0x12a0   :  { %v6430_v23 = vsub.f32 1.0, %v6429_v22 }
0x12a2   :  { %v6431_v31 = vmul.f32 %v7116_v43, %v6430_v23 }
0x12a4   :  { %v6432_v48 = vadd.f32 %v7116_v43, %v6431_v31 }
0x12a6   :  { %v6436_v29 = vsel %vm6435_vm13, %v7116_v43, %v6432_v48 }
0x12a7   :  { %v6441_v10 = vsel %vm6438_vm6, %v6440_v15, %v6436_v29  ;;  %v11911_v29 = vld [vmem:[#allocation21_spill] sm:$0xff] }
0x12a8   :  { %v6444_v4 = vmul.f32 0.0, %v6441_v10  ;;  %v396_v15 = vrot.slane %v11911_v29, 2  ;;  %v6675_v29 = vld [vmem:[%s6896_s1 + $0x8] sm:$0xff] }
0x1305   :  { %v6447_v0 = vpop.permute.xlu1 %6446 }
0x1306   :  { %v6449_v36 = vmul.f32 %v6447_v0, %v6441_v10  ;;  %v11912_v0 = vld [vmem:[#allocation7_spill] sm:$0xff] }
0x1308   :  { %6451 = vrot.lane.b32.xlu1 %v6449_v36, %s7155_s18 }
0x137a   :  { %v6452_v9 = vpop.permute.xlu1 %6451 }
0x137b   :  { %v6454_v16 = vadd.f32 %v6452_v9, %v6444_v4 }
0x137d   :  { %7117 = vtanh.f32 %v6454_v16  ;;  %v6511_v62 = vrot.slane %v6454_v16, 6 }
0x1383   :  { %v7118_v28 = vpop.eup %7117 }
0x1384   :  { %6457 = vrot.lane.b32.xlu1 %v7118_v28, %s7155_s18 }
0x13f6   :  { %v6458_v11 = vpop.permute.xlu1 %6457 }
0x13f7   :  { %v6460_v61 = vmul.f32 %v6458_v11, %v6441_v10  ;;  %v398_v10 = vadd.f32 %v396_v15, %v11912_v0  ;;  %v6674_v15 = vld [vmem:[%s6896_s1] sm:$0xff] }
0x13f9   :  { %6462 = vrot.lane.b32.xlu0 %v6460_v61, %s7156_s19  ;;  %v6913_v61 = vmul.f32 -1.442695, %v398_v10 }
0x146b   :  { %v6463_v24 = vpop.permute.xlu0 %6462 }
0x146c   :  { %7017 = vmatmul.msk.f32.vlgmr.msrb.gmra.mxu0 %vm11909_vm5, %v6463_v24 }
0x14e9   :  { %v6483_v39 = vpop.f32.mrf.mxu0 }
0x14ea   :  { %v6487_v14 = vrot.slane %v6483_v39, 6 }
0x14ec   :  { %v6489_v20 = vadd.f32 %v6487_v14, %v11192_v47 }
0x14ee   :  { %7119 = vtanh.f32 %v6489_v20  ;;  %v7018_v37 = vmul.f32 -1.442695, %v6489_v20 }
0x14f0   :  { %7121 = vpow2.f32 %v7018_v37 }
0x14f4   :  { %v7120_v12 = vpop.eup %7119 }
0x14f5   :  { %6515 = vrot.lane.b32.xlu2 %v7120_v12, %s7155_s18 }
0x14f6   :  { %v7122_v25 = vpop.eup %7121 }
0x14f7   :  { %v6493_v21 = vadd.f32 1.0, %v7122_v25 }
0x14f9   :  { %7123 = vrcp.f32 %v6493_v21  ;;  %v6505_v35 = vand.u32 2147483648, %v6493_v21  ;;  %vm6499_vm2 = vweird.f32 %v6493_v21  ;;  %v6503_v53 = vand.u32 2147483647, %v6493_v21 }
0x14fb   :  { %v6506_v56 = vor.u32 1.1754944e-38, %v6505_v35  ;;  %vm6504_vm15 = vcmp.eq.f32.partialorder %v6503_v53, 8.507059e+37 }
0x14ff   :  { %v7124_v40 = vpop.eup %7123 }
0x1500   :  { %v6495_v44 = vmul.f32 %v7124_v40, %v6493_v21  ;;  %vm6500_vm0 = vweird.f32 %v7124_v40 }
0x1501   :  { %vm6501_vm3 = vmor %vm6499_vm2, %vm6500_vm0 }
0x1502   :  { %v6496_v17 = vsub.f32 1.0, %v6495_v44 }
0x1504   :  { %v6497_v57 = vmul.f32 %v7124_v40, %v6496_v17 }
0x1506   :  { %v6498_v58 = vadd.f32 %v7124_v40, %v6497_v57 }
0x1508   :  { %v6502_v6 = vsel %vm6501_vm3, %v7124_v40, %v6498_v58  ;;  %vm11915_vm3 = vmmov %vm11913_vm7 }
0x1509   :  { %v6507_v18 = vsel %vm6504_vm15, %v6506_v56, %v6502_v6  ;;  %vm11916_vm15 = vcmask 1043456  }
0x150a   :  { %v6513_v19 = vmul.f32 %v6511_v62, %v6507_v18 }
0x154f   :  { %v6516_v30 = vpop.permute.xlu2 %6515 }
0x1550   :  { %v6518_v34 = vmul.f32 %v6516_v30, %v6507_v18 }
0x1552   :  { %6520 = vrot.lane.b32.xlu1 %v6518_v34, %s7155_s18 }
0x15c4   :  { %v6521_v49 = vpop.permute.xlu1 %6520 }
0x15c5   :  { %v6523_v45 = vadd.f32 %v6521_v49, %v6513_v19 }
0x15c7   :  { %7125 = vtanh.f32 %v6523_v45  ;;  %v6581_v31 = vrot.slane %v6523_v45, 6 }
0x15cd   :  { %v7126_v38 = vpop.eup %7125 }
0x15ce   :  { %6526 = vrot.lane.b32.xlu1 %v7126_v38, %s7155_s18 }
0x1640   :  { %v6527_v3 = vpop.permute.xlu1 %6526 }
0x1641   :  { %v6529_v7 = vmul.f32 %v6527_v3, %v6507_v18 }
0x1643   :  { %v6531_v1 = vrot.slane %v6529_v7, 2 }
0x1645   :  { %6532 = vrot.lane.b32.xlu0 %v6531_v1, %s7156_s19 }
0x16b7   :  { %v6533_v33 = vpop.permute.xlu0 %6532 }
0x16b8   :  { %7019 = vmatmul.msk.f32.vlgmr.msra.gmra.mxu3 %vm11910_vm11, %v6533_v33  ;;  %vm11917_vm11 = vmmov %vm11915_vm3 }
0x173b   :  { %v6553_v2 = vpop.f32.mrf.mxu3 }
0x173c   :  { %v6557_v13 = vrot.slane %v6553_v2, 4 }
0x173e   :  { %v6559_v63 = vadd.f32 %v6557_v13, %v11192_v47 }
0x1740   :  { %7127 = vtanh.f32 %v6559_v63  ;;  %v7020_v46 = vmul.f32 -1.442695, %v6559_v63 }
0x1742   :  { %7129 = vpow2.f32 %v7020_v46 }
0x1746   :  { %v7128_v32 = vpop.eup %7127 }
0x1747   :  { %6585 = vrot.lane.b32.xlu1 %v7128_v32, %s7155_s18  ;;  %v11914_v32 = vld [vmem:[#allocation11_spill] sm:$0xff] }
0x1748   :  { %v7130_v27 = vpop.eup %7129  ;;  %v420_v46 = vrot.slane %v11914_v32, 6 }
0x1749   :  { %v6563_v55 = vadd.f32 1.0, %v7130_v27 }
0x174b   :  { %7131 = vrcp.f32 %v6563_v55  ;;  %v6575_v51 = vand.u32 2147483648, %v6563_v55  ;;  %vm6569_vm10 = vweird.f32 %v6563_v55  ;;  %v6573_v50 = vand.u32 2147483647, %v6563_v55 }
0x174d   :  { %v6576_v52 = vor.u32 1.1754944e-38, %v6575_v51  ;;  %vm6574_vm12 = vcmp.eq.f32.partialorder %v6573_v50, 8.507059e+37 }
0x1751   :  { %v7132_v8 = vpop.eup %7131 }
0x1752   :  { %v6565_v60 = vmul.f32 %v7132_v8, %v6563_v55  ;;  %vm6570_vm14 = vweird.f32 %v7132_v8 }
0x1753   :  { %vm6571_vm4 = vmor %vm6569_vm10, %vm6570_vm14  ;;  %vm6732_vm14 = vcmask 31744   ;;  %vm6778_vm10 = vcmask 523264  }
0x1754   :  { %v6566_v54 = vsub.f32 1.0, %v6565_v60 }
0x1756   :  { %v6567_v5 = vmul.f32 %v7132_v8, %v6566_v54 }
0x1758   :  { %v6568_v41 = vadd.f32 %v7132_v8, %v6567_v5 }
0x175a   :  { %v6572_v42 = vsel %vm6571_vm4, %v7132_v8, %v6568_v41  ;;  %vm11918_vm4 = vmmov %vm11915_vm3 }
0x175b   :  { %v6577_v22 = vsel %vm6574_vm12, %v6576_v52, %v6572_v42  ;;  %vm6869_vm12 = vcmask 1024  }
0x175c   :  { %v6583_v48 = vmul.f32 %v6581_v31, %v6577_v22  ;;  %v6671_v31 = vld [vmem:[%s6895_s27 + $0x8] sm:$0xff] }
0x17b9   :  { %v6586_v43 = vpop.permute.xlu1 %6585 }
0x17ba   :  { %v6588_v23 = vmul.f32 %v6586_v43, %v6577_v22 }
0x17bc   :  { %6590 = vrot.lane.b32.xlu2 %v6588_v23, %s7155_s18  ;;  %v6672_v23 = vld [vmem:[%s6895_s27 + $0x10] sm:$0xff] }
0x1816   :  { %v6591_v26 = vpop.permute.xlu2 %6590 }
0x1817   :  { %v11209_v59 = vadd.f32 %v6591_v26, %v6583_v48  ;;  %v6670_v48 = vld [vmem:[%s6895_s27] sm:$0xff]  ;;  %v6677_v26 = vld [vmem:[%s6896_s1 + $0x18] sm:$0xff] }
0x1818   :  { %6696 = vmatpush.msrb.mxu3 %v6677_v26 }
0x1819   :  { %7133 = vtanh.f32 %v11209_v59  ;;  %v6651_v54 = vrot.slane %v11209_v59, 6  ;;  %v6676_v59 = vld [vmem:[%s6896_s1 + $0x10] sm:$0xff] }
0x181a   :  { %7135 = vtanh.f32 %v398_v10  ;;  %6697 = vmatpush.msrb.mxu3 %v6676_v59 }
0x181b   :  { %7137 = vpow2.f32 %v6913_v61  ;;  %v6772_v61 = vld [vmem:[%s6899_s11 + $0x30] sm:$0xff] }
0x181c   :  { %6698 = vmatpush.msrb.mxu3 %v6675_v29 }
0x181e   :  { %6699 = vmatpush.msrb.mxu3 %v6674_v15 }
0x181f   :  { %v7134_v36 = vpop.eup %7133 }
0x1820   :  { %6596 = vrot.lane.b32.xlu0 %v7134_v36, %s7155_s18  ;;  %v7136_v4 = vpop.eup %7135 }
0x1821   :  { %v7138_v24 = vpop.eup %7137 }
0x1822   :  { %v402_v39 = vadd.f32 1.0, %v7138_v24  ;;  %v6771_v24 = vld [vmem:[%s6899_s11 + $0x28] sm:$0xff] }
0x1824   :  { %7139 = vrcp.f32 %v402_v39  ;;  %v414_v57 = vand.u32 2147483648, %v402_v39  ;;  %vm408_vm8 = vweird.f32 %v402_v39  ;;  %v412_v58 = vand.u32 2147483647, %v402_v39 }
0x1826   :  { %v415_v53 = vor.u32 1.1754944e-38, %v414_v57  ;;  %vm413_vm13 = vcmp.eq.f32.partialorder %v412_v58, 8.507059e+37 }
0x1828   :  { %424 = vrot.lane.b32.xlu0 %v7136_v4, %s7155_s18 }
0x182a   :  { %v7140_v14 = vpop.eup %7139 }
0x182b   :  { %v404_v20 = vmul.f32 %v7140_v14, %v402_v39  ;;  %vm409_vm9 = vweird.f32 %v7140_v14  ;;  %v6770_v39 = vld [vmem:[%s6899_s11 + $0x20] sm:$0xff] }
0x182c   :  { %vm410_vm1 = vmor %vm408_vm8, %vm409_vm9 }
0x182d   :  { %v405_v25 = vsub.f32 1.0, %v404_v20  ;;  %v6768_v20 = vld [vmem:[%s6899_s11 + $0x10] sm:$0xff] }
0x182f   :  { %v406_v40 = vmul.f32 %v7140_v14, %v405_v25  ;;  %v6809_v25 = vld [vmem:[%s11259_s25 + $0x30] sm:$0xff] }
0x1831   :  { %v407_v44 = vadd.f32 %v7140_v14, %v406_v40  ;;  %v6808_v40 = vld [vmem:[%s11259_s25 + $0x28] sm:$0xff] }
0x1833   :  { %v411_v35 = vsel %vm410_vm1, %v7140_v14, %v407_v44  ;;  %v6769_v14 = vld [vmem:[%s6899_s11 + $0x18] sm:$0xff]  ;;  %v6807_v44 = vld [vmem:[%s11259_s25 + $0x20] sm:$0xff] }
0x1834   :  { %v416_v56 = vsel %vm413_vm13, %v415_v53, %v411_v35 }
0x1835   :  { %v422_v27 = vmul.f32 %v420_v46, %v416_v56 }
0x1892   :  { %v6597_v9 = vpop.permute.xlu0 %6596 }
0x1893   :  { %v6599_v16 = vmul.f32 %v6597_v9, %v6577_v22  ;;  %v6673_v22 = vld [vmem:[%s6895_s27 + $0x18] sm:$0xff] }
0x1894   :  { %6722 = vmatpush.msrb.mxu0 %v6673_v22 }
0x1895   :  { %v6601_v28 = vrot.slane %v6599_v16, 4 }
0x1896   :  { %6723 = vmatpush.msrb.mxu0 %v6672_v23 }
0x1897   :  { %6602 = vrot.lane.b32.xlu1 %v6601_v28, %s7156_s19  ;;  %v6730_v28 = vld [vmem:[%s6876_s22] sm:$0x3] }
0x1898   :  { %6724 = vmatpush.msrb.mxu0 %v6671_v31 }
0x189a   :  { %v425_v6 = vpop.permute.xlu0 %424  ;;  %6725 = vmatpush.msrb.mxu0 %v6670_v48 }
0x189b   :  { %v427_v30 = vmul.f32 %v425_v6, %v416_v56 }
0x1909   :  { %v6603_v11 = vpop.permute.xlu1 %6602 }
0x190a   :  { %7021 = vmatmul.msk.f32.vlgmr.msra.gmra.mxu0 %vm11913_vm7, %v6603_v11  ;;  %v6773_v11 = vld [vmem:[%s6899_s11 + $0x38] sm:$0xff] }
0x190b   :  { %6790 = vmatpush.msra.mxu0 %v6773_v11 }
0x190d   :  { %6791 = vmatpush.msra.mxu0 %v6772_v61 }
0x190f   :  { %6792 = vmatpush.msra.mxu0 %v6771_v24 }
0x1911   :  { %6793 = vmatpush.msra.mxu0 %v6770_v39 }
0x1913   :  { %6794 = vmatpush.msra.mxu0 %v6769_v14 }
0x1915   :  { %6795 = vmatpush.msra.mxu0 %v6768_v20 }
0x1987   :  { %v6623_v12 = vpop.f32.mrf.mxu0 }
0x1988   :  { %v6627_v37 = vrot.slane %v6623_v12, 2  ;;  %v6767_v12 = vld [vmem:[%s6899_s11 + $0x8] sm:$0xff] }
0x1989   :  { %6796 = vmatpush.msra.mxu0 %v6767_v12 }
0x198a   :  { %v6629_v21 = vadd.f32 %v6627_v37, %v11192_v47  ;;  %v6810_v37 = vld [vmem:[%s11259_s25 + $0x38] sm:$0xff] }
0x198b   :  { %6826 = vmatpush.msra.mxu1 %v6810_v37 }
0x198c   :  { %7141 = vtanh.f32 %v6629_v21  ;;  %v7022_v47 = vmul.f32 -1.442695, %v6629_v21  ;;  %v6766_v21 = vld [vmem:[%s6899_s11] sm:$0xff] }
0x198d   :  { %6827 = vmatpush.msra.mxu1 %v6809_v25  ;;  %6797 = vmatpush.msra.mxu0 %v6766_v21 }
0x198e   :  { %7143 = vpow2.f32 %v7022_v47 }
0x198f   :  { %6828 = vmatpush.msra.mxu1 %v6808_v40 }
0x1991   :  { %6829 = vmatpush.msra.mxu1 %v6807_v44 }
0x1992   :  { %v7142_v17 = vpop.eup %7141 }
0x1993   :  { %6655 = vrot.lane.b32.xlu2 %v7142_v17, %s7155_s18  ;;  %v6806_v17 = vld [vmem:[%s11259_s25 + $0x18] sm:$0xff] }
0x1994   :  { %v7144_v18 = vpop.eup %7143  ;;  %6830 = vmatpush.msra.mxu1 %v6806_v17 }
0x1995   :  { %v6633_v34 = vadd.f32 1.0, %v7144_v18  ;;  %v6805_v18 = vld [vmem:[%s11259_s25 + $0x10] sm:$0xff] }
0x1996   :  { %6831 = vmatpush.msra.mxu1 %v6805_v18 }
0x1997   :  { %7145 = vrcp.f32 %v6633_v34  ;;  %v6645_v3 = vand.u32 2147483648, %v6633_v34  ;;  %vm6639_vm5 = vweird.f32 %v6633_v34  ;;  %v6643_v7 = vand.u32 2147483647, %v6633_v34 }
0x1999   :  { %v6646_v33 = vor.u32 1.1754944e-38, %v6645_v3  ;;  %vm6644_vm2 = vcmp.eq.f32.partialorder %v6643_v7, 8.507059e+37 }
0x199b   :  { %429 = vrot.lane.b32.xlu2 %v427_v30, %s7155_s18 }
0x199d   :  { %v7146_v62 = vpop.eup %7145 }
0x199e   :  { %v6635_v19 = vmul.f32 %v7146_v62, %v6633_v34  ;;  %vm6640_vm6 = vweird.f32 %v7146_v62  ;;  %v6804_v34 = vld [vmem:[%s11259_s25 + $0x8] sm:$0xff] }
0x199f   :  { %vm6641_vm0 = vmor %vm6639_vm5, %vm6640_vm6  ;;  %6832 = vmatpush.msra.mxu1 %v6804_v34 }
0x19a0   :  { %v6636_v49 = vsub.f32 1.0, %v6635_v19  ;;  %v6841_v19 = vld [vmem:[%s6903_s14 + $0x18] sm:$0xff] }
0x19a1   :  { %6861 = vmatpush.msrb.mxu2 %v6841_v19 }
0x19a2   :  { %v6637_v45 = vmul.f32 %v7146_v62, %v6636_v49  ;;  %v6840_v49 = vld [vmem:[%s6903_s14 + $0x10] sm:$0xff] }
0x19a3   :  { %6862 = vmatpush.msrb.mxu2 %v6840_v49 }
0x19a4   :  { %v6638_v38 = vadd.f32 %v7146_v62, %v6637_v45  ;;  %v6839_v45 = vld [vmem:[%s6903_s14 + $0x8] sm:$0xff] }
0x19a5   :  { %6863 = vmatpush.msrb.mxu2 %v6839_v45 }
0x19a6   :  { %v6642_v1 = vsel %vm6641_vm0, %v7146_v62, %v6638_v38  ;;  %v6803_v62 = vld [vmem:[%s11259_s25] sm:$0xff] }
0x19a7   :  { %v6647_v13 = vsel %vm6644_vm2, %v6646_v33, %v6642_v1  ;;  %6833 = vmatpush.msra.mxu1 %v6803_v62  ;;  %v7078_v38 = vld [vmem:[%s11251_s7] ss:$0 sm:$0xff] }
0x19a8   :  { %v6653_v5 = vmul.f32 %v6651_v54, %v6647_v13  ;;  %v6838_v33 = vld [vmem:[%s6903_s14] sm:$0xff] }
0x19a9   :  { %6864 = vmatpush.msrb.mxu2 %v6838_v33 }
0x19ed   :  { %v6656_v2 = vpop.permute.xlu2 %6655 }
0x19ee   :  { %v6658_v63 = vmul.f32 %v6656_v2, %v6647_v13  ;;  %v68_v2 = vstv %s6904_s20 }
0x19ef   :  { %69 = vst [vmem:[#allocation6] sm:$0x1] %v68_v2 }
0x19f0   :  { %6660 = vrot.lane.b32.xlu1 %v6658_v63, %s7155_s18 }
0x19f5   :  { %v430_v55 = vpop.permute.xlu2 %429 }
0x19f6   :  { %v432_v8 = vadd.f32 %v430_v55, %v422_v27  ;;  %v7080_v46 = vld [vmem:[#allocation6] ss:$0 sm:$0xff] }
0x19f8   :  { %7147 = vtanh.f32 %v432_v8 }
0x19fe   :  { %v7148_v60 = vpop.eup %7147 }
0x19ff   :  { %435 = vrot.lane.b32.xlu1 %v7148_v60, %s7155_s18 }
0x1a62   :  { %v6661_v41 = vpop.permute.xlu1 %6660 }
0x1a63   :  { %v6663_v51 = vadd.f32 %v6661_v41, %v6653_v5 }
0x1a65   :  { %7149 = vtanh.f32 %v6663_v51 }
0x1a6b   :  { %v7150_v50 = vpop.eup %7149 }
0x1a6c   :  { %6666 = vrot.lane.b32.xlu0 %v7150_v50, %s7155_s18  ;;  %s7184_s18 = smov 23  }
0x1a6d   :  { %s6897_s16 = sld [smem:[%s11286_s0 + %s7184_s18]]  }
0x1a71   :  { %v436_v42 = vpop.permute.xlu1 %435 }
0x1a72   :  { %v438_v52 = vmul.f32 %v436_v42, %v416_v56 }
0x1a73   :  { %v6731_v9 = vld [vmem:[%s6897_s16] sm:$0xf] }
0x1a74   :  { %v6705_v43 = vrot.slane %v438_v52, 6  ;;  %7025 = vmatpush.msk.msra.mxu3 %vm11916_vm15, %v6731_v9 }
0x1a76   :  { %6706 = vrot.lane.b32.xlu0 %v6705_v43, %s7156_s19 }
0x1ade   :  { %v6667_v0 = vpop.permute.xlu0 %6666 }
0x1adf   :  { %v6669_v10 = vmul.f32 %v6667_v0, %v6647_v13  ;;  %v7079_v13 = vld [vmem:[%s6902_s29] ss:$0 sm:$0xff] }
0x1ae1   :  { %v6679_v36 = vrot.slane %v6669_v10, 6 }
0x1ae3   :  { %6680 = vrot.lane.b32.xlu2 %v6679_v36, %s7156_s19  ;;  %s7186_s19 = smov 24  }
0x1ae4   :  { %s11246_s3 = sld [smem:[%s11286_s0 + %s7186_s19]]  }
0x1ae8   :  { %v6707_v4 = vpop.permute.xlu0 %6706 }
0x1ae9   :  { %7024 = vmatmul.msk.f32.vlgmr.msrb.gmra.mxu0 %vm11915_vm3, %v6707_v4 }
0x1aea   :  { %v7077_v53 = vld [vmem:[%s11246_s3] ss:$0 sm:$0xff] }
0x1b3d   :  { %v6681_v16 = vpop.permute.xlu2 %6680 }
0x1b3e   :  { %7023 = vmatmul.msk.f32.vlgmr.msrb.gmra.mxu3 %vm11917_vm11, %v6681_v16 }
0x1b46   :  { %7026 = vmatmul.msk.f32.vlgmr.msra.gmra.mxu3 %vm6732_vm14, %v6730_v28 }
0x1b66   :  { %v6727_v58 = vpop.f32.mrf.mxu0 }
0x1bc1   :  { %v6701_v57 = vpop.f32.mrf.mxu3 }
0x1bc2   :  { %v6728_v35 = vadd.f32 %v6727_v58, %v6701_v57 }
0x1bc9   :  { %v6756_v6 = vpop.f32.mrf.mxu3 }
0x1bca   :  { %v6759_v56 = vadd.f32 %v6756_v6, %v6728_v35 }
0x1bcc   :  { %v6764_v30 = vadd.f32 %v7077_v53, %v6759_v56 }
0x1bce   :  { %v6765_v47 = vmax.f32 %v6764_v30, 0.0 }
0x1bd0   :  { %7027 = vmatmul.msk.f32.vlgmr.msra.gmra.mxu0 %vm6778_vm10, %v6765_v47 }
0x1c4d   :  { %v6799_v3 = vpop.f32.mrf.mxu0 }
0x1c4e   :  { %v6800_v7 = vadd.f32 %v7078_v38, %v6799_v3 }
0x1c50   :  { %v6802_v1 = vmax.f32 %v6800_v7, 0.0 }
0x1c52   :  { %7028 = vmatmul.msk.f32.vlgmr.msra.gmra.mxu1 %vm6778_vm10, %v6802_v1 }
0x1ccf   :  { %v6835_v63 = vpop.f32.mrf.mxu1 }
0x1cd0   :  { %v6836_v32 = vadd.f32 %v7079_v13, %v6835_v63 }
0x1cd2   :  { %7029 = vmatmul.msk.f32.vlgmr.msrb.gmra.mxu2 %vm11918_vm4, %v6836_v32 }
0x1d55   :  { %v6866_v27 = vpop.f32.mrf.mxu2 }
0x1d56   :  { %v6867_v55 = vadd.f32 %v7080_v46, %v6866_v27 }
0x1d58   :  { %6870 = vst.msk [vmem:[%s6905_s23] sm:$0x3] %vm6869_vm12, %v6867_v55 }

</bundles_post_ra>
